<compile_context>
chip_gen: v5e
topology: v5e:2x2
jax: 0.10.0
libtpu: 0.0.40
codegen_flags: <defaults>
</compile_context>

<pallas_src>
import functools

import jax
import jax.numpy as jnp
from jax.experimental import pallas as pl
from jax.experimental.pallas import tpu as pltpu


def ae_kernel(x_ref, we_ref, be_ref, wd_ref, bd_ref, out_ref, norm_ref):
    # ---- encode: z = x @ We + be  (MXU) ----
    x = x_ref[...]
    z = jnp.dot(x, we_ref[...], preferred_element_type=jnp.float32) + be_ref[...]

    # ---- per-row normalization over feature dim (dim=1); torch.std is unbiased ----
    h = z.shape[1]
    # Single-pass moments: both cross-lane reductions go to the XLU without a
    # serial mean -> subtract -> reduce dependency chain.
    sum_z = jnp.sum(z, axis=1, keepdims=True)
    sum_z2 = jnp.sum(z * z, axis=1, keepdims=True)
    mean = sum_z * (1.0 / h)
    var = (sum_z2 - sum_z * mean) * (1.0 / (h - 1))  # unbiased (torch.std)
    inv_std = jax.lax.rsqrt(var)                     # EUP rsqrt; no VPU divide
    normalized = (z - mean) * inv_std

    # ---- decode: sigmoid(n @ Wd + bd)  (MXU + EUP) ----
    dec = jnp.dot(normalized, wd_ref[...], preferred_element_type=jnp.float32) + bd_ref[...]
    out_ref[...] = jax.nn.sigmoid(dec)
    norm_ref[...] = normalized


def _round_up(n, m):
    return ((n + m - 1) // m) * m


def _cdiv(a, b):
    return (a + b - 1) // b


def _choose_batch_tiling(B, tile_b):
    """Pick (tile, n_steps) so that:
       - tile <= tile_b (roughly), multiple of 8,
       - n_steps >= 2 whenever B > 8 (v7x megacore sharding),
       - padding waste is at most ~8 rows per grid step."""
    if B <= 8:
        return _round_up(max(B, 1), 8), 1
    n_steps = max(2, _cdiv(B, tile_b))
    tb = _round_up(_cdiv(B, n_steps), 8)
    return tb, n_steps


@functools.partial(jax.jit, static_argnames=("tile_b",))
def ae_forward(x, w_enc, b_enc, w_dec, b_dec, *, tile_b=512):
    B, D_in = x.shape
    H = w_enc.shape[1]

    tb, n_steps = _choose_batch_tiling(B, tile_b)
    B_pad = tb * n_steps
    if B_pad != B:
        # Padded rows are computed independently (z is constant -> var=0 ->
        # NaN from rsqrt(0)*0, matching torch.std-without-eps semantics) and
        # sliced off below; they never contaminate real rows.
        x = jnp.pad(x, ((0, B_pad - B), (0, 0)))

    grid = (n_steps,)

    # VMEM budget: double-buffered x/recon/norm tiles + single-buffered weights.
    tiles_bytes = 4 * (2 * tb * D_in + 2 * tb * D_in + 2 * tb * H)
    weights_bytes = 4 * (2 * D_in * H + D_in + H)
    vmem_limit = min(int(1.5 * (tiles_bytes + weights_bytes)) + (4 << 20), 48 << 20)

    cost = pl.CostEstimate(
        flops=2 * B_pad * (D_in * H + H * D_in),
        # sigmoid ~ exp + reciprocal (2/elem) + one rsqrt per row
        transcendentals=B_pad * (2 * D_in + 1),
        bytes_accessed=4 * (B_pad * D_in * 2 + B_pad * H
                            + 2 * D_in * H + D_in + H),
    )

    out_shapes = (
        jax.ShapeDtypeStruct((B_pad, D_in), jnp.float32),  # reconstruction
        jax.ShapeDtypeStruct((B_pad, H), jnp.float32),     # normalized latent
    )

    # Constant-index (resident) params: single-buffered to halve their VMEM use.
    resident = functools.partial(pl.BlockSpec, pipeline_mode=pl.Buffered(1))

    recon, norm = pl.pallas_call(
        ae_kernel,
        out_shape=out_shapes,
        grid=grid,
        in_specs=[
            pl.BlockSpec((tb, D_in), lambda i: (i, 0)),        # x      [tb, D_in]
            resident((D_in, H), lambda i: (0, 0)),             # w_enc  resident
            resident((1, H), lambda i: (0, 0)),                # b_enc  resident
            resident((H, D_in), lambda i: (0, 0)),             # w_dec  resident
            resident((1, D_in), lambda i: (0, 0)),             # b_dec  resident
        ],
        out_specs=(
            pl.BlockSpec((tb, D_in), lambda i: (i, 0)),
            pl.BlockSpec((tb, H), lambda i: (i, 0)),
        ),
        compiler_params=pltpu.CompilerParams(
            dimension_semantics=("parallel",),
            vmem_limit_bytes=vmem_limit,
        ),
        cost_estimate=cost,
    )(x, w_enc, b_enc, w_dec, b_dec)

    if B_pad != B:
        recon = recon[:B]
        norm = norm[:B]
    return recon, norm


if __name__ == "__main__":
    # Feature dims are multiples of 256 (full 256x256 MXU feed on v6e/v7x) and
    # lane-dense (multiple of 128) so both outputs use unmasked stores. Batch
    # chosen so the default tile gives exactly 2 parallel grid steps.
    B, D_IN, H = 1024, 256, 256

    key = jax.random.PRNGKey(0)
    k_x, k_we, k_be, k_wd, k_bd = jax.random.split(key, 5)

    x = jax.random.normal(k_x, (B, D_IN), dtype=jnp.float32)
    # Deterministic "Linear" parameters (stored as [in, out]).
    w_enc = jax.random.normal(k_we, (D_IN, H), dtype=jnp.float32) * 0.1
    b_enc = jax.random.normal(k_be, (1, H), dtype=jnp.float32) * 0.1
    w_dec = jax.random.normal(k_wd, (H, D_IN), dtype=jnp.float32) * 0.1
    b_dec = jax.random.normal(k_bd, (1, D_IN), dtype=jnp.float32) * 0.1

    recon, normalized = ae_forward(x, w_enc, b_enc, w_dec, b_dec)
    jax.block_until_ready((recon, normalized))

    # Pure-JAX reference with faithful torch semantics (two-pass unbiased std,
    # no eps).
    z_ref = x @ w_enc + b_enc
    mean_ref = z_ref.mean(axis=1, keepdims=True)
    std_ref = jnp.sqrt(((z_ref - mean_ref) ** 2).sum(axis=1, keepdims=True) / (H - 1))
    norm_ref = (z_ref - mean_ref) / std_ref
    recon_ref = jax.nn.sigmoid(norm_ref @ w_dec + b_dec)
    assert jnp.allclose(recon, recon_ref, atol=2e-4), "recon mismatch"
    assert jnp.allclose(normalized, norm_ref, atol=2e-4), "normalized mismatch"

    print("KERNEL_OK")
</pallas_src>

<mosaic_0001>
module attributes {stable_mosaic.version = 11 : i64} {
  func.func @ae_kernel(%arg0: i32, %arg1: memref<512x256xf32, #tpu.memory_space<vmem>>, %arg2: memref<256x256xf32, #tpu.memory_space<vmem>>, %arg3: memref<1x256xf32, #tpu.memory_space<vmem>>, %arg4: memref<256x256xf32, #tpu.memory_space<vmem>>, %arg5: memref<1x256xf32, #tpu.memory_space<vmem>>, %arg6: memref<512x256xf32, #tpu.memory_space<vmem>>, %arg7: memref<512x256xf32, #tpu.memory_space<vmem>>) attributes {dimension_semantics = [#tpu.dimension_semantics<parallel>], iteration_bounds = array<i64: 2>, scalar_prefetch = 0 : i64, scratch_operands = 0 : i64, tpu.core_type = #tpu.core_type<tc>, window_params = [{transform_indices = @transform_0, window_bounds = array<i64: 512, 256>}, {pipeline_mode = #tpu.pipeline_mode<synchronous>, transform_indices = @transform_1, window_bounds = array<i64: 256, 256>}, {pipeline_mode = #tpu.pipeline_mode<synchronous>, transform_indices = @transform_2, window_bounds = array<i64: 1, 256>}, {pipeline_mode = #tpu.pipeline_mode<synchronous>, transform_indices = @transform_3, window_bounds = array<i64: 256, 256>}, {pipeline_mode = #tpu.pipeline_mode<synchronous>, transform_indices = @transform_4, window_bounds = array<i64: 1, 256>}, {transform_indices = @transform_5, window_bounds = array<i64: 512, 256>}, {transform_indices = @transform_6, window_bounds = array<i64: 512, 256>}]} {
    %c0 = arith.constant 0 : index
    %c0_0 = arith.constant 0 : index
    %0 = vector.load %arg1[%c0, %c0_0] : memref<512x256xf32, #tpu.memory_space<vmem>>, vector<512x256xf32>
    %c0_1 = arith.constant 0 : index
    %c0_2 = arith.constant 0 : index
    %1 = vector.load %arg2[%c0_1, %c0_2] : memref<256x256xf32, #tpu.memory_space<vmem>>, vector<256x256xf32>
    %cst = arith.constant dense<0.000000e+00> : vector<512x256xf32>
    %2 = tpu.matmul %0, %1, %cst {dimension_numbers = #tpu.dot_dimension_numbers<[1], [0], [0], [1], [0, 0, 1, 1], [], []>} : vector<512x256xf32>, vector<256x256xf32>, vector<512x256xf32> -> vector<512x256xf32>
    %c0_3 = arith.constant 0 : index
    %c0_4 = arith.constant 0 : index
    %3 = vector.load %arg3[%c0_3, %c0_4] : memref<1x256xf32, #tpu.memory_space<vmem>>, vector<1x256xf32>
    %4 = vector.broadcast %3 : vector<1x256xf32> to vector<512x256xf32>
    %5 = arith.addf %2, %4 : vector<512x256xf32>
    %cst_5 = arith.constant dense<0.000000e+00> : vector<512xf32>
    %6 = vector.multi_reduction <add>, %5, %cst_5 [1] : vector<512x256xf32> to vector<512xf32>
    %7 = vector.shape_cast %6 : vector<512xf32> to vector<512x1xf32>
    %8 = arith.mulf %5, %5 : vector<512x256xf32>
    %cst_6 = arith.constant dense<0.000000e+00> : vector<512xf32>
    %9 = vector.multi_reduction <add>, %8, %cst_6 [1] : vector<512x256xf32> to vector<512xf32>
    %10 = vector.shape_cast %9 : vector<512xf32> to vector<512x1xf32>
    %cst_7 = arith.constant 3.906250e-03 : f32
    %11 = vector.broadcast %cst_7 : f32 to vector<512x1xf32>
    %12 = arith.mulf %7, %11 : vector<512x1xf32>
    %13 = arith.mulf %7, %12 : vector<512x1xf32>
    %14 = arith.subf %10, %13 : vector<512x1xf32>
    %cst_8 = arith.constant 0.00392156886 : f32
    %15 = vector.broadcast %cst_8 : f32 to vector<512x1xf32>
    %16 = arith.mulf %14, %15 : vector<512x1xf32>
    %17 = math.rsqrt %16 : vector<512x1xf32>
    %18 = vector.broadcast %12 : vector<512x1xf32> to vector<512x256xf32>
    %19 = arith.subf %5, %18 : vector<512x256xf32>
    %20 = vector.broadcast %17 : vector<512x1xf32> to vector<512x256xf32>
    %21 = arith.mulf %19, %20 : vector<512x256xf32>
    %c0_9 = arith.constant 0 : index
    %c0_10 = arith.constant 0 : index
    %22 = vector.load %arg4[%c0_9, %c0_10] : memref<256x256xf32, #tpu.memory_space<vmem>>, vector<256x256xf32>
    %cst_11 = arith.constant dense<0.000000e+00> : vector<512x256xf32>
    %23 = tpu.matmul %21, %22, %cst_11 {dimension_numbers = #tpu.dot_dimension_numbers<[1], [0], [0], [1], [0, 0, 1, 1], [], []>} : vector<512x256xf32>, vector<256x256xf32>, vector<512x256xf32> -> vector<512x256xf32>
    %c0_12 = arith.constant 0 : index
    %c0_13 = arith.constant 0 : index
    %24 = vector.load %arg5[%c0_12, %c0_13] : memref<1x256xf32, #tpu.memory_space<vmem>>, vector<1x256xf32>
    %25 = vector.broadcast %24 : vector<1x256xf32> to vector<512x256xf32>
    %26 = arith.addf %23, %25 : vector<512x256xf32>
    %27 = arith.negf %26 : vector<512x256xf32>
    %28 = math.exp %27 : vector<512x256xf32>
    %cst_14 = arith.constant 1.000000e+00 : f32
    %29 = vector.broadcast %cst_14 : f32 to vector<512x256xf32>
    %30 = arith.addf %29, %28 : vector<512x256xf32>
    %31 = arith.divf %29, %30 : vector<512x256xf32>
    %c0_15 = arith.constant 0 : index
    %c0_16 = arith.constant 0 : index
    %32 = vector.load %arg6[%c0_15, %c0_16] : memref<512x256xf32, #tpu.memory_space<vmem>>, vector<512x256xf32>
    tpu.vector_store %arg6[%c0_15, %c0_16], %31 {strides = array<i32>} : memref<512x256xf32, #tpu.memory_space<vmem>>, vector<512x256xf32>,
    %c0_17 = arith.constant 0 : index
    %c0_18 = arith.constant 0 : index
    %33 = vector.load %arg7[%c0_17, %c0_18] : memref<512x256xf32, #tpu.memory_space<vmem>>, vector<512x256xf32>
    tpu.vector_store %arg7[%c0_17, %c0_18], %21 {strides = array<i32>} : memref<512x256xf32, #tpu.memory_space<vmem>>, vector<512x256xf32>,
    return
  }
  func.func @transform_0(%arg0: i32) -> (i32, i32) {
    %c0_i32 = arith.constant 0 : i32
    %c0_i32_0 = arith.constant 0 : i32
    return %arg0, %c0_i32 : i32, i32
  }
  func.func @transform_1(%arg0: i32) -> (i32, i32) {
    %c0_i32 = arith.constant 0 : i32
    %c0_i32_0 = arith.constant 0 : i32
    %c0_i32_1 = arith.constant 0 : i32
    return %c0_i32, %c0_i32_0 : i32, i32
  }
  func.func @transform_2(%arg0: i32) -> (i32, i32) {
    %c0_i32 = arith.constant 0 : i32
    %c0_i32_0 = arith.constant 0 : i32
    %c0_i32_1 = arith.constant 0 : i32
    return %c0_i32, %c0_i32_0 : i32, i32
  }
  func.func @transform_3(%arg0: i32) -> (i32, i32) {
    %c0_i32 = arith.constant 0 : i32
    %c0_i32_0 = arith.constant 0 : i32
    %c0_i32_1 = arith.constant 0 : i32
    return %c0_i32, %c0_i32_0 : i32, i32
  }
  func.func @transform_4(%arg0: i32) -> (i32, i32) {
    %c0_i32 = arith.constant 0 : i32
    %c0_i32_0 = arith.constant 0 : i32
    %c0_i32_1 = arith.constant 0 : i32
    return %c0_i32, %c0_i32_0 : i32, i32
  }
  func.func @transform_5(%arg0: i32) -> (i32, i32) {
    %c0_i32 = arith.constant 0 : i32
    %c0_i32_0 = arith.constant 0 : i32
    return %arg0, %c0_i32 : i32, i32
  }
  func.func @transform_6(%arg0: i32) -> (i32, i32) {
    %c0_i32 = arith.constant 0 : i32
    %c0_i32_0 = arith.constant 0 : i32
    return %arg0, %c0_i32 : i32, i32
  }
}

</mosaic_0001>

<bundles_post_ra>
// kernel: ae_forward.1
= control target key start
LH: loop header
LB: loop body
LE: loop exit
PB: predicated region body
PF: predicated region fallthrough
CT: control target
= control target key end

     0   :  { %12 = vsyncpa [#allocation3], 0  ;;  %s13531_s0 = inlined_call_operand.hbm [shape: f32[1024,256], index: 0, kind: input, shape index: {}]   ;;  %s13532_s1 = inlined_call_operand.hbm [shape: f32[256,256], index: 1, kind: input, shape index: {}]   ;;  %s13533_s2 = inlined_call_operand.hbm [shape: f32[1,256], index: 2, kind: input, shape index: {}]   ;;  %s13534_s3 = inlined_call_operand.hbm [shape: f32[256,256], index: 3, kind: input, shape index: {}]   ;;  %s13535_s4 = inlined_call_operand.vmem [shape: f32[1,256], index: 4, kind: input, shape index: {}]   ;;  %s13536_s5 = inlined_call_operand.hbm [shape: f32[1024,256], index: 5, kind: output, shape index: {0}]   ;;  %s13537_s6 = inlined_call_operand.hbm [shape: f32[1024,256], index: 6, kind: output, shape index: {1}]  }
   0x1   :  { %14 = vsyncpa [#allocation3 + $0x1], 0 }
   0x2   :  { %15 = vsyncpa [#allocation6], 0 }
   0x3   :  { %16 = vsyncpa [#allocation9], 0 }
   0x4   :  { %17 = vsyncpa [#allocation4], 0 }
   0x5   :  { %19 = vsyncpa [#allocation4 + $0x1], 0 }
   0x6   :  { %20 = vsyncpa [#allocation12], 0 }
   0x7   :  { %22 = vsyncpa [#allocation12 + $0x1], 0  ;;  %s8045_s21 = smov 0   ;;  %s8047_s22 = smov 0  }
   0x8   :  { %s8049_s23 = smov 0   ;;  %s8051_s24 = smov 0  }
   0x9 LB: > { %s8066_s25 = sadd.s32 4294967295, %s8001_s24   ;;  %s6802_s26 = sadd.s32 4294967294, %s8001_s24   ;;  %s8001_s24 = sphi %s8051_s24, %s14114_s24   ;;  %s7997_s23 = sphi %s8049_s23, %s14113_s23   ;;  %s7993_s22 = sphi %s8047_s22, %s14112_s22   ;;  %s7989_s21 = sphi %s8045_s21, %s14111_s21  }
   0xa   : > { %p48_p0 = scmp.ne.s32.totalorder %s7993_s22, %s7989_s21  ;;  %p49_p1 = scmp.eq.s32.totalorder %s8066_s25, 0 }
   0xb   : > { %p156_p2 = scmp.eq.s32.totalorder %s8066_s25, 1  ;;  %p162_p3 = scmp.eq.s32.totalorder %s6802_s26, 1 }
   0xc   : > { %p8075_p4 = por %p49_p1, %p48_p0  ;;  %p6803_p5 = scmp.ge.s32.totalorder %s8001_s24, 1 }
   0xd   : > { %p8080_p6 = por %p162_p3, %p48_p0  ;;  %p195_p7 = scmp.lt.s32.totalorder %s8001_s24, 3 }
   0xe   : > { %s206_s7 = sshll.u32 %s13532_s1, 4  ;;  %s8003_s9 = smov [#allocation5]   ;;  %s207_s7 = int_to_ptr.hbm [resolvable:$true] %s206_s7 }
   0xf   : > { %p8088_p8 = pnand %p6803_p5, %p195_p7  ;;  %s208_s10 = sshll.u32 %s8003_s9, 4  ;;  %s209_s10 = int_to_ptr.vmem [resolvable:$true] %s208_s10 }
  0x10   : > { %s221_s14 = sshll.u32 %s13533_s2, 4  ;;  %s13538_s15 = smov 256   ;;  %s222_s14 = int_to_ptr.hbm [resolvable:$true] %s221_s14 }
  0x11   : > { %p6981_p9 = pneg %p8088_p8  ;;  %s13539_s16 = smov 16  }
  0x12   : > { %s8006_s17 = smov [#allocation7]   ;;  %s232_s26 = sshll.u32 %s13534_s3, 4  ;;  %s233_s26 = int_to_ptr.hbm [resolvable:$true] %s232_s26 }
  0x13   : > { %p8096_p10 = pnand %p6981_p9, %p49_p1  ;;  %s223_s18 = sshll.u32 %s8006_s17, 4  ;;  %s224_s18 = int_to_ptr.vmem [resolvable:$true] %s223_s18 }
  0x14   : > { %s8007_s29 = smov [#allocation8]   ;;  %p42_p13 = scmp.ne.s32.totalorder %s7997_s23, %s7993_s22 }
  0x15   : > { %6984 = dma.hbm_to_vmem [thread:$0]  (!%p8096_p10), %s207_s7, 8192, %s209_s10, [#allocation6], %s13538_s15, %s13538_s15, %s13539_s16  }
  0x16   : > { %6987 = dma.hbm_to_vmem [thread:$0]  (!%p8096_p10), %s222_s14, 32, %s224_s18, [#allocation6]  }
  0x17   : > { %s234_s30 = sshll.u32 %s8007_s29, 4  ;;  %s8115_s7 = sadd.s32 1, %s8001_s24   ;;  %s235_s30 = int_to_ptr.vmem [resolvable:$true] %s234_s30 }
  0x18   : > { %6990 = dma.hbm_to_vmem [thread:$0]  (!%p8096_p10), %s233_s26, 8192, %s235_s30, [#allocation9], %s13538_s15, %s13538_s15, %s13539_s16  }
  0x19   : > { %s32_s9 = ssub.s32 %s8001_s24, %s8115_s7  ;;  %s35_s10 = sadd.s32 1, %s7997_s23 }
  0x1a   : > { %p33_p12 = scmp.eq.s32.totalorder %s32_s9, 0  ;;  %p43_p0 = scmp.eq.s32.totalorder %s8001_s24, 0 }
  0x1b   : > { %p8133_p3 = por %p156_p2, %p42_p13  ;;  %p7005_p5 = scmp.lt.s32.totalorder %s8001_s24, 2 }
  0x1c   : > { %s8129_s12 = scalar_select %p33_p12, %s7997_s23, %s35_s10  }
  0x1d   : > { %s251_s14 = sand.u32 1, %s7997_s23   ;;  %s6958_s11 = sshll.u32 %s8001_s24, 10 }
  0x1e   : > { %p44_p7 = por %p43_p0, %p42_p13  ;;  %s6808_s17 = sshll.u32 %s251_s14, 10 }
  0x1f   : > { %s261_s20 = scalar_lea.hbm %s13531_s0, %s6958_s11  ;;  %s255_s29 = scalar_lea.vmem [#allocation2], %s6808_s17 }
  0x20   : > { %s262_s26 = sshll.u32 %s261_s20, 4  ;;  %s264_s30 = sshll.u32 %s255_s29, 4  ;;  %s263_s26 = int_to_ptr.hbm [resolvable:$true] %s262_s26  ;;  %s265_s30 = int_to_ptr.vmem [resolvable:$true] %s264_s30 }
  0x21   : > { %p8143_p9 = pnand %p7005_p5, %p44_p7  ;;  %s252_s10 = scalar_lea.sflag [#allocation3], %s251_s14 }
  0x22   : > { %s7865_s15 = sshra.s32 %s263_s26, 4  ;;  %s7872_s17 = scalar_lea.hbm %s13531_s0, 2048  ;;  %s7866_s15 = int_to_ptr.hbm [resolvable:$true] %s7865_s15 }
  0x23   : > { %s7867_s16 = scalar_lea.hbm %s7866_s15, 1024  ;;  %p7869_p10 = pneg %p8143_p9 }
  0x24   : > { %p7868_p2 = scmp.ne.s32.totalorder %s7866_s15, %s7867_s16  ;;  %p7873_p0 = scmp.lt.s32.totalorder %s7866_s15, %s13531_s0 }
  0x25   : > { %p7874_p5 = scmp.lt.s32.totalorder %s7872_s17, %s7867_s16 }
  0x26   : > { %p7870_p12 = pnand %p7869_p10, %p7868_p2 }
  0x27   : > { %p7875_p7 = por %p7874_p5, %p7873_p0 }
  0x28   : > { %p7871_p13 = pneg %p7870_p12 }
  0x2a   : > { %p7876_p11 = pnand %p7875_p7, %p7871_p13 }
  0x2c   : > { %7879 = shalt.err (!%p7876_p11)
}
  0x2d   : > { %s13692_s14 = smov 16   ;;  %s13693_s29 = smov 256  }
  0x2e   : > { %6994 = dma.hbm_to_vmem [thread:$0]  (!%p8143_p9), %s263_s26, 16384, %s265_s30, %s252_s10, %s13693_s29, %s13693_s29, %s13692_s14  }
  0x2f   : > { %276 = sbr.rel (%p8088_p8) target bundleno = 1428 (0x594), region = 40 }
  0x34   : > { %s8163_s11 = sand.u32 1, %s7993_s22  }
  0x35   : > { %s8166_s15 = sshll.u32 %s8163_s11, 10  ;;  %s279_s16 = scalar_lea.sflag [#allocation3], %s8163_s11 }
  0x36   : > { %s8170_s18 = scalar_lea.vmem [#allocation2], %s8166_s15 }
  0x37   : > { %7968 = dma.done.wait (%p8075_p4), %s279_s16, 16384  }
  0x38   : > { %7970 = vsyncadd (%p8075_p4), %s279_s16, 4294950912 }
  0x39   : > { %7972 = dma.done.wait (%p49_p1), [#allocation6], 8224  }
  0x3a   : > { %7974 = vsyncadd (%p49_p1), [#allocation6], 4294959072 }
  0x3b   : > { %7976 = dma.done.wait (%p49_p1), [#allocation9], 8192  }
  0x3c   : > { %7978 = vsyncadd (%p49_p1), [#allocation9], 4294959104  ;;  %v493_v0 = vld [vmem:[#allocation5 + $0xf0] sm:$0xff]  ;;  %v494_v2 = vld [vmem:[#allocation5 + $0xf8] sm:$0xff]  ;;  %s8546_s27 = scalar_lea.vmem [#allocation11], %s8166_s15  ;;  %s10193_s30 = scalar_lea.vmem [#allocation10], %s8166_s15 }
  0x3d   : > { %v525_v1 = vld [vmem:[#allocation5 + $0x1f0] sm:$0xff]  ;;  %533 = vmatpush.msra.mxu0 %v493_v0  ;;  %v526_v3 = vld [vmem:[#allocation5 + $0x1f8] sm:$0xff]  ;;  %v491_v4 = vld [vmem:[#allocation5 + $0xe0] sm:$0xff]  ;;  %951 = vmatpush.msra.mxu2 %v494_v2  ;;  %s6960_s9 = sshll.u32 %s8066_s25, 10  ;;  %s6664_s20 = sshll.u32 %s8546_s27, 4  ;;  %s13209_s20 = int_to_ptr.vmem [resolvable:$true] %s6664_s20 }
  0x3e   : > { %742 = vmatpush.msra.mxu1 %v525_v1  ;;  %v523_v5 = vld [vmem:[#allocation5 + $0x1e0] sm:$0xff]  ;;  %1160 = vmatpush.msra.mxu3 %v526_v3  ;;  %v492_v6 = vld [vmem:[#allocation5 + $0xe8] sm:$0xff]  ;;  %v489_v8 = vld [vmem:[#allocation5 + $0xd0] sm:$0xff]  ;;  %s6663_s19 = scalar_lea.hbm %s13537_s6, %s6960_s9  ;;  %s6633_s29 = scalar_lea.sflag [#allocation12], %s8163_s11 }
  0x3f   : > { %v524_v7 = vld [vmem:[#allocation5 + $0x1e8] sm:$0xff]  ;;  %534 = vmatpush.msra.mxu0 %v491_v4  ;;  %v521_v9 = vld [vmem:[#allocation5 + $0x1d0] sm:$0xff]  ;;  %v490_v10 = vld [vmem:[#allocation5 + $0xd8] sm:$0xff]  ;;  %952 = vmatpush.msra.mxu2 %v492_v6  ;;  %s6666_s14 = sshll.u32 %s6663_s19, 4  ;;  %s7915_s8 = scalar_lea.hbm %s13537_s6, 2048  ;;  %s6667_s14 = int_to_ptr.hbm [resolvable:$true] %s6666_s14 }
  0x40   : > { %743 = vmatpush.msra.mxu1 %v523_v5  ;;  %v522_v11 = vld [vmem:[#allocation5 + $0x1d8] sm:$0xff]  ;;  %1161 = vmatpush.msra.mxu3 %v524_v7  ;;  %v487_v12 = vld [vmem:[#allocation5 + $0xc0] sm:$0xff]  ;;  %v488_v14 = vld [vmem:[#allocation5 + $0xc8] sm:$0xff]  ;;  %s7909_s15 = sshra.s32 %s6667_s14, 4  ;;  %s7910_s15 = int_to_ptr.hbm [resolvable:$true] %s7909_s15 }
  0x41   : > { %v519_v13 = vld [vmem:[#allocation5 + $0x1c0] sm:$0xff]  ;;  %535 = vmatpush.msra.mxu0 %v489_v8  ;;  %v520_v15 = vld [vmem:[#allocation5 + $0x1c8] sm:$0xff]  ;;  %953 = vmatpush.msra.mxu2 %v490_v10  ;;  %v485_v16 = vld [vmem:[#allocation5 + $0xb0] sm:$0xff]  ;;  %s7911_s16 = scalar_lea.hbm %s7910_s15, 1024  ;;  %p7916_p11 = scmp.lt.s32.totalorder %s7910_s15, %s13537_s6 }
  0x42   : > { %744 = vmatpush.msra.mxu1 %v521_v9  ;;  %1162 = vmatpush.msra.mxu3 %v522_v11  ;;  %v517_v17 = vld [vmem:[#allocation5 + $0x1b0] sm:$0xff]  ;;  %v486_v18 = vld [vmem:[#allocation5 + $0xb8] sm:$0xff]  ;;  %v483_v20 = vld [vmem:[#allocation5 + $0xa0] sm:$0xff]  ;;  %p7912_p1 = scmp.ne.s32.totalorder %s7910_s15, %s7911_s16  ;;  %p7917_p9 = scmp.lt.s32.totalorder %s7915_s8, %s7911_s16 }
  0x43   : > { %536 = vmatpush.msra.mxu0 %v487_v12  ;;  %v518_v19 = vld [vmem:[#allocation5 + $0x1b8] sm:$0xff]  ;;  %954 = vmatpush.msra.mxu2 %v488_v14  ;;  %v515_v21 = vld [vmem:[#allocation5 + $0x1a0] sm:$0xff]  ;;  %v484_v22 = vld [vmem:[#allocation5 + $0xa8] sm:$0xff] }
  0x44   : > { %745 = vmatpush.msra.mxu1 %v519_v13  ;;  %1163 = vmatpush.msra.mxu3 %v520_v15  ;;  %v516_v23 = vld [vmem:[#allocation5 + $0x1a8] sm:$0xff]  ;;  %v481_v24 = vld [vmem:[#allocation5 + $0x90] sm:$0xff]  ;;  %v482_v26 = vld [vmem:[#allocation5 + $0x98] sm:$0xff]  ;;  %p7913_p4 = pnand %p7912_p1, %p8133_p3  ;;  %p7918_p2 = por %p7917_p9, %p7916_p11 }
  0x45   : > { %537 = vmatpush.msra.mxu0 %v485_v16  ;;  %955 = vmatpush.msra.mxu2 %v486_v18  ;;  %v513_v25 = vld [vmem:[#allocation5 + $0x190] sm:$0xff]  ;;  %v514_v27 = vld [vmem:[#allocation5 + $0x198] sm:$0xff]  ;;  %v479_v28 = vld [vmem:[#allocation5 + $0x80] sm:$0xff] }
  0x46   : > { %746 = vmatpush.msra.mxu1 %v517_v17  ;;  %1164 = vmatpush.msra.mxu3 %v518_v19  ;;  %v511_v29 = vld [vmem:[#allocation5 + $0x180] sm:$0xff]  ;;  %v480_v30 = vld [vmem:[#allocation5 + $0x88] sm:$0xff]  ;;  %v477_v32 = vld [vmem:[#allocation5 + $0x70] sm:$0xff]  ;;  %p7914_p8 = pneg %p7913_p4 }
  0x47   : > { %538 = vmatpush.msra.mxu0 %v483_v20  ;;  %956 = vmatpush.msra.mxu2 %v484_v22  ;;  %v512_v31 = vld [vmem:[#allocation5 + $0x188] sm:$0xff]  ;;  %v509_v33 = vld [vmem:[#allocation5 + $0x170] sm:$0xff]  ;;  %v478_v34 = vld [vmem:[#allocation5 + $0x78] sm:$0xff] }
  0x48   : > { %747 = vmatpush.msra.mxu1 %v515_v21  ;;  %1165 = vmatpush.msra.mxu3 %v516_v23  ;;  %v510_v35 = vld [vmem:[#allocation5 + $0x178] sm:$0xff]  ;;  %v475_v36 = vld [vmem:[#allocation5 + $0x60] sm:$0xff]  ;;  %v476_v38 = vld [vmem:[#allocation5 + $0x68] sm:$0xff]  ;;  %p7919_p10 = pnand %p7918_p2, %p7914_p8 }
  0x49   : > { %539 = vmatpush.msra.mxu0 %v481_v24  ;;  %957 = vmatpush.msra.mxu2 %v482_v26  ;;  %v507_v37 = vld [vmem:[#allocation5 + $0x160] sm:$0xff]  ;;  %v508_v39 = vld [vmem:[#allocation5 + $0x168] sm:$0xff]  ;;  %v473_v40 = vld [vmem:[#allocation5 + $0x50] sm:$0xff] }
  0x4a   : > { %748 = vmatpush.msra.mxu1 %v513_v25  ;;  %1166 = vmatpush.msra.mxu3 %v514_v27  ;;  %v505_v41 = vld [vmem:[#allocation5 + $0x150] sm:$0xff]  ;;  %v474_v42 = vld [vmem:[#allocation5 + $0x58] sm:$0xff]  ;;  %v471_v44 = vld [vmem:[#allocation5 + $0x40] sm:$0xff] }
  0x4b   : > { %540 = vmatpush.msra.mxu0 %v479_v28  ;;  %958 = vmatpush.msra.mxu2 %v480_v30  ;;  %v506_v43 = vld [vmem:[#allocation5 + $0x158] sm:$0xff]  ;;  %v503_v45 = vld [vmem:[#allocation5 + $0x140] sm:$0xff]  ;;  %v472_v46 = vld [vmem:[#allocation5 + $0x48] sm:$0xff] }
  0x4c   : > { %749 = vmatpush.msra.mxu1 %v511_v29  ;;  %1167 = vmatpush.msra.mxu3 %v512_v31  ;;  %v504_v47 = vld [vmem:[#allocation5 + $0x148] sm:$0xff]  ;;  %v469_v48 = vld [vmem:[#allocation5 + $0x30] sm:$0xff]  ;;  %v470_v50 = vld [vmem:[#allocation5 + $0x38] sm:$0xff] }
  0x4d   : > { %541 = vmatpush.msra.mxu0 %v477_v32  ;;  %959 = vmatpush.msra.mxu2 %v478_v34  ;;  %v501_v49 = vld [vmem:[#allocation5 + $0x130] sm:$0xff]  ;;  %v502_v51 = vld [vmem:[#allocation5 + $0x138] sm:$0xff]  ;;  %v467_v52 = vld [vmem:[#allocation5 + $0x20] sm:$0xff] }
  0x4e   : > { %750 = vmatpush.msra.mxu1 %v509_v33  ;;  %1168 = vmatpush.msra.mxu3 %v510_v35  ;;  %v499_v53 = vld [vmem:[#allocation5 + $0x120] sm:$0xff]  ;;  %v468_v54 = vld [vmem:[#allocation5 + $0x28] sm:$0xff]  ;;  %v465_v56 = vld [vmem:[#allocation5 + $0x10] sm:$0xff] }
  0x4f   : > { %542 = vmatpush.msra.mxu0 %v475_v36  ;;  %960 = vmatpush.msra.mxu2 %v476_v38  ;;  %v500_v55 = vld [vmem:[#allocation5 + $0x128] sm:$0xff]  ;;  %v497_v57 = vld [vmem:[#allocation5 + $0x110] sm:$0xff]  ;;  %v466_v58 = vld [vmem:[#allocation5 + $0x18] sm:$0xff] }
  0x50   : > { %751 = vmatpush.msra.mxu1 %v507_v37  ;;  %1169 = vmatpush.msra.mxu3 %v508_v39  ;;  %v498_v59 = vld [vmem:[#allocation5 + $0x118] sm:$0xff]  ;;  %v463_v60 = vld [vmem:[#allocation5] sm:$0xff]  ;;  %v464_v62 = vld [vmem:[#allocation5 + $0x8] sm:$0xff] }
  0x51   : > { %543 = vmatpush.msra.mxu0 %v473_v40  ;;  %961 = vmatpush.msra.mxu2 %v474_v42  ;;  %v495_v61 = vld [vmem:[#allocation5 + $0x100] sm:$0xff]  ;;  %v496_v63 = vld [vmem:[#allocation5 + $0x108] sm:$0xff]  ;;  %v3063_v4 = vld [vmem:[#allocation8 + $0xf0] sm:$0xff] }
  0x52   : > { %752 = vmatpush.msra.mxu1 %v505_v41  ;;  %1170 = vmatpush.msra.mxu3 %v506_v43  ;;  %v335_v0 = vld [vmem:[%s8170_s18] sm:$0xff]  ;;  %v336_v1 = vld [vmem:[%s8170_s18 + $0x8] sm:$0xff]  ;;  %v3095_v5 = vld [vmem:[#allocation8 + $0x1f0] sm:$0xff] }
  0x53   : > { %544 = vmatpush.msra.mxu0 %v471_v44  ;;  %962 = vmatpush.msra.mxu2 %v472_v46  ;;  %v3064_v2 = vld [vmem:[#allocation8 + $0xf8] sm:$0xff]  ;;  %v3062_v6 = vld [vmem:[#allocation8 + $0xe8] sm:$0xff]  ;;  %v3061_v8 = vld [vmem:[#allocation8 + $0xe0] sm:$0xff] }
  0x54   : > { %753 = vmatpush.msra.mxu1 %v503_v45  ;;  %1171 = vmatpush.msra.mxu3 %v504_v47  ;;  %v3096_v3 = vld [vmem:[#allocation8 + $0x1f8] sm:$0xff]  ;;  %v3094_v7 = vld [vmem:[#allocation8 + $0x1e8] sm:$0xff]  ;;  %v3093_v11 = vld [vmem:[#allocation8 + $0x1e0] sm:$0xff] }
  0x55   : > { %545 = vmatpush.msra.mxu0 %v469_v48  ;;  %963 = vmatpush.msra.mxu2 %v470_v50  ;;  %v337_v9 = vld [vmem:[%s8170_s18 + $0x10] sm:$0xff]  ;;  %v338_v10 = vld [vmem:[%s8170_s18 + $0x18] sm:$0xff]  ;;  %v339_v12 = vld [vmem:[%s8170_s18 + $0x20] sm:$0xff] }
  0x56   : > { %754 = vmatpush.msra.mxu1 %v501_v49  ;;  %1172 = vmatpush.msra.mxu3 %v502_v51  ;;  %v340_v13 = vld [vmem:[%s8170_s18 + $0x28] sm:$0xff]  ;;  %v341_v14 = vld [vmem:[%s8170_s18 + $0x30] sm:$0xff]  ;;  %v342_v15 = vld [vmem:[%s8170_s18 + $0x38] sm:$0xff] }
  0x57   : > { %546 = vmatpush.msra.mxu0 %v467_v52  ;;  %964 = vmatpush.msra.mxu2 %v468_v54  ;;  %v343_v16 = vld [vmem:[%s8170_s18 + $0x40] sm:$0xff]  ;;  %v344_v17 = vld [vmem:[%s8170_s18 + $0x48] sm:$0xff]  ;;  %v3059_v20 = vld [vmem:[#allocation8 + $0xd0] sm:$0xff] }
  0x58   : > { %755 = vmatpush.msra.mxu1 %v499_v53  ;;  %1173 = vmatpush.msra.mxu3 %v500_v55  ;;  %v3060_v18 = vld [vmem:[#allocation8 + $0xd8] sm:$0xff]  ;;  %v345_v21 = vld [vmem:[%s8170_s18 + $0x50] sm:$0xff]  ;;  %v348_v25 = vld [vmem:[%s8170_s18 + $0x68] sm:$0xff] }
  0x59   : > { %547 = vmatpush.msra.mxu0 %v465_v56  ;;  %965 = vmatpush.msra.mxu2 %v466_v58  ;;  %v3092_v19 = vld [vmem:[#allocation8 + $0x1d8] sm:$0xff]  ;;  %v3091_v23 = vld [vmem:[#allocation8 + $0x1d0] sm:$0xff]  ;;  %v352_v29 = vld [vmem:[%s8170_s18 + $0x88] sm:$0xff] }
  0x5a   : > { %756 = vmatpush.msra.mxu1 %v497_v57  ;;  %1174 = vmatpush.msra.mxu3 %v498_v59  ;;  %v346_v22 = vld [vmem:[%s8170_s18 + $0x58] sm:$0xff]  ;;  %v347_v24 = vld [vmem:[%s8170_s18 + $0x60] sm:$0xff]  ;;  %v349_v26 = vld [vmem:[%s8170_s18 + $0x70] sm:$0xff] }
  0x5b   : > { %548 = vmatpush.msra.mxu0 %v463_v60  ;;  %966 = vmatpush.msra.mxu2 %v464_v62  ;;  %v350_v27 = vld [vmem:[%s8170_s18 + $0x78] sm:$0xff]  ;;  %v351_v28 = vld [vmem:[%s8170_s18 + $0x80] sm:$0xff]  ;;  %v3058_v30 = vld [vmem:[#allocation8 + $0xc8] sm:$0xff] }
  0x5c   : > { %757 = vmatpush.msra.mxu1 %v495_v61  ;;  %1175 = vmatpush.msra.mxu3 %v496_v63  ;;  %v3090_v31 = vld [vmem:[#allocation8 + $0x1c8] sm:$0xff]  ;;  %v3057_v32 = vld [vmem:[#allocation8 + $0xc0] sm:$0xff]  ;;  %v354_v34 = vld [vmem:[%s8170_s18 + $0x98] sm:$0xff] }
  0x5d   : > { %549 = vmatmul.f32.vlgmr.msra.gmra.mxu0 %v335_v0  ;;  %758 = vmatmul.f32.vlgmr.msra.gmra.mxu1 %v336_v1  ;;  %v353_v33 = vld [vmem:[%s8170_s18 + $0x90] sm:$0xff]  ;;  %v3089_v35 = vld [vmem:[#allocation8 + $0x1c0] sm:$0xff]  ;;  %v358_v39 = vld [vmem:[%s8170_s18 + $0xb8] sm:$0xff] }
  0x5e   : > { %967 = vmatmul.f32.vlgmr.msra.gmra.mxu2 %v335_v0  ;;  %1176 = vmatmul.f32.vlgmr.msra.gmra.mxu3 %v336_v1  ;;  %v355_v36 = vld [vmem:[%s8170_s18 + $0xa0] sm:$0xff]  ;;  %v356_v37 = vld [vmem:[%s8170_s18 + $0xa8] sm:$0xff]  ;;  %v357_v38 = vld [vmem:[%s8170_s18 + $0xb0] sm:$0xff] }
  0x5f   : > { %3521 = vmatpush.msrb.mxu2 %v3064_v2  ;;  %3730 = vmatpush.msrb.mxu3 %v3096_v3  ;;  %v359_v40 = vld [vmem:[%s8170_s18 + $0xc0] sm:$0xff]  ;;  %v360_v41 = vld [vmem:[%s8170_s18 + $0xc8] sm:$0xff]  ;;  %v361_v44 = vld [vmem:[%s8170_s18 + $0xd0] sm:$0xff] }
  0x60   : > { %3103 = vmatpush.msrb.mxu0 %v3063_v4  ;;  %3312 = vmatpush.msrb.mxu1 %v3095_v5  ;;  %v3056_v42 = vld [vmem:[#allocation8 + $0xb8] sm:$0xff]  ;;  %v3055_v46 = vld [vmem:[#allocation8 + $0xb0] sm:$0xff]  ;;  %v364_v49 = vld [vmem:[%s8170_s18 + $0xe8] sm:$0xff] }
  0x61   : > { %3522 = vmatpush.msrb.mxu2 %v3062_v6  ;;  %3731 = vmatpush.msrb.mxu3 %v3094_v7  ;;  %v3088_v43 = vld [vmem:[#allocation8 + $0x1b8] sm:$0xff]  ;;  %v3087_v47 = vld [vmem:[#allocation8 + $0x1b0] sm:$0xff]  ;;  %v368_v57 = vld [vmem:[%s8170_s18 + $0x108] sm:$0xff] }
  0x62   : > { %3104 = vmatpush.msrb.mxu0 %v3061_v8  ;;  %3313 = vmatpush.msrb.mxu1 %v3093_v11  ;;  %v362_v45 = vld [vmem:[%s8170_s18 + $0xd8] sm:$0xff]  ;;  %v363_v48 = vld [vmem:[%s8170_s18 + $0xe0] sm:$0xff]  ;;  %v365_v50 = vld [vmem:[%s8170_s18 + $0xf0] sm:$0xff] }
  0x63   : > { %3523 = vmatpush.msrb.mxu2 %v3060_v18  ;;  %3732 = vmatpush.msrb.mxu3 %v3092_v19  ;;  %v366_v51 = vld [vmem:[%s8170_s18 + $0xf8] sm:$0xff]  ;;  %v527_v52 = vld [vmem:[#allocation7] sm:$0x3]  ;;  %v3054_v60 = vld [vmem:[#allocation8 + $0xa8] sm:$0xff] }
  0x64   : > { %3105 = vmatpush.msrb.mxu0 %v3059_v20  ;;  %3314 = vmatpush.msrb.mxu1 %v3091_v23  ;;  %v8216_v53 = vperm.slane %v527_v52, 0  ;;  %v367_v56 = vld [vmem:[%s8170_s18 + $0x100] sm:$0xff]  ;;  %v8221_v59 = vperm.slane %v527_v52, 1  ;;  %v3086_v61 = vld [vmem:[#allocation8 + $0x1a8] sm:$0xff]  ;;  %v370_v5 = vld [vmem:[%s8170_s18 + $0x118] sm:$0xff] }
  0x65   : > { %552 = vmatmul.f32.gmra.mxu0 %v337_v9  ;;  %761 = vmatmul.f32.gmra.mxu1 %v338_v10  ;;  %v369_v4 = vld [vmem:[%s8170_s18 + $0x110] sm:$0xff]  ;;  %v3053_v7 = vld [vmem:[#allocation8 + $0xa0] sm:$0xff] }
  0x66   : > { %970 = vmatmul.f32.gmra.mxu2 %v337_v9  ;;  %1179 = vmatmul.f32.gmra.mxu3 %v338_v10  ;;  %v3085_v10 = vld [vmem:[#allocation8 + $0x1a0] sm:$0xff] }
  0x67   : > { %3524 = vmatpush.msrb.mxu2 %v3058_v30  ;;  %3733 = vmatpush.msrb.mxu3 %v3090_v31  ;;  %v372_v18 = vld [vmem:[%s8170_s18 + $0x128] sm:$0xff]  ;;  %v373_v31 = vld [vmem:[%s8170_s18 + $0x130] sm:$0xff] }
  0x68   : > { %3106 = vmatpush.msrb.mxu0 %v3057_v32  ;;  %3315 = vmatpush.msrb.mxu1 %v3089_v35  ;;  %v374_v32 = vld [vmem:[%s8170_s18 + $0x138] sm:$0xff] }
  0x69   : > { %3525 = vmatpush.msrb.mxu2 %v3056_v42  ;;  %3734 = vmatpush.msrb.mxu3 %v3088_v43 }
  0x6a   : > { %3107 = vmatpush.msrb.mxu0 %v3055_v46  ;;  %3316 = vmatpush.msrb.mxu1 %v3087_v47  ;;  %v376_v46 = vld [vmem:[%s8170_s18 + $0x148] sm:$0xff] }
  0x6b   : > { %3526 = vmatpush.msrb.mxu2 %v3054_v60  ;;  %3735 = vmatpush.msrb.mxu3 %v3086_v61 }
  0x6c   : > { %3108 = vmatpush.msrb.mxu0 %v3053_v7  ;;  %3317 = vmatpush.msrb.mxu1 %v3085_v10 }
  0x6d   : > { %555 = vmatmul.f32.gmra.mxu0 %v339_v12  ;;  %764 = vmatmul.f32.gmra.mxu1 %v340_v13 }
  0x6e   : > { %973 = vmatmul.f32.gmra.mxu2 %v339_v12  ;;  %1182 = vmatmul.f32.gmra.mxu3 %v340_v13 }
  0x75   : > { %558 = vmatmul.f32.gmra.mxu0 %v341_v14  ;;  %767 = vmatmul.f32.gmra.mxu1 %v342_v15 }
  0x76   : > { %976 = vmatmul.f32.gmra.mxu2 %v341_v14  ;;  %1185 = vmatmul.f32.gmra.mxu3 %v342_v15 }
  0x7d   : > { %561 = vmatmul.f32.gmra.mxu0 %v343_v16  ;;  %770 = vmatmul.f32.gmra.mxu1 %v344_v17 }
  0x7e   : > { %979 = vmatmul.f32.gmra.mxu2 %v343_v16  ;;  %1188 = vmatmul.f32.gmra.mxu3 %v344_v17  ;;  %v371_v17 = vld [vmem:[%s8170_s18 + $0x120] sm:$0xff] }
  0x85   : > { %564 = vmatmul.f32.gmra.mxu0 %v345_v21  ;;  %773 = vmatmul.f32.gmra.mxu1 %v346_v22 }
  0x86   : > { %982 = vmatmul.f32.gmra.mxu2 %v345_v21  ;;  %1191 = vmatmul.f32.gmra.mxu3 %v346_v22 }
  0x8d   : > { %567 = vmatmul.f32.gmra.mxu0 %v347_v24  ;;  %776 = vmatmul.f32.gmra.mxu1 %v348_v25 }
  0x8e   : > { %985 = vmatmul.f32.gmra.mxu2 %v347_v24  ;;  %1194 = vmatmul.f32.gmra.mxu3 %v348_v25 }
  0x95   : > { %570 = vmatmul.f32.gmra.mxu0 %v349_v26  ;;  %779 = vmatmul.f32.gmra.mxu1 %v350_v27 }
  0x96   : > { %988 = vmatmul.f32.gmra.mxu2 %v349_v26  ;;  %1197 = vmatmul.f32.gmra.mxu3 %v350_v27 }
  0x9d   : > { %573 = vmatmul.f32.gmra.mxu0 %v351_v28  ;;  %782 = vmatmul.f32.gmra.mxu1 %v352_v29 }
  0x9e   : > { %991 = vmatmul.f32.gmra.mxu2 %v351_v28  ;;  %1200 = vmatmul.f32.gmra.mxu3 %v352_v29 }
  0xa5   : > { %576 = vmatmul.f32.gmra.mxu0 %v353_v33  ;;  %785 = vmatmul.f32.gmra.mxu1 %v354_v34 }
  0xa6   : > { %994 = vmatmul.f32.gmra.mxu2 %v353_v33  ;;  %1203 = vmatmul.f32.gmra.mxu3 %v354_v34 }
  0xad   : > { %579 = vmatmul.f32.gmra.mxu0 %v355_v36  ;;  %788 = vmatmul.f32.gmra.mxu1 %v356_v37 }
  0xae   : > { %997 = vmatmul.f32.gmra.mxu2 %v355_v36  ;;  %1206 = vmatmul.f32.gmra.mxu3 %v356_v37 }
  0xb5   : > { %582 = vmatmul.f32.gmra.mxu0 %v357_v38  ;;  %791 = vmatmul.f32.gmra.mxu1 %v358_v39 }
  0xb6   : > { %1000 = vmatmul.f32.gmra.mxu2 %v357_v38  ;;  %1209 = vmatmul.f32.gmra.mxu3 %v358_v39 }
  0xbd   : > { %585 = vmatmul.f32.gmra.mxu0 %v359_v40  ;;  %794 = vmatmul.f32.gmra.mxu1 %v360_v41 }
  0xbe   : > { %1003 = vmatmul.f32.gmra.mxu2 %v359_v40  ;;  %1212 = vmatmul.f32.gmra.mxu3 %v360_v41 }
  0xc5   : > { %588 = vmatmul.f32.gmra.mxu0 %v361_v44  ;;  %797 = vmatmul.f32.gmra.mxu1 %v362_v45 }
  0xc6   : > { %1006 = vmatmul.f32.gmra.mxu2 %v361_v44  ;;  %1215 = vmatmul.f32.gmra.mxu3 %v362_v45  ;;  %v375_v45 = vld [vmem:[%s8170_s18 + $0x140] sm:$0xff] }
  0xcd   : > { %591 = vmatmul.f32.gmra.mxu0 %v363_v48  ;;  %800 = vmatmul.f32.gmra.mxu1 %v364_v49 }
  0xce   : > { %1009 = vmatmul.f32.gmra.mxu2 %v363_v48  ;;  %1218 = vmatmul.f32.gmra.mxu3 %v364_v49 }
  0xd5   : > { %594 = vmatmul.f32.gmra.mxu0 %v365_v50  ;;  %803 = vmatmul.f32.gmra.mxu1 %v366_v51 }
  0xd6   : > { %1012 = vmatmul.f32.gmra.mxu2 %v365_v50  ;;  %1221 = vmatmul.f32.gmra.mxu3 %v366_v51 }
  0xda   : > { %v550_v54 = vpop.f32.mrf.mxu0  ;;  %v759_v55 = vpop.f32.mrf.mxu1 }
  0xdb   : > { %v551_v58 = vadd.f32 %v550_v54, %v8216_v53 }
  0xdd   : > { %597 = vmatmul.f32.gmra.mxu0 %v367_v56  ;;  %806 = vmatmul.f32.gmra.mxu1 %v368_v57  ;;  %v8223_v0 = vadd.f32 %v759_v55, %v551_v58 }
  0xde   : > { %1015 = vmatmul.f32.gmra.mxu2 %v367_v56  ;;  %1224 = vmatmul.f32.gmra.mxu3 %v368_v57  ;;  %v3052_v56 = vld [vmem:[#allocation8 + $0x98] sm:$0xff] }
  0xdf   : > { %v1561_v19 = vmul.f32 %v8223_v0, %v8223_v0  ;;  %v3084_v57 = vld [vmem:[#allocation8 + $0x198] sm:$0xff]  ;;  %3527 = vmatpush.msrb.mxu2 %v3052_v56  ;;  %v384_v56 = vld [vmem:[%s8170_s18 + $0x188] sm:$0xff] }
  0xe0   : > { %3736 = vmatpush.msrb.mxu3 %v3084_v57 }
  0xe1   : > { %v968_v62 = vpop.f32.mrf.mxu2  ;;  %v1177_v63 = vpop.f32.mrf.mxu3 }
  0xe2   : > { %v969_v1 = vadd.f32 %v968_v62, %v8221_v59  ;;  %v553_v2 = vpop.f32.mrf.mxu0  ;;  %v762_v3 = vpop.f32.mrf.mxu1 }
  0xe3   : > { %v554_v8 = vadd.f32 %v553_v2, %v8216_v53 }
  0xe4   : > { %v8228_v6 = vadd.f32 %v1177_v63, %v969_v1 }
  0xe5   : > { %600 = vmatmul.f32.gmra.mxu0 %v369_v4  ;;  %809 = vmatmul.f32.gmra.mxu1 %v370_v5  ;;  %v8233_v13 = vadd.f32 %v762_v3, %v554_v8  ;;  %v377_v3 = vld [vmem:[%s8170_s18 + $0x150] sm:$0xff] }
  0xe6   : > { %1018 = vmatmul.f32.gmra.mxu2 %v369_v4  ;;  %1227 = vmatmul.f32.gmra.mxu3 %v370_v5  ;;  %v1369_v9 = vadd.f32 %v8228_v6, %v8223_v0  ;;  %v1562_v20 = vmul.f32 %v8228_v6, %v8228_v6  ;;  %v378_v4 = vld [vmem:[%s8170_s18 + $0x158] sm:$0xff] }
  0xe7   : > { %v1563_v33 = vmul.f32 %v8233_v13, %v8233_v13 }
  0xe8   : > { %1370 = vadd.xlane.f32.xlu0 %v1369_v9  ;;  %v1689_v24 = vadd.f32 %v1562_v20, %v1561_v19  ;;  %v3051_v9 = vld [vmem:[#allocation8 + $0x90] sm:$0xff] }
  0xe9   : > { %v971_v11 = vpop.f32.mrf.mxu2  ;;  %v1180_v12 = vpop.f32.mrf.mxu3  ;;  %3109 = vmatpush.msrb.mxu0 %v3051_v9 }
  0xea   : > { %v972_v14 = vadd.f32 %v971_v11, %v8221_v59  ;;  %v556_v15 = vpop.f32.mrf.mxu0  ;;  %v765_v16 = vpop.f32.mrf.mxu1 }
  0xeb   : > { %v557_v22 = vadd.f32 %v556_v15, %v8216_v53 }
  0xec   : > { %v8242_v21 = vadd.f32 %v1180_v12, %v972_v14  ;;  %v3083_v12 = vld [vmem:[#allocation8 + $0x190] sm:$0xff] }
  0xed   : > { %603 = vmatmul.f32.gmra.mxu0 %v371_v17  ;;  %812 = vmatmul.f32.gmra.mxu1 %v372_v18  ;;  %v8247_v27 = vadd.f32 %v765_v16, %v557_v22  ;;  %v379_v22 = vld [vmem:[%s8170_s18 + $0x160] sm:$0xff] }
  0xee   : > { %1021 = vmatmul.f32.gmra.mxu2 %v371_v17  ;;  %1230 = vmatmul.f32.gmra.mxu3 %v372_v18  ;;  %v1372_v23 = vadd.f32 %v8242_v21, %v8233_v13  ;;  %v1564_v34 = vmul.f32 %v8242_v21, %v8242_v21 }
  0xef   : > { %v1565_v47 = vmul.f32 %v8247_v27, %v8247_v27  ;;  %3318 = vmatpush.msrb.mxu1 %v3083_v12  ;;  %v385_v12 = vld [vmem:[%s8170_s18 + $0x190] sm:$0xff] }
  0xf0   : > { %1373 = vadd.xlane.f32.xlu1 %v1372_v23  ;;  %1690 = vadd.xlane.f32.xlu0 %v1689_v24  ;;  %v1692_v38 = vadd.f32 %v1564_v34, %v1563_v33  ;;  %v380_v23 = vld [vmem:[%s8170_s18 + $0x168] sm:$0xff] }
  0xf1   : > { %v974_v25 = vpop.f32.mrf.mxu2  ;;  %v1183_v26 = vpop.f32.mrf.mxu3 }
  0xf2   : > { %v975_v28 = vadd.f32 %v974_v25, %v8221_v59  ;;  %v559_v29 = vpop.f32.mrf.mxu0  ;;  %v768_v30 = vpop.f32.mrf.mxu1 }
  0xf3   : > { %v560_v36 = vadd.f32 %v559_v29, %v8216_v53 }
  0xf4   : > { %v8256_v35 = vadd.f32 %v1183_v26, %v975_v28 }
  0xf5   : > { %606 = vmatmul.f32.gmra.mxu0 %v373_v31  ;;  %815 = vmatmul.f32.gmra.mxu1 %v374_v32  ;;  %v8261_v39 = vadd.f32 %v768_v30, %v560_v36 }
  0xf6   : > { %1024 = vmatmul.f32.gmra.mxu2 %v373_v31  ;;  %1233 = vmatmul.f32.gmra.mxu3 %v374_v32  ;;  %v1375_v37 = vadd.f32 %v8256_v35, %v8247_v27  ;;  %v1566_v48 = vmul.f32 %v8256_v35, %v8256_v35 }
  0xf7   : > { %v1567_v51 = vmul.f32 %v8261_v39, %v8261_v39 }
  0xf8   : > { %1376 = vadd.xlane.f32.xlu2 %v1375_v37  ;;  %1693 = vadd.xlane.f32.xlu1 %v1692_v38  ;;  %v1695_v52 = vadd.f32 %v1566_v48, %v1565_v47  ;;  %v381_v38 = vld [vmem:[%s8170_s18 + $0x170] sm:$0xff] }
  0xf9   : > { %v977_v40 = vpop.f32.mrf.mxu2  ;;  %v1186_v41 = vpop.f32.mrf.mxu3 }
  0xfa   : > { %v978_v42 = vadd.f32 %v977_v40, %v8221_v59  ;;  %v562_v43 = vpop.f32.mrf.mxu0  ;;  %v771_v44 = vpop.f32.mrf.mxu1  ;;  %v382_v40 = vld [vmem:[%s8170_s18 + $0x178] sm:$0xff] }
  0xfb   : > { %v563_v50 = vadd.f32 %v562_v43, %v8216_v53 }
  0xfc   : > { %v8270_v49 = vadd.f32 %v1186_v41, %v978_v42 }
  0xfd   : > { %609 = vmatmul.f32.gmra.mxu0 %v375_v45  ;;  %818 = vmatmul.f32.gmra.mxu1 %v376_v46  ;;  %v8279_v58 = vadd.f32 %v771_v44, %v563_v50 }
  0xfe   : > { %1027 = vmatmul.f32.gmra.mxu2 %v375_v45  ;;  %1236 = vmatmul.f32.gmra.mxu3 %v376_v46  ;;  %v1378_v54 = vadd.f32 %v8270_v49, %v8261_v39  ;;  %v1568_v55 = vmul.f32 %v8270_v49, %v8270_v49 }
  0xff   : > { %v1569_v8 = vmul.f32 %v8279_v58, %v8279_v58 }
 0x100   : > { %1696 = vadd.xlane.f32.xlu2 %v1695_v52  ;;  %1379 = vadd.xlane.f32.xlu0 %v1378_v54  ;;  %v1698_v60 = vadd.f32 %v1568_v55, %v1567_v51  ;;  %v383_v55 = vld [vmem:[%s8170_s18 + $0x180] sm:$0xff] }
 0x101   : > { %v980_v61 = vpop.f32.mrf.mxu2  ;;  %v1189_v62 = vpop.f32.mrf.mxu3 }
 0x102   : > { %v981_v63 = vadd.f32 %v980_v61, %v8221_v59  ;;  %1699 = vadd.xlane.f32.xlu1 %v1698_v60  ;;  %v565_v1 = vpop.f32.mrf.mxu0  ;;  %v774_v2 = vpop.f32.mrf.mxu1 }
 0x103   : > { %v566_v7 = vadd.f32 %v565_v1, %v8216_v53  ;;  %v3050_v1 = vld [vmem:[#allocation8 + $0x88] sm:$0xff] }
 0x104   : > { %v8284_v5 = vadd.f32 %v1189_v62, %v981_v63  ;;  %3528 = vmatpush.msrb.mxu2 %v3050_v1 }
 0x105   : > { %612 = vmatmul.f32.gmra.mxu0 %v377_v3  ;;  %821 = vmatmul.f32.gmra.mxu1 %v378_v4  ;;  %v8293_v14 = vadd.f32 %v774_v2, %v566_v7  ;;  %v3082_v2 = vld [vmem:[#allocation8 + $0x188] sm:$0xff] }
 0x106   : > { %1030 = vmatmul.f32.gmra.mxu2 %v377_v3  ;;  %1239 = vmatmul.f32.gmra.mxu3 %v378_v4  ;;  %v1381_v10 = vadd.f32 %v8284_v5, %v8279_v58  ;;  %v1570_v11 = vmul.f32 %v8284_v5, %v8284_v5 }
 0x107   : > { %v1571_v26 = vmul.f32 %v8293_v14, %v8293_v14  ;;  %3737 = vmatpush.msrb.mxu3 %v3082_v2 }
 0x108   : > { %1382 = vadd.xlane.f32.xlu2 %v1381_v10  ;;  %v1701_v15 = vadd.f32 %v1570_v11, %v1569_v8 }
 0x109   : > { %v983_v16 = vpop.f32.mrf.mxu2  ;;  %v1192_v17 = vpop.f32.mrf.mxu3 }
 0x10a   : > { %v984_v18 = vadd.f32 %v983_v16, %v8221_v59  ;;  %1702 = vadd.xlane.f32.xlu0 %v1701_v15  ;;  %v568_v19 = vpop.f32.mrf.mxu0  ;;  %v777_v20 = vpop.f32.mrf.mxu1  ;;  %v386_v15 = vld [vmem:[%s8170_s18 + $0x198] sm:$0xff] }
 0x10b   : > { %v569_v25 = vadd.f32 %v568_v19, %v8216_v53  ;;  %v3049_v19 = vld [vmem:[#allocation8 + $0x80] sm:$0xff] }
 0x10c   : > { %v8298_v24 = vadd.f32 %v1192_v17, %v984_v18  ;;  %3110 = vmatpush.msrb.mxu0 %v3049_v19 }
 0x10d   : > { %615 = vmatmul.f32.gmra.mxu0 %v379_v22  ;;  %824 = vmatmul.f32.gmra.mxu1 %v380_v23  ;;  %v8307_v30 = vadd.f32 %v777_v20, %v569_v25 }
 0x10e   : > { %1033 = vmatmul.f32.gmra.mxu2 %v379_v22  ;;  %1242 = vmatmul.f32.gmra.mxu3 %v380_v23  ;;  %v1384_v28 = vadd.f32 %v8298_v24, %v8293_v14  ;;  %v1572_v29 = vmul.f32 %v8298_v24, %v8298_v24  ;;  %v3081_v23 = vld [vmem:[#allocation8 + $0x180] sm:$0xff] }
 0x10f   : > { %v1573_v43 = vmul.f32 %v8307_v30, %v8307_v30  ;;  %3319 = vmatpush.msrb.mxu1 %v3081_v23  ;;  %v3080_v23 = vld [vmem:[#allocation8 + $0x178] sm:$0xff] }
 0x110   : > { %1385 = vadd.xlane.f32.xlu1 %v1384_v28  ;;  %v1704_v31 = vadd.f32 %v1572_v29, %v1571_v26  ;;  %3738 = vmatpush.msrb.mxu3 %v3080_v23 }
 0x111   : > { %v986_v32 = vpop.f32.mrf.mxu2  ;;  %v1195_v33 = vpop.f32.mrf.mxu3 }
 0x112   : > { %v987_v34 = vadd.f32 %v986_v32, %v8221_v59  ;;  %1705 = vadd.xlane.f32.xlu2 %v1704_v31  ;;  %v571_v36 = vpop.f32.mrf.mxu0  ;;  %v780_v37 = vpop.f32.mrf.mxu1 }
 0x113   : > { %v572_v42 = vadd.f32 %v571_v36, %v8216_v53  ;;  %v388_v36 = vld [vmem:[%s8170_s18 + $0x1a8] sm:$0xff] }
 0x114   : > { %v8312_v41 = vadd.f32 %v1195_v33, %v987_v34  ;;  %v387_v34 = vld [vmem:[%s8170_s18 + $0x1a0] sm:$0xff] }
 0x115   : > { %618 = vmatmul.f32.gmra.mxu0 %v381_v38  ;;  %827 = vmatmul.f32.gmra.mxu1 %v382_v40  ;;  %v8321_v46 = vadd.f32 %v780_v37, %v572_v42 }
 0x116   : > { %1036 = vmatmul.f32.gmra.mxu2 %v381_v38  ;;  %1245 = vmatmul.f32.gmra.mxu3 %v382_v40  ;;  %v1387_v44 = vadd.f32 %v8312_v41, %v8307_v30  ;;  %v1574_v45 = vmul.f32 %v8312_v41, %v8312_v41 }
 0x117   : > { %v1575_v61 = vmul.f32 %v8321_v46, %v8321_v46 }
 0x118   : > { %1388 = vadd.xlane.f32.xlu0 %v1387_v44  ;;  %v1707_v47 = vadd.f32 %v1574_v45, %v1573_v43 }
 0x119   : > { %v989_v48 = vpop.f32.mrf.mxu2  ;;  %v1198_v50 = vpop.f32.mrf.mxu3 }
 0x11a   : > { %v990_v51 = vadd.f32 %v989_v48, %v8221_v59  ;;  %1708 = vadd.xlane.f32.xlu1 %v1707_v47  ;;  %v574_v52 = vpop.f32.mrf.mxu0  ;;  %v783_v54 = vpop.f32.mrf.mxu1 }
 0x11b   : > { %v575_v60 = vadd.f32 %v574_v52, %v8216_v53 }
 0x11c   : > { %v8326_v57 = vadd.f32 %v1198_v50, %v990_v51 }
 0x11d   : > { %621 = vmatmul.f32.gmra.mxu0 %v383_v55  ;;  %830 = vmatmul.f32.gmra.mxu1 %v384_v56  ;;  %v8335_v3 = vadd.f32 %v783_v54, %v575_v60  ;;  %v389_v54 = vld [vmem:[%s8170_s18 + $0x1b0] sm:$0xff] }
 0x11e   : > { %1039 = vmatmul.f32.gmra.mxu2 %v383_v55  ;;  %1248 = vmatmul.f32.gmra.mxu3 %v384_v56  ;;  %v1390_v62 = vadd.f32 %v8326_v57, %v8321_v46  ;;  %v1576_v63 = vmul.f32 %v8326_v57, %v8326_v57  ;;  %v390_v55 = vld [vmem:[%s8170_s18 + $0x1b8] sm:$0xff] }
 0x11f   : > { %v1577_v18 = vmul.f32 %v8335_v3, %v8335_v3 }
 0x120   : > { %1391 = vadd.xlane.f32.xlu2 %v1390_v62  ;;  %v1710_v4 = vadd.f32 %v1576_v63, %v1575_v61 }
 0x121   : > { %v992_v7 = vpop.f32.mrf.mxu2  ;;  %v1201_v8 = vpop.f32.mrf.mxu3 }
 0x122   : > { %v993_v9 = vadd.f32 %v992_v7, %v8221_v59  ;;  %1711 = vadd.xlane.f32.xlu0 %v1710_v4  ;;  %v577_v10 = vpop.f32.mrf.mxu0  ;;  %v786_v11 = vpop.f32.mrf.mxu1 }
 0x123   : > { %v578_v17 = vadd.f32 %v577_v10, %v8216_v53 }
 0x124   : > { %v8340_v16 = vadd.f32 %v1201_v8, %v993_v9 }
 0x125   : > { %624 = vmatmul.f32.gmra.mxu0 %v385_v12  ;;  %833 = vmatmul.f32.gmra.mxu1 %v386_v15  ;;  %v8349_v25 = vadd.f32 %v786_v11, %v578_v17  ;;  %v391_v11 = vld [vmem:[%s8170_s18 + $0x1c0] sm:$0xff] }
 0x126   : > { %1042 = vmatmul.f32.gmra.mxu2 %v385_v12  ;;  %1251 = vmatmul.f32.gmra.mxu3 %v386_v15  ;;  %v1393_v20 = vadd.f32 %v8340_v16, %v8335_v3  ;;  %v1578_v22 = vmul.f32 %v8340_v16, %v8340_v16  ;;  %v392_v12 = vld [vmem:[%s8170_s18 + $0x1c8] sm:$0xff] }
 0x127   : > { %v1579_v40 = vmul.f32 %v8349_v25, %v8349_v25 }
 0x128   : > { %1394 = vadd.xlane.f32.xlu1 %v1393_v20  ;;  %v1713_v26 = vadd.f32 %v1578_v22, %v1577_v18  ;;  %v3048_v22 = vld [vmem:[#allocation8 + $0x78] sm:$0xff] }
 0x129   : > { %v995_v28 = vpop.f32.mrf.mxu2  ;;  %v1204_v29 = vpop.f32.mrf.mxu3  ;;  %3529 = vmatpush.msrb.mxu2 %v3048_v22  ;;  %v398_v22 = vld [vmem:[%s8170_s18 + $0x1f8] sm:$0xff] }
 0x12a   : > { %v996_v31 = vadd.f32 %v995_v28, %v8221_v59  ;;  %1714 = vadd.xlane.f32.xlu2 %v1713_v26  ;;  %v580_v32 = vpop.f32.mrf.mxu0  ;;  %v789_v33 = vpop.f32.mrf.mxu1 }
 0x12b   : > { %v581_v38 = vadd.f32 %v580_v32, %v8216_v53 }
 0x12c   : > { %v8354_v37 = vadd.f32 %v1204_v29, %v996_v31 }
 0x12d   : > { %627 = vmatmul.f32.gmra.mxu0 %v387_v34  ;;  %836 = vmatmul.f32.gmra.mxu1 %v388_v36  ;;  %v8363_v44 = vadd.f32 %v789_v33, %v581_v38  ;;  %v394_v38 = vld [vmem:[%s8170_s18 + $0x1d8] sm:$0xff] }
 0x12e   : > { %1045 = vmatmul.f32.gmra.mxu2 %v387_v34  ;;  %1254 = vmatmul.f32.gmra.mxu3 %v388_v36  ;;  %v1396_v42 = vadd.f32 %v8354_v37, %v8349_v25  ;;  %v1580_v43 = vmul.f32 %v8354_v37, %v8354_v37  ;;  %v393_v36 = vld [vmem:[%s8170_s18 + $0x1d0] sm:$0xff] }
 0x12f   : > { %v1581_v61 = vmul.f32 %v8363_v44, %v8363_v44 }
 0x130   : > { %1397 = vadd.xlane.f32.xlu0 %v1396_v42  ;;  %v1716_v45 = vadd.f32 %v1580_v43, %v1579_v40 }
 0x131   : > { %v998_v47 = vpop.f32.mrf.mxu2  ;;  %v1207_v48 = vpop.f32.mrf.mxu3 }
 0x132   : > { %v999_v50 = vadd.f32 %v998_v47, %v8221_v59  ;;  %1717 = vadd.xlane.f32.xlu1 %v1716_v45  ;;  %v583_v51 = vpop.f32.mrf.mxu0  ;;  %v792_v52 = vpop.f32.mrf.mxu1 }
 0x133   : > { %v584_v60 = vadd.f32 %v583_v51, %v8216_v53 }
 0x134   : > { %v8368_v56 = vadd.f32 %v1207_v48, %v999_v50 }
 0x135   : > { %630 = vmatmul.f32.gmra.mxu0 %v389_v54  ;;  %839 = vmatmul.f32.gmra.mxu1 %v390_v55  ;;  %v8377_v1 = vadd.f32 %v792_v52, %v584_v60 }
 0x136   : > { %1048 = vmatmul.f32.gmra.mxu2 %v389_v54  ;;  %1257 = vmatmul.f32.gmra.mxu3 %v390_v55  ;;  %v1399_v62 = vadd.f32 %v8368_v56, %v8363_v44  ;;  %v1582_v63 = vmul.f32 %v8368_v56, %v8368_v56 }
 0x137   : > { %v1583_v18 = vmul.f32 %v8377_v1, %v8377_v1 }
 0x138   : > { %1400 = vadd.xlane.f32.xlu2 %v1399_v62  ;;  %v1719_v2 = vadd.f32 %v1582_v63, %v1581_v61  ;;  %v395_v61 = vld [vmem:[%s8170_s18 + $0x1e0] sm:$0xff]  ;;  %v396_v62 = vld [vmem:[%s8170_s18 + $0x1e8] sm:$0xff] }
 0x139   : > { %v1001_v4 = vpop.f32.mrf.mxu2  ;;  %v1210_v7 = vpop.f32.mrf.mxu3 }
 0x13a   : > { %v1002_v8 = vadd.f32 %v1001_v4, %v8221_v59  ;;  %1720 = vadd.xlane.f32.xlu0 %v1719_v2  ;;  %v586_v9 = vpop.f32.mrf.mxu0  ;;  %v795_v10 = vpop.f32.mrf.mxu1 }
 0x13b   : > { %v587_v17 = vadd.f32 %v586_v9, %v8216_v53 }
 0x13c   : > { %v8382_v15 = vadd.f32 %v1210_v7, %v1002_v8 }
 0x13d   : > { %633 = vmatmul.f32.gmra.mxu0 %v391_v11  ;;  %842 = vmatmul.f32.gmra.mxu1 %v392_v12  ;;  %v8391_v26 = vadd.f32 %v795_v10, %v587_v17 }
 0x13e   : > { %1051 = vmatmul.f32.gmra.mxu2 %v391_v11  ;;  %1260 = vmatmul.f32.gmra.mxu3 %v392_v12  ;;  %v1402_v19 = vadd.f32 %v8382_v15, %v8377_v1  ;;  %v1584_v20 = vmul.f32 %v8382_v15, %v8382_v15 }
 0x13f   : > { %v1585_v43 = vmul.f32 %v8391_v26, %v8391_v26 }
 0x140   : > { %1403 = vadd.xlane.f32.xlu1 %v1402_v19  ;;  %v1722_v28 = vadd.f32 %v1584_v20, %v1583_v18  ;;  %v397_v20 = vld [vmem:[%s8170_s18 + $0x1f0] sm:$0xff] }
 0x141   : > { %v1004_v29 = vpop.f32.mrf.mxu2  ;;  %v1213_v31 = vpop.f32.mrf.mxu3 }
 0x142   : > { %v1005_v32 = vadd.f32 %v1004_v29, %v8221_v59  ;;  %1723 = vadd.xlane.f32.xlu2 %v1722_v28  ;;  %v589_v33 = vpop.f32.mrf.mxu0  ;;  %v798_v34 = vpop.f32.mrf.mxu1 }
 0x143   : > { %v590_v42 = vadd.f32 %v589_v33, %v8216_v53  ;;  %v3047_v33 = vld [vmem:[#allocation8 + $0x70] sm:$0xff] }
 0x144   : > { %v8396_v40 = vadd.f32 %v1213_v31, %v1005_v32  ;;  %3111 = vmatpush.msrb.mxu0 %v3047_v33 }
 0x145   : > { %636 = vmatmul.f32.gmra.mxu0 %v393_v36  ;;  %845 = vmatmul.f32.gmra.mxu1 %v394_v38  ;;  %v8405_v48 = vadd.f32 %v798_v34, %v590_v42  ;;  %v3079_v34 = vld [vmem:[#allocation8 + $0x170] sm:$0xff] }
 0x146   : > { %1054 = vmatmul.f32.gmra.mxu2 %v393_v36  ;;  %1263 = vmatmul.f32.gmra.mxu3 %v394_v38  ;;  %v1405_v45 = vadd.f32 %v8396_v40, %v8391_v26  ;;  %v1586_v47 = vmul.f32 %v8396_v40, %v8396_v40 }
 0x147   : > { %v1587_v4 = vmul.f32 %v8405_v48, %v8405_v48  ;;  %3320 = vmatpush.msrb.mxu1 %v3079_v34 }
 0x148   : > { %1406 = vadd.xlane.f32.xlu0 %v1405_v45  ;;  %v1725_v50 = vadd.f32 %v1586_v47, %v1585_v43 }
 0x149   : > { %v1007_v51 = vpop.f32.mrf.mxu2  ;;  %v1216_v52 = vpop.f32.mrf.mxu3 }
 0x14a   : > { %v1008_v54 = vadd.f32 %v1007_v51, %v8221_v59  ;;  %1726 = vadd.xlane.f32.xlu1 %v1725_v50  ;;  %v592_v55 = vpop.f32.mrf.mxu0  ;;  %v801_v60 = vpop.f32.mrf.mxu1  ;;  %v399_v51 = vld [vmem:[%s8170_s18 + $0x200] sm:$0xff] }
 0x14b   : > { %v593_v2 = vadd.f32 %v592_v55, %v8216_v53 }
 0x14c   : > { %v8410_v63 = vadd.f32 %v1216_v52, %v1008_v54  ;;  %v400_v52 = vld [vmem:[%s8170_s18 + $0x208] sm:$0xff] }
 0x14d   : > { %639 = vmatmul.f32.gmra.mxu0 %v395_v61  ;;  %848 = vmatmul.f32.gmra.mxu1 %v396_v62  ;;  %v8419_v9 = vadd.f32 %v801_v60, %v593_v2 }
 0x14e   : > { %1057 = vmatmul.f32.gmra.mxu2 %v395_v61  ;;  %1266 = vmatmul.f32.gmra.mxu3 %v396_v62  ;;  %v1408_v7 = vadd.f32 %v8410_v63, %v8405_v48  ;;  %v1588_v8 = vmul.f32 %v8410_v63, %v8410_v63 }
 0x14f   : > { %v1589_v28 = vmul.f32 %v8419_v9, %v8419_v9 }
 0x150   : > { %1409 = vadd.xlane.f32.xlu2 %v1408_v7  ;;  %v1728_v10 = vadd.f32 %v1588_v8, %v1587_v4 }
 0x151   : > { %v1010_v11 = vpop.f32.mrf.mxu2  ;;  %v1219_v12 = vpop.f32.mrf.mxu3 }
 0x152   : > { %v1011_v17 = vadd.f32 %v1010_v11, %v8221_v59  ;;  %1729 = vadd.xlane.f32.xlu0 %v1728_v10  ;;  %v595_v18 = vpop.f32.mrf.mxu0  ;;  %v804_v19 = vpop.f32.mrf.mxu1 }
 0x153   : > { %v596_v29 = vadd.f32 %v595_v18, %v8216_v53 }
 0x154   : > { %v8424_v23 = vadd.f32 %v1219_v12, %v1011_v17 }
 0x155   : > { %642 = vmatmul.f32.gmra.mxu0 %v397_v20  ;;  %851 = vmatmul.f32.gmra.mxu1 %v398_v22  ;;  %v8433_v38 = vadd.f32 %v804_v19, %v596_v29 }
 0x156   : > { %1060 = vmatmul.f32.gmra.mxu2 %v397_v20  ;;  %1269 = vmatmul.f32.gmra.mxu3 %v398_v22  ;;  %v1411_v31 = vadd.f32 %v8424_v23, %v8419_v9  ;;  %v1590_v32 = vmul.f32 %v8424_v23, %v8424_v23  ;;  %v401_v20 = vld [vmem:[%s8170_s18 + $0x210] sm:$0xff]  ;;  %v402_v22 = vld [vmem:[%s8170_s18 + $0x218] sm:$0xff] }
 0x157   : > { %v1591_v61 = vmul.f32 %v8433_v38, %v8433_v38 }
 0x158   : > { %1412 = vadd.xlane.f32.xlu1 %v1411_v31  ;;  %v1731_v36 = vadd.f32 %v1590_v32, %v1589_v28 }
 0x159   : > { %v1013_v42 = vpop.f32.mrf.mxu2  ;;  %v1222_v43 = vpop.f32.mrf.mxu3 }
 0x15a   : > { %v1014_v45 = vadd.f32 %v1013_v42, %v8221_v59  ;;  %1732 = vadd.xlane.f32.xlu2 %v1731_v36  ;;  %v598_v47 = vpop.f32.mrf.mxu0  ;;  %v807_v50 = vpop.f32.mrf.mxu1 }
 0x15b   : > { %v1371_v54 = vpop.xlane.xlu0 %1370  ;;  %v599_v60 = vadd.f32 %v598_v47, %v8216_v53 }
 0x15c   : > { %v8438_v55 = vadd.f32 %v1222_v43, %v1014_v45  ;;  %v8443_v62 = vmul.f32 0.00390625, %v1371_v54 }
 0x15d   : > { %645 = vmatmul.f32.gmra.mxu0 %v399_v51  ;;  %854 = vmatmul.f32.gmra.mxu1 %v400_v52  ;;  %v8449_v7 = vadd.f32 %v807_v50, %v599_v60 }
 0x15e   : > { %1063 = vmatmul.f32.gmra.mxu2 %v399_v51  ;;  %1272 = vmatmul.f32.gmra.mxu3 %v400_v52  ;;  %v1414_v2 = vadd.f32 %v8438_v55, %v8433_v38  ;;  %v1592_v4 = vmul.f32 %v8438_v55, %v8438_v55  ;;  %v1945_v12 = vmul.f32 %v8443_v62, %v1371_v54 }
 0x15f   : > { %v1593_v34 = vmul.f32 %v8449_v7, %v8449_v7 }
 0x160   : > { %1415 = vadd.xlane.f32.xlu0 %v1414_v2  ;;  %v1734_v11 = vadd.f32 %v1592_v4, %v1591_v61  ;;  %v403_v4 = vld [vmem:[%s8170_s18 + $0x220] sm:$0xff] }
 0x161   : > { %v1016_v8 = vpop.f32.mrf.mxu2  ;;  %v1225_v10 = vpop.f32.mrf.mxu3 }
 0x162   : > { %v1017_v17 = vadd.f32 %v1016_v8, %v8221_v59  ;;  %v601_v18 = vpop.f32.mrf.mxu0  ;;  %v810_v19 = vpop.f32.mrf.mxu1  ;;  %1735 = vadd.xlane.f32.xlu1 %v1734_v11  ;;  %v404_v8 = vld [vmem:[%s8170_s18 + $0x228] sm:$0xff] }
 0x163   : > { %v1374_v28 = vpop.xlane.xlu1 %1373  ;;  %v1691_v29 = vpop.xlane.xlu0 %1690  ;;  %v602_v32 = vadd.f32 %v601_v18, %v8216_v53 }
 0x164   : > { %v8455_v31 = vadd.f32 %v1225_v10, %v1017_v17  ;;  %v2009_v33 = vsub.f32 %v1691_v29, %v1945_v12  ;;  %v8460_v36 = vmul.f32 0.00390625, %v1374_v28 }
 0x165   : > { %648 = vmatmul.f32.gmra.mxu0 %v401_v20  ;;  %857 = vmatmul.f32.gmra.mxu1 %v402_v22  ;;  %v8468_v47 = vadd.f32 %v810_v19, %v602_v32 }
 0x166   : > { %v8462_v42 = vmul.f32 0.003921569, %v2009_v33  ;;  %1066 = vmatmul.f32.gmra.mxu2 %v401_v20  ;;  %1275 = vmatmul.f32.gmra.mxu3 %v402_v22  ;;  %v1417_v43 = vadd.f32 %v8455_v31, %v8449_v7  ;;  %v1594_v45 = vmul.f32 %v8455_v31, %v8455_v31  ;;  %v1946_v54 = vmul.f32 %v8460_v36, %v1374_v28 }
 0x167   : > { %13694 = vst [vmem:[#allocation18_spill] sm:$0xff] %v8468_v47  ;;  %v1595_v19 = vmul.f32 %v8468_v47, %v8468_v47 }
 0x168   : > { %7049 = vrsqrt.f32 %v8462_v42  ;;  %1418 = vadd.xlane.f32.xlu2 %v1417_v43  ;;  %v1737_v50 = vadd.f32 %v1594_v45, %v1593_v34  ;;  %vm2143_vm1 = vweird.f32 %v8462_v42 }
 0x169   : > { %v1019_v51 = vpop.f32.mrf.mxu2  ;;  %v1228_v52 = vpop.f32.mrf.mxu3 }
 0x16a   : > { %v1020_v60 = vadd.f32 %v1019_v51, %v8221_v59  ;;  %1738 = vadd.xlane.f32.xlu0 %v1737_v50  ;;  %v604_v61 = vpop.f32.mrf.mxu0  ;;  %v813_v2 = vpop.f32.mrf.mxu1 }
 0x16b   : > { %v1377_v10 = vpop.xlane.xlu2 %1376  ;;  %v1694_v11 = vpop.xlane.xlu1 %1693  ;;  %v605_v17 = vadd.f32 %v604_v61, %v8216_v53 }
 0x16c   : > { %v8475_v12 = vadd.f32 %v1228_v52, %v1020_v60  ;;  %v2010_v18 = vsub.f32 %v1694_v11, %v1946_v54  ;;  %v8482_v22 = vmul.f32 0.00390625, %v1377_v10  ;;  %v3046_v52 = vld [vmem:[#allocation8 + $0x68] sm:$0xff]  ;;  %v3045_v60 = vld [vmem:[#allocation8 + $0x60] sm:$0xff] }
 0x16d   : > { %651 = vmatmul.f32.gmra.mxu0 %v403_v4  ;;  %860 = vmatmul.f32.gmra.mxu1 %v404_v8  ;;  %v8492_v34 = vadd.f32 %v813_v2, %v605_v17  ;;  %v3078_v54 = vld [vmem:[#allocation8 + $0x168] sm:$0xff]  ;;  %v406_v17 = vld [vmem:[%s8170_s18 + $0x238] sm:$0xff] }
 0x16e   : > { %13695 = vst [vmem:[#allocation19_spill] sm:$0xff] %v8475_v12  ;;  %v8480_v20 = vpop.eup %7049  ;;  %v8484_v28 = vmul.f32 0.003921569, %v2010_v18  ;;  %1069 = vmatmul.f32.gmra.mxu2 %v403_v4  ;;  %1278 = vmatmul.f32.gmra.mxu3 %v404_v8  ;;  %v1420_v29 = vadd.f32 %v8475_v12, %v8468_v47  ;;  %v1596_v32 = vmul.f32 %v8475_v12, %v8475_v12  ;;  %v405_v11 = vld [vmem:[%s8170_s18 + $0x230] sm:$0xff] }
 0x16f   : > { %v2138_v33 = vmul.f32 %v8480_v20, %v8462_v42  ;;  %13696 = vst [vmem:[#allocation20_spill] sm:$0xff] %v8492_v34  ;;  %v1947_v61 = vmul.f32 %v8482_v22, %v1377_v10  ;;  %3530 = vmatpush.msrb.mxu2 %v3046_v52  ;;  %3739 = vmatpush.msrb.mxu3 %v3078_v54  ;;  %vm2144_vm0 = vweird.f32 %v8480_v20 }
 0x170   : > { %7051 = vrsqrt.f32 %v8484_v28  ;;  %1421 = vadd.xlane.f32.xlu1 %v1420_v29  ;;  %v1740_v43 = vadd.f32 %v1596_v32, %v1595_v19  ;;  %3112 = vmatpush.msrb.mxu0 %v3045_v60  ;;  %v1597_v10 = vmul.f32 %v8492_v34, %v8492_v34  ;;  %vm2145_vm2 = vmor %vm2143_vm1, %vm2144_vm0  ;;  %vm2153_vm4 = vweird.f32 %v8484_v28 }
 0x171   : > { %v2139_v45 = vmul.f32 %v8480_v20, %v2138_v33  ;;  %v1022_v50 = vpop.f32.mrf.mxu2  ;;  %v1231_v51 = vpop.f32.mrf.mxu3 }
 0x172   : > { %v1023_v4 = vadd.f32 %v1022_v50, %v8221_v59  ;;  %1741 = vadd.xlane.f32.xlu2 %v1740_v43  ;;  %v607_v8 = vpop.f32.mrf.mxu0  ;;  %v816_v2 = vpop.f32.mrf.mxu1  ;;  %v2777_v43 = vsub.f32 %v8223_v0, %v8443_v62 }
 0x173   : > { %v2140_v18 = vmul.f32 0.5, %v2139_v45  ;;  %v608_v19 = vadd.f32 %v607_v8, %v8216_v53  ;;  %v1697_v29 = vpop.xlane.xlu2 %1696  ;;  %v1380_v32 = vpop.xlane.xlu0 %1379  ;;  %v2778_v8 = vsub.f32 %v8228_v6, %v8443_v62 }
 0x174   : > { %v8501_v33 = vadd.f32 %v1231_v51, %v1023_v4  ;;  %v2011_v12 = vsub.f32 %v1697_v29, %v1947_v61  ;;  %v8503_v47 = vmul.f32 0.00390625, %v1380_v32 }
 0x175   : > { %v2141_v50 = vsub.f32 1.5, %v2140_v18  ;;  %654 = vmatmul.f32.gmra.mxu0 %v405_v11  ;;  %863 = vmatmul.f32.gmra.mxu1 %v406_v17  ;;  %v8523_v4 = vadd.f32 %v816_v2, %v608_v19  ;;  %v3077_v2 = vld [vmem:[#allocation8 + $0x160] sm:$0xff] }
 0x176   : > { %13697 = vst [vmem:[#allocation21_spill] sm:$0xff] %v8501_v33  ;;  %v8510_v45 = vpop.eup %7051  ;;  %v8512_v52 = vmul.f32 0.003921569, %v2011_v12  ;;  %v1948_v51 = vmul.f32 %v8503_v47, %v1380_v32  ;;  %1072 = vmatmul.f32.gmra.mxu2 %v405_v11  ;;  %1281 = vmatmul.f32.gmra.mxu3 %v406_v17  ;;  %v1423_v54 = vadd.f32 %v8501_v33, %v8492_v34  ;;  %v1700_v12 = vpop.xlane.xlu1 %1699  ;;  %v408_v34 = vld [vmem:[%s8170_s18 + $0x248] sm:$0xff] }
 0x177   : > { %v1598_v60 = vmul.f32 %v8501_v33, %v8501_v33  ;;  %v2142_v0 = vmul.f32 %v8480_v20, %v2141_v50  ;;  %v2148_v61 = vmul.f32 %v8510_v45, %v8484_v28  ;;  %v407_v33 = vld [vmem:[%s8170_s18 + $0x240] sm:$0xff]  ;;  %3321 = vmatpush.msrb.mxu1 %v3077_v2  ;;  %vm2154_vm3 = vweird.f32 %v8510_v45 }
 0x178   : > { %7053 = vrsqrt.f32 %v8512_v52  ;;  %v2012_v11 = vsub.f32 %v1700_v12, %v1948_v51  ;;  %1424 = vadd.xlane.f32.xlu0 %v1423_v54  ;;  %vm2155_vm5 = vmor %vm2153_vm4, %vm2154_vm3  ;;  %v2780_v28 = vsub.f32 %v8242_v21, %v8460_v36  ;;  %vm2163_vm7 = vweird.f32 %v8512_v52 }
 0x179   : > { %v1743_v17 = vadd.f32 %v1598_v60, %v1597_v10  ;;  %v2149_v42 = vmul.f32 %v8510_v45, %v2148_v61  ;;  %v1025_v18 = vpop.f32.mrf.mxu2  ;;  %v1234_v29 = vpop.f32.mrf.mxu3  ;;  %v2146_v19 = vsel %vm2145_vm2, %v8480_v20, %v2142_v0  ;;  %v1599_v61 = vmul.f32 %v8523_v4, %v8523_v4 }
 0x17a   : > { %v8532_v32 = vmul.f32 0.003921569, %v2012_v11  ;;  %v1026_v6 = vadd.f32 %v1025_v18, %v8221_v59  ;;  %v610_v62 = vpop.f32.mrf.mxu0  ;;  %v819_v50 = vpop.f32.mrf.mxu1  ;;  %v2905_v51 = vmul.f32 %v2777_v43, %v2146_v19  ;;  %v2906_v10 = vmul.f32 %v2778_v8, %v2146_v19 }
 0x17b   : > { %1744 = vadd.xlane.f32.xlu1 %v1743_v17  ;;  %v2150_v54 = vmul.f32 0.5, %v2149_v42  ;;  %v1383_v60 = vpop.xlane.xlu2 %1382  ;;  %v611_v0 = vadd.f32 %v610_v62, %v8216_v53  ;;  %v2779_v19 = vsub.f32 %v8233_v13, %v8460_v36 }
 0x17c   : > { %7055 = vrsqrt.f32 %v8532_v32  ;;  %v8540_v20 = vadd.f32 %v1234_v29, %v1026_v6  ;;  %v8543_v12 = vmul.f32 0.00390625, %v1383_v60  ;;  %6499 = vst [vmem:[%s8546_s27] sm:$0xff] %v2905_v51  ;;  %vm2173_vm10 = vweird.f32 %v8532_v32 }
 0x17d   : > { %v2151_v43 = vsub.f32 1.5, %v2150_v54  ;;  %657 = vmatmul.f32.gmra.mxu0 %v407_v33  ;;  %866 = vmatmul.f32.gmra.mxu1 %v408_v34  ;;  %6500 = vst [vmem:[%s8546_s27 + $0x8] sm:$0xff] %v2906_v10  ;;  %v1703_v29 = vpop.xlane.xlu0 %1702 }
 0x17e   : > { %v8551_v8 = vpop.eup %7053  ;;  %v1949_v11 = vmul.f32 %v8543_v12, %v1383_v60  ;;  %1075 = vmatmul.f32.gmra.mxu2 %v407_v33  ;;  %1284 = vmatmul.f32.gmra.mxu3 %v408_v34  ;;  %v1426_v17 = vadd.f32 %v8540_v20, %v8523_v4  ;;  %v1600_v42 = vmul.f32 %v8540_v20, %v8540_v20 }
 0x17f   : > { %v2158_v18 = vmul.f32 %v8551_v8, %v8512_v52  ;;  %v2152_v2 = vmul.f32 %v8510_v45, %v2151_v43  ;;  %v8566_v34 = vadd.f32 %v819_v50, %v611_v0  ;;  %vm2164_vm6 = vweird.f32 %v8551_v8 }
 0x180   : > { %v2013_v33 = vsub.f32 %v1703_v29, %v1949_v11  ;;  %1427 = vadd.xlane.f32.xlu2 %v1426_v17  ;;  %v1746_v6 = vadd.f32 %v1600_v42, %v1599_v61  ;;  %v409_v61 = vld [vmem:[%s8170_s18 + $0x250] sm:$0xff]  ;;  %v410_v11 = vld [vmem:[%s8170_s18 + $0x258] sm:$0xff]  ;;  %vm2165_vm8 = vmor %vm2163_vm7, %vm2164_vm6  ;;  %v2782_v52 = vsub.f32 %v8256_v35, %v8482_v22 }
 0x181   : > { %v2159_v62 = vmul.f32 %v8551_v8, %v2158_v18  ;;  %v1028_v51 = vpop.f32.mrf.mxu2  ;;  %v1237_v10 = vpop.f32.mrf.mxu3  ;;  %v2156_v54 = vsel %vm2155_vm5, %v8510_v45, %v2152_v2 }
 0x182   : > { %v8572_v13 = vpop.eup %7055  ;;  %v8574_v60 = vmul.f32 0.003921569, %v2013_v33  ;;  %v1029_v50 = vadd.f32 %v1028_v51, %v8221_v59  ;;  %1747 = vadd.xlane.f32.xlu0 %v1746_v6  ;;  %v613_v0 = vpop.f32.mrf.mxu0  ;;  %v2907_v17 = vmul.f32 %v2779_v19, %v2156_v54  ;;  %v2908_v21 = vmul.f32 %v2780_v28, %v2156_v54 }
 0x183   : > { %v822_v43 = vpop.f32.mrf.mxu1  ;;  %v2160_v36 = vmul.f32 0.5, %v2159_v62  ;;  %v2168_v42 = vmul.f32 %v8572_v13, %v8532_v32  ;;  %v614_v45 = vadd.f32 %v613_v0, %v8216_v53  ;;  %v1386_v18 = vpop.xlane.xlu1 %1385  ;;  %v1601_v33 = vmul.f32 %v8566_v34, %v8566_v34 }
 0x184   : > { %7057 = vrsqrt.f32 %v8574_v60  ;;  %v8583_v29 = vadd.f32 %v1237_v10, %v1029_v50  ;;  %v8585_v2 = vmul.f32 0.00390625, %v1386_v18  ;;  %6501 = vst [vmem:[%s8546_s27 + $0x10] sm:$0xff] %v2907_v17  ;;  %vm2174_vm9 = vweird.f32 %v8572_v13 }
 0x185   : > { %v2161_v19 = vsub.f32 1.5, %v2160_v36  ;;  %v2169_v6 = vmul.f32 %v8572_v13, %v2168_v42  ;;  %660 = vmatmul.f32.gmra.mxu0 %v409_v61  ;;  %869 = vmatmul.f32.gmra.mxu1 %v410_v11  ;;  %6502 = vst [vmem:[%s8546_s27 + $0x18] sm:$0xff] %v2908_v21  ;;  %v8599_v54 = vadd.f32 %v822_v43, %v614_v45  ;;  %v1706_v50 = vpop.xlane.xlu2 %1705  ;;  %vm2175_vm11 = vmor %vm2173_vm10, %vm2174_vm9  ;;  %vm2183_vm13 = vweird.f32 %v8574_v60 }
 0x186   : > { %v1950_v28 = vmul.f32 %v8585_v2, %v1386_v18  ;;  %1078 = vmatmul.f32.gmra.mxu2 %v409_v61  ;;  %1287 = vmatmul.f32.gmra.mxu3 %v410_v11  ;;  %v1429_v62 = vadd.f32 %v8583_v29, %v8566_v34  ;;  %v1602_v51 = vmul.f32 %v8583_v29, %v8583_v29 }
 0x187   : > { %v2170_v10 = vmul.f32 0.5, %v2169_v6  ;;  %v2162_v0 = vmul.f32 %v8551_v8, %v2161_v19  ;;  %v2781_v11 = vsub.f32 %v8247_v27, %v8482_v22  ;;  %v2783_v45 = vsub.f32 %v8261_v39, %v8503_v47  ;;  %v411_v22 = vld [vmem:[%s8170_s18 + $0x260] sm:$0xff]  ;;  %v412_v6 = vld [vmem:[%s8170_s18 + $0x268] sm:$0xff] }
 0x188   : > { %v2014_v17 = vsub.f32 %v1706_v50, %v1950_v28  ;;  %1430 = vadd.xlane.f32.xlu1 %v1429_v62  ;;  %v1749_v61 = vadd.f32 %v1602_v51, %v1601_v33  ;;  %v1603_v51 = vmul.f32 %v8599_v54, %v8599_v54 }
 0x189   : > { %v2171_v21 = vsub.f32 1.5, %v2170_v10  ;;  %v1031_v43 = vpop.f32.mrf.mxu2  ;;  %v1240_v36 = vpop.f32.mrf.mxu3  ;;  %v2166_v42 = vsel %vm2165_vm8, %v8551_v8, %v2162_v0 }
 0x18a   : > { %v8612_v18 = vpop.eup %7057  ;;  %v8614_v33 = vmul.f32 0.003921569, %v2014_v17  ;;  %v1032_v19 = vadd.f32 %v1031_v43, %v8221_v59  ;;  %1750 = vadd.xlane.f32.xlu2 %v1749_v61  ;;  %v616_v27 = vpop.f32.mrf.mxu0  ;;  %v2909_v28 = vmul.f32 %v2781_v11, %v2166_v42  ;;  %v2910_v62 = vmul.f32 %v2782_v52, %v2166_v42 }
 0x18b   : > { %v825_v35 = vpop.f32.mrf.mxu1  ;;  %v2178_v39 = vmul.f32 %v8612_v18, %v8574_v60  ;;  %v1389_v8 = vpop.xlane.xlu0 %1388  ;;  %v2172_v10 = vmul.f32 %v8572_v13, %v2171_v21  ;;  %v617_v0 = vadd.f32 %v616_v27, %v8216_v53  ;;  %v2784_v11 = vsub.f32 %v8270_v49, %v8503_v47 }
 0x18c   : > { %7059 = vrsqrt.f32 %v8614_v33  ;;  %v8628_v50 = vadd.f32 %v1240_v36, %v1032_v19  ;;  %v8631_v17 = vmul.f32 0.00390625, %v1389_v8  ;;  %6503 = vst [vmem:[%s8546_s27 + $0x20] sm:$0xff] %v2909_v28  ;;  %vm2184_vm12 = vweird.f32 %v8612_v18 }
 0x18d   : > { %v2179_v32 = vmul.f32 %v8612_v18, %v2178_v39  ;;  %663 = vmatmul.f32.gmra.mxu0 %v411_v22  ;;  %872 = vmatmul.f32.gmra.mxu1 %v412_v6  ;;  %6504 = vst [vmem:[%s8546_s27 + $0x28] sm:$0xff] %v2910_v62  ;;  %v2176_v61 = vsel %vm2175_vm11, %v8572_v13, %v2172_v10  ;;  %v1709_v42 = vpop.xlane.xlu1 %1708  ;;  %v3044_v62 = vld [vmem:[#allocation8 + $0x58] sm:$0xff]  ;;  %vm2185_vm14 = vmor %vm2183_vm13, %vm2184_vm12  ;;  %vm2193_vm0 = vweird.f32 %v8614_v33 }
 0x18e   : > { %v1951_v52 = vmul.f32 %v8631_v17, %v1389_v8  ;;  %1081 = vmatmul.f32.gmra.mxu2 %v411_v22  ;;  %1290 = vmatmul.f32.gmra.mxu3 %v412_v6  ;;  %v1432_v21 = vadd.f32 %v8628_v50, %v8599_v54  ;;  %v1604_v43 = vmul.f32 %v8628_v50, %v8628_v50  ;;  %v3076_v39 = vld [vmem:[#allocation8 + $0x158] sm:$0xff]  ;;  %v3043_v8 = vld [vmem:[#allocation8 + $0x50] sm:$0xff] }
 0x18f   : > { %v2180_v36 = vmul.f32 0.5, %v2179_v32  ;;  %v2911_v19 = vmul.f32 %v2783_v45, %v2176_v61  ;;  %v2912_v27 = vmul.f32 %v2784_v11, %v2176_v61  ;;  %v8644_v28 = vadd.f32 %v825_v35, %v617_v0  ;;  %v413_v32 = vld [vmem:[%s8170_s18 + $0x270] sm:$0xff]  ;;  %v414_v61 = vld [vmem:[%s8170_s18 + $0x278] sm:$0xff]  ;;  %3531 = vmatpush.msrb.mxu2 %v3044_v62  ;;  %3740 = vmatpush.msrb.mxu3 %v3076_v39 }
 0x190   : > { %v2015_v13 = vsub.f32 %v1709_v42, %v1951_v52  ;;  %1433 = vadd.xlane.f32.xlu0 %v1432_v21  ;;  %v1752_v49 = vadd.f32 %v1604_v43, %v1603_v51  ;;  %v2785_v11 = vsub.f32 %v8279_v58, %v8543_v12  ;;  %3113 = vmatpush.msrb.mxu0 %v3043_v8 }
 0x191   : > { %v2181_v47 = vsub.f32 1.5, %v2180_v36  ;;  %v1034_v22 = vpop.f32.mrf.mxu2  ;;  %v1243_v6 = vpop.f32.mrf.mxu3  ;;  %6505 = vst [vmem:[%s8546_s27 + $0x30] sm:$0xff] %v2911_v19  ;;  %v1605_v60 = vmul.f32 %v8644_v28, %v8644_v28 }
 0x192   : > { %v8648_v10 = vpop.eup %7059  ;;  %v8650_v45 = vmul.f32 0.003921569, %v2015_v13  ;;  %v1035_v35 = vadd.f32 %v1034_v22, %v8221_v59  ;;  %1753 = vadd.xlane.f32.xlu1 %v1752_v49  ;;  %v619_v0 = vpop.f32.mrf.mxu0  ;;  %6506 = vst [vmem:[%s8546_s27 + $0x38] sm:$0xff] %v2912_v27  ;;  %v2786_v13 = vsub.f32 %v8284_v5, %v8543_v12 }
 0x193   : > { %v828_v51 = vpop.f32.mrf.mxu1  ;;  %v2188_v52 = vmul.f32 %v8648_v10, %v8614_v33  ;;  %v620_v21 = vadd.f32 %v619_v0, %v8216_v53  ;;  %v1392_v43 = vpop.xlane.xlu2 %1391  ;;  %v2182_v36 = vmul.f32 %v8612_v18, %v2181_v47  ;;  %vm2194_vm15 = vweird.f32 %v8648_v10 }
 0x194   : > { %7061 = vrsqrt.f32 %v8650_v45  ;;  %v8666_v42 = vadd.f32 %v1243_v6, %v1035_v35  ;;  %v8668_v58 = vmul.f32 0.00390625, %v1392_v43  ;;  %vm2195_vm1 = vmor %vm2193_vm0, %vm2194_vm15  ;;  %vm2203_vm3 = vweird.f32 %v8650_v45 }
 0x195   : > { %v2189_v19 = vmul.f32 %v8648_v10, %v2188_v52  ;;  %666 = vmatmul.f32.gmra.mxu0 %v413_v32  ;;  %875 = vmatmul.f32.gmra.mxu1 %v414_v61  ;;  %v2186_v27 = vsel %vm2185_vm14, %v8612_v18, %v2182_v36  ;;  %v8681_v62 = vadd.f32 %v828_v51, %v620_v21  ;;  %v1712_v39 = vpop.xlane.xlu0 %1711  ;;  %v415_v36 = vld [vmem:[%s8170_s18 + $0x280] sm:$0xff] }
 0x196   : > { %v1952_v49 = vmul.f32 %v8668_v58, %v1392_v43  ;;  %1084 = vmatmul.f32.gmra.mxu2 %v413_v32  ;;  %1293 = vmatmul.f32.gmra.mxu3 %v414_v61  ;;  %v1435_v47 = vadd.f32 %v8666_v42, %v8644_v28  ;;  %v1606_v22 = vmul.f32 %v8666_v42, %v8666_v42  ;;  %v3075_v61 = vld [vmem:[#allocation8 + $0x150] sm:$0xff] }
 0x197   : > { %v2190_v6 = vmul.f32 0.5, %v2189_v19  ;;  %v2913_v8 = vmul.f32 %v2785_v11, %v2186_v27  ;;  %v2914_v18 = vmul.f32 %v2786_v13, %v2186_v27  ;;  %v416_v19 = vld [vmem:[%s8170_s18 + $0x288] sm:$0xff]  ;;  %3322 = vmatpush.msrb.mxu1 %v3075_v61 }
 0x198   : > { %v2016_v35 = vsub.f32 %v1712_v39, %v1952_v49  ;;  %1436 = vadd.xlane.f32.xlu2 %v1435_v47  ;;  %v1755_v5 = vadd.f32 %v1606_v22, %v1605_v60  ;;  %v2787_v60 = vsub.f32 %v8293_v14, %v8585_v2  ;;  %v1607_v49 = vmul.f32 %v8681_v62, %v8681_v62 }
 0x199   : > { %v2191_v12 = vsub.f32 1.5, %v2190_v6  ;;  %v1037_v0 = vpop.f32.mrf.mxu2  ;;  %v1246_v32 = vpop.f32.mrf.mxu3  ;;  %6507 = vst [vmem:[%s8546_s27 + $0x40] sm:$0xff] %v2913_v8  ;;  %v2788_v8 = vsub.f32 %v8298_v24, %v8585_v2 }
 0x19a   : > { %v8685_v52 = vpop.eup %7061  ;;  %v8687_v51 = vmul.f32 0.003921569, %v2016_v35  ;;  %v1038_v11 = vadd.f32 %v1037_v0, %v8221_v59  ;;  %1756 = vadd.xlane.f32.xlu0 %v1755_v5  ;;  %v622_v21 = vpop.f32.mrf.mxu0  ;;  %6508 = vst [vmem:[%s8546_s27 + $0x48] sm:$0xff] %v2914_v18 }
 0x19b   : > { %v831_v43 = vpop.f32.mrf.mxu1  ;;  %v2198_v27 = vmul.f32 %v8685_v52, %v8650_v45  ;;  %v1395_v13 = vpop.xlane.xlu1 %1394  ;;  %v2192_v47 = vmul.f32 %v8648_v10, %v2191_v12  ;;  %v623_v14 = vadd.f32 %v622_v21, %v8216_v53  ;;  %vm2204_vm2 = vweird.f32 %v8685_v52 }
 0x19c   : > { %7063 = vrsqrt.f32 %v8687_v51  ;;  %v8704_v22 = vadd.f32 %v1246_v32, %v1038_v11  ;;  %v8707_v6 = vmul.f32 0.00390625, %v1395_v13  ;;  %vm2205_vm4 = vmor %vm2203_vm3, %vm2204_vm2  ;;  %vm2213_vm6 = vweird.f32 %v8687_v51 }
 0x19d   : > { %v2199_v33 = vmul.f32 %v8685_v52, %v2198_v27  ;;  %669 = vmatmul.f32.gmra.mxu0 %v415_v36  ;;  %878 = vmatmul.f32.gmra.mxu1 %v416_v19  ;;  %v2196_v39 = vsel %vm2195_vm1, %v8648_v10, %v2192_v47  ;;  %v1715_v0 = vpop.xlane.xlu2 %1714  ;;  %v8718_v10 = vadd.f32 %v831_v43, %v623_v14  ;;  %v417_v47 = vld [vmem:[%s8170_s18 + $0x290] sm:$0xff]  ;;  %v418_v14 = vld [vmem:[%s8170_s18 + $0x298] sm:$0xff] }
 0x19e   : > { %v1953_v18 = vmul.f32 %v8707_v6, %v1395_v13  ;;  %1087 = vmatmul.f32.gmra.mxu2 %v415_v36  ;;  %1296 = vmatmul.f32.gmra.mxu3 %v416_v19  ;;  %v1438_v35 = vadd.f32 %v8704_v22, %v8681_v62  ;;  %v1608_v5 = vmul.f32 %v8704_v22, %v8704_v22 }
 0x19f   : > { %v2200_v12 = vmul.f32 0.5, %v2199_v33  ;;  %v2915_v32 = vmul.f32 %v2787_v60, %v2196_v39  ;;  %v2916_v61 = vmul.f32 %v2788_v8, %v2196_v39 }
 0x1a0   : > { %v2017_v24 = vsub.f32 %v1715_v0, %v1953_v18  ;;  %1439 = vadd.xlane.f32.xlu1 %v1438_v35  ;;  %v1758_v2 = vadd.f32 %v1608_v5, %v1607_v49  ;;  %v2789_v49 = vsub.f32 %v8307_v30, %v8631_v17  ;;  %v1609_v30 = vmul.f32 %v8718_v10, %v8718_v10 }
 0x1a1   : > { %v2201_v11 = vsub.f32 1.5, %v2200_v12  ;;  %v1040_v21 = vpop.f32.mrf.mxu2  ;;  %v1249_v36 = vpop.f32.mrf.mxu3  ;;  %6509 = vst [vmem:[%s8546_s27 + $0x50] sm:$0xff] %v2915_v32  ;;  %v2790_v0 = vsub.f32 %v8312_v41, %v8631_v17 }
 0x1a2   : > { %v8722_v19 = vpop.eup %7063  ;;  %v8724_v27 = vmul.f32 0.003921569, %v2017_v24  ;;  %v1041_v60 = vadd.f32 %v1040_v21, %v8221_v59  ;;  %1759 = vadd.xlane.f32.xlu2 %v1758_v2  ;;  %v625_v43 = vpop.f32.mrf.mxu0  ;;  %6510 = vst [vmem:[%s8546_s27 + $0x58] sm:$0xff] %v2916_v61 }
 0x1a3   : > { %v834_v13 = vpop.f32.mrf.mxu1  ;;  %v2208_v33 = vmul.f32 %v8722_v19, %v8687_v51  ;;  %v626_v39 = vadd.f32 %v625_v43, %v8216_v53  ;;  %v1398_v8 = vpop.xlane.xlu0 %1397  ;;  %v2202_v18 = vmul.f32 %v8685_v52, %v2201_v11  ;;  %vm2214_vm5 = vweird.f32 %v8722_v19 }
 0x1a4   : > { %7065 = vrsqrt.f32 %v8724_v27  ;;  %v8740_v35 = vadd.f32 %v1249_v36, %v1041_v60  ;;  %v8742_v5 = vmul.f32 0.00390625, %v1398_v8  ;;  %vm2215_vm7 = vmor %vm2213_vm6, %vm2214_vm5  ;;  %vm2223_vm9 = vweird.f32 %v8724_v27 }
 0x1a5   : > { %v2209_v45 = vmul.f32 %v8722_v19, %v2208_v33  ;;  %672 = vmatmul.f32.gmra.mxu0 %v417_v47  ;;  %881 = vmatmul.f32.gmra.mxu1 %v418_v14  ;;  %v2206_v12 = vsel %vm2205_vm4, %v8685_v52, %v2202_v18  ;;  %v8755_v11 = vadd.f32 %v834_v13, %v626_v39  ;;  %v1718_v21 = vpop.xlane.xlu1 %1717  ;;  %v420_v18 = vld [vmem:[%s8170_s18 + $0x2a8] sm:$0xff] }
 0x1a6   : > { %v1954_v32 = vmul.f32 %v8742_v5, %v1398_v8  ;;  %1090 = vmatmul.f32.gmra.mxu2 %v417_v47  ;;  %1299 = vmatmul.f32.gmra.mxu3 %v418_v14  ;;  %v1441_v61 = vadd.f32 %v8740_v35, %v8718_v10  ;;  %v1610_v24 = vmul.f32 %v8740_v35, %v8740_v35  ;;  %v419_v8 = vld [vmem:[%s8170_s18 + $0x2a0] sm:$0xff] }
 0x1a7   : > { %v2210_v2 = vmul.f32 0.5, %v2209_v45  ;;  %v2917_v36 = vmul.f32 %v2789_v49, %v2206_v12  ;;  %v2918_v52 = vmul.f32 %v2790_v0, %v2206_v12  ;;  %v1611_v0 = vmul.f32 %v8755_v11, %v8755_v11 }
 0x1a8   : > { %v2018_v41 = vsub.f32 %v1718_v21, %v1954_v32  ;;  %1442 = vadd.xlane.f32.xlu0 %v1441_v61  ;;  %v1761_v17 = vadd.f32 %v1610_v24, %v1609_v30  ;;  %v2791_v30 = vsub.f32 %v8321_v46, %v8668_v58  ;;  %v2792_v21 = vsub.f32 %v8326_v57, %v8668_v58 }
 0x1a9   : > { %v2211_v60 = vsub.f32 1.5, %v2210_v2  ;;  %v1043_v43 = vpop.f32.mrf.mxu2  ;;  %v1252_v47 = vpop.f32.mrf.mxu3  ;;  %6511 = vst [vmem:[%s8546_s27 + $0x60] sm:$0xff] %v2917_v36 }
 0x1aa   : > { %v8759_v14 = vpop.eup %7065  ;;  %v8761_v33 = vmul.f32 0.003921569, %v2018_v41  ;;  %v1044_v13 = vadd.f32 %v1043_v43, %v8221_v59  ;;  %1762 = vadd.xlane.f32.xlu1 %v1761_v17  ;;  %v628_v49 = vpop.f32.mrf.mxu0  ;;  %6512 = vst [vmem:[%s8546_s27 + $0x68] sm:$0xff] %v2918_v52 }
 0x1ab   : > { %v837_v39 = vpop.f32.mrf.mxu1  ;;  %v2218_v45 = vmul.f32 %v8759_v14, %v8724_v27  ;;  %v1401_v12 = vpop.xlane.xlu2 %1400  ;;  %v2212_v32 = vmul.f32 %v8722_v19, %v2211_v60  ;;  %v629_v46 = vadd.f32 %v628_v49, %v8216_v53  ;;  %vm2224_vm8 = vweird.f32 %v8759_v14 }
 0x1ac   : > { %7067 = vrsqrt.f32 %v8761_v33  ;;  %v8778_v61 = vadd.f32 %v1252_v47, %v1044_v13  ;;  %v8781_v24 = vmul.f32 0.00390625, %v1401_v12  ;;  %vm2225_vm10 = vmor %vm2223_vm9, %vm2224_vm8  ;;  %vm2233_vm12 = vweird.f32 %v8761_v33 }
 0x1ad   : > { %v2219_v51 = vmul.f32 %v8759_v14, %v2218_v45  ;;  %675 = vmatmul.f32.gmra.mxu0 %v419_v8  ;;  %884 = vmatmul.f32.gmra.mxu1 %v420_v18  ;;  %v2216_v2 = vsel %vm2215_vm7, %v8722_v19, %v2212_v32  ;;  %v1721_v60 = vpop.xlane.xlu0 %1720  ;;  %v8792_v13 = vadd.f32 %v837_v39, %v629_v46  ;;  %v3074_v45 = vld [vmem:[#allocation8 + $0x148] sm:$0xff] }
 0x1ae   : > { %v1955_v36 = vmul.f32 %v8781_v24, %v1401_v12  ;;  %1093 = vmatmul.f32.gmra.mxu2 %v419_v8  ;;  %1302 = vmatmul.f32.gmra.mxu3 %v420_v18  ;;  %v1444_v52 = vadd.f32 %v8778_v61, %v8755_v11  ;;  %v1612_v41 = vmul.f32 %v8778_v61, %v8778_v61  ;;  %v3042_v18 = vld [vmem:[#allocation8 + $0x48] sm:$0xff]  ;;  %v3041_v12 = vld [vmem:[#allocation8 + $0x40] sm:$0xff] }
 0x1af   : > { %v2220_v17 = vmul.f32 0.5, %v2219_v51  ;;  %v2919_v43 = vmul.f32 %v2791_v30, %v2216_v2  ;;  %v2920_v47 = vmul.f32 %v2792_v21, %v2216_v2  ;;  %v421_v51 = vld [vmem:[%s8170_s18 + $0x2b0] sm:$0xff]  ;;  %v422_v2 = vld [vmem:[%s8170_s18 + $0x2b8] sm:$0xff]  ;;  %3532 = vmatpush.msrb.mxu2 %v3042_v18  ;;  %v2793_v21 = vsub.f32 %v8335_v3, %v8707_v6  ;;  %3741 = vmatpush.msrb.mxu3 %v3074_v45 }
 0x1b0   : > { %v2019_v19 = vsub.f32 %v1721_v60, %v1955_v36  ;;  %1445 = vadd.xlane.f32.xlu2 %v1444_v52  ;;  %v1764_v57 = vadd.f32 %v1612_v41, %v1611_v0  ;;  %3114 = vmatpush.msrb.mxu0 %v3041_v12  ;;  %v1613_v27 = vmul.f32 %v8792_v13, %v8792_v13 }
 0x1b1   : > { %v2221_v58 = vsub.f32 1.5, %v2220_v17  ;;  %v1046_v49 = vpop.f32.mrf.mxu2  ;;  %v1255_v8 = vpop.f32.mrf.mxu3  ;;  %6513 = vst [vmem:[%s8546_s27 + $0x70] sm:$0xff] %v2919_v43 }
 0x1b2   : > { %v8796_v32 = vpop.eup %7067  ;;  %v8798_v30 = vmul.f32 0.003921569, %v2019_v19  ;;  %v1047_v39 = vadd.f32 %v1046_v49, %v8221_v59  ;;  %1765 = vadd.xlane.f32.xlu0 %v1764_v57  ;;  %v631_v46 = vpop.f32.mrf.mxu0  ;;  %6514 = vst [vmem:[%s8546_s27 + $0x78] sm:$0xff] %v2920_v47  ;;  %v2794_v19 = vsub.f32 %v8340_v16, %v8707_v6 }
 0x1b3   : > { %v840_v0 = vpop.f32.mrf.mxu1  ;;  %v2228_v36 = vmul.f32 %v8796_v32, %v8761_v33  ;;  %v632_v52 = vadd.f32 %v631_v46, %v8216_v53  ;;  %v1404_v41 = vpop.xlane.xlu1 %1403  ;;  %v2222_v17 = vmul.f32 %v8759_v14, %v2221_v58  ;;  %vm2234_vm11 = vweird.f32 %v8796_v32 }
 0x1b4   : > { %7069 = vrsqrt.f32 %v8798_v30  ;;  %v8814_v60 = vadd.f32 %v1255_v8, %v1047_v39  ;;  %v8816_v3 = vmul.f32 0.00390625, %v1404_v41  ;;  %vm2235_vm13 = vmor %vm2233_vm12, %vm2234_vm11  ;;  %vm2243_vm15 = vweird.f32 %v8798_v30 }
 0x1b5   : > { %v2229_v43 = vmul.f32 %v8796_v32, %v2228_v36  ;;  %678 = vmatmul.f32.gmra.mxu0 %v421_v51  ;;  %887 = vmatmul.f32.gmra.mxu1 %v422_v2  ;;  %v2226_v47 = vsel %vm2225_vm10, %v8759_v14, %v2222_v17  ;;  %v8829_v18 = vadd.f32 %v840_v0, %v632_v52  ;;  %v1724_v45 = vpop.xlane.xlu2 %1723  ;;  %v423_v17 = vld [vmem:[%s8170_s18 + $0x2c0] sm:$0xff] }
 0x1b6   : > { %v1956_v57 = vmul.f32 %v8816_v3, %v1404_v41  ;;  %1096 = vmatmul.f32.gmra.mxu2 %v421_v51  ;;  %1305 = vmatmul.f32.gmra.mxu3 %v422_v2  ;;  %v1447_v58 = vadd.f32 %v8814_v60, %v8792_v13  ;;  %v1614_v49 = vmul.f32 %v8814_v60, %v8814_v60  ;;  %v3073_v2 = vld [vmem:[#allocation8 + $0x140] sm:$0xff] }
 0x1b7   : > { %v2230_v8 = vmul.f32 0.5, %v2229_v43  ;;  %v2921_v12 = vmul.f32 %v2793_v21, %v2226_v47  ;;  %v2922_v14 = vmul.f32 %v2794_v19, %v2226_v47  ;;  %v424_v43 = vld [vmem:[%s8170_s18 + $0x2c8] sm:$0xff]  ;;  %3323 = vmatpush.msrb.mxu1 %v3073_v2 }
 0x1b8   : > { %v2020_v39 = vsub.f32 %v1724_v45, %v1956_v57  ;;  %1448 = vadd.xlane.f32.xlu1 %v1447_v58  ;;  %v1767_v16 = vadd.f32 %v1614_v49, %v1613_v27  ;;  %v2795_v27 = vsub.f32 %v8349_v25, %v8742_v5  ;;  %v1615_v57 = vmul.f32 %v8829_v18, %v8829_v18 }
 0x1b9   : > { %v2231_v6 = vsub.f32 1.5, %v2230_v8  ;;  %v1049_v46 = vpop.f32.mrf.mxu2  ;;  %v1258_v51 = vpop.f32.mrf.mxu3  ;;  %6515 = vst [vmem:[%s8546_s27 + $0x80] sm:$0xff] %v2921_v12  ;;  %v2796_v12 = vsub.f32 %v8354_v37, %v8742_v5 }
 0x1ba   : > { %v8833_v36 = vpop.eup %7069  ;;  %v8835_v0 = vmul.f32 0.003921569, %v2020_v39  ;;  %v1050_v21 = vadd.f32 %v1049_v46, %v8221_v59  ;;  %1768 = vadd.xlane.f32.xlu2 %v1767_v16  ;;  %v634_v52 = vpop.f32.mrf.mxu0  ;;  %6516 = vst [vmem:[%s8546_s27 + $0x88] sm:$0xff] %v2922_v14 }
 0x1bb   : > { %v843_v41 = vpop.f32.mrf.mxu1  ;;  %v2238_v47 = vmul.f32 %v8833_v36, %v8798_v30  ;;  %v1407_v19 = vpop.xlane.xlu0 %1406  ;;  %v2232_v58 = vmul.f32 %v8796_v32, %v2231_v6  ;;  %v635_v25 = vadd.f32 %v634_v52, %v8216_v53  ;;  %vm2244_vm14 = vweird.f32 %v8833_v36 }
 0x1bc   : > { %7071 = vrsqrt.f32 %v8835_v0  ;;  %v8852_v49 = vadd.f32 %v1258_v51, %v1050_v21  ;;  %v8855_v8 = vmul.f32 0.00390625, %v1407_v19  ;;  %vm2245_vm0 = vmor %vm2243_vm15, %vm2244_vm14  ;;  %vm2253_vm2 = vweird.f32 %v8835_v0 }
 0x1bd   : > { %v2239_v33 = vmul.f32 %v8833_v36, %v2238_v47  ;;  %681 = vmatmul.f32.gmra.mxu0 %v423_v17  ;;  %890 = vmatmul.f32.gmra.mxu1 %v424_v43  ;;  %v2236_v45 = vsel %vm2235_vm13, %v8796_v32, %v2232_v58  ;;  %v1727_v46 = vpop.xlane.xlu1 %1726  ;;  %v8866_v32 = vadd.f32 %v843_v41, %v635_v25  ;;  %v425_v58 = vld [vmem:[%s8170_s18 + $0x2d0] sm:$0xff]  ;;  %v426_v25 = vld [vmem:[%s8170_s18 + $0x2d8] sm:$0xff] }
 0x1be   : > { %v1957_v14 = vmul.f32 %v8855_v8, %v1407_v19  ;;  %1099 = vmatmul.f32.gmra.mxu2 %v423_v17  ;;  %1308 = vmatmul.f32.gmra.mxu3 %v424_v43  ;;  %v1450_v39 = vadd.f32 %v8852_v49, %v8829_v18  ;;  %v1616_v16 = vmul.f32 %v8852_v49, %v8852_v49 }
 0x1bf   : > { %v2240_v6 = vmul.f32 0.5, %v2239_v33  ;;  %v2923_v51 = vmul.f32 %v2795_v27, %v2236_v45  ;;  %v2924_v2 = vmul.f32 %v2796_v12, %v2236_v45 }
 0x1c0   : > { %v2021_v37 = vsub.f32 %v1727_v46, %v1957_v14  ;;  %1451 = vadd.xlane.f32.xlu0 %v1450_v39  ;;  %v1770_v5 = vadd.f32 %v1616_v16, %v1615_v57  ;;  %v2797_v57 = vsub.f32 %v8363_v44, %v8781_v24  ;;  %v1617_v44 = vmul.f32 %v8866_v32, %v8866_v32 }
 0x1c1   : > { %v2241_v21 = vsub.f32 1.5, %v2240_v6  ;;  %v1052_v52 = vpop.f32.mrf.mxu2  ;;  %v1261_v17 = vpop.f32.mrf.mxu3  ;;  %6517 = vst [vmem:[%s8546_s27 + $0x90] sm:$0xff] %v2923_v51  ;;  %v2798_v46 = vsub.f32 %v8368_v56, %v8781_v24 }
 0x1c2   : > { %v8870_v43 = vpop.eup %7071  ;;  %v8872_v47 = vmul.f32 0.003921569, %v2021_v37  ;;  %v1053_v27 = vadd.f32 %v1052_v52, %v8221_v59  ;;  %1771 = vadd.xlane.f32.xlu1 %v1770_v5  ;;  %v637_v41 = vpop.f32.mrf.mxu0  ;;  %6518 = vst [vmem:[%s8546_s27 + $0x98] sm:$0xff] %v2924_v2 }
 0x1c3   : > { %v846_v19 = vpop.f32.mrf.mxu1  ;;  %v2248_v33 = vmul.f32 %v8870_v43, %v8835_v0  ;;  %v638_v45 = vadd.f32 %v637_v41, %v8216_v53  ;;  %v1410_v12 = vpop.xlane.xlu2 %1409  ;;  %v2242_v14 = vmul.f32 %v8833_v36, %v2241_v21  ;;  %vm2254_vm1 = vweird.f32 %v8870_v43 }
 0x1c4   : > { %7073 = vrsqrt.f32 %v8872_v47  ;;  %v8888_v39 = vadd.f32 %v1261_v17, %v1053_v27  ;;  %v8890_v16 = vmul.f32 0.00390625, %v1410_v12  ;;  %vm2255_vm3 = vmor %vm2253_vm2, %vm2254_vm1  ;;  %vm2263_vm5 = vweird.f32 %v8872_v47 }
 0x1c5   : > { %v2249_v30 = vmul.f32 %v8870_v43, %v2248_v33  ;;  %684 = vmatmul.f32.gmra.mxu0 %v425_v58  ;;  %893 = vmatmul.f32.gmra.mxu1 %v426_v25  ;;  %v2246_v6 = vsel %vm2245_vm0, %v8833_v36, %v2242_v14  ;;  %v8903_v21 = vadd.f32 %v846_v19, %v638_v45  ;;  %v1730_v52 = vpop.xlane.xlu0 %1729  ;;  %v428_v14 = vld [vmem:[%s8170_s18 + $0x2e8] sm:$0xff] }
 0x1c6   : > { %v1958_v51 = vmul.f32 %v8890_v16, %v1410_v12  ;;  %1102 = vmatmul.f32.gmra.mxu2 %v425_v58  ;;  %1311 = vmatmul.f32.gmra.mxu3 %v426_v25  ;;  %v1453_v2 = vadd.f32 %v8888_v39, %v8866_v32  ;;  %v1618_v37 = vmul.f32 %v8888_v39, %v8888_v39  ;;  %v427_v12 = vld [vmem:[%s8170_s18 + $0x2e0] sm:$0xff] }
 0x1c7   : > { %v2250_v5 = vmul.f32 0.5, %v2249_v30  ;;  %v2925_v17 = vmul.f32 %v2797_v57, %v2246_v6  ;;  %v2926_v36 = vmul.f32 %v2798_v46, %v2246_v6  ;;  %v1619_v46 = vmul.f32 %v8903_v21, %v8903_v21 }
 0x1c8   : > { %v2022_v56 = vsub.f32 %v1730_v52, %v1958_v51  ;;  %1454 = vadd.xlane.f32.xlu2 %v1453_v2  ;;  %v1773_v24 = vadd.f32 %v1618_v37, %v1617_v44  ;;  %v2799_v44 = vsub.f32 %v8377_v1, %v8816_v3  ;;  %v2800_v52 = vsub.f32 %v8382_v15, %v8816_v3 }
 0x1c9   : > { %v2251_v27 = vsub.f32 1.5, %v2250_v5  ;;  %v1055_v41 = vpop.f32.mrf.mxu2  ;;  %v1264_v58 = vpop.f32.mrf.mxu3  ;;  %6519 = vst [vmem:[%s8546_s27 + $0xa0] sm:$0xff] %v2925_v17 }
 0x1ca   : > { %v8907_v25 = vpop.eup %7073  ;;  %v8909_v33 = vmul.f32 0.003921569, %v2022_v56  ;;  %v1056_v19 = vadd.f32 %v1055_v41, %v8221_v59  ;;  %1774 = vadd.xlane.f32.xlu0 %v1773_v24  ;;  %v640_v57 = vpop.f32.mrf.mxu0  ;;  %6520 = vst [vmem:[%s8546_s27 + $0xa8] sm:$0xff] %v2926_v36 }
 0x1cb   : > { %v849_v45 = vpop.f32.mrf.mxu1  ;;  %v2258_v30 = vmul.f32 %v8907_v25, %v8872_v47  ;;  %v1413_v6 = vpop.xlane.xlu1 %1412  ;;  %v2252_v51 = vmul.f32 %v8870_v43, %v2251_v27  ;;  %v641_v1 = vadd.f32 %v640_v57, %v8216_v53  ;;  %vm2264_vm4 = vweird.f32 %v8907_v25 }
 0x1cc   : > { %7075 = vrsqrt.f32 %v8909_v33  ;;  %v8926_v2 = vadd.f32 %v1264_v58, %v1056_v19  ;;  %v8929_v37 = vmul.f32 0.00390625, %v1413_v6  ;;  %vm2265_vm6 = vmor %vm2263_vm5, %vm2264_vm4  ;;  %vm2273_vm8 = vweird.f32 %v8909_v33 }
 0x1cd   : > { %v2259_v0 = vmul.f32 %v8907_v25, %v2258_v30  ;;  %687 = vmatmul.f32.gmra.mxu0 %v427_v12  ;;  %896 = vmatmul.f32.gmra.mxu1 %v428_v14  ;;  %v2256_v5 = vsel %vm2255_vm3, %v8870_v43, %v2252_v51  ;;  %v1733_v27 = vpop.xlane.xlu2 %1732  ;;  %v8940_v19 = vadd.f32 %v849_v45, %v641_v1  ;;  %v3072_v30 = vld [vmem:[#allocation8 + $0x138] sm:$0xff] }
 0x1ce   : > { %v1959_v17 = vmul.f32 %v8929_v37, %v1413_v6  ;;  %1105 = vmatmul.f32.gmra.mxu2 %v427_v12  ;;  %1314 = vmatmul.f32.gmra.mxu3 %v428_v14  ;;  %v1456_v36 = vadd.f32 %v8926_v2, %v8903_v21  ;;  %v1620_v56 = vmul.f32 %v8926_v2, %v8926_v2  ;;  %v3040_v14 = vld [vmem:[#allocation8 + $0x38] sm:$0xff]  ;;  %v3039_v6 = vld [vmem:[#allocation8 + $0x30] sm:$0xff] }
 0x1cf   : > { %v2260_v24 = vmul.f32 0.5, %v2259_v0  ;;  %v2927_v41 = vmul.f32 %v2799_v44, %v2256_v5  ;;  %v2928_v58 = vmul.f32 %v2800_v52, %v2256_v5  ;;  %v429_v0 = vld [vmem:[%s8170_s18 + $0x2f0] sm:$0xff]  ;;  %v430_v5 = vld [vmem:[%s8170_s18 + $0x2f8] sm:$0xff]  ;;  %3533 = vmatpush.msrb.mxu2 %v3040_v14  ;;  %3742 = vmatpush.msrb.mxu3 %v3072_v30 }
 0x1d0   : > { %v2023_v43 = vsub.f32 %v1733_v27, %v1959_v17  ;;  %1457 = vadd.xlane.f32.xlu1 %v1456_v36  ;;  %v1776_v15 = vadd.f32 %v1620_v56, %v1619_v46  ;;  %3115 = vmatpush.msrb.mxu0 %v3039_v6  ;;  %v2801_v36 = vsub.f32 %v8391_v26, %v8855_v8 }
 0x1d1   : > { %v2261_v3 = vsub.f32 1.5, %v2260_v24  ;;  %v1058_v57 = vpop.f32.mrf.mxu2  ;;  %v1267_v12 = vpop.f32.mrf.mxu3  ;;  %6521 = vst [vmem:[%s8546_s27 + $0xb0] sm:$0xff] %v2927_v41  ;;  %v1621_v27 = vmul.f32 %v8940_v19, %v8940_v19 }
 0x1d2   : > { %v8944_v51 = vpop.eup %7075  ;;  %v8946_v44 = vmul.f32 0.003921569, %v2023_v43  ;;  %v1059_v45 = vadd.f32 %v1058_v57, %v8221_v59  ;;  %1777 = vadd.xlane.f32.xlu2 %v1776_v15  ;;  %v643_v1 = vpop.f32.mrf.mxu0  ;;  %6522 = vst [vmem:[%s8546_s27 + $0xb8] sm:$0xff] %v2928_v58  ;;  %v2802_v43 = vsub.f32 %v8396_v40, %v8855_v8 }
 0x1d3   : > { %v852_v46 = vpop.f32.mrf.mxu1  ;;  %v2268_v52 = vmul.f32 %v8944_v51, %v8909_v33  ;;  %v2262_v17 = vmul.f32 %v8907_v25, %v2261_v3  ;;  %v644_v24 = vadd.f32 %v643_v1, %v8216_v53  ;;  %v1416_v47 = vpop.xlane.xlu0 %1415  ;;  %vm2274_vm7 = vweird.f32 %v8944_v51 }
 0x1d4   : > { %7077 = vrsqrt.f32 %v8946_v44  ;;  %v8961_v56 = vadd.f32 %v1267_v12, %v1059_v45  ;;  %v8967_v58 = vmul.f32 0.00390625, %v1416_v47  ;;  %vm2275_vm9 = vmor %vm2273_vm8, %vm2274_vm7  ;;  %vm2283_vm11 = vweird.f32 %v8946_v44 }
 0x1d5   : > { %v2269_v41 = vmul.f32 %v8944_v51, %v2268_v52  ;;  %690 = vmatmul.f32.gmra.mxu0 %v429_v0  ;;  %899 = vmatmul.f32.gmra.mxu1 %v430_v5  ;;  %v2266_v26 = vsel %vm2265_vm6, %v8907_v25, %v2262_v17  ;;  %v8977_v6 = vadd.f32 %v852_v46, %v644_v24  ;;  %v1736_v25 = vpop.xlane.xlu1 %1735  ;;  %v432_v46 = vld [vmem:[%s8170_s18 + $0x308] sm:$0xff]  ;;  %v3071_v24 = vld [vmem:[#allocation8 + $0x130] sm:$0xff] }
 0x1d6   : > { %1108 = vmatmul.f32.gmra.mxu2 %v429_v0  ;;  %1317 = vmatmul.f32.gmra.mxu3 %v430_v5  ;;  %v1459_v15 = vadd.f32 %v8961_v56, %v8940_v19  ;;  %v1622_v3 = vmul.f32 %v8961_v56, %v8961_v56  ;;  %v2929_v57 = vmul.f32 %v2801_v36, %v2266_v26 }
 0x1d7   : > { %v2270_v12 = vmul.f32 0.5, %v2269_v41  ;;  %v1960_v14 = vmul.f32 %v8967_v58, %v1416_v47  ;;  %v2930_v30 = vmul.f32 %v2802_v43, %v2266_v26  ;;  %v431_v47 = vld [vmem:[%s8170_s18 + $0x300] sm:$0xff]  ;;  %v2803_v41 = vsub.f32 %v8405_v48, %v8890_v16  ;;  %3324 = vmatpush.msrb.mxu1 %v3071_v24 }
 0x1d8   : > { %1460 = vadd.xlane.f32.xlu0 %v1459_v15  ;;  %v1779_v40 = vadd.f32 %v1622_v3, %v1621_v27  ;;  %6523 = vst [vmem:[%s8546_s27 + $0xc0] sm:$0xff] %v2929_v57  ;;  %v2804_v15 = vsub.f32 %v8410_v63, %v8890_v16 }
 0x1d9   : > { %v2271_v8 = vsub.f32 1.5, %v2270_v12  ;;  %v2024_v45 = vsub.f32 %v1736_v25, %v1960_v14  ;;  %v1061_v1 = vpop.f32.mrf.mxu2  ;;  %v1270_v0 = vpop.f32.mrf.mxu3  ;;  %6524 = vst [vmem:[%s8546_s27 + $0xc8] sm:$0xff] %v2930_v30  ;;  %v1623_v12 = vmul.f32 %v8977_v6, %v8977_v6 }
 0x1da   : > { %v8981_v5 = vpop.eup %7077  ;;  %v1062_v52 = vadd.f32 %v1061_v1, %v8221_v59  ;;  %1780 = vadd.xlane.f32.xlu1 %v1779_v40  ;;  %v646_v17 = vpop.f32.mrf.mxu0 }
 0x1db   : > { %v855_v36 = vpop.f32.mrf.mxu1  ;;  %v2278_v27 = vmul.f32 %v8981_v5, %v8946_v44  ;;  %v8991_v26 = vmul.f32 0.003921569, %v2024_v45  ;;  %v1419_v43 = vpop.xlane.xlu2 %1418  ;;  %v2272_v48 = vmul.f32 %v8944_v51, %v2271_v8  ;;  %v647_v30 = vadd.f32 %v646_v17, %v8216_v53 }
 0x1dc   : > { %v8995_v3 = vadd.f32 %v1270_v0, %v1062_v52  ;;  %v8997_v57 = vmul.f32 0.00390625, %v1419_v43  ;;  %vm2284_vm10 = vweird.f32 %v8981_v5  ;;  %v2806_v44 = vsub.f32 %v8424_v23, %v8929_v37 }
 0x1dd   : > { %v2279_v14 = vmul.f32 %v8981_v5, %v2278_v27  ;;  %7079 = vrsqrt.f32 %v8991_v26  ;;  %693 = vmatmul.f32.gmra.mxu0 %v431_v47  ;;  %902 = vmatmul.f32.gmra.mxu1 %v432_v46  ;;  %v1739_v40 = vpop.xlane.xlu0 %1738  ;;  %v2276_v8 = vsel %vm2275_vm9, %v8944_v51, %v2272_v48  ;;  %vm2285_vm12 = vmor %vm2283_vm11, %vm2284_vm10  ;;  %vm2293_vm14 = vweird.f32 %v8991_v26 }
 0x1de   : > { %v1961_v63 = vmul.f32 %v8997_v57, %v1419_v43  ;;  %1111 = vmatmul.f32.gmra.mxu2 %v431_v47  ;;  %1320 = vmatmul.f32.gmra.mxu3 %v432_v46  ;;  %v1462_v16 = vadd.f32 %v8995_v3, %v8977_v6  ;;  %v1624_v33 = vmul.f32 %v8995_v3, %v8995_v3 }
 0x1df   : > { %v2280_v25 = vmul.f32 0.5, %v2279_v14  ;;  %v2931_v0 = vmul.f32 %v2803_v41, %v2276_v8  ;;  %v2932_v52 = vmul.f32 %v2804_v15, %v2276_v8  ;;  %v9015_v47 = vadd.f32 %v855_v36, %v647_v30  ;;  %v433_v14 = vld [vmem:[%s8170_s18 + $0x310] sm:$0xff] }
 0x1e0   : > { %v2025_v45 = vsub.f32 %v1739_v40, %v1961_v63  ;;  %1463 = vadd.xlane.f32.xlu2 %v1462_v16  ;;  %v1782_v1 = vadd.f32 %v1624_v33, %v1623_v12  ;;  %v434_v63 = vld [vmem:[%s8170_s18 + $0x318] sm:$0xff]  ;;  %v2805_v12 = vsub.f32 %v8419_v9, %v8929_v37 }
 0x1e1   : > { %v2281_v17 = vsub.f32 1.5, %v2280_v25  ;;  %v1064_v46 = vpop.f32.mrf.mxu2  ;;  %v1273_v24 = vpop.f32.mrf.mxu3  ;;  %6525 = vst [vmem:[%s8546_s27 + $0xd0] sm:$0xff] %v2931_v0  ;;  %v1625_v9 = vmul.f32 %v9015_v47, %v9015_v47 }
 0x1e2   : > { %v9017_v27 = vmul.f32 0.003921569, %v2025_v45  ;;  %v1065_v51 = vadd.f32 %v1064_v46, %v8221_v59  ;;  %1783 = vadd.xlane.f32.xlu0 %v1782_v1  ;;  %v649_v43 = vpop.f32.mrf.mxu0  ;;  %6526 = vst [vmem:[%s8546_s27 + $0xd8] sm:$0xff] %v2932_v52 }
 0x1e3   : > { %v858_v48 = vpop.f32.mrf.mxu1  ;;  %v9023_v41 = vpop.eup %7079  ;;  %v2282_v36 = vmul.f32 %v8981_v5, %v2281_v17  ;;  %v650_v16 = vadd.f32 %v649_v43, %v8216_v53 }
 0x1e4   : > { %v1422_v15 = vpop.xlane.xlu1 %1421  ;;  %v2288_v30 = vmul.f32 %v9023_v41, %v8991_v26  ;;  %7081 = vrsqrt.f32 %v9017_v27  ;;  %v9038_v33 = vadd.f32 %v1273_v24, %v1065_v51  ;;  %vm2294_vm13 = vweird.f32 %v9023_v41 }
 0x1e5   : > { %v9040_v25 = vmul.f32 0.00390625, %v1422_v15  ;;  %696 = vmatmul.f32.gmra.mxu0 %v433_v14  ;;  %905 = vmatmul.f32.gmra.mxu1 %v434_v63  ;;  %v2286_v40 = vsel %vm2285_vm12, %v8981_v5, %v2282_v36  ;;  %v9051_v17 = vadd.f32 %v858_v48, %v650_v16  ;;  %v1742_v5 = vpop.xlane.xlu2 %1741  ;;  %v2807_v48 = vsub.f32 %v8433_v38, %v8967_v58  ;;  %vm2295_vm15 = vmor %vm2293_vm14, %vm2294_vm13 }
 0x1e6   : > { %v2289_v8 = vmul.f32 %v9023_v41, %v2288_v30  ;;  %1114 = vmatmul.f32.gmra.mxu2 %v433_v14  ;;  %1323 = vmatmul.f32.gmra.mxu3 %v434_v63  ;;  %v2933_v45 = vmul.f32 %v2805_v12, %v2286_v40  ;;  %v2934_v1 = vmul.f32 %v2806_v44, %v2286_v40  ;;  %v435_v30 = vld [vmem:[%s8170_s18 + $0x320] sm:$0xff]  ;;  %v436_v44 = vld [vmem:[%s8170_s18 + $0x328] sm:$0xff]  ;;  %vm2303_vm1 = vweird.f32 %v9017_v27 }
 0x1e7   : > { %v1962_v23 = vmul.f32 %v9040_v25, %v1422_v15  ;;  %v1465_v37 = vadd.f32 %v9038_v33, %v9015_v47  ;;  %v1626_v0 = vmul.f32 %v9038_v33, %v9038_v33 }
 0x1e8   : > { %v2290_v52 = vmul.f32 0.5, %v2289_v8  ;;  %6527 = vst [vmem:[%s8546_s27 + $0xe0] sm:$0xff] %v2933_v45  ;;  %v2808_v8 = vsub.f32 %v8438_v55, %v8967_v58 }
 0x1e9   : > { %v2026_v46 = vsub.f32 %v1742_v5, %v1962_v23  ;;  %1466 = vadd.xlane.f32.xlu1 %v1465_v37  ;;  %v1067_v24 = vpop.f32.mrf.mxu2  ;;  %v1276_v51 = vpop.f32.mrf.mxu3  ;;  %v1785_v43 = vadd.f32 %v1626_v0, %v1625_v9  ;;  %6528 = vst [vmem:[%s8546_s27 + $0xe8] sm:$0xff] %v2934_v1  ;;  %v1627_v23 = vmul.f32 %v9051_v17, %v9051_v17 }
 0x1ea   : > { %v9055_v14 = vpop.eup %7081  ;;  %v2291_v63 = vsub.f32 1.5, %v2290_v52  ;;  %v1068_v15 = vadd.f32 %v1067_v24, %v8221_v59  ;;  %v652_v36 = vpop.f32.mrf.mxu0 }
 0x1eb   : > { %v861_v12 = vpop.f32.mrf.mxu1  ;;  %v2298_v16 = vmul.f32 %v9055_v14, %v9017_v27  ;;  %v9065_v40 = vmul.f32 0.003921569, %v2026_v46  ;;  %1786 = vadd.xlane.f32.xlu2 %v1785_v43  ;;  %v1425_v9 = vpop.xlane.xlu0 %1424  ;;  %v653_v0 = vadd.f32 %v652_v36, %v8216_v53  ;;  %vm2304_vm0 = vweird.f32 %v9055_v14 }
 0x1ec   : > { %v9069_v45 = vadd.f32 %v1276_v51, %v1068_v15  ;;  %v9071_v1 = vmul.f32 0.00390625, %v1425_v9  ;;  %v2292_v38 = vmul.f32 %v9023_v41, %v2291_v63  ;;  %vm2305_vm2 = vmor %vm2303_vm1, %vm2304_vm0  ;;  %v2810_v27 = vsub.f32 %v8455_v31, %v8997_v57 }
 0x1ed   : > { %v2299_v37 = vmul.f32 %v9055_v14, %v2298_v16  ;;  %7083 = vrsqrt.f32 %v9065_v40  ;;  %699 = vmatmul.f32.gmra.mxu0 %v435_v30  ;;  %908 = vmatmul.f32.gmra.mxu1 %v436_v44  ;;  %v9089_v36 = vadd.f32 %v861_v12, %v653_v0  ;;  %v3038_v16 = vld [vmem:[#allocation8 + $0x28] sm:$0xff]  ;;  %vm2313_vm4 = vweird.f32 %v9065_v40 }
 0x1ee   : > { %v1963_v55 = vmul.f32 %v9071_v1, %v1425_v9  ;;  %1117 = vmatmul.f32.gmra.mxu2 %v435_v30  ;;  %1326 = vmatmul.f32.gmra.mxu3 %v436_v44  ;;  %v1468_v58 = vadd.f32 %v9069_v45, %v9051_v17  ;;  %v1628_v26 = vmul.f32 %v9069_v45, %v9069_v45  ;;  %v1745_v5 = vpop.xlane.xlu1 %1744  ;;  %v3070_v9 = vld [vmem:[#allocation8 + $0x128] sm:$0xff] }
 0x1ef   : > { %v2300_v52 = vmul.f32 0.5, %v2299_v37  ;;  %v2296_v46 = vsel %vm2295_vm15, %v9023_v41, %v2292_v38  ;;  %v3037_v37 = vld [vmem:[#allocation8 + $0x20] sm:$0xff]  ;;  %3534 = vmatpush.msrb.mxu2 %v3038_v16  ;;  %3743 = vmatpush.msrb.mxu3 %v3070_v9 }
 0x1f0   : > { %v2027_v24 = vsub.f32 %v1745_v5, %v1963_v55  ;;  %1469 = vadd.xlane.f32.xlu0 %v1468_v58  ;;  %v1788_v51 = vadd.f32 %v1628_v26, %v1627_v23  ;;  %v2935_v43 = vmul.f32 %v2807_v48, %v2296_v46  ;;  %v2936_v63 = vmul.f32 %v2808_v8, %v2296_v46  ;;  %v437_v8 = vld [vmem:[%s8170_s18 + $0x330] sm:$0xff]  ;;  %v438_v55 = vld [vmem:[%s8170_s18 + $0x338] sm:$0xff] }
 0x1f1   : > { %v2301_v15 = vsub.f32 1.5, %v2300_v52  ;;  %v1070_v30 = vpop.f32.mrf.mxu2  ;;  %v1279_v44 = vpop.f32.mrf.mxu3  ;;  %3116 = vmatpush.msrb.mxu0 %v3037_v37  ;;  %v2809_v26 = vsub.f32 %v8449_v7, %v8997_v57  ;;  %v1629_v7 = vmul.f32 %v9089_v36, %v9089_v36 }
 0x1f2   : > { %v9091_v41 = vmul.f32 0.003921569, %v2027_v24  ;;  %v1071_v23 = vadd.f32 %v1070_v30, %v8221_v59  ;;  %1789 = vadd.xlane.f32.xlu1 %v1788_v51  ;;  %v655_v48 = vpop.f32.mrf.mxu0  ;;  %6529 = vst [vmem:[%s8546_s27 + $0xf0] sm:$0xff] %v2935_v43 }
 0x1f3   : > { %v864_v38 = vpop.f32.mrf.mxu1  ;;  %v9097_v58 = vpop.eup %7083  ;;  %6530 = vst [vmem:[%s8546_s27 + $0xf8] sm:$0xff] %v2936_v63  ;;  %v2302_v0 = vmul.f32 %v9055_v14, %v2301_v15  ;;  %v656_v5 = vadd.f32 %v655_v48, %v8216_v53 }
 0x1f4   : > { %v1428_v12 = vpop.xlane.xlu2 %1427  ;;  %v2308_v52 = vmul.f32 %v9097_v58, %v9065_v40  ;;  %7085 = vrsqrt.f32 %v9091_v41  ;;  %v9112_v46 = vadd.f32 %v1279_v44, %v1071_v23  ;;  %vm2314_vm3 = vweird.f32 %v9097_v58 }
 0x1f5   : > { %v9114_v24 = vmul.f32 0.00390625, %v1428_v12  ;;  %702 = vmatmul.f32.gmra.mxu0 %v437_v8  ;;  %911 = vmatmul.f32.gmra.mxu1 %v438_v55  ;;  %v2306_v51 = vsel %vm2305_vm2, %v9055_v14, %v2302_v0  ;;  %v9125_v16 = vadd.f32 %v864_v38, %v656_v5  ;;  %v1748_v14 = vpop.xlane.xlu0 %1747  ;;  %v13698_v38 = vld [vmem:[#allocation18_spill] sm:$0xff]  ;;  %vm2315_vm5 = vmor %vm2313_vm4, %vm2314_vm3  ;;  %vm2323_vm7 = vweird.f32 %v9091_v41 }
 0x1f6   : > { %v2309_v43 = vmul.f32 %v9097_v58, %v2308_v52  ;;  %1120 = vmatmul.f32.gmra.mxu2 %v437_v8  ;;  %1329 = vmatmul.f32.gmra.mxu3 %v438_v55  ;;  %v2937_v63 = vmul.f32 %v2809_v26, %v2306_v51  ;;  %v2938_v15 = vmul.f32 %v2810_v27, %v2306_v51  ;;  %v439_v52 = vld [vmem:[%s8170_s18 + $0x340] sm:$0xff]  ;;  %v440_v27 = vld [vmem:[%s8170_s18 + $0x348] sm:$0xff] }
 0x1f7   : > { %v1964_v31 = vmul.f32 %v9114_v24, %v1428_v12  ;;  %v1471_v57 = vadd.f32 %v9112_v46, %v9089_v36  ;;  %v1630_v30 = vmul.f32 %v9112_v46, %v9112_v46  ;;  %v3069_v51 = vld [vmem:[#allocation8 + $0x120] sm:$0xff]  ;;  %v2811_v5 = vsub.f32 %v13698_v38, %v9040_v25 }
 0x1f8   : > { %v2310_v44 = vmul.f32 0.5, %v2309_v43  ;;  %6531 = vst [vmem:[%s8546_s27 + $0x100] sm:$0xff] %v2937_v63  ;;  %3325 = vmatpush.msrb.mxu1 %v3069_v51 }
 0x1f9   : > { %v2028_v9 = vsub.f32 %v1748_v14, %v1964_v31  ;;  %1472 = vadd.xlane.f32.xlu2 %v1471_v57  ;;  %v1073_v37 = vpop.f32.mrf.mxu2  ;;  %v1282_v23 = vpop.f32.mrf.mxu3  ;;  %v1791_v48 = vadd.f32 %v1630_v30, %v1629_v7  ;;  %6532 = vst [vmem:[%s8546_s27 + $0x108] sm:$0xff] %v2938_v15  ;;  %v13699_v15 = vld [vmem:[#allocation19_spill] sm:$0xff] }
 0x1fa   : > { %v9129_v8 = vpop.eup %7085  ;;  %v2311_v55 = vsub.f32 1.5, %v2310_v44  ;;  %v1074_v12 = vadd.f32 %v1073_v37, %v8221_v59  ;;  %v658_v0 = vpop.f32.mrf.mxu0  ;;  %v2812_v31 = vsub.f32 %v13699_v15, %v9040_v25  ;;  %v1631_v44 = vmul.f32 %v9125_v16, %v9125_v16 }
 0x1fb   : > { %v867_v26 = vpop.f32.mrf.mxu1  ;;  %v2318_v43 = vmul.f32 %v9129_v8, %v9091_v41  ;;  %v9139_v7 = vmul.f32 0.003921569, %v2028_v9  ;;  %1792 = vadd.xlane.f32.xlu0 %v1791_v48  ;;  %v1431_v63 = vpop.xlane.xlu1 %1430  ;;  %v659_v37 = vadd.f32 %v658_v0, %v8216_v53  ;;  %vm2324_vm6 = vweird.f32 %v9129_v8 }
 0x1fc   : > { %v9143_v57 = vadd.f32 %v1282_v23, %v1074_v12  ;;  %v9145_v30 = vmul.f32 0.00390625, %v1431_v63  ;;  %v2312_v14 = vmul.f32 %v9097_v58, %v2311_v55  ;;  %vm2325_vm8 = vmor %vm2323_vm7, %vm2324_vm6 }
 0x1fd   : > { %v2319_v9 = vmul.f32 %v9129_v8, %v2318_v43  ;;  %7087 = vrsqrt.f32 %v9139_v7  ;;  %705 = vmatmul.f32.gmra.mxu0 %v439_v52  ;;  %914 = vmatmul.f32.gmra.mxu1 %v440_v27  ;;  %v1751_v55 = vpop.xlane.xlu2 %1750  ;;  %vm2333_vm10 = vweird.f32 %v9139_v7 }
 0x1fe   : > { %v1965_v25 = vmul.f32 %v9145_v30, %v1431_v63  ;;  %1123 = vmatmul.f32.gmra.mxu2 %v439_v52  ;;  %1332 = vmatmul.f32.gmra.mxu3 %v440_v27  ;;  %v1474_v23 = vadd.f32 %v9143_v57, %v9125_v16  ;;  %v1632_v40 = vmul.f32 %v9143_v57, %v9143_v57 }
 0x1ff   : > { %v2320_v48 = vmul.f32 0.5, %v2319_v9  ;;  %v2316_v12 = vsel %vm2315_vm5, %v9097_v58, %v2312_v14  ;;  %v9163_v27 = vadd.f32 %v867_v26, %v659_v37 }
 0x200   : > { %v2029_v0 = vsub.f32 %v1751_v55, %v1965_v25  ;;  %1475 = vadd.xlane.f32.xlu1 %v1474_v23  ;;  %v1794_v51 = vadd.f32 %v1632_v40, %v1631_v44  ;;  %v2939_v38 = vmul.f32 %v2811_v5, %v2316_v12  ;;  %v2940_v43 = vmul.f32 %v2812_v31, %v2316_v12  ;;  %v441_v23 = vld [vmem:[%s8170_s18 + $0x350] sm:$0xff]  ;;  %v442_v55 = vld [vmem:[%s8170_s18 + $0x358] sm:$0xff] }
 0x201   : > { %v2321_v52 = vsub.f32 1.5, %v2320_v48  ;;  %13700 = vst [vmem:[#allocation18_spill] sm:$0xff] %v9163_v27  ;;  %v1076_v63 = vpop.f32.mrf.mxu2  ;;  %v1285_v15 = vpop.f32.mrf.mxu3  ;;  %v13701_v44 = vld [vmem:[#allocation20_spill] sm:$0xff]  ;;  %v13702_v12 = vld [vmem:[#allocation21_spill] sm:$0xff] }
 0x202   : > { %v9165_v9 = vmul.f32 0.003921569, %v2029_v0  ;;  %v1077_v58 = vadd.f32 %v1076_v63, %v8221_v59  ;;  %1795 = vadd.xlane.f32.xlu2 %v1794_v51  ;;  %v661_v14 = vpop.f32.mrf.mxu0  ;;  %6533 = vst [vmem:[%s8546_s27 + $0x110] sm:$0xff] %v2939_v38  ;;  %v2813_v37 = vsub.f32 %v13701_v44, %v9071_v1  ;;  %v2814_v41 = vsub.f32 %v13702_v12, %v9071_v1 }
 0x203   : > { %v870_v25 = vpop.f32.mrf.mxu1  ;;  %v9171_v5 = vpop.eup %7087  ;;  %6534 = vst [vmem:[%s8546_s27 + $0x118] sm:$0xff] %v2940_v43  ;;  %v2322_v26 = vmul.f32 %v9129_v8, %v2321_v52  ;;  %v662_v48 = vadd.f32 %v661_v14, %v8216_v53  ;;  %v1633_v38 = vmul.f32 %v9163_v27, %v9163_v27 }
 0x204   : > { %v1434_v31 = vpop.xlane.xlu0 %1433  ;;  %v2328_v40 = vmul.f32 %v9171_v5, %v9139_v7  ;;  %7089 = vrsqrt.f32 %v9165_v9  ;;  %v9186_v0 = vadd.f32 %v1285_v15, %v1077_v58  ;;  %vm2334_vm9 = vweird.f32 %v9171_v5 }
 0x205   : > { %v9188_v51 = vmul.f32 0.00390625, %v1434_v31  ;;  %708 = vmatmul.f32.gmra.mxu0 %v441_v23  ;;  %917 = vmatmul.f32.gmra.mxu1 %v442_v55  ;;  %v2326_v43 = vsel %vm2325_vm8, %v9129_v8, %v2322_v26  ;;  %v9199_v12 = vadd.f32 %v870_v25, %v662_v48  ;;  %v1754_v8 = vpop.xlane.xlu1 %1753  ;;  %v2815_v25 = vsub.f32 %v8523_v4, %v9114_v24  ;;  %vm2335_vm11 = vmor %vm2333_vm10, %vm2334_vm9 }
 0x206   : > { %13703 = vst [vmem:[#allocation19_spill] sm:$0xff] %v9186_v0  ;;  %v2329_v52 = vmul.f32 %v9171_v5, %v2328_v40  ;;  %1126 = vmatmul.f32.gmra.mxu2 %v441_v23  ;;  %1335 = vmatmul.f32.gmra.mxu3 %v442_v55  ;;  %v2941_v63 = vmul.f32 %v2813_v37, %v2326_v43  ;;  %vm2343_vm13 = vweird.f32 %v9165_v9 }
 0x207   : > { %v2942_v14 = vmul.f32 %v2814_v41, %v2326_v43  ;;  %v1966_v1 = vmul.f32 %v9188_v51, %v1434_v31  ;;  %v1477_v15 = vadd.f32 %v9186_v0, %v9163_v27  ;;  %v1634_v58 = vmul.f32 %v9186_v0, %v9186_v0  ;;  %13704 = vst [vmem:[#allocation20_spill] sm:$0xff] %v9199_v12  ;;  %v443_v27 = vld [vmem:[%s8170_s18 + $0x360] sm:$0xff] }
 0x208   : > { %v2330_v44 = vmul.f32 0.5, %v2329_v52  ;;  %6535 = vst [vmem:[%s8546_s27 + $0x120] sm:$0xff] %v2941_v63  ;;  %v444_v52 = vld [vmem:[%s8170_s18 + $0x368] sm:$0xff] }
 0x209   : > { %v2030_v23 = vsub.f32 %v1754_v8, %v1966_v1  ;;  %1478 = vadd.xlane.f32.xlu0 %v1477_v15  ;;  %v1079_v55 = vpop.f32.mrf.mxu2  ;;  %v1288_v26 = vpop.f32.mrf.mxu3  ;;  %v1797_v37 = vadd.f32 %v1634_v58, %v1633_v38  ;;  %6536 = vst [vmem:[%s8546_s27 + $0x128] sm:$0xff] %v2942_v14  ;;  %v2816_v14 = vsub.f32 %v8540_v20, %v9114_v24 }
 0x20a   : > { %v9203_v31 = vpop.eup %7089  ;;  %v2331_v40 = vsub.f32 1.5, %v2330_v44  ;;  %v1080_v41 = vadd.f32 %v1079_v55, %v8221_v59  ;;  %v664_v43 = vpop.f32.mrf.mxu0  ;;  %v1635_v58 = vmul.f32 %v9199_v12, %v9199_v12 }
 0x20b   : > { %v873_v0 = vpop.f32.mrf.mxu1  ;;  %v2338_v48 = vmul.f32 %v9203_v31, %v9165_v9  ;;  %v9213_v63 = vmul.f32 0.003921569, %v2030_v23  ;;  %1798 = vadd.xlane.f32.xlu1 %v1797_v37  ;;  %v1437_v38 = vpop.xlane.xlu2 %1436  ;;  %v665_v8 = vadd.f32 %v664_v43, %v8216_v53  ;;  %vm2344_vm12 = vweird.f32 %v9203_v31 }
 0x20c   : > { %v9217_v1 = vadd.f32 %v1288_v26, %v1080_v41  ;;  %v9219_v15 = vmul.f32 0.00390625, %v1437_v38  ;;  %v2332_v4 = vmul.f32 %v9171_v5, %v2331_v40  ;;  %vm2345_vm14 = vmor %vm2343_vm13, %vm2344_vm12  ;;  %v2818_v9 = vsub.f32 %v8583_v29, %v9145_v30 }
 0x20d   : > { %v2339_v44 = vmul.f32 %v9203_v31, %v2338_v48  ;;  %7091 = vrsqrt.f32 %v9213_v63  ;;  %711 = vmatmul.f32.gmra.mxu0 %v443_v27  ;;  %920 = vmatmul.f32.gmra.mxu1 %v444_v52  ;;  %v1757_v55 = vpop.xlane.xlu0 %1756  ;;  %vm2353_vm0 = vweird.f32 %v9213_v63 }
 0x20e   : > { %13705 = vst [vmem:[#allocation21_spill] sm:$0xff] %v9217_v1  ;;  %v1967_v20 = vmul.f32 %v9219_v15, %v1437_v38  ;;  %1129 = vmatmul.f32.gmra.mxu2 %v443_v27  ;;  %1338 = vmatmul.f32.gmra.mxu3 %v444_v52  ;;  %v1480_v24 = vadd.f32 %v9217_v1, %v9199_v12  ;;  %v3035_v12 = vld [vmem:[#allocation8 + $0x10] sm:$0xff] }
 0x20f   : > { %v1636_v7 = vmul.f32 %v9217_v1, %v9217_v1  ;;  %v2340_v23 = vmul.f32 0.5, %v2339_v44  ;;  %v2336_v26 = vsel %vm2335_vm11, %v9171_v5, %v2332_v4  ;;  %v9237_v27 = vadd.f32 %v873_v0, %v665_v8  ;;  %v3036_v1 = vld [vmem:[#allocation8 + $0x18] sm:$0xff]  ;;  %3117 = vmatpush.msrb.mxu0 %v3035_v12 }
 0x210   : > { %v2031_v37 = vsub.f32 %v1757_v55, %v1967_v20  ;;  %1481 = vadd.xlane.f32.xlu2 %v1480_v24  ;;  %v2943_v41 = vmul.f32 %v2815_v25, %v2336_v26  ;;  %v2944_v43 = vmul.f32 %v2816_v14, %v2336_v26  ;;  %v3068_v44 = vld [vmem:[#allocation8 + $0x118] sm:$0xff]  ;;  %v445_v14 = vld [vmem:[%s8170_s18 + $0x370] sm:$0xff]  ;;  %3535 = vmatpush.msrb.mxu2 %v3036_v1 }
 0x211   : > { %v1800_v40 = vadd.f32 %v1636_v7, %v1635_v58  ;;  %v2341_v48 = vsub.f32 1.5, %v2340_v23  ;;  %v1082_v52 = vpop.f32.mrf.mxu2  ;;  %v1291_v38 = vpop.f32.mrf.mxu3  ;;  %v446_v20 = vld [vmem:[%s8170_s18 + $0x378] sm:$0xff]  ;;  %3744 = vmatpush.msrb.mxu3 %v3068_v44  ;;  %v2817_v7 = vsub.f32 %v8566_v34, %v9145_v30  ;;  %v1637_v34 = vmul.f32 %v9237_v27, %v9237_v27 }
 0x212   : > { %v9239_v5 = vmul.f32 0.003921569, %v2031_v37  ;;  %v1083_v58 = vadd.f32 %v1082_v52, %v8221_v59  ;;  %v667_v25 = vpop.f32.mrf.mxu0  ;;  %6537 = vst [vmem:[%s8546_s27 + $0x130] sm:$0xff] %v2943_v41 }
 0x213   : > { %1801 = vadd.xlane.f32.xlu0 %v1800_v40  ;;  %v876_v4 = vpop.f32.mrf.mxu1  ;;  %v9245_v24 = vpop.eup %7091  ;;  %6538 = vst [vmem:[%s8546_s27 + $0x138] sm:$0xff] %v2944_v43  ;;  %v2342_v8 = vmul.f32 %v9203_v31, %v2341_v48  ;;  %v668_v23 = vadd.f32 %v667_v25, %v8216_v53 }
 0x214   : > { %v1440_v0 = vpop.xlane.xlu1 %1439  ;;  %v2348_v1 = vmul.f32 %v9245_v24, %v9213_v63  ;;  %7093 = vrsqrt.f32 %v9239_v5  ;;  %v9260_v12 = vadd.f32 %v1291_v38, %v1083_v58  ;;  %vm2354_vm15 = vweird.f32 %v9245_v24 }
 0x215   : > { %v9262_v55 = vmul.f32 0.00390625, %v1440_v0  ;;  %714 = vmatmul.f32.gmra.mxu0 %v445_v14  ;;  %923 = vmatmul.f32.gmra.mxu1 %v446_v20  ;;  %v2346_v26 = vsel %vm2345_vm14, %v9203_v31, %v2342_v8  ;;  %v9273_v52 = vadd.f32 %v876_v4, %v668_v23  ;;  %v1760_v31 = vpop.xlane.xlu2 %1759  ;;  %v2819_v4 = vsub.f32 %v8599_v54, %v9188_v51  ;;  %vm2355_vm1 = vmor %vm2353_vm0, %vm2354_vm15 }
 0x216   : > { %v2349_v37 = vmul.f32 %v9245_v24, %v2348_v1  ;;  %1132 = vmatmul.f32.gmra.mxu2 %v445_v14  ;;  %1341 = vmatmul.f32.gmra.mxu3 %v446_v20  ;;  %v2945_v40 = vmul.f32 %v2817_v7, %v2346_v26  ;;  %v2946_v41 = vmul.f32 %v2818_v9, %v2346_v26  ;;  %v447_v1 = vld [vmem:[%s8170_s18 + $0x380] sm:$0xff]  ;;  %v448_v9 = vld [vmem:[%s8170_s18 + $0x388] sm:$0xff]  ;;  %v3067_v26 = vld [vmem:[#allocation8 + $0x110] sm:$0xff]  ;;  %vm2363_vm3 = vweird.f32 %v9239_v5 }
 0x217   : > { %v1968_v29 = vmul.f32 %v9262_v55, %v1440_v0  ;;  %v1483_v30 = vadd.f32 %v9260_v12, %v9237_v27  ;;  %v1638_v43 = vmul.f32 %v9260_v12, %v9260_v12  ;;  %3326 = vmatpush.msrb.mxu1 %v3067_v26  ;;  %v1639_v54 = vmul.f32 %v9273_v52, %v9273_v52 }
 0x218   : > { %v2350_v48 = vmul.f32 0.5, %v2349_v37  ;;  %6539 = vst [vmem:[%s8546_s27 + $0x140] sm:$0xff] %v2945_v40  ;;  %v2820_v40 = vsub.f32 %v8628_v50, %v9188_v51 }
 0x219   : > { %v2032_v38 = vsub.f32 %v1760_v31, %v1968_v29  ;;  %1484 = vadd.xlane.f32.xlu1 %v1483_v30  ;;  %v1085_v44 = vpop.f32.mrf.mxu2  ;;  %v1294_v58 = vpop.f32.mrf.mxu3  ;;  %v1803_v25 = vadd.f32 %v1638_v43, %v1637_v34  ;;  %6540 = vst [vmem:[%s8546_s27 + $0x148] sm:$0xff] %v2946_v41 }
 0x21a   : > { %v9277_v14 = vpop.eup %7093  ;;  %v2351_v20 = vsub.f32 1.5, %v2350_v48  ;;  %v1086_v0 = vadd.f32 %v1085_v44, %v8221_v59  ;;  %v670_v8 = vpop.f32.mrf.mxu0 }
 0x21b   : > { %v879_v7 = vpop.f32.mrf.mxu1  ;;  %v2358_v23 = vmul.f32 %v9277_v14, %v9239_v5  ;;  %v9287_v34 = vmul.f32 0.003921569, %v2032_v38  ;;  %1804 = vadd.xlane.f32.xlu2 %v1803_v25  ;;  %v1443_v37 = vpop.xlane.xlu0 %1442  ;;  %v671_v48 = vadd.f32 %v670_v8, %v8216_v53  ;;  %vm2364_vm2 = vweird.f32 %v9277_v14 }
 0x21c   : > { %v9291_v41 = vadd.f32 %v1294_v58, %v1086_v0  ;;  %v9293_v29 = vmul.f32 0.00390625, %v1443_v37  ;;  %v2352_v30 = vmul.f32 %v9245_v24, %v2351_v20  ;;  %vm2365_vm4 = vmor %vm2363_vm3, %vm2364_vm2  ;;  %v2822_v5 = vsub.f32 %v8666_v42, %v9219_v15 }
 0x21d   : > { %v2359_v43 = vmul.f32 %v9277_v14, %v2358_v23  ;;  %7095 = vrsqrt.f32 %v9287_v34  ;;  %717 = vmatmul.f32.gmra.mxu0 %v447_v1  ;;  %926 = vmatmul.f32.gmra.mxu1 %v448_v9  ;;  %v1763_v38 = vpop.xlane.xlu1 %1762  ;;  %vm2373_vm6 = vweird.f32 %v9287_v34 }
 0x21e   : > { %v1969_v50 = vmul.f32 %v9293_v29, %v1443_v37  ;;  %1135 = vmatmul.f32.gmra.mxu2 %v447_v1  ;;  %1344 = vmatmul.f32.gmra.mxu3 %v448_v9  ;;  %v1486_v51 = vadd.f32 %v9291_v41, %v9273_v52  ;;  %v1640_v63 = vmul.f32 %v9291_v41, %v9291_v41 }
 0x21f   : > { %v2360_v31 = vmul.f32 0.5, %v2359_v43  ;;  %v2356_v44 = vsel %vm2355_vm1, %v9245_v24, %v2352_v30  ;;  %v9311_v1 = vadd.f32 %v879_v7, %v671_v48  ;;  %v449_v43 = vld [vmem:[%s8170_s18 + $0x390] sm:$0xff] }
 0x220   : > { %v2033_v58 = vsub.f32 %v1763_v38, %v1969_v50  ;;  %1487 = vadd.xlane.f32.xlu0 %v1486_v51  ;;  %v1806_v25 = vadd.f32 %v1640_v63, %v1639_v54  ;;  %v2947_v20 = vmul.f32 %v2819_v4, %v2356_v44  ;;  %v2948_v0 = vmul.f32 %v2820_v40, %v2356_v44  ;;  %v450_v50 = vld [vmem:[%s8170_s18 + $0x398] sm:$0xff] }
 0x221   : > { %v2361_v8 = vsub.f32 1.5, %v2360_v31  ;;  %v1088_v9 = vpop.f32.mrf.mxu2  ;;  %v1297_v26 = vpop.f32.mrf.mxu3  ;;  %v2821_v54 = vsub.f32 %v8644_v28, %v9219_v15  ;;  %v1641_v28 = vmul.f32 %v9311_v1, %v9311_v1 }
 0x222   : > { %v9313_v23 = vmul.f32 0.003921569, %v2033_v58  ;;  %v1089_v24 = vadd.f32 %v1088_v9, %v8221_v59  ;;  %1807 = vadd.xlane.f32.xlu1 %v1806_v25  ;;  %v673_v37 = vpop.f32.mrf.mxu0  ;;  %6541 = vst [vmem:[%s8546_s27 + $0x150] sm:$0xff] %v2947_v20 }
 0x223   : > { %v882_v30 = vpop.f32.mrf.mxu1  ;;  %v9319_v4 = vpop.eup %7095  ;;  %6542 = vst [vmem:[%s8546_s27 + $0x158] sm:$0xff] %v2948_v0  ;;  %v2362_v7 = vmul.f32 %v9277_v14, %v2361_v8  ;;  %v674_v51 = vadd.f32 %v673_v37, %v8216_v53 }
 0x224   : > { %v1446_v40 = vpop.xlane.xlu2 %1445  ;;  %v2368_v48 = vmul.f32 %v9319_v4, %v9287_v34  ;;  %7097 = vrsqrt.f32 %v9313_v23  ;;  %v9334_v63 = vadd.f32 %v1297_v26, %v1089_v24  ;;  %vm2374_vm5 = vweird.f32 %v9319_v4 }
 0x225   : > { %v9336_v31 = vmul.f32 0.00390625, %v1446_v40  ;;  %720 = vmatmul.f32.gmra.mxu0 %v449_v43  ;;  %929 = vmatmul.f32.gmra.mxu1 %v450_v50  ;;  %v2366_v38 = vsel %vm2365_vm4, %v9277_v14, %v2362_v7  ;;  %v9347_v8 = vadd.f32 %v882_v30, %v674_v51  ;;  %v1766_v14 = vpop.xlane.xlu0 %1765  ;;  %v2823_v30 = vsub.f32 %v8681_v62, %v9262_v55  ;;  %vm2375_vm7 = vmor %vm2373_vm6, %vm2374_vm5 }
 0x226   : > { %v2369_v44 = vmul.f32 %v9319_v4, %v2368_v48  ;;  %1138 = vmatmul.f32.gmra.mxu2 %v449_v43  ;;  %1347 = vmatmul.f32.gmra.mxu3 %v450_v50  ;;  %v2949_v58 = vmul.f32 %v2821_v54, %v2366_v38  ;;  %v2950_v25 = vmul.f32 %v2822_v5, %v2366_v38  ;;  %v451_v48 = vld [vmem:[%s8170_s18 + $0x3a0] sm:$0xff]  ;;  %v452_v5 = vld [vmem:[%s8170_s18 + $0x3a8] sm:$0xff]  ;;  %vm2383_vm9 = vweird.f32 %v9313_v23 }
 0x227   : > { %v1970_v42 = vmul.f32 %v9336_v31, %v1446_v40  ;;  %v1489_v15 = vadd.f32 %v9334_v63, %v9311_v1  ;;  %v1642_v20 = vmul.f32 %v9334_v63, %v9334_v63 }
 0x228   : > { %v2370_v0 = vmul.f32 0.5, %v2369_v44  ;;  %6543 = vst [vmem:[%s8546_s27 + $0x160] sm:$0xff] %v2949_v58  ;;  %v2824_v44 = vsub.f32 %v8704_v22, %v9262_v55 }
 0x229   : > { %v2034_v9 = vsub.f32 %v1766_v14, %v1970_v42  ;;  %1490 = vadd.xlane.f32.xlu2 %v1489_v15  ;;  %v1091_v26 = vpop.f32.mrf.mxu2  ;;  %v1300_v24 = vpop.f32.mrf.mxu3  ;;  %v1809_v37 = vadd.f32 %v1642_v20, %v1641_v28  ;;  %6544 = vst [vmem:[%s8546_s27 + $0x168] sm:$0xff] %v2950_v25  ;;  %v1643_v42 = vmul.f32 %v9347_v8, %v9347_v8 }
 0x22a   : > { %v9351_v43 = vpop.eup %7097  ;;  %v2371_v50 = vsub.f32 1.5, %v2370_v0  ;;  %v1092_v40 = vadd.f32 %v1091_v26, %v8221_v59  ;;  %v676_v7 = vpop.f32.mrf.mxu0 }
 0x22b   : > { %v885_v54 = vpop.f32.mrf.mxu1  ;;  %v2378_v51 = vmul.f32 %v9351_v43, %v9313_v23  ;;  %v9361_v38 = vmul.f32 0.003921569, %v2034_v9  ;;  %1810 = vadd.xlane.f32.xlu0 %v1809_v37  ;;  %v1449_v28 = vpop.xlane.xlu1 %1448  ;;  %v677_v20 = vadd.f32 %v676_v7, %v8216_v53  ;;  %vm2384_vm8 = vweird.f32 %v9351_v43 }
 0x22c   : > { %v9365_v58 = vadd.f32 %v1300_v24, %v1092_v40  ;;  %v9367_v25 = vmul.f32 0.00390625, %v1449_v28  ;;  %v2372_v62 = vmul.f32 %v9319_v4, %v2371_v50  ;;  %vm2385_vm10 = vmor %vm2383_vm9, %vm2384_vm8  ;;  %v2826_v23 = vsub.f32 %v8740_v35, %v9293_v29 }
 0x22d   : > { %v2379_v15 = vmul.f32 %v9351_v43, %v2378_v51  ;;  %7099 = vrsqrt.f32 %v9361_v38  ;;  %723 = vmatmul.f32.gmra.mxu0 %v451_v48  ;;  %932 = vmatmul.f32.gmra.mxu1 %v452_v5  ;;  %v1769_v14 = vpop.xlane.xlu2 %1768  ;;  %v9385_v7 = vadd.f32 %v885_v54, %v677_v20  ;;  %v3034_v51 = vld [vmem:[#allocation8 + $0x8] sm:$0xff]  ;;  %vm2393_vm12 = vweird.f32 %v9361_v38 }
 0x22e   : > { %v1971_v22 = vmul.f32 %v9367_v25, %v1449_v28  ;;  %1141 = vmatmul.f32.gmra.mxu2 %v451_v48  ;;  %1350 = vmatmul.f32.gmra.mxu3 %v452_v5  ;;  %v1492_v55 = vadd.f32 %v9365_v58, %v9347_v8  ;;  %v1644_v34 = vmul.f32 %v9365_v58, %v9365_v58  ;;  %v3066_v28 = vld [vmem:[#allocation8 + $0x108] sm:$0xff] }
 0x22f   : > { %v2380_v0 = vmul.f32 0.5, %v2379_v15  ;;  %v2376_v9 = vsel %vm2375_vm7, %v9319_v4, %v2372_v62  ;;  %v3033_v15 = vld [vmem:[#allocation8] sm:$0xff]  ;;  %3536 = vmatpush.msrb.mxu2 %v3034_v51  ;;  %3745 = vmatpush.msrb.mxu3 %v3066_v28 }
 0x230   : > { %v2035_v26 = vsub.f32 %v1769_v14, %v1971_v22  ;;  %1493 = vadd.xlane.f32.xlu1 %v1492_v55  ;;  %v1812_v24 = vadd.f32 %v1644_v34, %v1643_v42  ;;  %v2951_v37 = vmul.f32 %v2823_v30, %v2376_v9  ;;  %v2952_v50 = vmul.f32 %v2824_v44, %v2376_v9  ;;  %v453_v44 = vld [vmem:[%s8170_s18 + $0x3b0] sm:$0xff]  ;;  %v454_v22 = vld [vmem:[%s8170_s18 + $0x3b8] sm:$0xff] }
 0x231   : > { %v2381_v40 = vsub.f32 1.5, %v2380_v0  ;;  %v1094_v48 = vpop.f32.mrf.mxu2  ;;  %v1303_v5 = vpop.f32.mrf.mxu3  ;;  %3118 = vmatpush.msrb.mxu0 %v3033_v15  ;;  %v2825_v34 = vsub.f32 %v8718_v10, %v9293_v29  ;;  %v1645_v10 = vmul.f32 %v9385_v7, %v9385_v7 }
 0x232   : > { %v9387_v4 = vmul.f32 0.003921569, %v2035_v26  ;;  %v1095_v42 = vadd.f32 %v1094_v48, %v8221_v59  ;;  %1813 = vadd.xlane.f32.xlu2 %v1812_v24  ;;  %v679_v30 = vpop.f32.mrf.mxu0  ;;  %6545 = vst [vmem:[%s8546_s27 + $0x170] sm:$0xff] %v2951_v37 }
 0x233   : > { %v888_v62 = vpop.f32.mrf.mxu1  ;;  %v9393_v55 = vpop.eup %7099  ;;  %6546 = vst [vmem:[%s8546_s27 + $0x178] sm:$0xff] %v2952_v50  ;;  %v2382_v20 = vmul.f32 %v9351_v43, %v2381_v40  ;;  %v680_v14 = vadd.f32 %v679_v30, %v8216_v53 }
 0x234   : > { %v1452_v54 = vpop.xlane.xlu0 %1451  ;;  %v2388_v0 = vmul.f32 %v9393_v55, %v9361_v38  ;;  %7101 = vrsqrt.f32 %v9387_v4  ;;  %v9408_v9 = vadd.f32 %v1303_v5, %v1095_v42  ;;  %vm2394_vm11 = vweird.f32 %v9393_v55 }
 0x235   : > { %v9410_v26 = vmul.f32 0.00390625, %v1452_v54  ;;  %726 = vmatmul.f32.gmra.mxu0 %v453_v44  ;;  %935 = vmatmul.f32.gmra.mxu1 %v454_v22  ;;  %v2386_v24 = vsel %vm2385_vm10, %v9351_v43, %v2382_v20  ;;  %v9421_v51 = vadd.f32 %v888_v62, %v680_v14  ;;  %v1772_v43 = vpop.xlane.xlu1 %1771  ;;  %vm2395_vm13 = vmor %vm2393_vm12, %vm2394_vm11  ;;  %vm2403_vm15 = vweird.f32 %v9387_v4 }
 0x236   : > { %v2389_v37 = vmul.f32 %v9393_v55, %v2388_v0  ;;  %1144 = vmatmul.f32.gmra.mxu2 %v453_v44  ;;  %1353 = vmatmul.f32.gmra.mxu3 %v454_v22  ;;  %v2953_v50 = vmul.f32 %v2825_v34, %v2386_v24  ;;  %v2954_v40 = vmul.f32 %v2826_v23, %v2386_v24  ;;  %v455_v34 = vld [vmem:[%s8170_s18 + $0x3c0] sm:$0xff]  ;;  %v456_v0 = vld [vmem:[%s8170_s18 + $0x3c8] sm:$0xff] }
 0x237   : > { %v1972_v35 = vmul.f32 %v9410_v26, %v1452_v54  ;;  %v1495_v29 = vadd.f32 %v9408_v9, %v9385_v7  ;;  %v1646_v48 = vmul.f32 %v9408_v9, %v9408_v9  ;;  %v3065_v23 = vld [vmem:[#allocation8 + $0x100] sm:$0xff] }
 0x238   : > { %v2390_v5 = vmul.f32 0.5, %v2389_v37  ;;  %6547 = vst [vmem:[%s8546_s27 + $0x180] sm:$0xff] %v2953_v50  ;;  %3327 = vmatpush.msrb.mxu1 %v3065_v23 }
 0x239   : > { %v2036_v28 = vsub.f32 %v1772_v43, %v1972_v35  ;;  %1496 = vadd.xlane.f32.xlu0 %v1495_v29  ;;  %v1097_v15 = vpop.f32.mrf.mxu2  ;;  %v1306_v42 = vpop.f32.mrf.mxu3  ;;  %v1815_v30 = vadd.f32 %v1646_v48, %v1645_v10  ;;  %6548 = vst [vmem:[%s8546_s27 + $0x188] sm:$0xff] %v2954_v40  ;;  %v1647_v40 = vmul.f32 %v9421_v51, %v9421_v51 }
 0x23a   : > { %v9425_v44 = vpop.eup %7101  ;;  %v1098_v22 = vadd.f32 %v1097_v15, %v8221_v59  ;;  %v682_v54 = vpop.f32.mrf.mxu0  ;;  %v2391_v24 = vsub.f32 1.5, %v2390_v5 }
 0x23b   : > { %v891_v20 = vpop.f32.mrf.mxu1  ;;  %v2398_v62 = vmul.f32 %v9425_v44, %v9387_v4  ;;  %v9432_v14 = vmul.f32 0.003921569, %v2036_v28  ;;  %1816 = vadd.xlane.f32.xlu1 %v1815_v30  ;;  %v1455_v37 = vpop.xlane.xlu2 %1454  ;;  %v683_v29 = vadd.f32 %v682_v54, %v8216_v53  ;;  %v2828_v54 = vsub.f32 %v8778_v61, %v9336_v31 }
 0x23c   : > { %v9434_v10 = vadd.f32 %v1306_v42, %v1098_v22  ;;  %v9436_v50 = vmul.f32 0.00390625, %v1455_v37  ;;  %v2392_v15 = vmul.f32 %v9393_v55, %v2391_v24  ;;  %v2827_v22 = vsub.f32 %v8755_v11, %v9336_v31 }
 0x23d   : > { %v2399_v35 = vmul.f32 %v9425_v44, %v2398_v62  ;;  %7103 = vrsqrt.f32 %v9432_v14  ;;  %729 = vmatmul.f32.gmra.mxu0 %v455_v34  ;;  %938 = vmatmul.f32.gmra.mxu1 %v456_v0  ;;  %v1775_v28 = vpop.xlane.xlu0 %1774  ;;  %vm2404_vm14 = vweird.f32 %v9425_v44  ;;  %vm2413_vm2 = vweird.f32 %v9432_v14 }
 0x23e   : > { %v1973_v48 = vmul.f32 %v9436_v50, %v1455_v37  ;;  %1147 = vmatmul.f32.gmra.mxu2 %v455_v34  ;;  %1356 = vmatmul.f32.gmra.mxu3 %v456_v0  ;;  %v1498_v5 = vadd.f32 %v9434_v10, %v9421_v51  ;;  %v1648_v43 = vmul.f32 %v9434_v10, %v9434_v10  ;;  %vm2405_vm0 = vmor %vm2403_vm15, %vm2404_vm14 }
 0x23f   : > { %v9455_v34 = vadd.f32 %v891_v20, %v683_v29  ;;  %v2396_v23 = vsel %vm2395_vm13, %v9393_v55, %v2392_v15  ;;  %v2400_v24 = vmul.f32 0.5, %v2399_v35 }
 0x240   : > { %v2037_v42 = vsub.f32 %v1775_v28, %v1973_v48  ;;  %1499 = vadd.xlane.f32.xlu2 %v1498_v5  ;;  %v1818_v30 = vadd.f32 %v1648_v43, %v1647_v40  ;;  %v457_v48 = vld [vmem:[%s8170_s18 + $0x3d0] sm:$0xff]  ;;  %v458_v5 = vld [vmem:[%s8170_s18 + $0x3d8] sm:$0xff]  ;;  %v2955_v11 = vmul.f32 %v2827_v22, %v2396_v23  ;;  %v2956_v43 = vmul.f32 %v2828_v54, %v2396_v23 }
 0x241   : > { %v1100_v0 = vpop.f32.mrf.mxu2  ;;  %v1309_v38 = vpop.f32.mrf.mxu3  ;;  %v1649_v29 = vmul.f32 %v9455_v34, %v9455_v34  ;;  %v2401_v15 = vsub.f32 1.5, %v2400_v24 }
 0x242   : > { %v1101_v62 = vadd.f32 %v1100_v0, %v8221_v59  ;;  %1819 = vadd.xlane.f32.xlu0 %v1818_v30  ;;  %v685_v37 = vpop.f32.mrf.mxu0  ;;  %v9463_v61 = vmul.f32 0.003921569, %v2037_v42  ;;  %6549 = vst [vmem:[%s8546_s27 + $0x190] sm:$0xff] %v2955_v11  ;;  %v459_v11 = vld [vmem:[%s8170_s18 + $0x3e0] sm:$0xff] }
 0x243   : > { %v894_v40 = vpop.f32.mrf.mxu1  ;;  %v9461_v28 = vpop.eup %7103  ;;  %v686_v20 = vadd.f32 %v685_v37, %v8216_v53  ;;  %6550 = vst [vmem:[%s8546_s27 + $0x198] sm:$0xff] %v2956_v43  ;;  %v460_v43 = vld [vmem:[%s8170_s18 + $0x3e8] sm:$0xff] }
 0x244   : > { %v1458_v31 = vpop.xlane.xlu1 %1457  ;;  %v2408_v55 = vmul.f32 %v9461_v28, %v9432_v14  ;;  %v9469_v35 = vadd.f32 %v1309_v38, %v1101_v62  ;;  %7105 = vrsqrt.f32 %v9463_v61  ;;  %vm2414_vm1 = vweird.f32 %v9461_v28 }
 0x245   : > { %732 = vmatmul.f32.gmra.mxu0 %v457_v48  ;;  %941 = vmatmul.f32.gmra.mxu1 %v458_v5  ;;  %v9474_v30 = vmul.f32 0.00390625, %v1458_v31  ;;  %v9482_v54 = vadd.f32 %v894_v40, %v686_v20  ;;  %vm2415_vm3 = vmor %vm2413_vm2, %vm2414_vm1  ;;  %v2832_v14 = vsub.f32 %v8852_v49, %v9410_v26  ;;  %vm2423_vm5 = vweird.f32 %v9463_v61 }
 0x246   : > { %13706 = vst [vmem:[#allocation22_spill] sm:$0xff] %v9469_v35  ;;  %1150 = vmatmul.f32.gmra.mxu2 %v457_v48  ;;  %1359 = vmatmul.f32.gmra.mxu3 %v458_v5  ;;  %v1501_v42 = vadd.f32 %v9469_v35, %v9455_v34  ;;  %v1650_v22 = vmul.f32 %v9469_v35, %v9469_v35 }
 0x247   : > { %13707 = vst [vmem:[#allocation23_spill] sm:$0xff] %v9482_v54  ;;  %v2409_v0 = vmul.f32 %v9461_v28, %v2408_v55  ;;  %v1974_v62 = vmul.f32 %v9474_v30, %v1458_v31  ;;  %v2402_v35 = vmul.f32 %v9425_v44, %v2401_v15  ;;  %v1651_v4 = vmul.f32 %v9482_v54, %v9482_v54 }
 0x248   : > { %1502 = vadd.xlane.f32.xlu1 %v1501_v42  ;;  %v1821_v24 = vadd.f32 %v1650_v22, %v1649_v29  ;;  %v1778_v42 = vpop.xlane.xlu2 %1777  ;;  %v2829_v15 = vsub.f32 %v8792_v13, %v9367_v25 }
 0x249   : > { %v1103_v38 = vpop.f32.mrf.mxu2  ;;  %v1312_v23 = vpop.f32.mrf.mxu3  ;;  %v2406_v31 = vsel %vm2405_vm0, %v9425_v44, %v2402_v35  ;;  %v2410_v29 = vmul.f32 0.5, %v2409_v0 }
 0x24a   : > { %v1104_v37 = vadd.f32 %v1103_v38, %v8221_v59  ;;  %v688_v48 = vpop.f32.mrf.mxu0  ;;  %1822 = vadd.xlane.f32.xlu2 %v1821_v24  ;;  %v9498_v55 = vpop.eup %7105  ;;  %v2830_v38 = vsub.f32 %v8814_v60, %v9367_v25  ;;  %v2957_v24 = vmul.f32 %v2829_v15, %v2406_v31 }
 0x24b   : > { %v897_v5 = vpop.f32.mrf.mxu1  ;;  %v1461_v20 = vpop.xlane.xlu0 %1460  ;;  %v689_v22 = vadd.f32 %v688_v48, %v8216_v53  ;;  %v2418_v13 = vmul.f32 %v9498_v55, %v9463_v61  ;;  %v2411_v25 = vsub.f32 1.5, %v2410_v29  ;;  %vm2424_vm4 = vweird.f32 %v9498_v55 }
 0x24c   : > { %v9493_v40 = vadd.f32 %v1312_v23, %v1104_v37  ;;  %v2038_v23 = vsub.f32 %v1778_v42, %v1974_v62  ;;  %v9509_v0 = vmul.f32 0.00390625, %v1461_v20  ;;  %v2958_v37 = vmul.f32 %v2830_v38, %v2406_v31  ;;  %6551 = vst [vmem:[%s8546_s27 + $0x1a0] sm:$0xff] %v2957_v24  ;;  %v461_v31 = vld [vmem:[%s8170_s18 + $0x3f0] sm:$0xff]  ;;  %v462_v38 = vld [vmem:[%s8170_s18 + $0x3f8] sm:$0xff]  ;;  %vm2425_vm6 = vmor %vm2423_vm5, %vm2424_vm4 }
 0x24d   : > { %735 = vmatmul.f32.gmra.mxu0 %v459_v11  ;;  %944 = vmatmul.f32.gmra.mxu1 %v460_v43  ;;  %v9513_v62 = vadd.f32 %v897_v5, %v689_v22  ;;  %v2419_v5 = vmul.f32 %v9498_v55, %v2418_v13 }
 0x24e   : > { %13708 = vst [vmem:[#allocation24_spill] sm:$0xff] %v9493_v40  ;;  %1153 = vmatmul.f32.gmra.mxu2 %v459_v11  ;;  %1362 = vmatmul.f32.gmra.mxu3 %v460_v43  ;;  %v1504_v44 = vadd.f32 %v9493_v40, %v9482_v54  ;;  %v1652_v35 = vmul.f32 %v9493_v40, %v9493_v40  ;;  %v9516_v43 = vmul.f32 0.003921569, %v2038_v23 }
 0x24f   : > { %13709 = vst [vmem:[#allocation25_spill] sm:$0xff] %v9513_v62  ;;  %v1975_v54 = vmul.f32 %v9509_v0, %v1461_v20  ;;  %v1653_v23 = vmul.f32 %v9513_v62, %v9513_v62  ;;  %v1781_v20 = vpop.xlane.xlu1 %1780 }
 0x250   : > { %1505 = vadd.xlane.f32.xlu0 %v1504_v44  ;;  %v1824_v60 = vadd.f32 %v1652_v35, %v1651_v4  ;;  %6552 = vst [vmem:[%s8546_s27 + $0x1a8] sm:$0xff] %v2958_v37  ;;  %v2412_v44 = vmul.f32 %v9461_v28, %v2411_v25  ;;  %7107 = vrsqrt.f32 %v9516_v43  ;;  %v2831_v35 = vsub.f32 %v8829_v18, %v9410_v26 }
 0x251   : > { %v1106_v48 = vpop.f32.mrf.mxu2  ;;  %v1315_v11 = vpop.f32.mrf.mxu3  ;;  %v2039_v24 = vsub.f32 %v1781_v20, %v1975_v54  ;;  %vm2433_vm8 = vweird.f32 %v9516_v43 }
 0x252   : > { %v1107_v42 = vadd.f32 %v1106_v48, %v8221_v59  ;;  %1825 = vadd.xlane.f32.xlu1 %v1824_v60  ;;  %v691_v15 = vpop.f32.mrf.mxu0  ;;  %v2420_v60 = vmul.f32 0.5, %v2419_v5  ;;  %v2416_v18 = vsel %vm2415_vm3, %v9461_v28, %v2412_v44 }
 0x253   : > { %v900_v40 = vpop.f32.mrf.mxu1  ;;  %v692_v4 = vadd.f32 %v691_v15, %v8216_v53  ;;  %v1464_v22 = vpop.xlane.xlu2 %1463  ;;  %v2959_v15 = vmul.f32 %v2831_v35, %v2416_v18  ;;  %v9549_v5 = vmul.f32 0.003921569, %v2039_v24  ;;  %v7689_v35 = vld [vmem:[%s8546_s27] sm:$0xff] }
 0x254   : > { %v9526_v29 = vadd.f32 %v1315_v11, %v1107_v42  ;;  %v9545_v48 = vmul.f32 0.00390625, %v1464_v22  ;;  %v2421_v28 = vsub.f32 1.5, %v2420_v60 }
 0x255   : > { %738 = vmatmul.f32.gmra.mxu0 %v461_v31  ;;  %947 = vmatmul.f32.gmra.mxu1 %v462_v38  ;;  %v9543_v25 = vadd.f32 %v900_v40, %v692_v4  ;;  %6553 = vst [vmem:[%s8546_s27 + $0x1b0] sm:$0xff] %v2959_v15  ;;  %7109 = vrsqrt.f32 %v9549_v5  ;;  %vm2443_vm11 = vweird.f32 %v9549_v5 }
 0x256   : > { %13710 = vst [vmem:[#allocation26_spill] sm:$0xff] %v9526_v29  ;;  %1156 = vmatmul.f32.gmra.mxu2 %v461_v31  ;;  %1365 = vmatmul.f32.gmra.mxu3 %v462_v38  ;;  %v1507_v37 = vadd.f32 %v9526_v29, %v9513_v62  ;;  %v1654_v13 = vmul.f32 %v9526_v29, %v9526_v29  ;;  %v9552_v40 = vpop.eup %7107 }
 0x257   : > { %13711 = vst [vmem:[#allocation27_spill] sm:$0xff] %v9543_v25  ;;  %v2960_v31 = vmul.f32 %v2832_v14, %v2416_v18  ;;  %v1976_v4 = vmul.f32 %v9545_v48, %v1464_v22  ;;  %v1784_v14 = vpop.xlane.xlu0 %1783  ;;  %vm2434_vm7 = vweird.f32 %v9552_v40 }
 0x258   : > { %1508 = vadd.xlane.f32.xlu2 %v1507_v37  ;;  %v1827_v42 = vadd.f32 %v1654_v13, %v1653_v23  ;;  %v1655_v23 = vmul.f32 %v9543_v25, %v9543_v25  ;;  %v7690_v37 = vld [vmem:[%s8546_s27 + $0x8] sm:$0xff]  ;;  %v2428_v13 = vmul.f32 %v9552_v40, %v9516_v43  ;;  %vm2435_vm9 = vmor %vm2433_vm8, %vm2434_vm7 }
 0x259   : > { %v1109_v11 = vpop.f32.mrf.mxu2  ;;  %v1318_v54 = vpop.f32.mrf.mxu3  ;;  %6554 = vst [vmem:[%s8546_s27 + $0x1b8] sm:$0xff] %v2960_v31  ;;  %v2040_v60 = vsub.f32 %v1784_v14, %v1976_v4  ;;  %v2833_v31 = vsub.f32 %v8866_v32, %v9436_v50 }
 0x25a   : > { %v1110_v38 = vadd.f32 %v1109_v11, %v8221_v59  ;;  %v694_v49 = vpop.f32.mrf.mxu0  ;;  %1828 = vadd.xlane.f32.xlu0 %v1827_v42  ;;  %v2422_v11 = vmul.f32 %v9498_v55, %v2421_v28 }
 0x25b   : > { %v903_v26 = vpop.f32.mrf.mxu1  ;;  %v695_v20 = vadd.f32 %v694_v49, %v8216_v53 }
 0x25c   : > { %v9555_v44 = vadd.f32 %v1318_v54, %v1110_v38  ;;  %v2834_v38 = vsub.f32 %v8888_v39, %v9436_v50  ;;  %v2426_v28 = vsel %vm2425_vm6, %v9498_v55, %v2422_v11  ;;  %v9587_v50 = vpop.eup %7109 }
 0x25d   : > { %3119 = vmatmul.f32.vlgmr.msrb.gmra.mxu0 %v7689_v35  ;;  %3328 = vmatmul.f32.vlgmr.msrb.gmra.mxu1 %v7690_v37  ;;  %v9573_v54 = vadd.f32 %v903_v26, %v695_v20  ;;  %v2429_v26 = vmul.f32 %v9552_v40, %v2428_v13  ;;  %v2961_v20 = vmul.f32 %v2833_v31, %v2426_v28  ;;  %vm2444_vm10 = vweird.f32 %v9587_v50 }
 0x25e   : > { %13712 = vst [vmem:[#allocation28_spill] sm:$0xff] %v9555_v44  ;;  %3537 = vmatmul.f32.vlgmr.msrb.gmra.mxu2 %v7689_v35  ;;  %3746 = vmatmul.f32.vlgmr.msrb.gmra.mxu3 %v7690_v37  ;;  %v1510_v24 = vadd.f32 %v9555_v44, %v9543_v25  ;;  %v1656_v22 = vmul.f32 %v9555_v44, %v9555_v44  ;;  %v9582_v37 = vmul.f32 0.003921569, %v2040_v60  ;;  %vm2445_vm12 = vmor %vm2443_vm11, %vm2444_vm10 }
 0x25f   : > { %13713 = vst [vmem:[#allocation29_spill] sm:$0xff] %v9573_v54  ;;  %v2962_v35 = vmul.f32 %v2834_v38, %v2426_v28  ;;  %v1657_v55 = vmul.f32 %v9573_v54, %v9573_v54  ;;  %v2430_v60 = vmul.f32 0.5, %v2429_v26  ;;  %v2438_v11 = vmul.f32 %v9587_v50, %v9549_v5 }
 0x260   : > { %1511 = vadd.xlane.f32.xlu1 %v1510_v24  ;;  %v1830_v18 = vadd.f32 %v1656_v22, %v1655_v23  ;;  %v1467_v23 = vpop.xlane.xlu1 %1466  ;;  %v7691_v24 = vld [vmem:[%s8546_s27 + $0x10] sm:$0xff]  ;;  %v7692_v22 = vld [vmem:[%s8546_s27 + $0x18] sm:$0xff]  ;;  %6555 = vst [vmem:[%s8546_s27 + $0x1c0] sm:$0xff] %v2961_v20  ;;  %7111 = vrsqrt.f32 %v9582_v37  ;;  %v2837_v5 = vsub.f32 %v8940_v19, %v9509_v0  ;;  %vm2453_vm14 = vweird.f32 %v9582_v37 }
 0x261   : > { %v1112_v42 = vpop.f32.mrf.mxu2  ;;  %v1321_v15 = vpop.f32.mrf.mxu3  ;;  %v9594_v13 = vmul.f32 0.00390625, %v1467_v23  ;;  %6556 = vst [vmem:[%s8546_s27 + $0x1c8] sm:$0xff] %v2962_v35  ;;  %v2431_v35 = vsub.f32 1.5, %v2430_v60 }
 0x262   : > { %v1113_v61 = vadd.f32 %v1112_v42, %v8221_v59  ;;  %1831 = vadd.xlane.f32.xlu2 %v1830_v18  ;;  %v697_v49 = vpop.f32.mrf.mxu0 }
 0x263   : > { %v906_v4 = vpop.f32.mrf.mxu1  ;;  %v698_v39 = vadd.f32 %v697_v49, %v8216_v53  ;;  %v1977_v49 = vmul.f32 %v9594_v13, %v1467_v23 }
 0x264   : > { %v9584_v32 = vadd.f32 %v1321_v15, %v1113_v61  ;;  %v1470_v15 = vpop.xlane.xlu0 %1469 }
 0x265   : > { %3122 = vmatmul.f32.gmra.mxu0 %v7691_v24  ;;  %3331 = vmatmul.f32.gmra.mxu1 %v7692_v22  ;;  %v9604_v42 = vadd.f32 %v906_v4, %v698_v39 }
 0x266   : > { %13714 = vst [vmem:[#allocation30_spill] sm:$0xff] %v9584_v32  ;;  %3540 = vmatmul.f32.gmra.mxu2 %v7691_v24  ;;  %3749 = vmatmul.f32.gmra.mxu3 %v7692_v22  ;;  %v1513_v14 = vadd.f32 %v9584_v32, %v9573_v54  ;;  %v1658_v18 = vmul.f32 %v9584_v32, %v9584_v32  ;;  %v1787_v24 = vpop.xlane.xlu2 %1786  ;;  %v9619_v60 = vpop.eup %7111 }
 0x267   : > { %13715 = vst [vmem:[#allocation31_spill] sm:$0xff] %v9604_v42  ;;  %v2439_v22 = vmul.f32 %v9587_v50, %v2438_v11  ;;  %v1659_v39 = vmul.f32 %v9604_v42, %v9604_v42  ;;  %vm2454_vm13 = vweird.f32 %v9619_v60 }
 0x268   : > { %1514 = vadd.xlane.f32.xlu0 %v1513_v14  ;;  %v1833_v61 = vadd.f32 %v1658_v18, %v1657_v55  ;;  %v9614_v55 = vmul.f32 0.00390625, %v1470_v15  ;;  %v7693_v14 = vld [vmem:[%s8546_s27 + $0x20] sm:$0xff]  ;;  %v7694_v18 = vld [vmem:[%s8546_s27 + $0x28] sm:$0xff]  ;;  %vm2455_vm15 = vmor %vm2453_vm14, %vm2454_vm13 }
 0x269   : > { %v1115_v31 = vpop.f32.mrf.mxu2  ;;  %v1324_v38 = vpop.f32.mrf.mxu3 }
 0x26a   : > { %v1116_v28 = vadd.f32 %v1115_v31, %v8221_v59  ;;  %v700_v26 = vpop.f32.mrf.mxu0  ;;  %1834 = vadd.xlane.f32.xlu1 %v1833_v61  ;;  %v2041_v31 = vsub.f32 %v1787_v24, %v1977_v49  ;;  %v2432_v61 = vmul.f32 %v9552_v40, %v2431_v35  ;;  %v2835_v49 = vsub.f32 %v8903_v21, %v9474_v30 }
 0x26b   : > { %v909_v20 = vpop.f32.mrf.mxu1  ;;  %v701_v23 = vadd.f32 %v700_v26, %v8216_v53  ;;  %v2836_v24 = vsub.f32 %v8926_v2, %v9474_v30 }
 0x26c   : > { %v9609_v4 = vadd.f32 %v1324_v38, %v1116_v28  ;;  %v2440_v28 = vmul.f32 0.5, %v2439_v22  ;;  %v2436_v22 = vsel %vm2435_vm9, %v9552_v40, %v2432_v61  ;;  %v7695_v61 = vld [vmem:[%s8546_s27 + $0x30] sm:$0xff] }
 0x26d   : > { %3125 = vmatmul.f32.gmra.mxu0 %v7693_v14  ;;  %3334 = vmatmul.f32.gmra.mxu1 %v7694_v18  ;;  %v9636_v43 = vadd.f32 %v909_v20, %v701_v23 }
 0x26e   : > { %13716 = vst [vmem:[#allocation32_spill] sm:$0xff] %v9609_v4  ;;  %3543 = vmatmul.f32.gmra.mxu2 %v7693_v14  ;;  %3752 = vmatmul.f32.gmra.mxu3 %v7694_v18  ;;  %v1516_v11 = vadd.f32 %v9609_v4, %v9604_v42  ;;  %v1660_v38 = vmul.f32 %v9609_v4, %v9609_v4  ;;  %v1473_v20 = vpop.xlane.xlu2 %1472  ;;  %v2441_v23 = vsub.f32 1.5, %v2440_v28  ;;  %v1793_v19 = vpop.xlane.xlu0 %1792 }
 0x26f   : > { %v2448_v14 = vmul.f32 %v9619_v60, %v9582_v37  ;;  %v1978_v18 = vmul.f32 %v9614_v55, %v1470_v15  ;;  %13717 = vst [vmem:[#allocation33_spill] sm:$0xff] %v9636_v43  ;;  %v1790_v15 = vpop.xlane.xlu1 %1789  ;;  %v2839_v37 = vsub.f32 %v8977_v6, %v9545_v48 }
 0x270   : > { %1517 = vadd.xlane.f32.xlu2 %v1516_v11  ;;  %v1836_v26 = vadd.f32 %v1660_v38, %v1659_v39  ;;  %v9639_v39 = vmul.f32 0.003921569, %v2041_v31  ;;  %v2963_v11 = vmul.f32 %v2835_v49, %v2436_v22  ;;  %v2964_v38 = vmul.f32 %v2836_v24, %v2436_v22 }
 0x271   : > { %v1118_v35 = vpop.f32.mrf.mxu2  ;;  %v1327_v4 = vpop.f32.mrf.mxu3  ;;  %v2449_v40 = vmul.f32 %v9619_v60, %v2448_v14  ;;  %v2042_v31 = vsub.f32 %v1790_v15, %v1978_v18  ;;  %v9653_v49 = vmul.f32 0.00390625, %v1473_v20 }
 0x272   : > { %v1119_v21 = vadd.f32 %v1118_v35, %v8221_v59  ;;  %1837 = vadd.xlane.f32.xlu0 %v1836_v26  ;;  %v703_v2 = vpop.f32.mrf.mxu0  ;;  %6557 = vst [vmem:[%s8546_s27 + $0x1d0] sm:$0xff] %v2963_v11  ;;  %v7696_v35 = vld [vmem:[%s8546_s27 + $0x38] sm:$0xff]  ;;  %v1661_v26 = vmul.f32 %v9636_v43, %v9636_v43  ;;  %7113 = vrsqrt.f32 %v9639_v39  ;;  %v2442_v11 = vmul.f32 %v9587_v50, %v2441_v23 }
 0x273   : > { %v912_v30 = vpop.f32.mrf.mxu1  ;;  %v704_v32 = vadd.f32 %v703_v2, %v8216_v53  ;;  %6558 = vst [vmem:[%s8546_s27 + $0x1d8] sm:$0xff] %v2964_v38  ;;  %v2450_v14 = vmul.f32 0.5, %v2449_v40  ;;  %v9663_v18 = vmul.f32 0.003921569, %v2042_v31  ;;  %v1979_v38 = vmul.f32 %v9653_v49, %v1473_v20 }
 0x274   : > { %v9642_v42 = vadd.f32 %v1327_v4, %v1119_v21  ;;  %v2446_v40 = vsel %vm2445_vm12, %v9587_v50, %v2442_v11  ;;  %v7698_v50 = vld [vmem:[%s8546_s27 + $0x48] sm:$0xff]  ;;  %vm2463_vm1 = vweird.f32 %v9639_v39 }
 0x275   : > { %3128 = vmatmul.f32.gmra.mxu0 %v7695_v61  ;;  %3337 = vmatmul.f32.gmra.mxu1 %v7696_v35  ;;  %v9661_v24 = vadd.f32 %v912_v30, %v704_v32  ;;  %v2838_v32 = vsub.f32 %v8961_v56, %v9509_v0  ;;  %7115 = vrsqrt.f32 %v9663_v18  ;;  %v7697_v0 = vld [vmem:[%s8546_s27 + $0x40] sm:$0xff]  ;;  %vm2473_vm4 = vweird.f32 %v9663_v18 }
 0x276   : > { %13718 = vst [vmem:[#allocation34_spill] sm:$0xff] %v9642_v42  ;;  %3546 = vmatmul.f32.gmra.mxu2 %v7695_v61  ;;  %3755 = vmatmul.f32.gmra.mxu3 %v7696_v35  ;;  %v1519_v4 = vadd.f32 %v9642_v42, %v9636_v43  ;;  %v1662_v28 = vmul.f32 %v9642_v42, %v9642_v42 }
 0x277   : > { %13719 = vst [vmem:[#allocation35_spill] sm:$0xff] %v9661_v24  ;;  %v1476_v30 = vpop.xlane.xlu1 %1475  ;;  %v1663_v20 = vmul.f32 %v9661_v24, %v9661_v24 }
 0x278   : > { %1520 = vadd.xlane.f32.xlu1 %v1519_v4  ;;  %v1839_v2 = vadd.f32 %v1662_v28, %v1661_v26  ;;  %v9673_v23 = vpop.eup %7113  ;;  %v2965_v26 = vmul.f32 %v2837_v5, %v2446_v40  ;;  %v2966_v4 = vmul.f32 %v2838_v32, %v2446_v40  ;;  %v2451_v28 = vsub.f32 1.5, %v2450_v14 }
 0x279   : > { %v1121_v22 = vpop.f32.mrf.mxu2  ;;  %v1330_v21 = vpop.f32.mrf.mxu3  ;;  %v2458_v11 = vmul.f32 %v9673_v23, %v9639_v39  ;;  %vm2464_vm0 = vweird.f32 %v9673_v23 }
 0x27a   : > { %v1122_v15 = vadd.f32 %v1121_v22, %v8221_v59  ;;  %v706_v61 = vpop.f32.mrf.mxu0  ;;  %1840 = vadd.xlane.f32.xlu2 %v1839_v2  ;;  %v2043_v22 = vsub.f32 %v1793_v19, %v1979_v38  ;;  %6559 = vst [vmem:[%s8546_s27 + $0x1e0] sm:$0xff] %v2965_v26  ;;  %vm2465_vm2 = vmor %vm2463_vm1, %vm2464_vm0 }
 0x27b   : > { %v915_v35 = vpop.f32.mrf.mxu1  ;;  %v707_v56 = vadd.f32 %v706_v61, %v8216_v53  ;;  %6560 = vst [vmem:[%s8546_s27 + $0x1e8] sm:$0xff] %v2966_v4  ;;  %v9701_v4 = vpop.eup %7115 }
 0x27c   : > { %v9675_v31 = vadd.f32 %v1330_v21, %v1122_v15  ;;  %v9683_v21 = vmul.f32 0.00390625, %v1476_v30  ;;  %v9696_v32 = vmul.f32 0.003921569, %v2043_v22  ;;  %v1796_v22 = vpop.xlane.xlu2 %1795  ;;  %vm2474_vm3 = vweird.f32 %v9701_v4 }
 0x27d   : > { %3131 = vmatmul.f32.gmra.mxu0 %v7697_v0  ;;  %3340 = vmatmul.f32.gmra.mxu1 %v7698_v50  ;;  %v9694_v38 = vadd.f32 %v915_v35, %v707_v56  ;;  %v2459_v35 = vmul.f32 %v9673_v23, %v2458_v11  ;;  %vm2475_vm5 = vmor %vm2473_vm4, %vm2474_vm3 }
 0x27e   : > { %13720 = vst [vmem:[#allocation36_spill] sm:$0xff] %v9675_v31  ;;  %3549 = vmatmul.f32.gmra.mxu2 %v7697_v0  ;;  %3758 = vmatmul.f32.gmra.mxu3 %v7698_v50  ;;  %v1522_v2 = vadd.f32 %v9675_v31, %v9661_v24  ;;  %v1664_v14 = vmul.f32 %v9675_v31, %v9675_v31  ;;  %7117 = vrsqrt.f32 %v9696_v32  ;;  %vm2483_vm7 = vweird.f32 %v9696_v32 }
 0x27f   : > { %13721 = vst [vmem:[#allocation37_spill] sm:$0xff] %v9694_v38  ;;  %v1980_v40 = vmul.f32 %v9683_v21, %v1476_v30  ;;  %v7699_v30 = vld [vmem:[%s8546_s27 + $0x50] sm:$0xff] }
 0x280   : > { %1523 = vadd.xlane.f32.xlu0 %v1522_v2  ;;  %v1842_v15 = vadd.f32 %v1664_v14, %v1663_v20  ;;  %v2452_v20 = vmul.f32 %v9619_v60, %v2451_v28  ;;  %v7700_v2 = vld [vmem:[%s8546_s27 + $0x58] sm:$0xff]  ;;  %v1665_v14 = vmul.f32 %v9694_v38, %v9694_v38 }
 0x281   : > { %v1124_v61 = vpop.f32.mrf.mxu2  ;;  %v1333_v5 = vpop.f32.mrf.mxu3  ;;  %v2044_v11 = vsub.f32 %v1796_v22, %v1980_v40 }
 0x282   : > { %v1125_v19 = vadd.f32 %v1124_v61, %v8221_v59  ;;  %1843 = vadd.xlane.f32.xlu1 %v1842_v15  ;;  %v709_v0 = vpop.f32.mrf.mxu0  ;;  %v2456_v28 = vsel %vm2455_vm15, %v9619_v60, %v2452_v20  ;;  %v2840_v61 = vsub.f32 %v8995_v3, %v9545_v48  ;;  %v1479_v60 = vpop.xlane.xlu0 %1478 }
 0x283   : > { %v918_v26 = vpop.f32.mrf.mxu1  ;;  %v710_v50 = vadd.f32 %v709_v0, %v8216_v53  ;;  %v2967_v0 = vmul.f32 %v2839_v37, %v2456_v28  ;;  %v9727_v3 = vmul.f32 0.003921569, %v2044_v11  ;;  %v9729_v48 = vmul.f32 0.00390625, %v1479_v60 }
 0x284   : > { %v9705_v56 = vadd.f32 %v1333_v5, %v1125_v19  ;;  %v2460_v5 = vmul.f32 0.5, %v2459_v35  ;;  %v2468_v19 = vmul.f32 %v9701_v4, %v9663_v18  ;;  %v2968_v20 = vmul.f32 %v2840_v61, %v2456_v28  ;;  %v7702_v61 = vld [vmem:[%s8546_s27 + $0x68] sm:$0xff] }
 0x285   : > { %3134 = vmatmul.f32.gmra.mxu0 %v7699_v30  ;;  %3343 = vmatmul.f32.gmra.mxu1 %v7700_v2  ;;  %v9724_v40 = vadd.f32 %v918_v26, %v710_v50  ;;  %6561 = vst [vmem:[%s8546_s27 + $0x1f0] sm:$0xff] %v2967_v0  ;;  %v9734_v50 = vpop.eup %7117  ;;  %7119 = vrsqrt.f32 %v9727_v3  ;;  %vm2493_vm10 = vweird.f32 %v9727_v3 }
 0x286   : > { %13722 = vst [vmem:[#allocation38_spill] sm:$0xff] %v9705_v56  ;;  %3552 = vmatmul.f32.gmra.mxu2 %v7699_v30  ;;  %3761 = vmatmul.f32.gmra.mxu3 %v7700_v2  ;;  %v1525_v15 = vadd.f32 %v9705_v56, %v9694_v38  ;;  %v1666_v6 = vmul.f32 %v9705_v56, %v9705_v56  ;;  %v2461_v37 = vsub.f32 1.5, %v2460_v5  ;;  %vm2484_vm6 = vweird.f32 %v9734_v50 }
 0x287   : > { %13723 = vst [vmem:[#allocation39_spill] sm:$0xff] %v9724_v40  ;;  %v2469_v26 = vmul.f32 %v9701_v4, %v2468_v19  ;;  %v1981_v5 = vmul.f32 %v9729_v48, %v1479_v60  ;;  %v1799_v19 = vpop.xlane.xlu1 %1798  ;;  %vm2485_vm8 = vmor %vm2483_vm7, %vm2484_vm6 }
 0x288   : > { %1526 = vadd.xlane.f32.xlu2 %v1525_v15  ;;  %v1845_v2 = vadd.f32 %v1666_v6, %v1665_v14  ;;  %6562 = vst [vmem:[%s8546_s27 + $0x1f8] sm:$0xff] %v2968_v20  ;;  %v1667_v14 = vmul.f32 %v9724_v40, %v9724_v40  ;;  %v7701_v15 = vld [vmem:[%s8546_s27 + $0x60] sm:$0xff]  ;;  %v1482_v6 = vpop.xlane.xlu2 %1481 }
 0x289   : > { %v1127_v22 = vpop.f32.mrf.mxu2  ;;  %v1336_v30 = vpop.f32.mrf.mxu3 }
 0x28a   : > { %v1128_v35 = vadd.f32 %v1127_v22, %v8221_v59  ;;  %v712_v38 = vpop.f32.mrf.mxu0  ;;  %1846 = vadd.xlane.f32.xlu0 %v1845_v2  ;;  %v2478_v22 = vmul.f32 %v9734_v50, %v9696_v32  ;;  %v2841_v2 = vsub.f32 %v9015_v47, %v9594_v13 }
 0x28b   : > { %v921_v31 = vpop.f32.mrf.mxu1  ;;  %v713_v11 = vadd.f32 %v712_v38, %v8216_v53  ;;  %v2470_v38 = vmul.f32 0.5, %v2469_v26 }
 0x28c   : > { %v9736_v28 = vadd.f32 %v1336_v30, %v1128_v35  ;;  %v2462_v30 = vmul.f32 %v9673_v23, %v2461_v37  ;;  %v2842_v35 = vsub.f32 %v9038_v33, %v9594_v13 }
 0x28d   : > { %3137 = vmatmul.f32.gmra.mxu0 %v7701_v15  ;;  %3346 = vmatmul.f32.gmra.mxu1 %v7702_v61  ;;  %v9762_v39 = vadd.f32 %v921_v31, %v713_v11  ;;  %v2471_v13 = vsub.f32 1.5, %v2470_v38  ;;  %v2479_v31 = vmul.f32 %v9734_v50, %v2478_v22  ;;  %v9767_v11 = vpop.eup %7119 }
 0x28e   : > { %13724 = vst [vmem:[#allocation40_spill] sm:$0xff] %v9736_v28  ;;  %3555 = vmatmul.f32.gmra.mxu2 %v7701_v15  ;;  %3764 = vmatmul.f32.gmra.mxu3 %v7702_v61  ;;  %v1528_v0 = vadd.f32 %v9736_v28, %v9724_v40  ;;  %v1668_v20 = vmul.f32 %v9736_v28, %v9736_v28  ;;  %v9760_v15 = vmul.f32 0.00390625, %v1482_v6  ;;  %vm2494_vm9 = vweird.f32 %v9767_v11 }
 0x28f   : > { %13725 = vst [vmem:[#allocation41_spill] sm:$0xff] %v9762_v39  ;;  %v2466_v37 = vsel %vm2465_vm2, %v9673_v23, %v2462_v30  ;;  %v2045_v28 = vsub.f32 %v1799_v19, %v1981_v5  ;;  %v7703_v19 = vld [vmem:[%s8546_s27 + $0x70] sm:$0xff]  ;;  %v7704_v30 = vld [vmem:[%s8546_s27 + $0x78] sm:$0xff]  ;;  %v1669_v38 = vmul.f32 %v9762_v39, %v9762_v39  ;;  %vm2495_vm11 = vmor %vm2493_vm10, %vm2494_vm9 }
 0x290   : > { %1529 = vadd.xlane.f32.xlu1 %v1528_v0  ;;  %v1848_v60 = vadd.f32 %v1668_v20, %v1667_v14  ;;  %v2969_v20 = vmul.f32 %v2841_v2, %v2466_v37  ;;  %v2970_v33 = vmul.f32 %v2842_v35, %v2466_v37  ;;  %v1982_v5 = vmul.f32 %v9760_v15, %v1482_v6 }
 0x291   : > { %v1130_v26 = vpop.f32.mrf.mxu2  ;;  %v1339_v61 = vpop.f32.mrf.mxu3  ;;  %v9781_v22 = vmul.f32 0.003921569, %v2045_v28  ;;  %v2480_v35 = vmul.f32 0.5, %v2479_v31  ;;  %v2488_v6 = vmul.f32 %v9767_v11, %v9727_v3  ;;  %v2472_v37 = vmul.f32 %v9701_v4, %v2471_v13 }
 0x292   : > { %v1131_v0 = vadd.f32 %v1130_v26, %v8221_v59  ;;  %1849 = vadd.xlane.f32.xlu2 %v1848_v60  ;;  %v715_v14 = vpop.f32.mrf.mxu0  ;;  %6563 = vst [vmem:[%s8546_s27 + $0x200] sm:$0xff] %v2969_v20  ;;  %v1485_v60 = vpop.xlane.xlu1 %1484  ;;  %v2843_v28 = vsub.f32 %v9051_v17, %v9614_v55  ;;  %v2848_v3 = vsub.f32 %v9143_v57, %v9683_v21 }
 0x293   : > { %v924_v47 = vpop.f32.mrf.mxu1  ;;  %v716_v23 = vadd.f32 %v715_v14, %v8216_v53  ;;  %6564 = vst [vmem:[%s8546_s27 + $0x208] sm:$0xff] %v2970_v33  ;;  %v1802_v26 = vpop.xlane.xlu0 %1801  ;;  %v9798_v20 = vmul.f32 0.00390625, %v1485_v60  ;;  %v2476_v13 = vsel %vm2475_vm5, %v9701_v4, %v2472_v37  ;;  %7121 = vrsqrt.f32 %v9781_v22  ;;  %v7705_v37 = vld [vmem:[%s8546_s27 + $0x80] sm:$0xff] }
 0x294   : > { %v9769_v40 = vadd.f32 %v1339_v61, %v1131_v0  ;;  %v2844_v0 = vsub.f32 %v9069_v45, %v9614_v55  ;;  %v2046_v14 = vsub.f32 %v1802_v26, %v1982_v5  ;;  %v2481_v55 = vsub.f32 1.5, %v2480_v35  ;;  %v7706_v35 = vld [vmem:[%s8546_s27 + $0x88] sm:$0xff] }
 0x295   : > { %3140 = vmatmul.f32.gmra.mxu0 %v7703_v19  ;;  %3349 = vmatmul.f32.gmra.mxu1 %v7704_v30  ;;  %v9792_v18 = vadd.f32 %v924_v47, %v716_v23  ;;  %v2489_v5 = vmul.f32 %v9767_v11, %v2488_v6  ;;  %v1983_v26 = vmul.f32 %v9798_v20, %v1485_v60  ;;  %vm2503_vm13 = vweird.f32 %v9781_v22 }
 0x296   : > { %13726 = vst [vmem:[#allocation42_spill] sm:$0xff] %v9769_v40  ;;  %3558 = vmatmul.f32.gmra.mxu2 %v7703_v19  ;;  %3767 = vmatmul.f32.gmra.mxu3 %v7704_v30  ;;  %v1531_v2 = vadd.f32 %v9769_v40, %v9762_v39  ;;  %v1670_v61 = vmul.f32 %v9769_v40, %v9769_v40 }
 0x297   : > { %13727 = vst [vmem:[#allocation43_spill] sm:$0xff] %v9792_v18  ;;  %v2971_v30 = vmul.f32 %v2843_v28, %v2476_v13  ;;  %v2972_v45 = vmul.f32 %v2844_v0, %v2476_v13  ;;  %v1671_v4 = vmul.f32 %v9792_v18, %v9792_v18  ;;  %v2490_v0 = vmul.f32 0.5, %v2489_v5 }
 0x298   : > { %1532 = vadd.xlane.f32.xlu0 %v1531_v2  ;;  %v1851_v19 = vadd.f32 %v1670_v61, %v1669_v38  ;;  %v9810_v38 = vmul.f32 0.003921569, %v2046_v14  ;;  %v2482_v60 = vmul.f32 %v9734_v50, %v2481_v55  ;;  %v2845_v13 = vsub.f32 %v9089_v36, %v9653_v49 }
 0x299   : > { %v1133_v33 = vpop.f32.mrf.mxu2  ;;  %v1342_v31 = vpop.f32.mrf.mxu3  ;;  %6565 = vst [vmem:[%s8546_s27 + $0x210] sm:$0xff] %v2971_v30 }
 0x29a   : > { %v1134_v47 = vadd.f32 %v1133_v33, %v8221_v59  ;;  %v718_v23 = vpop.f32.mrf.mxu0  ;;  %1852 = vadd.xlane.f32.xlu1 %v1851_v19  ;;  %6566 = vst [vmem:[%s8546_s27 + $0x218] sm:$0xff] %v2972_v45  ;;  %v9823_v33 = vpop.eup %7121  ;;  %7123 = vrsqrt.f32 %v9810_v38  ;;  %v2486_v55 = vsel %vm2485_vm8, %v9734_v50, %v2482_v60  ;;  %vm2513_vm0 = vweird.f32 %v9810_v38 }
 0x29b   : > { %v927_v17 = vpop.f32.mrf.mxu1  ;;  %v719_v61 = vadd.f32 %v718_v23, %v8216_v53  ;;  %v1488_v14 = vpop.xlane.xlu0 %1487  ;;  %vm2504_vm12 = vweird.f32 %v9823_v33 }
 0x29c   : > { %v9804_v2 = vadd.f32 %v1342_v31, %v1134_v47  ;;  %v1805_v31 = vpop.xlane.xlu2 %1804  ;;  %v2846_v47 = vsub.f32 %v9112_v46, %v9653_v49  ;;  %v9835_v5 = vmul.f32 0.00390625, %v1488_v14  ;;  %v2973_v49 = vmul.f32 %v2845_v13, %v2486_v55  ;;  %vm2505_vm14 = vmor %vm2503_vm13, %vm2504_vm12 }
 0x29d   : > { %3143 = vmatmul.f32.gmra.mxu0 %v7705_v37  ;;  %3352 = vmatmul.f32.gmra.mxu1 %v7706_v35  ;;  %v2047_v32 = vsub.f32 %v1805_v31, %v1983_v26  ;;  %v9832_v23 = vadd.f32 %v927_v17, %v719_v61  ;;  %v2491_v26 = vsub.f32 1.5, %v2490_v0  ;;  %v2498_v17 = vmul.f32 %v9823_v33, %v9781_v22 }
 0x29e   : > { %13728 = vst [vmem:[#allocation44_spill] sm:$0xff] %v9804_v2  ;;  %3561 = vmatmul.f32.gmra.mxu2 %v7705_v37  ;;  %3770 = vmatmul.f32.gmra.mxu3 %v7706_v35  ;;  %v1534_v6 = vadd.f32 %v9804_v2, %v9792_v18  ;;  %v1672_v28 = vmul.f32 %v9804_v2, %v9804_v2 }
 0x29f   : > { %13729 = vst [vmem:[#allocation45_spill] sm:$0xff] %v9832_v23  ;;  %v2974_v37 = vmul.f32 %v2846_v47, %v2486_v55  ;;  %v9845_v50 = vmul.f32 0.003921569, %v2047_v32  ;;  %v1673_v60 = vmul.f32 %v9832_v23, %v9832_v23  ;;  %v1984_v0 = vmul.f32 %v9835_v5, %v1488_v14  ;;  %v1808_v14 = vpop.xlane.xlu1 %1807 }
 0x2a0   : > { %1535 = vadd.xlane.f32.xlu2 %v1534_v6  ;;  %v1854_v19 = vadd.f32 %v1672_v28, %v1671_v4  ;;  %6567 = vst [vmem:[%s8546_s27 + $0x220] sm:$0xff] %v2973_v49  ;;  %v7707_v6 = vld [vmem:[%s8546_s27 + $0x90] sm:$0xff]  ;;  %v7708_v28 = vld [vmem:[%s8546_s27 + $0x98] sm:$0xff]  ;;  %v2499_v13 = vmul.f32 %v9823_v33, %v2498_v17  ;;  %v2492_v32 = vmul.f32 %v9767_v11, %v2491_v26 }
 0x2a1   : > { %v1136_v30 = vpop.f32.mrf.mxu2  ;;  %v1345_v45 = vpop.f32.mrf.mxu3  ;;  %6568 = vst [vmem:[%s8546_s27 + $0x228] sm:$0xff] %v2974_v37  ;;  %v2847_v55 = vsub.f32 %v9125_v16, %v9683_v21  ;;  %7125 = vrsqrt.f32 %v9845_v50  ;;  %v2048_v26 = vsub.f32 %v1808_v14, %v1984_v0  ;;  %vm2523_vm3 = vweird.f32 %v9845_v50 }
 0x2a2   : > { %v1137_v4 = vadd.f32 %v1136_v30, %v8221_v59  ;;  %1855 = vadd.xlane.f32.xlu0 %v1854_v19  ;;  %v721_v36 = vpop.f32.mrf.mxu0  ;;  %v9855_v19 = vpop.eup %7123  ;;  %v2496_v37 = vsel %vm2495_vm11, %v9767_v11, %v2492_v32 }
 0x2a3   : > { %v930_v46 = vpop.f32.mrf.mxu1  ;;  %v722_v35 = vadd.f32 %v721_v36, %v8216_v53  ;;  %v2975_v16 = vmul.f32 %v2847_v55, %v2496_v37  ;;  %v2508_v57 = vmul.f32 %v9855_v19, %v9810_v38  ;;  %vm2514_vm15 = vweird.f32 %v9855_v19 }
 0x2a4   : > { %v9840_v61 = vadd.f32 %v1345_v45, %v1137_v4  ;;  %v1491_v30 = vpop.xlane.xlu2 %1490  ;;  %vm2515_vm1 = vmor %vm2513_vm0, %vm2514_vm15 }
 0x2a5   : > { %3146 = vmatmul.f32.gmra.mxu0 %v7707_v6  ;;  %3355 = vmatmul.f32.gmra.mxu1 %v7708_v28  ;;  %v9864_v45 = vadd.f32 %v930_v46, %v722_v35  ;;  %6569 = vst [vmem:[%s8546_s27 + $0x230] sm:$0xff] %v2975_v16  ;;  %v9880_v11 = vmul.f32 0.00390625, %v1491_v30 }
 0x2a6   : > { %13730 = vst [vmem:[#allocation46_spill] sm:$0xff] %v9840_v61  ;;  %3564 = vmatmul.f32.gmra.mxu2 %v7707_v6  ;;  %3773 = vmatmul.f32.gmra.mxu3 %v7708_v28  ;;  %v1537_v31 = vadd.f32 %v9840_v61, %v9832_v23  ;;  %v1674_v47 = vmul.f32 %v9840_v61, %v9840_v61  ;;  %v2500_v28 = vmul.f32 0.5, %v2499_v13  ;;  %v9886_v13 = vmul.f32 0.003921569, %v2048_v26 }
 0x2a7   : > { %13731 = vst [vmem:[#allocation47_spill] sm:$0xff] %v9864_v45  ;;  %v2976_v6 = vmul.f32 %v2848_v3, %v2496_v37  ;;  %v9892_v55 = vpop.eup %7125 }
 0x2a8   : > { %1538 = vadd.xlane.f32.xlu1 %v1537_v31  ;;  %v1857_v49 = vadd.f32 %v1674_v47, %v1673_v60  ;;  %v1675_v60 = vmul.f32 %v9864_v45, %v9864_v45  ;;  %v7709_v31 = vld [vmem:[%s8546_s27 + $0xa0] sm:$0xff]  ;;  %v7710_v47 = vld [vmem:[%s8546_s27 + $0xa8] sm:$0xff]  ;;  %v2501_v3 = vsub.f32 1.5, %v2500_v28  ;;  %7127 = vrsqrt.f32 %v9886_v13 }
 0x2a9   : > { %v1139_v4 = vpop.f32.mrf.mxu2  ;;  %v1348_v36 = vpop.f32.mrf.mxu3  ;;  %6570 = vst [vmem:[%s8546_s27 + $0x238] sm:$0xff] %v2976_v6  ;;  %vm2524_vm2 = vweird.f32 %v9892_v55  ;;  %vm2533_vm6 = vweird.f32 %v9886_v13 }
 0x2aa   : > { %v1140_v46 = vadd.f32 %v1139_v4, %v8221_v59  ;;  %v724_v17 = vpop.f32.mrf.mxu0  ;;  %1858 = vadd.xlane.f32.xlu2 %v1857_v49  ;;  %v2509_v4 = vmul.f32 %v9855_v19, %v2508_v57  ;;  %v1985_v49 = vmul.f32 %v9880_v11, %v1491_v30  ;;  %v1494_v30 = vpop.xlane.xlu1 %1493  ;;  %vm2525_vm4 = vmor %vm2523_vm3, %vm2524_vm2 }
 0x2ab   : > { %v933_v35 = vpop.f32.mrf.mxu1  ;;  %v725_v0 = vadd.f32 %v724_v17, %v8216_v53  ;;  %v2518_v17 = vmul.f32 %v9892_v55, %v9845_v50 }
 0x2ac   : > { %v9875_v21 = vadd.f32 %v1348_v36, %v1140_v46  ;;  %v2510_v57 = vmul.f32 0.5, %v2509_v4 }
 0x2ad   : > { %3149 = vmatmul.f32.gmra.mxu0 %v7709_v31  ;;  %3358 = vmatmul.f32.gmra.mxu1 %v7710_v47  ;;  %v9897_v37 = vadd.f32 %v933_v35, %v725_v0  ;;  %v2502_v35 = vmul.f32 %v9823_v33, %v2501_v3  ;;  %v2519_v4 = vmul.f32 %v9892_v55, %v2518_v17 }
 0x2ae   : > { %13732 = vst [vmem:[#allocation48_spill] sm:$0xff] %v9875_v21  ;;  %3567 = vmatmul.f32.gmra.mxu2 %v7709_v31  ;;  %3776 = vmatmul.f32.gmra.mxu3 %v7710_v47  ;;  %v1540_v32 = vadd.f32 %v9875_v21, %v9864_v45  ;;  %v1676_v14 = vmul.f32 %v9875_v21, %v9875_v21  ;;  %v13735_v47 = vld [vmem:[#allocation18_spill] sm:$0xff]  ;;  %v9918_v21 = vmul.f32 0.00390625, %v1494_v30 }
 0x2af   : > { %13733 = vst [vmem:[#allocation49_spill] sm:$0xff] %v9897_v37  ;;  %v1677_v22 = vmul.f32 %v9897_v37, %v9897_v37  ;;  %v2506_v3 = vsel %vm2505_vm14, %v9823_v33, %v2502_v35  ;;  %v9926_v33 = vpop.eup %7127  ;;  %v2520_v61 = vmul.f32 0.5, %v2519_v4 }
 0x2b0   : > { %1541 = vadd.xlane.f32.xlu0 %v1540_v32  ;;  %v1860_v36 = vadd.f32 %v1676_v14, %v1675_v60  ;;  %v1811_v60 = vpop.xlane.xlu0 %1810  ;;  %v2849_v32 = vsub.f32 %v13735_v47, %v9729_v48  ;;  %vm2534_vm5 = vweird.f32 %v9926_v33 }
 0x2b1   : > { %v1142_v26 = vpop.f32.mrf.mxu2  ;;  %v1351_v46 = vpop.f32.mrf.mxu3  ;;  %v2049_v14 = vsub.f32 %v1811_v60, %v1985_v49  ;;  %v13736_v49 = vld [vmem:[#allocation19_spill] sm:$0xff]  ;;  %vm2535_vm7 = vmor %vm2533_vm6, %vm2534_vm5 }
 0x2b2   : > { %v1143_v16 = vadd.f32 %v1142_v26, %v8221_v59  ;;  %1861 = vadd.xlane.f32.xlu1 %v1860_v36  ;;  %v727_v6 = vpop.f32.mrf.mxu0  ;;  %v7711_v36 = vld [vmem:[%s8546_s27 + $0xb0] sm:$0xff]  ;;  %v7712_v26 = vld [vmem:[%s8546_s27 + $0xb8] sm:$0xff]  ;;  %v2977_v47 = vmul.f32 %v2849_v32, %v2506_v3 }
 0x2b3   : > { %v936_v28 = vpop.f32.mrf.mxu1  ;;  %v728_v31 = vadd.f32 %v727_v6, %v8216_v53  ;;  %v2511_v6 = vsub.f32 1.5, %v2510_v57 }
 0x2b4   : > { %v9907_v0 = vadd.f32 %v1351_v46, %v1143_v16  ;;  %v2850_v16 = vsub.f32 %v13736_v49, %v9729_v48  ;;  %6571 = vst [vmem:[%s8546_s27 + $0x240] sm:$0xff] %v2977_v47  ;;  %v1986_v48 = vmul.f32 %v9918_v21, %v1494_v30 }
 0x2b5   : > { %3152 = vmatmul.f32.gmra.mxu0 %v7711_v36  ;;  %3361 = vmatmul.f32.gmra.mxu1 %v7712_v26  ;;  %v9928_v17 = vadd.f32 %v936_v28, %v728_v31  ;;  %v2528_v28 = vmul.f32 %v9926_v33, %v9886_v13  ;;  %v2512_v31 = vmul.f32 %v9855_v19, %v2511_v6 }
 0x2b6   : > { %13734 = vst [vmem:[#allocation50_spill] sm:$0xff] %v9907_v0  ;;  %3570 = vmatmul.f32.gmra.mxu2 %v7711_v36  ;;  %3779 = vmatmul.f32.gmra.mxu3 %v7712_v26  ;;  %v1543_v46 = vadd.f32 %v9907_v0, %v9897_v37  ;;  %v1678_v60 = vmul.f32 %v9907_v0, %v9907_v0  ;;  %v9930_v36 = vmul.f32 0.003921569, %v2049_v14 }
 0x2b7   : > { %13737 = vst [vmem:[#allocation18_spill] sm:$0xff] %v9928_v17  ;;  %v2978_v35 = vmul.f32 %v2850_v16, %v2506_v3  ;;  %v1679_v30 = vmul.f32 %v9928_v17, %v9928_v17  ;;  %v1814_v3 = vpop.xlane.xlu2 %1813  ;;  %v7714_v16 = vld [vmem:[%s8546_s27 + $0xc8] sm:$0xff] }
 0x2b8   : > { %1544 = vadd.xlane.f32.xlu2 %v1543_v46  ;;  %v1863_v37 = vadd.f32 %v1678_v60, %v1677_v22  ;;  %v1497_v14 = vpop.xlane.xlu0 %1496  ;;  %7129 = vrsqrt.f32 %v9930_v36  ;;  %v7713_v46 = vld [vmem:[%s8546_s27 + $0xc0] sm:$0xff]  ;;  %v2050_v60 = vsub.f32 %v1814_v3, %v1986_v48  ;;  %vm2543_vm9 = vweird.f32 %v9930_v36 }
 0x2b9   : > { %v1145_v26 = vpop.f32.mrf.mxu2  ;;  %v1354_v45 = vpop.f32.mrf.mxu3  ;;  %6572 = vst [vmem:[%s8546_s27 + $0x248] sm:$0xff] %v2978_v35  ;;  %v2529_v35 = vmul.f32 %v9926_v33, %v2528_v28 }
 0x2ba   : > { %v1146_v57 = vadd.f32 %v1145_v26, %v8221_v59  ;;  %v730_v49 = vpop.f32.mrf.mxu0  ;;  %1864 = vadd.xlane.f32.xlu0 %v1863_v37  ;;  %v13739_v37 = vld [vmem:[#allocation20_spill] sm:$0xff]  ;;  %v9958_v26 = vmul.f32 0.00390625, %v1497_v14  ;;  %v9966_v28 = vmul.f32 0.003921569, %v2050_v60 }
 0x2bb   : > { %v939_v32 = vpop.f32.mrf.mxu1  ;;  %v731_v4 = vadd.f32 %v730_v49, %v8216_v53  ;;  %v2851_v6 = vsub.f32 %v13739_v37, %v9760_v15  ;;  %v13740_v49 = vld [vmem:[#allocation21_spill] sm:$0xff] }
 0x2bc   : > { %v9940_v22 = vadd.f32 %v1354_v45, %v1146_v57  ;;  %v2521_v45 = vsub.f32 1.5, %v2520_v61  ;;  %v2516_v57 = vsel %vm2515_vm1, %v9855_v19, %v2512_v31  ;;  %v2852_v37 = vsub.f32 %v13740_v49, %v9760_v15 }
 0x2bd   : > { %3155 = vmatmul.f32.gmra.mxu0 %v7713_v46  ;;  %3364 = vmatmul.f32.gmra.mxu1 %v7714_v16  ;;  %v2979_v48 = vmul.f32 %v2851_v6, %v2516_v57  ;;  %v9964_v3 = vadd.f32 %v939_v32, %v731_v4  ;;  %v1987_v32 = vmul.f32 %v9958_v26, %v1497_v14  ;;  %7131 = vrsqrt.f32 %v9966_v28 }
 0x2be   : > { %13738 = vst [vmem:[#allocation19_spill] sm:$0xff] %v9940_v22  ;;  %3573 = vmatmul.f32.gmra.mxu2 %v7713_v46  ;;  %3782 = vmatmul.f32.gmra.mxu3 %v7714_v16  ;;  %v1546_v38 = vadd.f32 %v9940_v22, %v9928_v17  ;;  %v1680_v47 = vmul.f32 %v9940_v22, %v9940_v22  ;;  %v9970_v31 = vpop.eup %7129  ;;  %vm2553_vm12 = vweird.f32 %v9966_v28 }
 0x2bf   : > { %13741 = vst [vmem:[#allocation20_spill] sm:$0xff] %v9964_v3  ;;  %v2980_v22 = vmul.f32 %v2852_v37, %v2516_v57  ;;  %v2522_v4 = vmul.f32 %v9892_v55, %v2521_v45  ;;  %v1681_v50 = vmul.f32 %v9964_v3, %v9964_v3  ;;  %v2853_v14 = vsub.f32 %v9237_v27, %v9798_v20 }
 0x2c0   : > { %1547 = vadd.xlane.f32.xlu1 %v1546_v38  ;;  %v1866_v61 = vadd.f32 %v1680_v47, %v1679_v30  ;;  %6573 = vst [vmem:[%s8546_s27 + $0x250] sm:$0xff] %v2979_v48  ;;  %v2530_v30 = vmul.f32 0.5, %v2529_v35  ;;  %v7715_v38 = vld [vmem:[%s8546_s27 + $0xd0] sm:$0xff]  ;;  %v7716_v47 = vld [vmem:[%s8546_s27 + $0xd8] sm:$0xff]  ;;  %v2854_v57 = vsub.f32 %v9260_v12, %v9798_v20  ;;  %vm2544_vm8 = vweird.f32 %v9970_v31 }
 0x2c1   : > { %v1148_v46 = vpop.f32.mrf.mxu2  ;;  %v1357_v16 = vpop.f32.mrf.mxu3  ;;  %6574 = vst [vmem:[%s8546_s27 + $0x258] sm:$0xff] %v2980_v22  ;;  %v2526_v35 = vsel %vm2525_vm4, %v9892_v55, %v2522_v4  ;;  %v2538_v22 = vmul.f32 %v9970_v31, %v9930_v36  ;;  %vm2545_vm10 = vmor %vm2543_vm9, %vm2544_vm8 }
 0x2c2   : > { %v1149_v17 = vadd.f32 %v1148_v46, %v8221_v59  ;;  %1867 = vadd.xlane.f32.xlu2 %v1866_v61  ;;  %v733_v19 = vpop.f32.mrf.mxu0  ;;  %v2531_v55 = vsub.f32 1.5, %v2530_v30  ;;  %v2981_v37 = vmul.f32 %v2853_v14, %v2526_v35  ;;  %v2982_v48 = vmul.f32 %v2854_v57, %v2526_v35  ;;  %v7717_v35 = vld [vmem:[%s8546_s27 + $0xe0] sm:$0xff]  ;;  %v7718_v14 = vld [vmem:[%s8546_s27 + $0xe8] sm:$0xff] }
 0x2c3   : > { %v942_v15 = vpop.f32.mrf.mxu1  ;;  %v734_v60 = vadd.f32 %v733_v19, %v8216_v53  ;;  %v2539_v4 = vmul.f32 %v9970_v31, %v2538_v22  ;;  %v2855_v57 = vsub.f32 %v9273_v52, %v9835_v5 }
 0x2c4   : > { %v9978_v6 = vadd.f32 %v1357_v16, %v1149_v17  ;;  %v1817_v17 = vpop.xlane.xlu1 %1816  ;;  %6575 = vst [vmem:[%s8546_s27 + $0x260] sm:$0xff] %v2981_v37 }
 0x2c5   : > { %3158 = vmatmul.f32.gmra.mxu0 %v7715_v38  ;;  %3367 = vmatmul.f32.gmra.mxu1 %v7716_v47  ;;  %v2051_v49 = vsub.f32 %v1817_v17, %v1987_v32  ;;  %v9997_v61 = vadd.f32 %v942_v15, %v734_v60  ;;  %6576 = vst [vmem:[%s8546_s27 + $0x268] sm:$0xff] %v2982_v48  ;;  %v10007_v60 = vpop.eup %7131  ;;  %v2540_v22 = vmul.f32 0.5, %v2539_v4 }
 0x2c6   : > { %13742 = vst [vmem:[#allocation21_spill] sm:$0xff] %v9978_v6  ;;  %3576 = vmatmul.f32.gmra.mxu2 %v7715_v38  ;;  %3785 = vmatmul.f32.gmra.mxu3 %v7716_v47  ;;  %v1549_v45 = vadd.f32 %v9978_v6, %v9964_v3  ;;  %v1682_v27 = vmul.f32 %v9978_v6, %v9978_v6  ;;  %vm2554_vm11 = vweird.f32 %v10007_v60 }
 0x2c7   : > { %13743 = vst [vmem:[#allocation51_spill] sm:$0xff] %v9997_v61  ;;  %v10004_v32 = vmul.f32 0.003921569, %v2051_v49  ;;  %v2532_v15 = vmul.f32 %v9926_v33, %v2531_v55  ;;  %v1683_v47 = vmul.f32 %v9997_v61, %v9997_v61  ;;  %v2548_v13 = vmul.f32 %v10007_v60, %v9966_v28  ;;  %vm2555_vm13 = vmor %vm2553_vm12, %vm2554_vm11 }
 0x2c8   : > { %1550 = vadd.xlane.f32.xlu0 %v1549_v45  ;;  %v1869_v19 = vadd.f32 %v1682_v27, %v1681_v50  ;;  %v2856_v49 = vsub.f32 %v9291_v41, %v9835_v5  ;;  %v1500_v5 = vpop.xlane.xlu2 %1499  ;;  %v2859_v28 = vsub.f32 %v9347_v8, %v9918_v21 }
 0x2c9   : > { %v1151_v46 = vpop.f32.mrf.mxu2  ;;  %v1360_v16 = vpop.f32.mrf.mxu3  ;;  %7133 = vrsqrt.f32 %v10004_v32  ;;  %v2536_v55 = vsel %vm2535_vm7, %v9926_v33, %v2532_v15  ;;  %v2541_v33 = vsub.f32 1.5, %v2540_v22  ;;  %v2549_v41 = vmul.f32 %v10007_v60, %v2548_v13  ;;  %v3097_v15 = vld [vmem:[%s13535_s4] sm:$0x3] }
 0x2ca   : > { %v1152_v12 = vadd.f32 %v1151_v46, %v8221_v59  ;;  %v736_v20 = vpop.f32.mrf.mxu0  ;;  %1870 = vadd.xlane.f32.xlu1 %v1869_v19  ;;  %v2983_v37 = vmul.f32 %v2855_v57, %v2536_v55  ;;  %v2984_v52 = vmul.f32 %v2856_v49, %v2536_v55  ;;  %v7720_v22 = vld [vmem:[%s8546_s27 + $0xf8] sm:$0xff]  ;;  %v10057_v55 = vperm.slane %v3097_v15, 0 }
 0x2cb   : > { %v945_v30 = vpop.f32.mrf.mxu1  ;;  %v737_v50 = vadd.f32 %v736_v20, %v8216_v53  ;;  %v10034_v20 = vpop.xlane.xlu0 %1819  ;;  %v2550_v13 = vmul.f32 0.5, %v2549_v41  ;;  %v2542_v49 = vmul.f32 %v9970_v31, %v2541_v33  ;;  %vm2563_vm15 = vweird.f32 %v10004_v32 }
 0x2cc   : > { %v10009_v38 = vadd.f32 %v1360_v16, %v1152_v12  ;;  %6577 = vst [vmem:[%s8546_s27 + $0x270] sm:$0xff] %v2983_v37  ;;  %v2857_v37 = vsub.f32 %v9311_v1, %v9880_v11 }
 0x2cd   : > { %3161 = vmatmul.f32.gmra.mxu0 %v7717_v35  ;;  %3370 = vmatmul.f32.gmra.mxu1 %v7718_v14  ;;  %v10029_v48 = vadd.f32 %v945_v30, %v737_v50  ;;  %6578 = vst [vmem:[%s8546_s27 + $0x278] sm:$0xff] %v2984_v52  ;;  %v1503_v50 = vpop.xlane.xlu1 %1502  ;;  %v2546_v33 = vsel %vm2545_vm10, %v9970_v31, %v2542_v49 }
 0x2ce   : > { %13744 = vst [vmem:[#allocation52_spill] sm:$0xff] %v10009_v38  ;;  %3579 = vmatmul.f32.gmra.mxu2 %v7717_v35  ;;  %3788 = vmatmul.f32.gmra.mxu3 %v7718_v14  ;;  %v1552_v17 = vadd.f32 %v10009_v38, %v9997_v61  ;;  %v1684_v45 = vmul.f32 %v10009_v38, %v10009_v38  ;;  %v7719_v14 = vld [vmem:[%s8546_s27 + $0xf0] sm:$0xff] }
 0x2cf   : > { %13745 = vst [vmem:[#allocation53_spill] sm:$0xff] %v10029_v48 }
 0x2d0   : > { %1553 = vadd.xlane.f32.xlu2 %v1552_v17  ;;  %v1872_v27 = vadd.f32 %v1684_v45, %v1683_v47  ;;  %v10042_v47 = vpop.eup %7133  ;;  %v1685_v17 = vmul.f32 %v10029_v48, %v10029_v48  ;;  %v10051_v45 = vmul.f32 0.00390625, %v1500_v5 }
 0x2d1   : > { %v1154_v46 = vpop.f32.mrf.mxu2  ;;  %v1363_v16 = vpop.f32.mrf.mxu3  ;;  %v2558_v36 = vmul.f32 %v10042_v47, %v10004_v32  ;;  %vm2564_vm14 = vweird.f32 %v10042_v47 }
 0x2d2   : > { %v1155_v19 = vadd.f32 %v1154_v46, %v8221_v59  ;;  %1873 = vadd.xlane.f32.xlu0 %v1872_v27  ;;  %v739_v4 = vpop.f32.mrf.mxu0  ;;  %v10064_v27 = vmul.f32 0.00390625, %v1503_v50  ;;  %v2858_v46 = vsub.f32 %v9334_v63, %v9880_v11  ;;  %v1988_v1 = vmul.f32 %v10051_v45, %v1500_v5  ;;  %vm2565_vm0 = vmor %vm2563_vm15, %vm2564_vm14 }
 0x2d3   : > { %v948_v12 = vpop.f32.mrf.mxu1  ;;  %v740_v35 = vadd.f32 %v739_v4, %v8216_v53  ;;  %v1506_v63 = vpop.xlane.xlu0 %1505 }
 0x2d4   : > { %v10037_v30 = vadd.f32 %v1363_v16, %v1155_v19  ;;  %v1989_v31 = vmul.f32 %v10064_v27, %v1503_v50  ;;  %v10087_v49 = vmul.f32 0.00390625, %v1506_v63 }
 0x2d5   : > { %3164 = vmatmul.f32.gmra.mxu0 %v7719_v14  ;;  %3373 = vmatmul.f32.gmra.mxu1 %v7720_v22  ;;  %v10070_v16 = vadd.f32 %v948_v12, %v740_v35  ;;  %v2551_v12 = vsub.f32 1.5, %v2550_v13  ;;  %v2559_v35 = vmul.f32 %v10042_v47, %v2558_v36  ;;  %v10091_v36 = vperm.slane %v3097_v15, 1 }
 0x2d6   : > { %13746 = vst [vmem:[#allocation54_spill] sm:$0xff] %v10037_v30  ;;  %3582 = vmatmul.f32.gmra.mxu2 %v7719_v14  ;;  %3791 = vmatmul.f32.gmra.mxu3 %v7720_v22  ;;  %v1555_v57 = vadd.f32 %v10037_v30, %v10029_v48  ;;  %v1686_v53 = vmul.f32 %v10037_v30, %v10037_v30 }
 0x2d7   : > { %13747 = vst [vmem:[#allocation55_spill] sm:$0xff] %v10070_v16  ;;  %v2986_v30 = vmul.f32 %v2858_v46, %v2546_v33  ;;  %v1687_v5 = vmul.f32 %v10070_v16, %v10070_v16  ;;  %v1823_v46 = vpop.xlane.xlu2 %1822 }
 0x2d8   : > { %1556 = vadd.xlane.f32.xlu1 %v1555_v57  ;;  %v1875_v4 = vadd.f32 %v1686_v53, %v1685_v17  ;;  %v2985_v57 = vmul.f32 %v2857_v37, %v2546_v33  ;;  %v7722_v53 = vld [vmem:[%s8546_s27 + $0x108] sm:$0xff]  ;;  %v2052_v37 = vsub.f32 %v10034_v20, %v1988_v1  ;;  %v2552_v33 = vmul.f32 %v10007_v60, %v2551_v12 }
 0x2d9   : > { %v1157_v52 = vpop.f32.mrf.mxu2  ;;  %v1366_v19 = vpop.f32.mrf.mxu3  ;;  %6580 = vst [vmem:[%s8546_s27 + $0x288] sm:$0xff] %v2986_v30  ;;  %v2053_v30 = vsub.f32 %v1823_v46, %v1989_v31  ;;  %v2860_v20 = vsub.f32 %v9365_v58, %v9918_v21 }
 0x2da   : > { %v1158_v41 = vadd.f32 %v1157_v52, %v8221_v59  ;;  %v3120_v14 = vpop.f32.mrf.mxu0  ;;  %1876 = vadd.xlane.f32.xlu2 %v1875_v4  ;;  %6579 = vst [vmem:[%s8546_s27 + $0x280] sm:$0xff] %v2985_v57  ;;  %v7721_v59 = vld [vmem:[%s8546_s27 + $0x100] sm:$0xff]  ;;  %v10107_v12 = vmul.f32 0.003921569, %v2052_v37 }
 0x2db   : > { %v3329_v22 = vpop.f32.mrf.mxu1  ;;  %v3121_v11 = vadd.f32 %v3120_v14, %v10057_v55  ;;  %v10110_v21 = vmul.f32 0.003921569, %v2053_v30 }
 0x2dc   : > { %v10078_v17 = vadd.f32 %v1366_v19, %v1158_v41  ;;  %v2560_v19 = vmul.f32 0.5, %v2559_v35 }
 0x2dd   : > { %3167 = vmatmul.f32.gmra.mxu0 %v7721_v59  ;;  %3376 = vmatmul.f32.gmra.mxu1 %v7722_v53  ;;  %v3330_v13 = vadd.f32 %v3329_v22, %v3121_v11  ;;  %v1990_v22 = vmul.f32 %v10087_v49, %v1506_v63  ;;  %v2556_v11 = vsel %vm2555_vm13, %v10007_v60, %v2552_v33  ;;  %v1826_v63 = vpop.xlane.xlu1 %1825 }
 0x2de   : > { %13748 = vst [vmem:[#allocation56_spill] sm:$0xff] %v10078_v17  ;;  %3585 = vmatmul.f32.gmra.mxu2 %v7721_v59  ;;  %3794 = vmatmul.f32.gmra.mxu3 %v7722_v53  ;;  %v1558_v50 = vadd.f32 %v10078_v17, %v10070_v16  ;;  %v1688_v52 = vmul.f32 %v10078_v17, %v10078_v17  ;;  %v2561_v58 = vsub.f32 1.5, %v2560_v19 }
 0x2df   : > { %v6819_v4 = vmul.f32 -1.442695, %v3330_v13  ;;  %v2987_v8 = vmul.f32 %v2859_v28, %v2556_v11  ;;  %v2988_v31 = vmul.f32 %v2860_v20, %v2556_v11  ;;  %v7723_v13 = vld [vmem:[%s8546_s27 + $0x110] sm:$0xff]  ;;  %v2054_v60 = vsub.f32 %v1826_v63, %v1990_v22  ;;  %v1509_v37 = vpop.xlane.xlu2 %1508 }
 0x2e0   : > { %1559 = vadd.xlane.f32.xlu0 %v1558_v50  ;;  %v1878_v14 = vadd.f32 %v1688_v52, %v1687_v5  ;;  %v7724_v50 = vld [vmem:[%s8546_s27 + $0x118] sm:$0xff]  ;;  %v2562_v30 = vmul.f32 %v10042_v47, %v2561_v58  ;;  %v2862_v58 = vsub.f32 %v9408_v9, %v9958_v26 }
 0x2e1   : > { %v3538_v41 = vpop.f32.mrf.mxu2  ;;  %v3747_v15 = vpop.f32.mrf.mxu3  ;;  %7135 = vpow2.f32 %v6819_v4  ;;  %6581 = vst [vmem:[%s8546_s27 + $0x290] sm:$0xff] %v2987_v8  ;;  %v7726_v8 = vld [vmem:[%s8546_s27 + $0x128] sm:$0xff] }
 0x2e2   : > { %v3539_v57 = vadd.f32 %v3538_v41, %v10091_v36  ;;  %v3123_v1 = vpop.f32.mrf.mxu0  ;;  %1879 = vadd.xlane.f32.xlu1 %v1878_v14  ;;  %6582 = vst [vmem:[%s8546_s27 + $0x298] sm:$0xff] %v2988_v31  ;;  %7137 = vrsqrt.f32 %v10107_v12  ;;  %v10123_v41 = vmul.f32 0.003921569, %v2054_v60  ;;  %v2861_v31 = vsub.f32 %v9385_v7, %v9958_v26 }
 0x2e3   : > { %v3124_v35 = vadd.f32 %v3123_v1, %v10057_v55  ;;  %v3332_v59 = vpop.f32.mrf.mxu1  ;;  %7139 = vrsqrt.f32 %v10110_v21 }
 0x2e4   : > { %v3748_v53 = vadd.f32 %v3747_v15, %v3539_v57  ;;  %v10125_v15 = vmul.f32 0.00390625, %v1509_v37  ;;  %v2566_v57 = vsel %vm2565_vm0, %v10042_v47, %v2562_v30 }
 0x2e5   : > { %v3333_v5 = vadd.f32 %v3332_v59, %v3124_v35  ;;  %3170 = vmatmul.f32.gmra.mxu0 %v7723_v13  ;;  %3379 = vmatmul.f32.gmra.mxu1 %v7724_v50  ;;  %v1512_v22 = vpop.xlane.xlu1 %1511  ;;  %v7725_v35 = vld [vmem:[%s8546_s27 + $0x120] sm:$0xff]  ;;  %v2989_v7 = vmul.f32 %v2861_v31, %v2566_v57  ;;  %v2990_v60 = vmul.f32 %v2862_v58, %v2566_v57  ;;  %v7728_v31 = vld [vmem:[%s8546_s27 + $0x138] sm:$0xff] }
 0x2e6   : > { %3588 = vmatmul.f32.gmra.mxu2 %v7723_v13  ;;  %3797 = vmatmul.f32.gmra.mxu3 %v7724_v50  ;;  %v6820_v46 = vmul.f32 -1.442695, %v3748_v53  ;;  %13749 = vst [vmem:[#allocation57_spill] sm:$0xff] %v10125_v15  ;;  %v1991_v47 = vmul.f32 %v10125_v15, %v1509_v37  ;;  %v10143_v13 = vmul.f32 0.00390625, %v1512_v22 }
 0x2e7   : > { %v6821_v52 = vmul.f32 -1.442695, %v3333_v5  ;;  %v7136_v19 = vpop.eup %7135  ;;  %6583 = vst [vmem:[%s8546_s27 + $0x2a0] sm:$0xff] %v2989_v7 }
 0x2e8   : > { %v10121_v4 = vadd.f32 1.0, %v7136_v19  ;;  %7141 = vpow2.f32 %v6820_v46  ;;  %v10130_v1 = vpop.eup %7137  ;;  %13750 = vst [vmem:[#allocation58_spill] sm:$0xff] %v10143_v13  ;;  %v1829_v19 = vpop.xlane.xlu0 %1828 }
 0x2e9   : > { %v3541_v33 = vpop.f32.mrf.mxu2  ;;  %7143 = vpow2.f32 %v6821_v52  ;;  %v3750_v20 = vpop.f32.mrf.mxu3  ;;  %6584 = vst [vmem:[%s8546_s27 + $0x2a8] sm:$0xff] %v2990_v60 }
 0x2ea   : > { %v3542_v14 = vadd.f32 %v3541_v33, %v10091_v36  ;;  %v3126_v28 = vpop.f32.mrf.mxu0  ;;  %7145 = vrcp.f32 %v10121_v4  ;;  %v10139_v63 = vpop.eup %7139  ;;  %vm4456_vm2 = vweird.f32 %v10121_v4 }
 0x2eb   : > { %v3127_v11 = vadd.f32 %v3126_v28, %v10057_v55  ;;  %7147 = vrsqrt.f32 %v10123_v41  ;;  %v3335_v53 = vpop.f32.mrf.mxu1  ;;  %v2055_v28 = vsub.f32 %v1829_v19, %v1991_v47  ;;  %v2578_v57 = vmul.f32 %v10139_v63, %v10110_v21 }
 0x2ec   : > { %v3751_v32 = vadd.f32 %v3750_v20, %v3542_v14  ;;  %v2568_v14 = vmul.f32 %v10130_v1, %v10107_v12  ;;  %v1992_v20 = vmul.f32 %v10143_v13, %v1512_v22  ;;  %v4460_v22 = vand.u32 2147483647, %v10121_v4 }
 0x2ed   : > { %3173 = vmatmul.f32.gmra.mxu0 %v7725_v35  ;;  %3382 = vmatmul.f32.gmra.mxu1 %v7726_v8  ;;  %v3336_v50 = vadd.f32 %v3335_v53, %v3127_v11 }
 0x2ee   : > { %v6822_v59 = vmul.f32 -1.442695, %v3751_v32  ;;  %3591 = vmatmul.f32.gmra.mxu2 %v7725_v35  ;;  %3800 = vmatmul.f32.gmra.mxu3 %v7726_v8  ;;  %v7142_v5 = vpop.eup %7141  ;;  %v4462_v35 = vand.u32 2147483648, %v10121_v4  ;;  %v7727_v8 = vld [vmem:[%s8546_s27 + $0x130] sm:$0xff]  ;;  %v10166_v47 = vmul.f32 %v10130_v1, %v2568_v14  ;;  %vm4461_vm4 = vcmp.eq.f32.partialorder %v4460_v22, 8.507059e+37 }
 0x2ef   : > { %v7144_v46 = vpop.eup %7143  ;;  %v10145_v9 = vadd.f32 1.0, %v7142_v5  ;;  %v6823_v33 = vmul.f32 -1.442695, %v3336_v50  ;;  %v10168_v5 = vmul.f32 0.003921569, %v2055_v28 }
 0x2f0   : > { %7149 = vpow2.f32 %v6822_v59  ;;  %v7146_v26 = vpop.eup %7145  ;;  %v10147_v52 = vadd.f32 1.0, %v7144_v46  ;;  %v1832_v59 = vpop.xlane.xlu2 %1831  ;;  %v4463_v28 = vor.u32 1.1754944e-38, %v4462_v35 }
 0x2f1   : > { %v3544_v37 = vpop.f32.mrf.mxu2  ;;  %v4452_v30 = vmul.f32 %v7146_v26, %v10121_v4  ;;  %7151 = vrcp.f32 %v10145_v9  ;;  %v10157_v32 = vpop.eup %7147  ;;  %vm4457_vm1 = vweird.f32 %v7146_v26  ;;  %v2056_v50 = vsub.f32 %v1832_v59, %v1992_v20 }
 0x2f2   : > { %7153 = vrcp.f32 %v10147_v52  ;;  %v3753_v60 = vpop.f32.mrf.mxu3  ;;  %v3129_v46 = vpop.f32.mrf.mxu0  ;;  %vm4458_vm3 = vmor %vm4456_vm2, %vm4457_vm1  ;;  %vm4471_vm7 = vweird.f32 %v10145_v9  ;;  %vm4486_vm8 = vweird.f32 %v10147_v52 }
 0x2f3   : > { %v4453_v11 = vsub.f32 1.0, %v4452_v30  ;;  %7155 = vpow2.f32 %v6823_v33  ;;  %v10173_v30 = vmul.f32 %v10139_v63, %v2578_v57  ;;  %v3545_v57 = vadd.f32 %v3544_v37, %v10091_v36 }
 0x2f4   : > { %v10190_v4 = vmul.f32 0.003921569, %v2056_v50  ;;  %v4477_v37 = vand.u32 2147483648, %v10145_v9 }
 0x2f5   : > { %3176 = vmatmul.f32.gmra.mxu0 %v7727_v8  ;;  %3385 = vmatmul.f32.gmra.mxu1 %v7728_v31  ;;  %v4454_v53 = vmul.f32 %v7146_v26, %v4453_v11  ;;  %v10177_v11 = vmul.f32 %v10157_v32, %v10123_v41 }
 0x2f6   : > { %v7150_v58 = vpop.eup %7149  ;;  %3594 = vmatmul.f32.gmra.mxu2 %v7727_v8  ;;  %3803 = vmatmul.f32.gmra.mxu3 %v7728_v31 }
 0x2f7   : > { %v10170_v7 = vadd.f32 1.0, %v7150_v58  ;;  %v7152_v19 = vpop.eup %7151  ;;  %v4455_v33 = vadd.f32 %v7146_v26, %v4454_v53  ;;  %v3130_v58 = vadd.f32 %v3129_v46, %v10057_v55  ;;  %v4492_v46 = vand.u32 2147483648, %v10147_v52 }
 0x2f8   : > { %v10180_v14 = vpop.eup %7153  ;;  %v4467_v20 = vmul.f32 %v7152_v19, %v10145_v9  ;;  %vm4472_vm5 = vweird.f32 %v7152_v19  ;;  %v1518_v0 = vpop.xlane.xlu2 %1517 }
 0x2f9   : > { %7157 = vrcp.f32 %v10170_v7  ;;  %v4459_v8 = vsel %vm4458_vm3, %v7146_v26, %v4455_v33  ;;  %v4482_v31 = vmul.f32 %v10180_v14, %v10147_v52  ;;  %v3547_v53 = vpop.f32.mrf.mxu2  ;;  %v7156_v17 = vpop.eup %7155  ;;  %v4475_v26 = vand.u32 2147483647, %v10145_v9  ;;  %vm4473_vm9 = vmor %vm4471_vm7, %vm4472_vm5 }
 0x2fa   : > { %7159 = vrsqrt.f32 %v10168_v5  ;;  %v4464_v59 = vsel %vm4461_vm4, %v4463_v28, %v4459_v8  ;;  %v4468_v35 = vsub.f32 1.0, %v4467_v20  ;;  %v3338_v33 = vpop.f32.mrf.mxu1  ;;  %v10199_v48 = vadd.f32 1.0, %v7156_v17  ;;  %v7729_v20 = vld [vmem:[%s8546_s27 + $0x140] sm:$0xff]  ;;  %v7730_v8 = vld [vmem:[%s8546_s27 + $0x148] sm:$0xff] }
 0x2fb   : > { %6371 = vst [vmem:[%s10193_s30] sm:$0xff] %v4464_v59  ;;  %v4483_v22 = vsub.f32 1.0, %v4482_v31  ;;  %v3754_v28 = vadd.f32 %v3753_v60, %v3545_v57  ;;  %vm4487_vm6 = vweird.f32 %v10180_v14  ;;  %v4490_v59 = vand.u32 2147483647, %v10147_v52 }
 0x2fc   : > { %v4469_v50 = vmul.f32 %v7152_v19, %v4468_v35  ;;  %v3339_v61 = vadd.f32 %v3338_v33, %v3130_v58  ;;  %7161 = vrcp.f32 %v10199_v48  ;;  %vm4476_vm10 = vcmp.eq.f32.partialorder %v4475_v26, 8.507059e+37  ;;  %vm4488_vm11 = vmor %vm4486_vm8, %vm4487_vm6  ;;  %v3756_v33 = vpop.f32.mrf.mxu3 }
 0x2fd   : > { %3179 = vmatmul.f32.gmra.mxu0 %v7729_v20  ;;  %3388 = vmatmul.f32.gmra.mxu1 %v7730_v8  ;;  %v4484_v38 = vmul.f32 %v10180_v14, %v4483_v22  ;;  %v4478_v17 = vor.u32 1.1754944e-38, %v4477_v37  ;;  %v4493_v9 = vor.u32 1.1754944e-38, %v4492_v46  ;;  %v6824_v52 = vmul.f32 -1.442695, %v3754_v28 }
 0x2fe   : > { %3597 = vmatmul.f32.gmra.mxu2 %v7729_v20  ;;  %3806 = vmatmul.f32.gmra.mxu3 %v7730_v8  ;;  %v4470_v6 = vadd.f32 %v7152_v19, %v4469_v50  ;;  %v6825_v22 = vmul.f32 -1.442695, %v3339_v61  ;;  %v3132_v50 = vpop.f32.mrf.mxu0  ;;  %vm4491_vm12 = vcmp.eq.f32.partialorder %v4490_v59, 8.507059e+37  ;;  %v3548_v61 = vadd.f32 %v3547_v53, %v10091_v36 }
 0x2ff   : > { %v7158_v31 = vpop.eup %7157  ;;  %v4485_v60 = vadd.f32 %v10180_v14, %v4484_v38  ;;  %v1515_v38 = vpop.xlane.xlu0 %1514  ;;  %7163 = vpow2.f32 %v6824_v52  ;;  %v10228_v59 = vmul.f32 0.5, %v10173_v30  ;;  %vm4501_vm14 = vweird.f32 %v10170_v7 }
 0x300   : > { %v4497_v57 = vmul.f32 %v7158_v31, %v10170_v7  ;;  %v10212_v58 = vpop.eup %7159  ;;  %v4474_v35 = vsel %vm4473_vm9, %v7152_v19, %v4470_v6  ;;  %v4505_v6 = vand.u32 2147483647, %v10170_v7  ;;  %v4507_v19 = vand.u32 2147483648, %v10170_v7 }
 0x301   : > { %v4479_v20 = vsel %vm4476_vm10, %v4478_v17, %v4474_v35  ;;  %v4489_v26 = vsel %vm4488_vm11, %v10180_v14, %v4485_v60  ;;  %vm4502_vm13 = vweird.f32 %v7158_v31  ;;  %7165 = vpow2.f32 %v6825_v22  ;;  %v7731_v35 = vld [vmem:[%s8546_s27 + $0x150] sm:$0xff] }
 0x302   : > { %v4498_v37 = vsub.f32 1.0, %v4497_v57  ;;  %6372 = vst [vmem:[%s10193_s30 + $0x8] sm:$0xff] %v4479_v20  ;;  %v4494_v8 = vsel %vm4491_vm12, %v4493_v9, %v4489_v26  ;;  %v10222_v28 = vpop.eup %7161  ;;  %v10225_v14 = vmul.f32 0.5, %v10166_v47  ;;  %v2589_v17 = vmul.f32 %v10157_v32, %v10177_v11  ;;  %v3550_v57 = vpop.f32.mrf.mxu2  ;;  %v7732_v9 = vld [vmem:[%s8546_s27 + $0x158] sm:$0xff]  ;;  %vm4503_vm15 = vmor %vm4501_vm14, %vm4502_vm13 }
 0x303   : > { %6373 = vst [vmem:[%s10193_s30 + $0x10] sm:$0xff] %v4494_v8  ;;  %v3133_v60 = vadd.f32 %v3132_v50, %v10057_v55  ;;  %v10235_v52 = vmul.f32 0.00390625, %v1515_v38  ;;  %v4512_v47 = vmul.f32 %v10222_v28, %v10199_v48  ;;  %v3341_v30 = vpop.f32.mrf.mxu1  ;;  %7167 = vrsqrt.f32 %v10190_v4 }
 0x304   : > { %v4499_v46 = vmul.f32 %v7158_v31, %v4498_v37  ;;  %v4508_v11 = vor.u32 1.1754944e-38, %v4507_v19  ;;  %v3757_v22 = vadd.f32 %v3756_v33, %v3548_v61  ;;  %vm4506_vm0 = vcmp.eq.f32.partialorder %v4505_v6, 8.507059e+37 }
 0x305   : > { %3182 = vmatmul.f32.gmra.mxu0 %v7731_v35  ;;  %3391 = vmatmul.f32.gmra.mxu1 %v7732_v9  ;;  %13751 = vst [vmem:[#allocation59_spill] sm:$0xff] %v10235_v52  ;;  %v3342_v50 = vadd.f32 %v3341_v30, %v3133_v60  ;;  %v4513_v26 = vsub.f32 1.0, %v4512_v47  ;;  %v3551_v37 = vadd.f32 %v3550_v57, %v10091_v36  ;;  %v7164_v7 = vpop.eup %7163  ;;  %vm4517_vm1 = vweird.f32 %v10222_v28  ;;  %v3759_v60 = vpop.f32.mrf.mxu3 }
 0x306   : > { %v4500_v53 = vadd.f32 %v7158_v31, %v4499_v46  ;;  %3600 = vmatmul.f32.gmra.mxu2 %v7731_v35  ;;  %3809 = vmatmul.f32.gmra.mxu3 %v7732_v9  ;;  %v4520_v46 = vand.u32 2147483647, %v10199_v48  ;;  %v4522_v35 = vand.u32 2147483648, %v10199_v48  ;;  %v6826_v9 = vmul.f32 -1.442695, %v3757_v22  ;;  %v3135_v57 = vpop.f32.mrf.mxu0 }
 0x307   : > { %v7166_v3 = vpop.eup %7165  ;;  %v4514_v23 = vmul.f32 %v10222_v28, %v4513_v26  ;;  %v10248_v33 = vadd.f32 1.0, %v7164_v7  ;;  %v2598_v6 = vmul.f32 %v10212_v58, %v10168_v5  ;;  %v1993_v19 = vmul.f32 %v10235_v52, %v1515_v38  ;;  %v1835_v26 = vpop.xlane.xlu1 %1834 }
 0x308   : > { %v4504_v20 = vsel %vm4503_vm15, %v7158_v31, %v4500_v53  ;;  %v6827_v31 = vmul.f32 -1.442695, %v3342_v50  ;;  %v10253_v61 = vadd.f32 1.0, %v7166_v3  ;;  %7169 = vpow2.f32 %v6826_v9 }
 0x309   : > { %v4509_v8 = vsel %vm4506_vm0, %v4508_v11, %v4504_v20  ;;  %v4515_v53 = vadd.f32 %v10222_v28, %v4514_v23  ;;  %vm4516_vm2 = vweird.f32 %v10199_v48  ;;  %7171 = vrcp.f32 %v10248_v33  ;;  %v10258_v30 = vpop.eup %7167  ;;  %v7733_v23 = vld [vmem:[%s8546_s27 + $0x160] sm:$0xff]  ;;  %v7734_v48 = vld [vmem:[%s8546_s27 + $0x168] sm:$0xff] }
 0x30a   : > { %6374 = vst [vmem:[%s10193_s30 + $0x18] sm:$0xff] %v4509_v8  ;;  %v3760_v47 = vadd.f32 %v3759_v60, %v3551_v37  ;;  %v10260_v11 = vmul.f32 0.5, %v2589_v17  ;;  %v10262_v22 = vmul.f32 0.00390625, %v1518_v0  ;;  %vm10266_vm3 = vmor %vm4516_vm2, %vm4517_vm1  ;;  %v4523_v38 = vor.u32 1.1754944e-38, %v4522_v35 }
 0x30b   : > { %7173 = vrcp.f32 %v10253_v61  ;;  %v4519_v17 = vsel %vm10266_vm3, %v10222_v28, %v4515_v53  ;;  %vm4521_vm4 = vcmp.eq.f32.partialorder %v4520_v46, 8.507059e+37  ;;  %v3136_v50 = vadd.f32 %v3135_v57, %v10057_v55  ;;  %v3344_v28 = vpop.f32.mrf.mxu1  ;;  %v7736_v57 = vld [vmem:[%s8546_s27 + $0x178] sm:$0xff] }
 0x30c   : > { %13752 = vst [vmem:[#allocation60_spill] sm:$0xff] %v10262_v22  ;;  %7175 = vpow2.f32 %v6827_v31  ;;  %v2599_v20 = vmul.f32 %v10212_v58, %v2598_v6  ;;  %v4524_v37 = vsel %vm4521_vm4, %v4523_v38, %v4519_v17  ;;  %v2057_v7 = vsub.f32 %v1835_v26, %v1993_v19  ;;  %v10296_v17 = vpop.xlane.xlu0 %1837 }
 0x30d   : > { %3185 = vmatmul.f32.gmra.mxu0 %v7733_v23  ;;  %3394 = vmatmul.f32.gmra.mxu1 %v7734_v48  ;;  %6375 = vst [vmem:[%s10193_s30 + $0x20] sm:$0xff] %v4524_v37  ;;  %v6828_v8 = vmul.f32 -1.442695, %v3760_v47  ;;  %v10281_v60 = vmul.f32 %v10262_v22, %v1518_v0  ;;  %v3345_v6 = vadd.f32 %v3344_v28, %v3136_v50  ;;  %v4535_v37 = vand.u32 2147483647, %v10248_v33  ;;  %v7735_v28 = vld [vmem:[%s8546_s27 + $0x170] sm:$0xff] }
 0x30e   : > { %3603 = vmatmul.f32.gmra.mxu2 %v7733_v23  ;;  %3812 = vmatmul.f32.gmra.mxu3 %v7734_v48  ;;  %v7170_v35 = vpop.eup %7169  ;;  %v10287_v19 = vmul.f32 0.5, %v2599_v20  ;;  %v2608_v23 = vmul.f32 %v10258_v30, %v10190_v4  ;;  %v10294_v48 = vmul.f32 0.003921569, %v2057_v7  ;;  %vm4531_vm5 = vweird.f32 %v10248_v33  ;;  %v3138_v9 = vpop.f32.mrf.mxu0  ;;  %v7740_v22 = vld [vmem:[%s8546_s27 + $0x198] sm:$0xff] }
 0x30f   : > { %v7172_v46 = vpop.eup %7171  ;;  %v10285_v53 = vadd.f32 1.0, %v7170_v35  ;;  %7177 = vpow2.f32 %v6828_v8  ;;  %v4537_v8 = vand.u32 2147483648, %v10248_v33  ;;  %v3553_v35 = vpop.f32.mrf.mxu2  ;;  %v6829_v0 = vmul.f32 -1.442695, %v3345_v6 }
 0x310   : > { %13755 = vst [vmem:[#allocation61_spill] sm:$0xff] %v10287_v19  ;;  %v4527_v47 = vmul.f32 %v7172_v46, %v10248_v33  ;;  %v10309_v20 = vpop.xlane.xlu1 %1520  ;;  %vm4532_vm6 = vweird.f32 %v7172_v46  ;;  %v4550_v2 = vand.u32 2147483647, %v10253_v61  ;;  %v4552_v18 = vand.u32 2147483648, %v10253_v61  ;;  %v3762_v33 = vpop.f32.mrf.mxu3 }
 0x311   : > { %v7174_v3 = vpop.eup %7173  ;;  %13756 = vst [vmem:[#allocation62_spill] sm:$0xff] %v10294_v48  ;;  %7179 = vrcp.f32 %v10285_v53  ;;  %vm4546_vm7 = vweird.f32 %v10253_v61  ;;  %vm4536_vm9 = vcmp.eq.f32.partialorder %v4535_v37, 8.507059e+37  ;;  %v4538_v6 = vor.u32 1.1754944e-38, %v4537_v8  ;;  %vm4533_vm10 = vmor %vm4531_vm5, %vm4532_vm6 }
 0x312   : > { %v7176_v38 = vpop.eup %7175  ;;  %v4542_v50 = vmul.f32 %v7174_v3, %v10253_v61  ;;  %v4528_v26 = vsub.f32 1.0, %v4527_v47  ;;  %vm4547_vm8 = vweird.f32 %v7174_v3  ;;  %vm4551_vm12 = vcmp.eq.f32.partialorder %v4550_v2, 8.507059e+37 }
 0x313   : > { %v10307_v31 = vadd.f32 1.0, %v7176_v38  ;;  %vm4548_vm11 = vmor %vm4546_vm7, %vm4547_vm8  ;;  %v4553_v37 = vor.u32 1.1754944e-38, %v4552_v18  ;;  %v7738_v18 = vld [vmem:[%s8546_s27 + $0x188] sm:$0xff]  ;;  %vm4561_vm14 = vweird.f32 %v10285_v53 }
 0x314   : > { %v4543_v7 = vsub.f32 1.0, %v4542_v50  ;;  %v4529_v47 = vmul.f32 %v7172_v46, %v4528_v26 }
 0x315   : > { %3188 = vmatmul.f32.gmra.mxu0 %v7735_v28  ;;  %3397 = vmatmul.f32.gmra.mxu1 %v7736_v57  ;;  %7181 = vrcp.f32 %v10307_v31  ;;  %v7178_v38 = vpop.eup %7177  ;;  %vm4576_vm2 = vweird.f32 %v10307_v31 }
 0x316   : > { %3606 = vmatmul.f32.gmra.mxu2 %v7735_v28  ;;  %3815 = vmatmul.f32.gmra.mxu3 %v7736_v57  ;;  %v4544_v40 = vmul.f32 %v7174_v3, %v4543_v7  ;;  %v4530_v50 = vadd.f32 %v7172_v46, %v4529_v47  ;;  %v3554_v57 = vadd.f32 %v3553_v35, %v10091_v36  ;;  %v10320_v39 = vadd.f32 1.0, %v7178_v38  ;;  %v7737_v38 = vld [vmem:[%s8546_s27 + $0x180] sm:$0xff] }
 0x317   : > { %v10316_v28 = vpop.eup %7179  ;;  %7183 = vpow2.f32 %v6829_v0  ;;  %v3139_v7 = vadd.f32 %v3138_v9, %v10057_v55  ;;  %v4565_v47 = vand.u32 2147483647, %v10285_v53  ;;  %v3347_v9 = vpop.f32.mrf.mxu1 }
 0x318   : > { %v4545_v26 = vadd.f32 %v7174_v3, %v4544_v40  ;;  %v4534_v56 = vsel %vm4533_vm10, %v7172_v46, %v4530_v50  ;;  %v4557_v8 = vmul.f32 %v10316_v28, %v10285_v53  ;;  %7185 = vrcp.f32 %v10320_v39 }
 0x319   : > { %v4539_v35 = vsel %vm4536_vm9, %v4538_v6, %v4534_v56  ;;  %v3763_v2 = vadd.f32 %v3762_v33, %v3554_v57  ;;  %v10336_v56 = vmul.f32 %v10258_v30, %v2608_v23  ;;  %7187 = vrsqrt.f32 %v10294_v48 }
 0x31a   : > { %v4549_v40 = vsel %vm4548_vm11, %v7174_v3, %v4545_v26  ;;  %6376 = vst [vmem:[%s10193_s30 + $0x28] sm:$0xff] %v4539_v35  ;;  %v4558_v0 = vsub.f32 1.0, %v4557_v8  ;;  %v10339_v3 = vpop.xlane.xlu2 %1840  ;;  %v4567_v6 = vand.u32 2147483648, %v10285_v53  ;;  %v3348_v26 = vadd.f32 %v3347_v9, %v3139_v7  ;;  %v10348_v8 = vpop.xlane.xlu1 %1843 }
 0x31b   : > { %v4554_v61 = vsel %vm4551_vm12, %v4553_v37, %v4549_v40  ;;  %v10333_v50 = vpop.eup %7181  ;;  %v13757_v57 = vsub.f32 %v10296_v17, %v10281_v60  ;;  %vm4562_vm13 = vweird.f32 %v10316_v28  ;;  %v3556_v35 = vpop.f32.mrf.mxu2  ;;  %v10355_v7 = vmul.f32 0.00390625, %v10309_v20 }
 0x31c   : > { %6377 = vst [vmem:[%s10193_s30 + $0x30] sm:$0xff] %v4554_v61  ;;  %v4559_v23 = vmul.f32 %v10316_v28, %v4558_v0  ;;  %v4572_v33 = vmul.f32 %v10333_v50, %v10307_v31  ;;  %vm10358_vm15 = vcmp.eq.f32.partialorder %v4565_v47, 8.507059e+37  ;;  %v4580_v17 = vand.u32 2147483647, %v10307_v31  ;;  %v3141_v9 = vpop.f32.mrf.mxu0  ;;  %v1524_v61 = vpop.xlane.xlu0 %1523  ;;  %vm4563_vm0 = vmor %vm4561_vm14, %vm4562_vm13 }
 0x31d   : > { %3191 = vmatmul.f32.gmra.mxu0 %v7737_v38  ;;  %3400 = vmatmul.f32.gmra.mxu1 %v7738_v18  ;;  %v10346_v37 = vmul.f32 0.003921569, %v13757_v57  ;;  %v7184_v40 = vpop.eup %7183  ;;  %13759 = vst [vmem:[#allocation64_spill] sm:$0xff] %v10355_v7  ;;  %v6830_v57 = vmul.f32 -1.442695, %v3763_v2  ;;  %v4568_v53 = vor.u32 1.1754944e-38, %v4567_v6  ;;  %v3557_v42 = vadd.f32 %v3556_v35, %v10091_v36 }
 0x31e   : > { %3609 = vmatmul.f32.gmra.mxu2 %v7737_v38  ;;  %3818 = vmatmul.f32.gmra.mxu3 %v7738_v18  ;;  %v4560_v0 = vadd.f32 %v10316_v28, %v4559_v23  ;;  %v4573_v38 = vsub.f32 1.0, %v4572_v33  ;;  %v10364_v18 = vadd.f32 1.0, %v7184_v40  ;;  %v10366_v46 = vpop.eup %7185  ;;  %v4582_v47 = vand.u32 2147483648, %v10307_v31 }
 0x31f   : > { %13758 = vst [vmem:[#allocation63_spill] sm:$0xff] %v10346_v37  ;;  %v6831_v24 = vmul.f32 -1.442695, %v3348_v26  ;;  %vm4577_vm1 = vweird.f32 %v10333_v50  ;;  %v4587_v2 = vmul.f32 %v10366_v46, %v10320_v39  ;;  %v10377_v33 = vpop.eup %7187  ;;  %v10379_v40 = vmul.f32 0.00390625, %v1524_v61 }
 0x320   : > { %v4564_v43 = vsel %vm4563_vm0, %v10316_v28, %v4560_v0  ;;  %v4574_v23 = vmul.f32 %v10333_v50, %v4573_v38  ;;  %13762 = vst [vmem:[#allocation65_spill] sm:$0xff] %v10377_v33  ;;  %7189 = vrcp.f32 %v10364_v18  ;;  %vm10387_vm3 = vcmp.eq.f32.partialorder %v4580_v17, 8.507059e+37  ;;  %v3765_v0 = vpop.f32.mrf.mxu3  ;;  %v7739_v38 = vld [vmem:[%s8546_s27 + $0x190] sm:$0xff]  ;;  %vm10395_vm4 = vmor %vm4576_vm2, %vm4577_vm1 }
 0x321   : > { %13763 = vst [vmem:[#allocation66_spill] sm:$0xff] %v10379_v40  ;;  %v4569_v6 = vsel %vm10358_vm15, %v4568_v53, %v4564_v43  ;;  %v4588_v35 = vsub.f32 1.0, %v4587_v2  ;;  %7191 = vpow2.f32 %v6830_v57  ;;  %v4583_v31 = vor.u32 1.1754944e-38, %v4582_v47 }
 0x322   : > { %6378 = vst [vmem:[%s10193_s30 + $0x38] sm:$0xff] %v4569_v6  ;;  %v4575_v28 = vadd.f32 %v10333_v50, %v4574_v23  ;;  %v1527_v60 = vpop.xlane.xlu2 %1526  ;;  %v4597_v17 = vand.u32 2147483648, %v10320_v39  ;;  %7193 = vpow2.f32 %v6831_v24  ;;  %v3766_v53 = vadd.f32 %v3765_v0, %v3557_v42  ;;  %v3350_v23 = vpop.f32.mrf.mxu1 }
 0x323   : > { %v4589_v2 = vmul.f32 %v10366_v46, %v4588_v35  ;;  %vm4592_vm5 = vweird.f32 %v10366_v46  ;;  %v4595_v6 = vand.u32 2147483647, %v10320_v39  ;;  %v1530_v54 = vpop.xlane.xlu1 %1529  ;;  %v1995_v47 = vmul.f32 %v10355_v7, %v10309_v20 }
 0x324   : > { %v4579_v57 = vsel %vm10395_vm4, %v10333_v50, %v4575_v28  ;;  %v1996_v24 = vmul.f32 %v10379_v40, %v1524_v61  ;;  %v10411_v0 = vmul.f32 0.00390625, %v1527_v60  ;;  %vm4591_vm6 = vweird.f32 %v10320_v39  ;;  %v10423_v43 = vpop.f32.mrf.mxu0 }
 0x325   : > { %3194 = vmatmul.f32.gmra.mxu0 %v7739_v38  ;;  %3403 = vmatmul.f32.gmra.mxu1 %v7740_v22  ;;  %v4584_v42 = vsel %vm10387_vm3, %v4583_v31, %v4579_v57  ;;  %v4590_v50 = vadd.f32 %v10366_v46, %v4589_v2  ;;  %v3142_v28 = vadd.f32 %v3141_v9, %v10057_v55  ;;  %vm4593_vm7 = vmor %vm4591_vm6, %vm4592_vm5  ;;  %v4598_v61 = vor.u32 1.1754944e-38, %v4597_v17 }
 0x326   : > { %3612 = vmatmul.f32.gmra.mxu2 %v7739_v38  ;;  %3821 = vmatmul.f32.gmra.mxu3 %v7740_v22  ;;  %v6832_v22 = vmul.f32 -1.442695, %v3766_v53  ;;  %13768 = vst [vmem:[#allocation67_spill] sm:$0xff] %v10411_v0  ;;  %v10417_v35 = vpop.eup %7189  ;;  %v2618_v20 = vmul.f32 %v10377_v33, %v10294_v48  ;;  %v10421_v26 = vmul.f32 0.00390625, %v1530_v54  ;;  %v3559_v38 = vpop.f32.mrf.mxu2  ;;  %vm4596_vm8 = vcmp.eq.f32.partialorder %v4595_v6, 8.507059e+37  ;;  %v7742_v6 = vld [vmem:[%s8546_s27 + $0x1a8] sm:$0xff] }
 0x327   : > { %6379 = vst [vmem:[%s10193_s30 + $0x40] sm:$0xff] %v4584_v42  ;;  %v7192_v31 = vpop.eup %7191  ;;  %v4594_v39 = vsel %vm4593_vm7, %v10366_v46, %v4590_v50  ;;  %v4602_v9 = vmul.f32 %v10417_v35, %v10364_v18  ;;  %v2059_v17 = vsub.f32 %v10339_v3, %v1995_v47  ;;  %v2060_v57 = vsub.f32 %v10348_v8, %v1996_v24  ;;  %v7741_v46 = vld [vmem:[%s8546_s27 + $0x1a0] sm:$0xff] }
 0x328   : > { %13769 = vst [vmem:[#allocation68_spill] sm:$0xff] %v10421_v26  ;;  %7195 = vpow2.f32 %v6832_v22  ;;  %v7194_v53 = vpop.eup %7193  ;;  %v4599_v2 = vsel %vm4596_vm8, %v4598_v61, %v4594_v39  ;;  %v10431_v42 = vadd.f32 1.0, %v7192_v31  ;;  %v1997_v22 = vmul.f32 %v10411_v0, %v1527_v60  ;;  %v1847_v60 = vpop.xlane.xlu0 %1846 }
 0x329   : > { %7197 = vrsqrt.f32 %v10346_v37  ;;  %6380 = vst [vmem:[%s10193_s30 + $0x48] sm:$0xff] %v4599_v2  ;;  %v4603_v40 = vsub.f32 1.0, %v4602_v9  ;;  %v10435_v7 = vadd.f32 1.0, %v7194_v53  ;;  %v3351_v52 = vadd.f32 %v3350_v23, %v3142_v28  ;;  %v3768_v31 = vpop.f32.mrf.mxu3 }
 0x32a   : > { %v2619_v50 = vmul.f32 %v10377_v33, %v2618_v20  ;;  %v1998_v3 = vmul.f32 %v10421_v26, %v1530_v54  ;;  %v4612_v8 = vand.u32 2147483648, %v10364_v18  ;;  %7199 = vrcp.f32 %v10431_v42  ;;  %v10452_v39 = vpop.f32.mrf.mxu1  ;;  %v1850_v2 = vpop.xlane.xlu2 %1849 }
 0x32b   : > { %v4604_v47 = vmul.f32 %v10417_v35, %v4603_v40  ;;  %vm4607_vm9 = vweird.f32 %v10417_v35  ;;  %v4610_v23 = vand.u32 2147483647, %v10364_v18  ;;  %7201 = vrcp.f32 %v10435_v7 }
 0x32c   : > { %v10447_v28 = vmul.f32 0.003921569, %v2059_v17  ;;  %v10449_v20 = vmul.f32 0.003921569, %v2060_v57  ;;  %v6833_v54 = vmul.f32 -1.442695, %v3351_v52  ;;  %v3560_v61 = vadd.f32 %v3559_v38, %v10091_v36 }
 0x32d   : > { %3197 = vmatmul.f32.gmra.mxu0 %v7741_v46  ;;  %3406 = vmatmul.f32.gmra.mxu1 %v7742_v6  ;;  %v2061_v40 = vsub.f32 %v1847_v60, %v1997_v22  ;;  %v4605_v53 = vadd.f32 %v10417_v35, %v4604_v47  ;;  %vm4606_vm10 = vweird.f32 %v10364_v18  ;;  %v10461_v17 = vmul.f32 0.5, %v10336_v56  ;;  %v10473_v60 = vpop.f32.mrf.mxu0 }
 0x32e   : > { %3615 = vmatmul.f32.gmra.mxu2 %v7741_v46  ;;  %3824 = vmatmul.f32.gmra.mxu3 %v7742_v6  ;;  %v7196_v24 = vpop.eup %7195  ;;  %13770 = vst [vmem:[#allocation69_spill] sm:$0xff] %v10447_v28  ;;  %vm4608_vm11 = vmor %vm4606_vm10, %vm4607_vm9  ;;  %v4613_v52 = vor.u32 1.1754944e-38, %v4612_v8  ;;  %v2062_v38 = vsub.f32 %v1850_v2, %v1998_v3  ;;  %7203 = vpow2.f32 %v6833_v54  ;;  %vm4611_vm12 = vcmp.eq.f32.partialorder %v4610_v23, 8.507059e+37  ;;  %v3562_v3 = vpop.f32.mrf.mxu2  ;;  %v7744_v54 = vld [vmem:[%s8546_s27 + $0x1b8] sm:$0xff] }
 0x32f   : > { %13771 = vst [vmem:[#allocation70_spill] sm:$0xff] %v10449_v20  ;;  %v10454_v9 = vpop.eup %7197  ;;  %v10458_v46 = vadd.f32 1.0, %v7196_v24  ;;  %v4609_v57 = vsel %vm4608_vm11, %v10417_v35, %v4605_v53  ;;  %v4625_v22 = vand.u32 2147483647, %v10431_v42  ;;  %v10470_v56 = vmul.f32 0.5, %v2619_v50  ;;  %v7743_v24 = vld [vmem:[%s8546_s27 + $0x1b0] sm:$0xff] }
 0x330   : > { %13772 = vst [vmem:[#allocation71_spill] sm:$0xff] %v10454_v9  ;;  %v10468_v18 = vpop.eup %7199  ;;  %v4614_v6 = vsel %vm4611_vm12, %v4613_v52, %v4609_v57  ;;  %v3769_v8 = vadd.f32 %v3768_v31, %v3560_v61  ;;  %v10479_v35 = vmul.f32 %v10454_v9, %v10346_v37  ;;  %v10482_v23 = vmul.f32 0.003921569, %v2061_v40 }
 0x331   : > { %13773 = vst [vmem:[#allocation72_spill] sm:$0xff] %v10461_v17  ;;  %7205 = vrcp.f32 %v10458_v46  ;;  %v10475_v47 = vpop.eup %7201  ;;  %v4617_v50 = vmul.f32 %v10468_v18, %v10431_v42  ;;  %v10489_v61 = vmul.f32 0.003921569, %v2062_v38  ;;  %vm4621_vm13 = vweird.f32 %v10431_v42  ;;  %v7759_v17 = vld [vmem:[%s8546_s27 + $0x230] sm:$0xff] }
 0x332   : > { %13774 = vst [vmem:[#allocation73_spill] sm:$0xff] %v10470_v56  ;;  %7207 = vrsqrt.f32 %v10447_v28  ;;  %v4627_v31 = vand.u32 2147483648, %v10431_v42  ;;  %v4632_v53 = vmul.f32 %v10475_v47, %v10435_v7  ;;  %vm10495_vm14 = vcmp.eq.f32.partialorder %v4625_v22, 8.507059e+37  ;;  %v3356_v48 = vpop.f32.mrf.mxu1 }
 0x333   : > { %7209 = vrsqrt.f32 %v10449_v20  ;;  %13775 = vst [vmem:[#allocation74_spill] sm:$0xff] %v10482_v23  ;;  %v4618_v40 = vsub.f32 1.0, %v4617_v50  ;;  %vm4636_vm15 = vweird.f32 %v10435_v7  ;;  %v4640_v52 = vand.u32 2147483647, %v10435_v7 }
 0x334   : > { %6381 = vst [vmem:[%s10193_s30 + $0x50] sm:$0xff] %v4614_v6  ;;  %v7204_v38 = vpop.eup %7203  ;;  %v4633_v57 = vsub.f32 1.0, %v4632_v53  ;;  %v4642_v6 = vand.u32 2147483648, %v10435_v7  ;;  %v6834_v26 = vmul.f32 -1.442695, %v3769_v8  ;;  %v3145_v0 = vadd.f32 %v10423_v43, %v10057_v55  ;;  %v3771_v43 = vpop.f32.mrf.mxu3 }
 0x335   : > { %3200 = vmatmul.f32.gmra.mxu0 %v7743_v24  ;;  %3409 = vmatmul.f32.gmra.mxu1 %v7744_v54  ;;  %13776 = vst [vmem:[#allocation75_spill] sm:$0xff] %v10489_v61  ;;  %v4619_v50 = vmul.f32 %v10468_v18, %v4618_v40  ;;  %vm4622_vm0 = vweird.f32 %v10468_v18  ;;  %v10508_v22 = vadd.f32 1.0, %v7204_v38  ;;  %vm4637_vm1 = vweird.f32 %v10475_v47 }
 0x336   : > { %3618 = vmatmul.f32.gmra.mxu2 %v7743_v24  ;;  %3827 = vmatmul.f32.gmra.mxu3 %v7744_v54  ;;  %v3563_v24 = vadd.f32 %v3562_v3, %v10091_v36  ;;  %v4634_v53 = vmul.f32 %v10475_v47, %v4633_v57  ;;  %7211 = vpow2.f32 %v6834_v26  ;;  %v4628_v33 = vor.u32 1.1754944e-38, %v4627_v31  ;;  %vm4623_vm3 = vmor %vm4621_vm13, %vm4622_vm0 }
 0x337   : > { %v10504_v37 = vpop.eup %7205  ;;  %v4620_v38 = vadd.f32 %v10468_v18, %v4619_v50  ;;  %vm10520_vm2 = vcmp.eq.f32.partialorder %v4640_v52, 8.507059e+37  ;;  %7213 = vrcp.f32 %v10508_v22  ;;  %v4643_v57 = vor.u32 1.1754944e-38, %v4642_v6  ;;  %vm10536_vm4 = vmor %vm4636_vm15, %vm4637_vm1  ;;  %v7745_v6 = vld [vmem:[%s8546_s27 + $0x1c0] sm:$0xff] }
 0x338   : > { %v10511_v54 = vpop.eup %7207  ;;  %v4647_v8 = vmul.f32 %v10504_v37, %v10458_v46  ;;  %v4635_v26 = vadd.f32 %v10475_v47, %v4634_v53  ;;  %v3354_v25 = vadd.f32 %v10452_v39, %v3145_v0  ;;  %v4655_v52 = vand.u32 2147483647, %v10458_v46  ;;  %v7746_v53 = vld [vmem:[%s8546_s27 + $0x1c8] sm:$0xff] }
 0x339   : > { %13779 = vst [vmem:[#allocation76_spill] sm:$0xff] %v10511_v54  ;;  %v10517_v40 = vpop.eup %7209  ;;  %v4624_v50 = vsel %vm4623_vm3, %v10468_v18, %v4620_v38  ;;  %v4657_v42 = vand.u32 2147483648, %v10458_v46  ;;  %v3772_v13 = vadd.f32 %v3771_v43, %v3563_v24  ;;  %vm4652_vm5 = vweird.f32 %v10504_v37  ;;  %v3565_v18 = vpop.f32.mrf.mxu2 }
 0x33a   : > { %13780 = vst [vmem:[#allocation77_spill] sm:$0xff] %v10517_v40  ;;  %v4648_v44 = vsub.f32 1.0, %v4647_v8  ;;  %v4629_v0 = vsel %vm10495_vm14, %v4628_v33, %v4624_v50  ;;  %v4639_v7 = vsel %vm10536_vm4, %v10475_v47, %v4635_v26  ;;  %v10551_v8 = vpop.f32.mrf.mxu0  ;;  %vm2574_vm6 = vweird.f32 %v10130_v1 }
 0x33b   : > { %v2638_v2 = vmul.f32 %v10511_v54, %v10447_v28  ;;  %7215 = vrsqrt.f32 %v10482_v23  ;;  %6382 = vst [vmem:[%s10193_s30 + $0x58] sm:$0xff] %v4629_v0  ;;  %v4644_v33 = vsel %vm10520_vm2, %v4643_v57, %v4639_v7  ;;  %v6835_v47 = vmul.f32 -1.442695, %v3354_v25  ;;  %v1533_v57 = vpop.xlane.xlu0 %1532 }
 0x33c   : > { %v4649_v39 = vmul.f32 %v10504_v37, %v4648_v44  ;;  %v7212_v44 = vpop.eup %7211  ;;  %7217 = vrsqrt.f32 %v10489_v61  ;;  %6383 = vst [vmem:[%s10193_s30 + $0x60] sm:$0xff] %v4644_v33  ;;  %vm4651_vm7 = vweird.f32 %v10458_v46  ;;  %v6836_v43 = vmul.f32 -1.442695, %v3772_v13 }
 0x33d   : > { %3203 = vmatmul.f32.gmra.mxu0 %v7745_v6  ;;  %3412 = vmatmul.f32.gmra.mxu1 %v7746_v53  ;;  %v10564_v38 = vpop.eup %7213  ;;  %vm2573_vm8 = vweird.f32 %v10107_v12  ;;  %vm4653_vm9 = vmor %vm4651_vm7, %vm4652_vm5  ;;  %v4658_v3 = vor.u32 1.1754944e-38, %v4657_v42  ;;  %v10569_v26 = vadd.f32 1.0, %v7212_v44  ;;  %7219 = vpow2.f32 %v6835_v47  ;;  %v7747_v44 = vld [vmem:[%s8546_s27 + $0x1d0] sm:$0xff] }
 0x33e   : > { %3621 = vmatmul.f32.gmra.mxu2 %v7745_v6  ;;  %3830 = vmatmul.f32.gmra.mxu3 %v7746_v53  ;;  %v4650_v24 = vadd.f32 %v10504_v37, %v4649_v39  ;;  %v3148_v25 = vadd.f32 %v10473_v60, %v10057_v55  ;;  %vm4656_vm10 = vcmp.eq.f32.partialorder %v4655_v52, 8.507059e+37  ;;  %v4662_v13 = vmul.f32 %v10564_v38, %v10508_v22  ;;  %v3774_v52 = vpop.f32.mrf.mxu3  ;;  %v10582_v53 = vpop.f32.mrf.mxu1  ;;  %vm2575_vm15 = vmor %vm2573_vm8, %vm2574_vm6 }
 0x33f   : > { %7221 = vpow2.f32 %v6836_v43  ;;  %v2629_v46 = vmul.f32 %v10454_v9, %v10479_v35  ;;  %v2639_v31 = vmul.f32 %v10511_v54, %v2638_v2  ;;  %v13785_v0 = vsub.f32 1.5, %v10225_v14 }
 0x340   : > { %v4654_v50 = vsel %vm4653_vm9, %v10504_v37, %v4650_v24  ;;  %7223 = vrcp.f32 %v10569_v26  ;;  %v4663_v6 = vsub.f32 1.0, %v4662_v13  ;;  %v3357_v37 = vadd.f32 %v3356_v48, %v3148_v25  ;;  %v7748_v48 = vld [vmem:[%s8546_s27 + $0x1d8] sm:$0xff] }
 0x341   : > { %v4659_v42 = vsel %vm4656_vm10, %v4658_v3, %v4654_v50  ;;  %v2572_v7 = vmul.f32 %v10130_v1, %v13785_v0  ;;  %v10587_v35 = vpop.eup %7215  ;;  %v10589_v39 = vmul.f32 0.00390625, %v1533_v57  ;;  %v4670_v2 = vand.u32 2147483647, %v10508_v22  ;;  %v1536_v0 = vpop.xlane.xlu2 %1535 }
 0x342   : > { %6384 = vst [vmem:[%s10193_s30 + $0x68] sm:$0xff] %v4659_v42  ;;  %v4672_v33 = vand.u32 2147483648, %v10508_v22  ;;  %v3566_v47 = vadd.f32 %v3565_v18, %v10091_v36  ;;  %v10596_v24 = vpop.eup %7217  ;;  %v4664_v43 = vmul.f32 %v10564_v38, %v4663_v6  ;;  %vm4667_vm11 = vweird.f32 %v10564_v38  ;;  %v1853_v42 = vpop.xlane.xlu1 %1852 }
 0x343   : > { %13786 = vst [vmem:[#allocation78_spill] sm:$0xff] %v10587_v35  ;;  %v6837_v3 = vmul.f32 -1.442695, %v3357_v37  ;;  %v7220_v25 = vpop.eup %7219  ;;  %v10601_v50 = vmul.f32 0.5, %v2629_v46  ;;  %v10603_v13 = vmul.f32 0.5, %v2639_v31  ;;  %v2648_v18 = vmul.f32 %v10517_v40, %v10449_v20  ;;  %v10611_v37 = vpop.f32.mrf.mxu2 }
 0x344   : > { %13787 = vst [vmem:[#allocation79_spill] sm:$0xff] %v10589_v39  ;;  %v3775_v60 = vadd.f32 %v3774_v52, %v3566_v47  ;;  %v4665_v14 = vadd.f32 %v10564_v38, %v4664_v43  ;;  %vm4666_vm12 = vweird.f32 %v10508_v22  ;;  %v10609_v6 = vadd.f32 1.0, %v7220_v25  ;;  %v10613_v46 = vpop.f32.mrf.mxu0 }
 0x345   : > { %3206 = vmatmul.f32.gmra.mxu0 %v7747_v44  ;;  %3415 = vmatmul.f32.gmra.mxu1 %v7748_v48  ;;  %13788 = vst [vmem:[#allocation80_spill] sm:$0xff] %v10596_v24  ;;  %v7222_v28 = vpop.eup %7221  ;;  %7225 = vpow2.f32 %v6837_v3  ;;  %vm4668_vm13 = vmor %vm4666_vm12, %vm4667_vm11  ;;  %vm4671_vm14 = vcmp.eq.f32.partialorder %v4670_v2, 8.507059e+37  ;;  %v4673_v52 = vor.u32 1.1754944e-38, %v4672_v33  ;;  %v2649_v2 = vmul.f32 %v10517_v40, %v2648_v18 }
 0x346   : > { %3624 = vmatmul.f32.gmra.mxu2 %v7747_v44  ;;  %3833 = vmatmul.f32.gmra.mxu3 %v7748_v48  ;;  %13789 = vst [vmem:[#allocation81_spill] sm:$0xff] %v10601_v50  ;;  %v10615_v31 = vpop.eup %7223  ;;  %v1999_v44 = vmul.f32 %v10589_v39, %v1533_v57  ;;  %v10620_v47 = vadd.f32 1.0, %v7222_v28  ;;  %v4669_v22 = vsel %vm4668_vm13, %v10564_v38, %v4665_v14  ;;  %7227 = vrcp.f32 %v10609_v6  ;;  %v10650_v39 = vpop.f32.mrf.mxu1 }
 0x347   : > { %13790 = vst [vmem:[#allocation82_spill] sm:$0xff] %v10603_v13  ;;  %v4677_v48 = vmul.f32 %v10615_v31, %v10569_v26  ;;  %v6838_v57 = vmul.f32 -1.442695, %v3775_v60  ;;  %v10631_v33 = vmul.f32 0.00390625, %v1536_v0  ;;  %v4674_v28 = vsel %vm4671_vm14, %v4673_v52, %v4669_v22  ;;  %v7749_v52 = vld [vmem:[%s8546_s27 + $0x1e0] sm:$0xff] }
 0x348   : > { %v10634_v43 = vsel %vm2575_vm15, %v10130_v1, %v2572_v7  ;;  %v2658_v12 = vmul.f32 %v10587_v35, %v10482_v23  ;;  %v2668_v38 = vmul.f32 %v10596_v24, %v10489_v61  ;;  %6385 = vst [vmem:[%s10193_s30 + $0x70] sm:$0xff] %v4674_v28  ;;  %7229 = vrcp.f32 %v10620_v47  ;;  %v7750_v1 = vld [vmem:[%s8546_s27 + $0x1e8] sm:$0xff]  ;;  %v3777_v28 = vpop.f32.mrf.mxu3 }
 0x349   : > { %13791 = vst [vmem:[#allocation83_spill] sm:$0xff] %v10631_v33  ;;  %v4678_v14 = vsub.f32 1.0, %v4677_v48  ;;  %v2063_v25 = vsub.f32 %v1853_v42, %v1999_v44  ;;  %v4687_v18 = vand.u32 2147483648, %v10569_v26  ;;  %vm4682_vm0 = vweird.f32 %v10615_v31 }
 0x34a   : > { %v4685_v48 = vand.u32 2147483647, %v10569_v26  ;;  %7231 = vpow2.f32 %v6838_v57  ;;  %v10652_v42 = vmul.f32 0.5, %v2649_v2  ;;  %v10655_v44 = vmul.f32 %v10631_v33, %v1536_v0  ;;  %v10657_v3 = vpop.xlane.xlu1 %1538 }
 0x34b   : > { %v7226_v7 = vpop.eup %7225  ;;  %v4679_v22 = vmul.f32 %v10615_v31, %v4678_v14  ;;  %v3151_v14 = vadd.f32 %v10551_v8, %v10057_v55  ;;  %v10666_v57 = vmul.f32 %v10587_v35, %v2658_v12  ;;  %vm4681_vm1 = vweird.f32 %v10569_v26 }
 0x34c   : > { %13792 = vst [vmem:[#allocation84_spill] sm:$0xff] %v10652_v42  ;;  %v10659_v60 = vadd.f32 1.0, %v7226_v7  ;;  %v10663_v61 = vpop.eup %7227  ;;  %v10673_v0 = vmul.f32 0.003921569, %v2063_v25  ;;  %vm4683_vm2 = vmor %vm4681_vm1, %vm4682_vm0  ;;  %v4688_v8 = vor.u32 1.1754944e-38, %v4687_v18  ;;  %vm4686_vm3 = vcmp.eq.f32.partialorder %v4685_v48, 8.507059e+37  ;;  %v10689_v33 = vpop.f32.mrf.mxu0 }
 0x34d   : > { %3209 = vmatmul.f32.gmra.mxu0 %v7749_v52  ;;  %3418 = vmatmul.f32.gmra.mxu1 %v7750_v1  ;;  %v4680_v2 = vadd.f32 %v10615_v31, %v4679_v22  ;;  %v4692_v12 = vmul.f32 %v10663_v61, %v10609_v6  ;;  %v10684_v26 = vmul.f32 0.00390625, %v10657_v3  ;;  %v3360_v25 = vadd.f32 %v10582_v53, %v3151_v14  ;;  %v10687_v22 = vpop.f32.mrf.mxu2 }
 0x34e   : > { %3627 = vmatmul.f32.gmra.mxu2 %v7749_v52  ;;  %3836 = vmatmul.f32.gmra.mxu3 %v7750_v1  ;;  %v10669_v52 = vmul.f32 %v10596_v24, %v2668_v38  ;;  %13793 = vst [vmem:[#allocation85_spill] sm:$0xff] %v10673_v0  ;;  %v10675_v1 = vpop.xlane.xlu0 %1855  ;;  %7233 = vrcp.f32 %v10659_v60  ;;  %v7230_v38 = vpop.eup %7229  ;;  %v4700_v48 = vand.u32 2147483647, %v10609_v6  ;;  %v3569_v14 = vadd.f32 %v10611_v37, %v10091_v36 }
 0x34f   : > { %v4684_v7 = vsel %vm4683_vm2, %v10615_v31, %v4680_v2  ;;  %13794 = vst [vmem:[#allocation86_spill] sm:$0xff] %v10684_v26  ;;  %v2064_v18 = vsub.f32 %v10675_v1, %v10655_v44  ;;  %v4693_v23 = vsub.f32 1.0, %v4692_v12  ;;  %v4707_v35 = vmul.f32 %v7230_v38, %v10620_v47  ;;  %v10701_v44 = vpop.xlane.xlu2 %1858  ;;  %v7751_v12 = vld [vmem:[%s8546_s27 + $0x1f0] sm:$0xff] }
 0x350   : > { %v4689_v24 = vsel %vm4686_vm3, %v4688_v8, %v4684_v7  ;;  %v7232_v31 = vpop.eup %7231  ;;  %v4702_v2 = vand.u32 2147483648, %v10609_v6  ;;  %v6839_v53 = vmul.f32 -1.442695, %v3360_v25  ;;  %vm4697_vm4 = vweird.f32 %v10663_v61 }
 0x351   : > { %6386 = vst [vmem:[%s10193_s30 + $0x78] sm:$0xff] %v4689_v24  ;;  %v4694_v20 = vmul.f32 %v10663_v61, %v4693_v23  ;;  %v4708_v1 = vsub.f32 1.0, %v4707_v35  ;;  %v10703_v8 = vadd.f32 1.0, %v7232_v31  ;;  %v7752_v24 = vld [vmem:[%s8546_s27 + $0x1f8] sm:$0xff]  ;;  %vm4696_vm5 = vweird.f32 %v10609_v6 }
 0x352   : > { %vm4711_vm6 = vweird.f32 %v10620_v47  ;;  %v4717_v7 = vand.u32 2147483648, %v10620_v47  ;;  %7235 = vpow2.f32 %v6839_v53  ;;  %vm4712_vm7 = vweird.f32 %v7230_v38  ;;  %vm4698_vm8 = vmor %vm4696_vm5, %vm4697_vm4 }
 0x353   : > { %v4695_v37 = vadd.f32 %v10663_v61, %v4694_v20  ;;  %v4709_v35 = vmul.f32 %v7230_v38, %v4708_v1  ;;  %v4715_v25 = vand.u32 2147483647, %v10620_v47  ;;  %v4703_v31 = vor.u32 1.1754944e-38, %v4702_v2  ;;  %vm4713_vm10 = vmor %vm4711_vm6, %vm4712_vm7 }
 0x354   : > { %v10710_v23 = vpop.eup %7233  ;;  %7237 = vrcp.f32 %v10703_v8  ;;  %v3778_v53 = vadd.f32 %v3777_v28, %v3569_v14  ;;  %vm4701_vm9 = vcmp.eq.f32.partialorder %v4700_v48, 8.507059e+37  ;;  %v3154_v13 = vadd.f32 %v10613_v46, %v10057_v55 }
 0x355   : > { %3212 = vmatmul.f32.gmra.mxu0 %v7751_v12  ;;  %3421 = vmatmul.f32.gmra.mxu1 %v7752_v24  ;;  %v4722_v6 = vmul.f32 %v10710_v23, %v10659_v60  ;;  %v4699_v20 = vsel %vm4698_vm8, %v10663_v61, %v4695_v37  ;;  %v4710_v1 = vadd.f32 %v7230_v38, %v4709_v35  ;;  %7239 = vrsqrt.f32 %v10673_v0 }
 0x356   : > { %3630 = vmatmul.f32.gmra.mxu2 %v7751_v12  ;;  %3839 = vmatmul.f32.gmra.mxu3 %v7752_v24  ;;  %v10719_v12 = vpop.f32.mrf.mxu3  ;;  %v10721_v24 = vpop.f32.mrf.mxu1  ;;  %v4704_v2 = vsel %vm4701_vm9, %v4703_v31, %v4699_v20  ;;  %v4718_v28 = vor.u32 1.1754944e-38, %v4717_v7  ;;  %vm4716_vm11 = vcmp.eq.f32.partialorder %v4715_v25, 8.507059e+37  ;;  %v4730_v61 = vand.u32 2147483647, %v10659_v60 }
 0x357   : > { %v1542_v40 = vpop.xlane.xlu0 %1541  ;;  %v4723_v14 = vsub.f32 1.0, %v4722_v6  ;;  %6387 = vst [vmem:[%s10193_s30 + $0x80] sm:$0xff] %v4704_v2  ;;  %v4714_v50 = vsel %vm4713_vm10, %v7230_v38, %v4710_v1  ;;  %v4732_v48 = vand.u32 2147483648, %v10659_v60  ;;  %vm4727_vm12 = vweird.f32 %v10710_v23  ;;  %v10735_v31 = vpop.f32.mrf.mxu2  ;;  %v7753_v1 = vld [vmem:[%s8546_s27 + $0x200] sm:$0xff]  ;;  %v7754_v2 = vld [vmem:[%s8546_s27 + $0x208] sm:$0xff] }
 0x358   : > { %v7236_v46 = vpop.eup %7235  ;;  %v4719_v37 = vsel %vm4716_vm11, %v4718_v28, %v4714_v50  ;;  %v6840_v47 = vmul.f32 -1.442695, %v3778_v53  ;;  %v10737_v7 = vpop.f32.mrf.mxu0  ;;  %v10739_v6 = vmul.f32 0.003921569, %v2064_v18  ;;  %v10743_v38 = vmul.f32 %v10684_v26, %v10657_v3 }
 0x359   : > { %v4724_v35 = vmul.f32 %v10710_v23, %v4723_v14  ;;  %6388 = vst [vmem:[%s10193_s30 + $0x88] sm:$0xff] %v4719_v37  ;;  %v1545_v25 = vpop.xlane.xlu2 %1544  ;;  %v10746_v20 = vadd.f32 1.0, %v7236_v46  ;;  %v3363_v50 = vadd.f32 %v10650_v39, %v3154_v13  ;;  %vm4726_vm13 = vweird.f32 %v10659_v60  ;;  %v10767_v46 = vpop.xlane.xlu1 %1861 }
 0x35a   : > { %13795 = vst [vmem:[#allocation87_spill] sm:$0xff] %v10739_v6  ;;  %v10751_v53 = vpop.eup %7237  ;;  %v10755_v18 = vmul.f32 0.00390625, %v1542_v40  ;;  %7241 = vpow2.f32 %v6840_v47  ;;  %vm4728_vm14 = vmor %vm4726_vm13, %vm4727_vm12  ;;  %v4733_v3 = vor.u32 1.1754944e-38, %v4732_v48  ;;  %v3572_v13 = vadd.f32 %v10687_v22, %v10091_v36 }
 0x35b   : > { %v4725_v28 = vadd.f32 %v10710_v23, %v4724_v35  ;;  %v4737_v39 = vmul.f32 %v10751_v53, %v10703_v8  ;;  %7243 = vrcp.f32 %v10746_v20  ;;  %v10764_v14 = vpop.eup %7239  ;;  %vm4731_vm15 = vcmp.eq.f32.partialorder %v4730_v61, 8.507059e+37 }
 0x35c   : > { %13796 = vst [vmem:[#allocation88_spill] sm:$0xff] %v10755_v18  ;;  %v10769_v37 = vmul.f32 0.00390625, %v1545_v25  ;;  %v6841_v35 = vmul.f32 -1.442695, %v3363_v50  ;;  %7245 = vrsqrt.f32 %v10739_v6  ;;  %v10777_v22 = vmul.f32 0.5, %v10666_v57 }
 0x35d   : > { %3215 = vmatmul.f32.gmra.mxu0 %v7753_v1  ;;  %3424 = vmatmul.f32.gmra.mxu1 %v7754_v2  ;;  %13797 = vst [vmem:[#allocation89_spill] sm:$0xff] %v10764_v14  ;;  %v4729_v60 = vsel %vm4728_vm14, %v10710_v23, %v4725_v28  ;;  %v4738_v47 = vsub.f32 1.0, %v4737_v39  ;;  %v2002_v23 = vmul.f32 %v10755_v18, %v1542_v40  ;;  %v4747_v61 = vand.u32 2147483648, %v10703_v8 }
 0x35e   : > { %3633 = vmatmul.f32.gmra.mxu2 %v7753_v1  ;;  %3842 = vmatmul.f32.gmra.mxu3 %v7754_v2  ;;  %13798 = vst [vmem:[#allocation90_spill] sm:$0xff] %v10769_v37  ;;  %v4734_v48 = vsel %vm4731_vm15, %v4733_v3, %v4729_v60  ;;  %v3157_v2 = vadd.f32 %v10689_v33, %v10057_v55  ;;  %7247 = vpow2.f32 %v6841_v35  ;;  %v3783_v28 = vpop.f32.mrf.mxu3  ;;  %v10782_v50 = vpop.f32.mrf.mxu1  ;;  %vm4742_vm0 = vweird.f32 %v10751_v53 }
 0x35f   : > { %v10772_v1 = vpop.xlane.xlu0 %1864  ;;  %13799 = vst [vmem:[#allocation91_spill] sm:$0xff] %v10777_v22  ;;  %v4739_v3 = vmul.f32 %v10751_v53, %v4738_v47  ;;  %v4745_v33 = vand.u32 2147483647, %v10703_v8  ;;  %v3781_v57 = vadd.f32 %v10719_v12, %v3572_v13  ;;  %v10789_v60 = vmul.f32 0.5, %v10669_v52  ;;  %v7755_v13 = vld [vmem:[%s8546_s27 + $0x210] sm:$0xff]  ;;  %v7756_v52 = vld [vmem:[%s8546_s27 + $0x218] sm:$0xff] }
 0x360   : > { %6389 = vst [vmem:[%s10193_s30 + $0x90] sm:$0xff] %v4734_v48  ;;  %v7242_v39 = vpop.eup %7241  ;;  %v2065_v40 = vsub.f32 %v10701_v44, %v10743_v38  ;;  %vm4741_vm1 = vweird.f32 %v10703_v8  ;;  %v2003_v35 = vmul.f32 %v10769_v37, %v1545_v25  ;;  %v3366_v12 = vadd.f32 %v10721_v24, %v3157_v2  ;;  %v10815_v2 = vpop.f32.mrf.mxu2 }
 0x361   : > { %13800 = vst [vmem:[#allocation92_spill] sm:$0xff] %v10789_v60  ;;  %v10795_v48 = vpop.eup %7243  ;;  %v4740_v47 = vadd.f32 %v10751_v53, %v4739_v3  ;;  %v10798_v18 = vadd.f32 1.0, %v7242_v39  ;;  %v6842_v26 = vmul.f32 -1.442695, %v3781_v57  ;;  %v2678_v44 = vmul.f32 %v10764_v14, %v10673_v0  ;;  %vm10807_vm2 = vmor %vm4741_vm1, %vm4742_vm0  ;;  %v10817_v3 = vpop.f32.mrf.mxu0 }
 0x362   : > { %v4748_v38 = vor.u32 1.1754944e-38, %v4747_v61  ;;  %v4752_v25 = vmul.f32 %v10795_v48, %v10746_v20  ;;  %v3575_v24 = vadd.f32 %v10735_v31, %v10091_v36  ;;  %v10819_v57 = vpop.eup %7245  ;;  %v2066_v39 = vsub.f32 %v10767_v46, %v2002_v23 }
 0x363   : > { %13803 = vst [vmem:[#allocation93_spill] sm:$0xff] %v10819_v57  ;;  %v4744_v61 = vsel %vm10807_vm2, %v10751_v53, %v4740_v47  ;;  %vm4746_vm3 = vcmp.eq.f32.partialorder %v4745_v33, 8.507059e+37  ;;  %7249 = vrcp.f32 %v10798_v18  ;;  %v10826_v31 = vmul.f32 0.003921569, %v2065_v40 }
 0x364   : > { %v7248_v37 = vpop.eup %7247  ;;  %v4749_v0 = vsel %vm4746_vm3, %v4748_v38, %v4744_v61  ;;  %v4753_v54 = vsub.f32 1.0, %v4752_v25  ;;  %v2067_v9 = vsub.f32 %v10772_v1, %v2003_v35  ;;  %7251 = vpow2.f32 %v6842_v26  ;;  %v7758_v61 = vld [vmem:[%s8546_s27 + $0x228] sm:$0xff] }
 0x365   : > { %3218 = vmatmul.f32.gmra.mxu0 %v7755_v13  ;;  %3427 = vmatmul.f32.gmra.mxu1 %v7756_v52  ;;  %13804 = vst [vmem:[#allocation94_spill] sm:$0xff] %v10826_v31  ;;  %v10831_v56 = vadd.f32 1.0, %v7248_v37  ;;  %v6843_v46 = vmul.f32 -1.442695, %v3366_v12  ;;  %vm4757_vm4 = vweird.f32 %v10795_v48  ;;  %v4760_v23 = vand.u32 2147483647, %v10746_v20 }
 0x366   : > { %3636 = vmatmul.f32.gmra.mxu2 %v7755_v13  ;;  %3845 = vmatmul.f32.gmra.mxu3 %v7756_v52  ;;  %v1548_v13 = vpop.xlane.xlu1 %1547  ;;  %6390 = vst [vmem:[%s10193_s30 + $0x98] sm:$0xff] %v4749_v0  ;;  %v4762_v52 = vand.u32 2147483648, %v10746_v20  ;;  %v4754_v53 = vmul.f32 %v10795_v48, %v4753_v54  ;;  %v3784_v40 = vadd.f32 %v3783_v28, %v3575_v24  ;;  %v10838_v1 = vmul.f32 0.003921569, %v2066_v39  ;;  %v10845_v37 = vpop.f32.mrf.mxu3  ;;  %v7757_v39 = vld [vmem:[%s8546_s27 + $0x220] sm:$0xff] }
 0x367   : > { %v1551_v33 = vpop.xlane.xlu0 %1550  ;;  %v2688_v47 = vmul.f32 %v10819_v57, %v10739_v6  ;;  %v10840_v0 = vmul.f32 0.00390625, %v1548_v13  ;;  %7253 = vrcp.f32 %v10831_v56  ;;  %vm4756_vm5 = vweird.f32 %v10746_v20  ;;  %v10847_v28 = vpop.f32.mrf.mxu1 }
 0x368   : > { %13805 = vst [vmem:[#allocation95_spill] sm:$0xff] %v10838_v1  ;;  %v4755_v26 = vadd.f32 %v10795_v48, %v4754_v53  ;;  %7255 = vpow2.f32 %v6843_v46  ;;  %v6844_v54 = vmul.f32 -1.442695, %v3784_v40  ;;  %v10852_v12 = vmul.f32 %v10764_v14, %v2678_v44  ;;  %vm10856_vm6 = vmor %vm4756_vm5, %vm4757_vm4  ;;  %v10862_v20 = vpop.xlane.xlu2 %1867 }
 0x369   : > { %13806 = vst [vmem:[#allocation96_spill] sm:$0xff] %v10840_v0  ;;  %v10849_v35 = vpop.eup %7249  ;;  %v4763_v38 = vor.u32 1.1754944e-38, %v4762_v52  ;;  %v10860_v25 = vmul.f32 0.003921569, %v2067_v9  ;;  %v10864_v24 = vmul.f32 0.00390625, %v1551_v33  ;;  %7257 = vrsqrt.f32 %v10826_v31  ;;  %v10885_v8 = vpop.f32.mrf.mxu0 }
 0x36a   : > { %v4759_v44 = vsel %vm10856_vm6, %v10795_v48, %v4755_v26  ;;  %vm4761_vm7 = vcmp.eq.f32.partialorder %v4760_v23, 8.507059e+37  ;;  %v4767_v9 = vmul.f32 %v10849_v35, %v10798_v18  ;;  %v7252_v52 = vpop.eup %7251  ;;  %v4775_v53 = vand.u32 2147483647, %v10798_v18  ;;  %v10883_v26 = vpop.f32.mrf.mxu2 }
 0x36b   : > { %13809 = vst [vmem:[#allocation97_spill] sm:$0xff] %v10860_v25  ;;  %v4764_v46 = vsel %vm4761_vm7, %v4763_v38, %v4759_v44  ;;  %v2004_v40 = vmul.f32 %v10840_v0, %v1548_v13  ;;  %7259 = vpow2.f32 %v6844_v54  ;;  %v10877_v6 = vmul.f32 %v10819_v57, %v2688_v47 }
 0x36c   : > { %13810 = vst [vmem:[#allocation98_spill] sm:$0xff] %v10864_v24  ;;  %7261 = vrsqrt.f32 %v10838_v1  ;;  %v4768_v48 = vsub.f32 1.0, %v4767_v9  ;;  %v10881_v23 = vadd.f32 1.0, %v7252_v52  ;;  %v4777_v13 = vand.u32 2147483648, %v10798_v18 }
 0x36d   : > { %3221 = vmatmul.f32.gmra.mxu0 %v7757_v39  ;;  %3430 = vmatmul.f32.gmra.mxu1 %v7758_v61  ;;  %6391 = vst [vmem:[%s10193_s30 + $0xa0] sm:$0xff] %v4764_v46  ;;  %7263 = vrsqrt.f32 %v10860_v25  ;;  %v2005_v54 = vmul.f32 %v10864_v24, %v1551_v33  ;;  %v3160_v47 = vadd.f32 %v10737_v7, %v10057_v55  ;;  %vm4772_vm8 = vweird.f32 %v10849_v35 }
 0x36e   : > { %3639 = vmatmul.f32.gmra.mxu2 %v7757_v39  ;;  %3848 = vmatmul.f32.gmra.mxu3 %v7758_v61  ;;  %v10887_v39 = vpop.eup %7253  ;;  %v4769_v61 = vmul.f32 %v10849_v35, %v4768_v48  ;;  %7265 = vrcp.f32 %v10881_v23  ;;  %vm4771_vm9 = vweird.f32 %v10798_v18  ;;  %vm10900_vm10 = vcmp.eq.f32.partialorder %v4775_v53, 8.507059e+37  ;;  %v1871_v0 = vpop.xlane.xlu1 %1870 }
 0x36f   : > { %v7256_v38 = vpop.eup %7255  ;;  %v4782_v44 = vmul.f32 %v10887_v39, %v10831_v56  ;;  %v2068_v33 = vsub.f32 %v10862_v20, %v2004_v40  ;;  %v3578_v7 = vadd.f32 %v10815_v2, %v10091_v36  ;;  %v3369_v18 = vadd.f32 %v10782_v50, %v3160_v47  ;;  %vm10913_vm11 = vmor %vm4771_vm9, %vm4772_vm8 }
 0x370   : > { %v10907_v52 = vpop.eup %7257  ;;  %v4770_v46 = vadd.f32 %v10849_v35, %v4769_v61  ;;  %v10910_v24 = vadd.f32 1.0, %v7256_v38  ;;  %v4778_v20 = vor.u32 1.1754944e-38, %v4777_v13  ;;  %v4790_v40 = vand.u32 2147483647, %v10831_v56  ;;  %v1554_v16 = vpop.xlane.xlu2 %1553  ;;  %v7760_v61 = vld [vmem:[%s8546_s27 + $0x238] sm:$0xff] }
 0x371   : > { %13813 = vst [vmem:[#allocation99_spill] sm:$0xff] %v10907_v52  ;;  %v4783_v48 = vsub.f32 1.0, %v4782_v44  ;;  %v7260_v53 = vpop.eup %7259  ;;  %v4792_v2 = vand.u32 2147483648, %v10831_v56  ;;  %v2069_v14 = vsub.f32 %v1871_v0, %v2005_v54  ;;  %vm4787_vm12 = vweird.f32 %v10887_v39  ;;  %v10929_v13 = vpop.f32.mrf.mxu3 }
 0x372   : > { %v10921_v38 = vpop.eup %7261  ;;  %v4774_v50 = vsel %vm10913_vm11, %v10849_v35, %v4770_v46  ;;  %7267 = vrcp.f32 %v10910_v24  ;;  %v10931_v0 = vpop.f32.mrf.mxu1  ;;  %v10937_v44 = vmul.f32 %v10907_v52, %v10826_v31  ;;  %vm4786_vm13 = vweird.f32 %v10831_v56 }
 0x373   : > { %13816 = vst [vmem:[#allocation100_spill] sm:$0xff] %v10921_v38  ;;  %v4784_v47 = vmul.f32 %v10887_v39, %v4783_v48  ;;  %v10933_v54 = vpop.eup %7263  ;;  %v4779_v57 = vsel %vm10900_vm10, %v4778_v20, %v4774_v50  ;;  %v10942_v35 = vmul.f32 0.003921569, %v2068_v33  ;;  %v10946_v29 = vadd.f32 1.0, %v7260_v53  ;;  %vm4788_vm14 = vmor %vm4786_vm13, %vm4787_vm12 }
 0x374   : > { %13817 = vst [vmem:[#allocation101_spill] sm:$0xff] %v10933_v54  ;;  %v7266_v46 = vpop.eup %7265  ;;  %vm4791_vm15 = vcmp.eq.f32.partialorder %v4790_v40, 8.507059e+37  ;;  %v4793_v9 = vor.u32 1.1754944e-38, %v4792_v2  ;;  %v10952_v56 = vmul.f32 0.00390625, %v1554_v16  ;;  %v4805_v50 = vand.u32 2147483647, %v10881_v23 }
 0x375   : > { %3224 = vmatmul.f32.gmra.mxu0 %v7759_v17  ;;  %3433 = vmatmul.f32.gmra.mxu1 %v7760_v61  ;;  %13818 = vst [vmem:[#allocation102_spill] sm:$0xff] %v10942_v35  ;;  %v4785_v48 = vadd.f32 %v10887_v39, %v4784_v47  ;;  %v4797_v20 = vmul.f32 %v7266_v46, %v10881_v23  ;;  %v10956_v47 = vmul.f32 0.003921569, %v2069_v14  ;;  %7269 = vrcp.f32 %v10946_v29 }
 0x376   : > { %3642 = vmatmul.f32.gmra.mxu2 %v7759_v17  ;;  %3851 = vmatmul.f32.gmra.mxu3 %v7760_v61  ;;  %6392 = vst [vmem:[%s10193_s30 + $0xa8] sm:$0xff] %v4779_v57  ;;  %v6845_v17 = vmul.f32 -1.442695, %v3369_v18  ;;  %v3787_v61 = vadd.f32 %v10845_v37, %v3578_v7  ;;  %v10959_v18 = vpop.f32.mrf.mxu2  ;;  %v10961_v37 = vpop.f32.mrf.mxu0  ;;  %v10965_v7 = vmul.f32 %v10921_v38, %v10838_v1  ;;  %7271 = vrsqrt.f32 %v10942_v35 }
 0x377   : > { %13819 = vst [vmem:[#allocation103_spill] sm:$0xff] %v10952_v56  ;;  %v4789_v33 = vsel %vm4788_vm14, %v10887_v39, %v4785_v48  ;;  %v4798_v39 = vsub.f32 1.0, %v4797_v20  ;;  %v10972_v14 = vmul.f32 %v10933_v54, %v10860_v25  ;;  %v4807_v2 = vand.u32 2147483648, %v10881_v23  ;;  %v7761_v20 = vld [vmem:[%s8546_s27 + $0x240] sm:$0xff] }
 0x378   : > { %13820 = vst [vmem:[#allocation104_spill] sm:$0xff] %v10956_v47  ;;  %v4794_v53 = vsel %vm4791_vm15, %v4793_v9, %v4789_v33  ;;  %v10968_v40 = vpop.eup %7267  ;;  %7273 = vpow2.f32 %v6845_v17  ;;  %v6846_v57 = vmul.f32 -1.442695, %v3787_v61  ;;  %vm4802_vm0 = vweird.f32 %v7266_v46  ;;  %v7762_v33 = vld [vmem:[%s8546_s27 + $0x248] sm:$0xff] }
 0x379   : > { %6393 = vst [vmem:[%s10193_s30 + $0xb0] sm:$0xff] %v4794_v53  ;;  %v4799_v48 = vmul.f32 %v7266_v46, %v4798_v39  ;;  %v4812_v1 = vmul.f32 %v10968_v40, %v10910_v24  ;;  %v10979_v9 = vmul.f32 %v10952_v56, %v1554_v16  ;;  %vm4801_vm1 = vweird.f32 %v10881_v23 }
 0x37a   : > { %vm10984_vm2 = vcmp.eq.f32.partialorder %v4805_v50, 8.507059e+37  ;;  %v4820_v17 = vand.u32 2147483647, %v10910_v24  ;;  %7275 = vrsqrt.f32 %v10956_v47  ;;  %v3163_v16 = vadd.f32 %v10817_v3, %v10057_v55  ;;  %vm4803_vm3 = vmor %vm4801_vm1, %vm4802_vm0 }
 0x37b   : > { %v4800_v61 = vadd.f32 %v7266_v46, %v4799_v48  ;;  %v4813_v39 = vsub.f32 1.0, %v4812_v1  ;;  %7277 = vpow2.f32 %v6846_v57  ;;  %v10992_v56 = vpop.eup %7269  ;;  %v4808_v23 = vor.u32 1.1754944e-38, %v4807_v2  ;;  %v11001_v1 = vpop.f32.mrf.mxu1 }
 0x37c   : > { %vm4816_vm4 = vweird.f32 %v10910_v24  ;;  %v4822_v50 = vand.u32 2147483648, %v10910_v24  ;;  %v11003_v57 = vpop.eup %7271  ;;  %vm4817_vm5 = vweird.f32 %v10968_v40  ;;  %v4827_v2 = vmul.f32 %v10992_v56, %v10946_v29 }
 0x37d   : > { %3227 = vmatmul.f32.gmra.mxu0 %v7761_v20  ;;  %3436 = vmatmul.f32.gmra.mxu1 %v7762_v33  ;;  %13823 = vst [vmem:[#allocation105_spill] sm:$0xff] %v11003_v57  ;;  %v4804_v3 = vsel %vm4803_vm3, %v7266_v46, %v4800_v61  ;;  %v4814_v48 = vmul.f32 %v10968_v40, %v4813_v39  ;;  %vm11011_vm6 = vcmp.eq.f32.partialorder %v4820_v17, 8.507059e+37  ;;  %vm11027_vm7 = vmor %vm4816_vm4, %vm4817_vm5  ;;  %vm4832_vm8 = vweird.f32 %v10992_v56 }
 0x37e   : > { %3645 = vmatmul.f32.gmra.mxu2 %v7761_v20  ;;  %3854 = vmatmul.f32.gmra.mxu3 %v7762_v33  ;;  %v3581_v20 = vadd.f32 %v10883_v26, %v10091_v36  ;;  %v10999_v33 = vpop.f32.mrf.mxu3  ;;  %v7274_v25 = vpop.eup %7273  ;;  %v4809_v31 = vsel %vm10984_vm2, %v4808_v23, %v4804_v3  ;;  %v3372_v62 = vadd.f32 %v10847_v28, %v3163_v16  ;;  %v4828_v39 = vsub.f32 1.0, %v4827_v2  ;;  %v7764_v3 = vld [vmem:[%s8546_s27 + $0x258] sm:$0xff] }
 0x37f   : > { %v3166_v46 = vadd.f32 %v10885_v8, %v10057_v55  ;;  %6394 = vst [vmem:[%s10193_s30 + $0xb8] sm:$0xff] %v4809_v31  ;;  %v4815_v61 = vadd.f32 %v10968_v40, %v4814_v48  ;;  %v11020_v15 = vadd.f32 1.0, %v7274_v25  ;;  %v4823_v28 = vor.u32 1.1754944e-38, %v4822_v50  ;;  %v11033_v23 = vpop.f32.mrf.mxu2  ;;  %v11035_v25 = vpop.f32.mrf.mxu0  ;;  %v7763_v50 = vld [vmem:[%s8546_s27 + $0x250] sm:$0xff] }
 0x380   : > { %v3790_v19 = vadd.f32 %v10929_v13, %v3581_v20  ;;  %v11023_v53 = vpop.eup %7275  ;;  %v4835_v31 = vand.u32 2147483647, %v10946_v29  ;;  %v4837_v8 = vand.u32 2147483648, %v10946_v29  ;;  %v6847_v16 = vmul.f32 -1.442695, %v3372_v62  ;;  %v1874_v26 = vpop.xlane.xlu0 %1873 }
 0x381   : > { %13826 = vst [vmem:[#allocation106_spill] sm:$0xff] %v11023_v53  ;;  %v7278_v13 = vpop.eup %7277  ;;  %v4819_v24 = vsel %vm11027_vm7, %v10968_v40, %v4815_v61  ;;  %v4829_v20 = vmul.f32 %v10992_v56, %v4828_v39  ;;  %7279 = vrcp.f32 %v11020_v15  ;;  %v2728_v62 = vmul.f32 %v11003_v57, %v10942_v35 }
 0x382   : > { %v4824_v48 = vsel %vm11011_vm6, %v4823_v28, %v4819_v24  ;;  %vm4831_vm9 = vweird.f32 %v10946_v29  ;;  %v3375_v40 = vadd.f32 %v10931_v0, %v3166_v46  ;;  %v11053_v61 = vadd.f32 1.0, %v7278_v13 }
 0x383   : > { %6395 = vst [vmem:[%s10193_s30 + $0xc0] sm:$0xff] %v4824_v48  ;;  %v4830_v2 = vadd.f32 %v10992_v56, %v4829_v20  ;;  %7281 = vpow2.f32 %v6847_v16  ;;  %v6848_v39 = vmul.f32 -1.442695, %v3790_v19  ;;  %v11056_v17 = vmul.f32 0.5, %v10852_v12  ;;  %vm4833_vm10 = vmor %vm4831_vm9, %vm4832_vm8  ;;  %v11074_v13 = vpop.f32.mrf.mxu1 }
 0x384   : > { %v11059_v35 = vmul.f32 0.5, %v10877_v6  ;;  %v2699_v29 = vmul.f32 %v10907_v52, %v10937_v44  ;;  %v4838_v0 = vor.u32 1.1754944e-38, %v4837_v8  ;;  %vm4836_vm11 = vcmp.eq.f32.partialorder %v4835_v31, 8.507059e+37  ;;  %v7770_v52 = vld [vmem:[%s8546_s27 + $0x288] sm:$0xff] }
 0x385   : > { %3230 = vmatmul.f32.gmra.mxu0 %v7763_v50  ;;  %3439 = vmatmul.f32.gmra.mxu1 %v7764_v3  ;;  %13829 = vst [vmem:[#allocation107_spill] sm:$0xff] %v11056_v17  ;;  %v4834_v46 = vsel %vm4833_vm10, %v10992_v56, %v4830_v2  ;;  %v2070_v19 = vsub.f32 %v1874_v26, %v10979_v9  ;;  %7283 = vrcp.f32 %v11053_v61  ;;  %v6849_v31 = vmul.f32 -1.442695, %v3375_v40  ;;  %v7766_v40 = vld [vmem:[%s8546_s27 + $0x268] sm:$0xff] }
 0x386   : > { %3648 = vmatmul.f32.gmra.mxu2 %v7763_v50  ;;  %3857 = vmatmul.f32.gmra.mxu3 %v7764_v3  ;;  %13830 = vst [vmem:[#allocation108_spill] sm:$0xff] %v11059_v35  ;;  %v2709_v44 = vmul.f32 %v10921_v38, %v10965_v7  ;;  %v4839_v28 = vsel %vm4836_vm11, %v4838_v0, %v4834_v46  ;;  %v11072_v16 = vpop.f32.mrf.mxu3  ;;  %7285 = vpow2.f32 %v6848_v39  ;;  %v11084_v48 = vmul.f32 0.5, %v2699_v29 }
 0x387   : > { %v7280_v8 = vpop.eup %7279  ;;  %v2719_v56 = vmul.f32 %v10933_v54, %v10972_v14  ;;  %v2729_v9 = vmul.f32 %v11003_v57, %v2728_v62  ;;  %6396 = vst [vmem:[%s10193_s30 + $0xc8] sm:$0xff] %v4839_v28  ;;  %v2738_v14 = vmul.f32 %v11023_v53, %v10956_v47  ;;  %v11088_v2 = vmul.f32 0.003921569, %v2070_v19  ;;  %v7765_v62 = vld [vmem:[%s8546_s27 + $0x260] sm:$0xff]  ;;  %v11098_v29 = vpop.f32.mrf.mxu2 }
 0x388   : > { %v4842_v50 = vmul.f32 %v7280_v8, %v11020_v15  ;;  %7287 = vpow2.f32 %v6849_v31  ;;  %v11092_v39 = vmul.f32 0.5, %v2709_v44  ;;  %v3584_v46 = vadd.f32 %v10959_v18, %v10091_v36  ;;  %v11100_v28 = vpop.f32.mrf.mxu0  ;;  %v11122_v47 = vpop.xlane.xlu1 %1556 }
 0x389   : > { %v7282_v3 = vpop.eup %7281  ;;  %v11102_v31 = vmul.f32 0.5, %v2719_v56  ;;  %v11104_v20 = vmul.f32 0.5, %v2729_v9  ;;  %v4850_v44 = vand.u32 2147483647, %v11020_v15  ;;  %vm4847_vm12 = vweird.f32 %v7280_v8 }
 0x38a   : > { %v4843_v0 = vsub.f32 1.0, %v4842_v50  ;;  %v11094_v26 = vadd.f32 1.0, %v7282_v3  ;;  %v4852_v50 = vand.u32 2147483648, %v11020_v15  ;;  %v11111_v24 = vmul.f32 %v11023_v53, %v2738_v14  ;;  %v7768_v53 = vld [vmem:[%s8546_s27 + $0x278] sm:$0xff] }
 0x38b   : > { %v7284_v19 = vpop.eup %7283  ;;  %13831 = vst [vmem:[#allocation109_spill] sm:$0xff] %v11104_v20  ;;  %vm4846_vm13 = vweird.f32 %v11020_v15  ;;  %v3169_v56 = vadd.f32 %v10961_v37, %v10057_v55  ;;  %vm4851_vm15 = vcmp.eq.f32.partialorder %v4850_v44, 8.507059e+37  ;;  %v4865_v14 = vand.u32 2147483647, %v11053_v61 }
 0x38c   : > { %v4844_v3 = vmul.f32 %v7280_v8, %v4843_v0  ;;  %v4857_v7 = vmul.f32 %v7284_v19, %v11053_v61  ;;  %7289 = vrcp.f32 %v11094_v26  ;;  %v7286_v18 = vpop.eup %7285  ;;  %v3793_v0 = vadd.f32 %v10999_v33, %v3584_v46  ;;  %vm4848_vm14 = vmor %vm4846_vm13, %vm4847_vm12  ;;  %v11127_v33 = vpop.f32.mrf.mxu1 }
 0x38d   : > { %3233 = vmatmul.f32.gmra.mxu0 %v7765_v62  ;;  %3442 = vmatmul.f32.gmra.mxu1 %v7766_v40  ;;  %7291 = vrsqrt.f32 %v11088_v2  ;;  %v4853_v12 = vor.u32 1.1754944e-38, %v4852_v50  ;;  %v4867_v15 = vand.u32 2147483648, %v11053_v61  ;;  %vm4862_vm0 = vweird.f32 %v7284_v19 }
 0x38e   : > { %3651 = vmatmul.f32.gmra.mxu2 %v7765_v62  ;;  %3860 = vmatmul.f32.gmra.mxu3 %v7766_v40  ;;  %v4845_v9 = vadd.f32 %v7280_v8, %v4844_v3  ;;  %v4858_v62 = vsub.f32 1.0, %v4857_v7  ;;  %v11117_v40 = vadd.f32 1.0, %v7286_v18  ;;  %v7288_v6 = vpop.eup %7287  ;;  %v11125_v7 = vpop.f32.mrf.mxu3  ;;  %vm4861_vm1 = vweird.f32 %v11053_v61  ;;  %v7767_v18 = vld [vmem:[%s8546_s27 + $0x270] sm:$0xff] }
 0x38f   : > { %v4880_v44 = vand.u32 2147483647, %v11094_v26  ;;  %v4882_v50 = vand.u32 2147483648, %v11094_v26  ;;  %v6850_v57 = vmul.f32 -1.442695, %v3793_v0  ;;  %v3378_v54 = vadd.f32 %v11001_v1, %v3169_v56  ;;  %vm4863_vm2 = vmor %vm4861_vm1, %vm4862_vm0  ;;  %v3592_v56 = vpop.f32.mrf.mxu2 }
 0x390   : > { %v4849_v37 = vsel %vm4848_vm14, %v7280_v8, %v4845_v9  ;;  %v4859_v3 = vmul.f32 %v7284_v19, %v4858_v62  ;;  %7293 = vrcp.f32 %v11117_v40  ;;  %v11137_v62 = vadd.f32 1.0, %v7288_v6  ;;  %v3177_v61 = vpop.f32.mrf.mxu0 }
 0x391   : > { %v4854_v46 = vsel %vm4851_vm15, %v4853_v12, %v4849_v37  ;;  %vm4866_vm3 = vcmp.eq.f32.partialorder %v4865_v14, 8.507059e+37  ;;  %v4868_v37 = vor.u32 1.1754944e-38, %v4867_v15  ;;  %v11146_v38 = vmul.f32 0.00390625, %v11122_v47 }
 0x392   : > { %v11134_v8 = vpop.eup %7289  ;;  %6397 = vst [vmem:[%s10193_s30 + $0xd0] sm:$0xff] %v4854_v46  ;;  %v4860_v9 = vadd.f32 %v7284_v19, %v4859_v3  ;;  %v4895_v1 = vand.u32 2147483647, %v11117_v40  ;;  %7295 = vrcp.f32 %v11137_v62  ;;  %vm4876_vm4 = vweird.f32 %v11094_v26 }
 0x393   : > { %v11140_v12 = vpop.eup %7291  ;;  %13832 = vst [vmem:[#allocation110_spill] sm:$0xff] %v11146_v38  ;;  %v4872_v6 = vmul.f32 %v11134_v8, %v11094_v26  ;;  %v4897_v14 = vand.u32 2147483648, %v11117_v40  ;;  %vm11157_vm5 = vcmp.eq.f32.partialorder %v4880_v44, 8.507059e+37  ;;  %7297 = vpow2.f32 %v6850_v57 }
 0x394   : > { %v4864_v0 = vsel %vm4863_vm2, %v7284_v19, %v4860_v9  ;;  %v4883_v19 = vor.u32 1.1754944e-38, %v4882_v50  ;;  %v6851_v9 = vmul.f32 -1.442695, %v3378_v54  ;;  %vm4877_vm6 = vweird.f32 %v11134_v8 }
 0x395   : > { %3236 = vmatmul.f32.gmra.mxu0 %v7767_v18  ;;  %3445 = vmatmul.f32.gmra.mxu1 %v7768_v53  ;;  %v4869_v3 = vsel %vm4866_vm3, %v4868_v37, %v4864_v0  ;;  %v4873_v46 = vsub.f32 1.0, %v4872_v6  ;;  %vm4891_vm7 = vweird.f32 %v11117_v40  ;;  %vm11165_vm8 = vcmp.eq.f32.partialorder %v4895_v1, 8.507059e+37  ;;  %vm4878_vm9 = vmor %vm4876_vm4, %vm4877_vm6 }
 0x396   : > { %3654 = vmatmul.f32.gmra.mxu2 %v7767_v18  ;;  %3863 = vmatmul.f32.gmra.mxu3 %v7768_v53  ;;  %v3587_v53 = vadd.f32 %v11033_v23, %v10091_v36  ;;  %v7294_v15 = vpop.eup %7293  ;;  %6398 = vst [vmem:[%s10193_s30 + $0xd8] sm:$0xff] %v4869_v3  ;;  %7299 = vpow2.f32 %v6851_v9  ;;  %v3172_v57 = vadd.f32 %v11035_v25, %v10057_v55  ;;  %v4898_v0 = vor.u32 1.1754944e-38, %v4897_v14  ;;  %v3801_v14 = vpop.f32.mrf.mxu3 }
 0x397   : > { %v4874_v23 = vmul.f32 %v11134_v8, %v4873_v46  ;;  %v4887_v37 = vmul.f32 %v7294_v15, %v11117_v40  ;;  %v3590_v3 = vadd.f32 %v11098_v29, %v10091_v36  ;;  %v7769_v46 = vld [vmem:[%s8546_s27 + $0x280] sm:$0xff]  ;;  %v4910_v25 = vand.u32 2147483647, %v11137_v62  ;;  %v3386_v9 = vpop.f32.mrf.mxu1 }
 0x398   : > { %v3796_v44 = vadd.f32 %v11072_v16, %v3587_v53  ;;  %v11177_v1 = vpop.eup %7295  ;;  %v3381_v53 = vadd.f32 %v11074_v13, %v3172_v57  ;;  %v3175_v29 = vadd.f32 %v11100_v28, %v10057_v55  ;;  %vm4892_vm10 = vweird.f32 %v7294_v15 }
 0x399   : > { %v4875_v54 = vadd.f32 %v11134_v8, %v4874_v23  ;;  %v4888_v50 = vsub.f32 1.0, %v4887_v37  ;;  %v4902_v26 = vmul.f32 %v11177_v1, %v11137_v62  ;;  %v7298_v35 = vpop.eup %7297  ;;  %v3593_v57 = vadd.f32 %v3592_v56, %v10091_v36  ;;  %vm4893_vm11 = vmor %vm4891_vm7, %vm4892_vm10  ;;  %v11202_v56 = vpop.f32.mrf.mxu2 }
 0x39a   : > { %v6852_v16 = vmul.f32 -1.442695, %v3796_v44  ;;  %v6853_v13 = vmul.f32 -1.442695, %v3381_v53  ;;  %vm4907_vm12 = vweird.f32 %v11177_v1  ;;  %v4912_v18 = vand.u32 2147483648, %v11137_v62 }
 0x39b   : > { %v4879_v23 = vsel %vm4878_vm9, %v11134_v8, %v4875_v54  ;;  %v4889_v37 = vmul.f32 %v7294_v15, %v4888_v50  ;;  %v4903_v17 = vsub.f32 1.0, %v4902_v26  ;;  %v11204_v54 = vpop.f32.mrf.mxu0  ;;  %v3178_v40 = vadd.f32 %v3177_v61, %v10057_v55 }
 0x39c   : > { %v4884_v44 = vsel %vm11157_vm5, %v4883_v19, %v4879_v23  ;;  %7301 = vpow2.f32 %v6852_v16  ;;  %v7300_v8 = vpop.eup %7299  ;;  %v3384_v19 = vadd.f32 %v11127_v33, %v3175_v29  ;;  %v11211_v50 = vmul.f32 %v11146_v38, %v11122_v47  ;;  %v7772_v47 = vld [vmem:[%s8546_s27 + $0x298] sm:$0xff]  ;;  %v11237_v23 = vpop.xlane.xlu2 %1876 }
 0x39d   : > { %3239 = vmatmul.f32.gmra.mxu0 %v7769_v46  ;;  %3448 = vmatmul.f32.gmra.mxu1 %v7770_v52  ;;  %6399 = vst [vmem:[%s10193_s30 + $0xe0] sm:$0xff] %v4884_v44  ;;  %v4890_v28 = vadd.f32 %v7294_v15, %v4889_v37  ;;  %7303 = vpow2.f32 %v6853_v13  ;;  %v3802_v16 = vadd.f32 %v3801_v14, %v3593_v57  ;;  %vm4906_vm13 = vweird.f32 %v11137_v62  ;;  %v11232_v14 = vpop.xlane.xlu0 %1559 }
 0x39e   : > { %3657 = vmatmul.f32.gmra.mxu2 %v7769_v46  ;;  %3866 = vmatmul.f32.gmra.mxu3 %v7770_v52  ;;  %v11194_v46 = vadd.f32 1.0, %v7298_v35  ;;  %v3799_v52 = vadd.f32 %v11125_v7, %v3590_v3  ;;  %v4904_v7 = vmul.f32 %v11177_v1, %v4903_v17  ;;  %v11215_v3 = vadd.f32 1.0, %v7300_v8  ;;  %vm11228_vm15 = vmor %vm4906_vm13, %vm4907_vm12 }
 0x39f   : > { %v4894_v35 = vsel %vm4893_vm11, %v7294_v15, %v4890_v28  ;;  %vm11220_vm14 = vcmp.eq.f32.partialorder %v4910_v25, 8.507059e+37  ;;  %v7771_v15 = vld [vmem:[%s8546_s27 + $0x290] sm:$0xff]  ;;  %v6855_v44 = vmul.f32 -1.442695, %v3384_v19  ;;  %v3387_v13 = vadd.f32 %v3386_v9, %v3178_v40 }
 0x3a0   : > { %7305 = vrcp.f32 %v11194_v46  ;;  %v4899_v33 = vsel %vm11165_vm8, %v4898_v0, %v4894_v35  ;;  %v4905_v53 = vadd.f32 %v11177_v1, %v4904_v7  ;;  %v6854_v61 = vmul.f32 -1.442695, %v3799_v52  ;;  %v11249_v35 = vpop.f32.mrf.mxu1 }
 0x3a1   : > { %6400 = vst [vmem:[%s10193_s30 + $0xe8] sm:$0xff] %v4899_v33  ;;  %v4913_v0 = vor.u32 1.1754944e-38, %v4912_v18  ;;  %v4925_v62 = vand.u32 2147483647, %v11194_v46  ;;  %v4927_v25 = vand.u32 2147483648, %v11194_v46  ;;  %7307 = vrcp.f32 %v11215_v3  ;;  %v3804_v18 = vpop.f32.mrf.mxu3  ;;  %v11275_v6 = vpop.f32.mrf.mxu2 }
 0x3a2   : > { %v7302_v29 = vpop.eup %7301  ;;  %v4909_v37 = vsel %vm11228_vm15, %v11177_v1, %v4905_v53  ;;  %v11245_v28 = vmul.f32 0.5, %v11111_v24  ;;  %7309 = vpow2.f32 %v6854_v61  ;;  %v6856_v8 = vmul.f32 -1.442695, %v3802_v16 }
 0x3a3   : > { %v11242_v26 = vadd.f32 1.0, %v7302_v29  ;;  %v7304_v57 = vpop.eup %7303  ;;  %v4914_v52 = vsel %vm11220_vm14, %v4913_v0, %v4909_v37  ;;  %v11257_v9 = vmul.f32 0.00390625, %v11232_v14  ;;  %v4940_v24 = vand.u32 2147483647, %v11215_v3  ;;  %v11277_v0 = vpop.f32.mrf.mxu0  ;;  %v7773_v37 = vld [vmem:[%s8546_s27 + $0x2a0] sm:$0xff] }
 0x3a4   : > { %13841 = vst [vmem:[#allocation111_spill] sm:$0xff] %v11245_v28  ;;  %vm4921_vm0 = vweird.f32 %v11194_v46  ;;  %vm11264_vm1 = vcmp.eq.f32.partialorder %v4925_v62, 8.507059e+37  ;;  %v4942_v33 = vand.u32 2147483648, %v11215_v3  ;;  %v4928_v16 = vor.u32 1.1754944e-38, %v4927_v25 }
 0x3a5   : > { %3242 = vmatmul.f32.gmra.mxu0 %v7771_v15  ;;  %3451 = vmatmul.f32.gmra.mxu1 %v7772_v47  ;;  %6401 = vst [vmem:[%s10193_s30 + $0xf0] sm:$0xff] %v4914_v52  ;;  %7311 = vrcp.f32 %v11242_v26  ;;  %v11269_v53 = vadd.f32 1.0, %v7304_v57  ;;  %v6857_v17 = vmul.f32 -1.442695, %v3387_v13  ;;  %v4957_v29 = vand.u32 2147483648, %v11242_v26 }
 0x3a6   : > { %3660 = vmatmul.f32.gmra.mxu2 %v7771_v15  ;;  %3869 = vmatmul.f32.gmra.mxu3 %v7772_v47  ;;  %v11251_v7 = vpop.eup %7305  ;;  %7313 = vpow2.f32 %v6855_v44  ;;  %v4955_v47 = vand.u32 2147483647, %v11242_v26  ;;  %vm4936_vm2 = vweird.f32 %v11215_v3  ;;  %vm11282_vm3 = vcmp.eq.f32.partialorder %v4940_v24, 8.507059e+37  ;;  %v7774_v44 = vld [vmem:[%s8546_s27 + $0x2a8] sm:$0xff] }
 0x3a7   : > { %v4917_v19 = vmul.f32 %v11251_v7, %v11194_v46  ;;  %v11271_v61 = vpop.eup %7307  ;;  %7315 = vpow2.f32 %v6856_v8  ;;  %vm4922_vm4 = vweird.f32 %v11251_v7  ;;  %v4943_v52 = vor.u32 1.1754944e-38, %v4942_v33 }
 0x3a8   : > { %v4932_v62 = vmul.f32 %v11271_v61, %v11215_v3  ;;  %7317 = vrcp.f32 %v11269_v53  ;;  %v7310_v13 = vpop.eup %7309  ;;  %v3596_v8 = vadd.f32 %v11202_v56, %v10091_v36  ;;  %vm4951_vm5 = vweird.f32 %v11242_v26  ;;  %vm4923_vm7 = vmor %vm4921_vm0, %vm4922_vm4 }
 0x3a9   : > { %v4918_v15 = vsub.f32 1.0, %v4917_v19  ;;  %v11294_v1 = vadd.f32 1.0, %v7310_v13  ;;  %v3181_v38 = vadd.f32 %v11204_v54, %v10057_v55  ;;  %vm11300_vm6 = vcmp.eq.f32.partialorder %v4955_v47, 8.507059e+37  ;;  %v11315_v46 = vpop.f32.mrf.mxu3 }
 0x3aa   : > { %v4933_v19 = vsub.f32 1.0, %v4932_v62  ;;  %v4958_v56 = vor.u32 1.1754944e-38, %v4957_v29  ;;  %7319 = vpow2.f32 %v6857_v17  ;;  %vm4937_vm8 = vweird.f32 %v11271_v61 }
 0x3ab   : > { %v4919_v57 = vmul.f32 %v11251_v7, %v4918_v15  ;;  %v7312_v24 = vpop.eup %7311  ;;  %v4970_v54 = vand.u32 2147483647, %v11269_v53  ;;  %7321 = vrcp.f32 %v11294_v1  ;;  %vm4966_vm9 = vweird.f32 %v11269_v53  ;;  %vm4938_vm10 = vmor %vm4936_vm2, %vm4937_vm8 }
 0x3ac   : > { %v4947_v15 = vmul.f32 %v7312_v24, %v11242_v26  ;;  %v4934_v62 = vmul.f32 %v11271_v61, %v4933_v19  ;;  %v4972_v17 = vand.u32 2147483648, %v11269_v53  ;;  %v3805_v13 = vadd.f32 %v3804_v18, %v3596_v8 }
 0x3ad   : > { %3245 = vmatmul.f32.gmra.mxu0 %v7773_v37  ;;  %3454 = vmatmul.f32.gmra.mxu1 %v7774_v44  ;;  %v4920_v60 = vadd.f32 %v11251_v7, %v4919_v57  ;;  %v11317_v57 = vpop.f32.mrf.mxu1  ;;  %vm4952_vm11 = vweird.f32 %v7312_v24  ;;  %vm11339_vm12 = vcmp.eq.f32.partialorder %v4970_v54, 8.507059e+37  ;;  %vm4981_vm15 = vweird.f32 %v11294_v1 }
 0x3ae   : > { %3663 = vmatmul.f32.gmra.mxu2 %v7773_v37  ;;  %3872 = vmatmul.f32.gmra.mxu3 %v7774_v44  ;;  %v7314_v37 = vpop.eup %7313  ;;  %v4948_v29 = vsub.f32 1.0, %v4947_v15  ;;  %v4935_v42 = vadd.f32 %v11271_v61, %v4934_v62  ;;  %vm4953_vm13 = vmor %vm4951_vm5, %vm4952_vm11 }
 0x3af   : > { %v7316_v47 = vpop.eup %7315  ;;  %v4924_v44 = vsel %vm4923_vm7, %v11251_v7, %v4920_v60  ;;  %v11322_v28 = vadd.f32 1.0, %v7314_v37  ;;  %v4985_v7 = vand.u32 2147483647, %v11294_v1 }
 0x3b0   : > { %v7318_v19 = vpop.eup %7317  ;;  %v4929_v22 = vsel %vm11264_vm1, %v4928_v16, %v4924_v44  ;;  %v11324_v20 = vadd.f32 1.0, %v7316_v47  ;;  %v4949_v60 = vmul.f32 %v7312_v24, %v4948_v29  ;;  %v4939_v40 = vsel %vm4938_vm10, %v11271_v61, %v4935_v42  ;;  %v11343_v47 = vpop.f32.mrf.mxu2 }
 0x3b1   : > { %6402 = vst [vmem:[%s10193_s30 + $0xf8] sm:$0xff] %v4929_v22  ;;  %v4962_v18 = vmul.f32 %v7318_v19, %v11269_v53  ;;  %v4987_v16 = vand.u32 2147483648, %v11294_v1  ;;  %7323 = vrcp.f32 %v11322_v28  ;;  %v3390_v22 = vadd.f32 %v11249_v35, %v3181_v38  ;;  %v7320_v8 = vpop.eup %7319  ;;  %v11345_v44 = vpop.f32.mrf.mxu0 }
 0x3b2   : > { %v4944_v3 = vsel %vm11282_vm3, %v4943_v52, %v4939_v40  ;;  %v4950_v15 = vadd.f32 %v7312_v24, %v4949_v60  ;;  %v7322_v42 = vpop.eup %7321  ;;  %vm4967_vm14 = vweird.f32 %v7318_v19  ;;  %v4973_v38 = vor.u32 1.1754944e-38, %v4972_v17 }
 0x3b3   : > { %v4963_v37 = vsub.f32 1.0, %v4962_v18  ;;  %6403 = vst [vmem:[%s10193_s30 + $0x100] sm:$0xff] %v4944_v3  ;;  %7325 = vrcp.f32 %v11324_v20  ;;  %v4977_v25 = vmul.f32 %v7322_v42, %v11294_v1  ;;  %vm11354_vm0 = vcmp.eq.f32.partialorder %v4985_v7, 8.507059e+37  ;;  %vm4968_vm2 = vmor %vm4966_vm9, %vm4967_vm14 }
 0x3b4   : > { %v4954_v35 = vsel %vm4953_vm13, %v7312_v24, %v4950_v15  ;;  %v4988_v29 = vor.u32 1.1754944e-38, %v4987_v16  ;;  %v5000_v26 = vand.u32 2147483647, %v11322_v28  ;;  %v5002_v17 = vand.u32 2147483648, %v11322_v28 }
 0x3b5   : > { %v4964_v61 = vmul.f32 %v7318_v19, %v4963_v37  ;;  %v4959_v54 = vsel %vm11300_vm6, %v4958_v56, %v4954_v35  ;;  %v4978_v18 = vsub.f32 1.0, %v4977_v25  ;;  %vm4996_vm1 = vweird.f32 %v11322_v28  ;;  %v3810_v37 = vpop.f32.mrf.mxu3  ;;  %v3395_v35 = vpop.f32.mrf.mxu1 }
 0x3b6   : > { %6404 = vst [vmem:[%s10193_s30 + $0x108] sm:$0xff] %v4959_v54  ;;  %v11364_v24 = vadd.f32 1.0, %v7320_v8  ;;  %vm4982_vm3 = vweird.f32 %v7322_v42  ;;  %v5015_v33 = vand.u32 2147483647, %v11324_v20  ;;  %v6858_v56 = vmul.f32 -1.442695, %v3805_v13 }
 0x3b7   : > { %v4965_v60 = vadd.f32 %v7318_v19, %v4964_v61  ;;  %v7324_v40 = vpop.eup %7323  ;;  %v3599_v7 = vadd.f32 %v11275_v6, %v10091_v36  ;;  %v4979_v3 = vmul.f32 %v7322_v42, %v4978_v18  ;;  %vm5011_vm4 = vweird.f32 %v11324_v20  ;;  %vm4983_vm6 = vmor %vm4981_vm15, %vm4982_vm3 }
 0x3b8   : > { %v4992_v15 = vmul.f32 %v7324_v40, %v11322_v28  ;;  %v6859_v8 = vmul.f32 -1.442695, %v3390_v22  ;;  %vm11376_vm5 = vcmp.eq.f32.partialorder %v5000_v26, 8.507059e+37  ;;  %v5003_v13 = vor.u32 1.1754944e-38, %v5002_v17  ;;  %v3604_v18 = vpop.f32.mrf.mxu2 }
 0x3b9   : > { %v4969_v16 = vsel %vm4968_vm2, %v7318_v19, %v4965_v60  ;;  %v7326_v61 = vpop.eup %7325  ;;  %7327 = vrcp.f32 %v11364_v24  ;;  %v4980_v6 = vadd.f32 %v7322_v42, %v4979_v3  ;;  %v3184_v22 = vadd.f32 %v11277_v0, %v10057_v55 }
 0x3ba   : > { %v4974_v53 = vsel %vm11339_vm12, %v4973_v38, %v4969_v16  ;;  %v4993_v19 = vsub.f32 1.0, %v4992_v15  ;;  %v5007_v54 = vmul.f32 %v7326_v61, %v11324_v20  ;;  %vm4997_vm7 = vweird.f32 %v7324_v40  ;;  %v3189_v16 = vpop.f32.mrf.mxu0 }
 0x3bb   : > { %6405 = vst [vmem:[%s10193_s30 + $0x110] sm:$0xff] %v4974_v53  ;;  %v5017_v62 = vand.u32 2147483648, %v11324_v20  ;;  %7329 = vpow2.f32 %v6858_v56  ;;  %v3808_v38 = vadd.f32 %v11315_v46, %v3599_v7  ;;  %v4984_v26 = vsel %vm4983_vm6, %v7322_v42, %v4980_v6  ;;  %vm4998_vm10 = vmor %vm4996_vm1, %vm4997_vm7 }
 0x3bc   : > { %v4994_v17 = vmul.f32 %v7324_v40, %v4993_v19  ;;  %v5008_v60 = vsub.f32 1.0, %v5007_v54  ;;  %7331 = vpow2.f32 %v6859_v8  ;;  %v4989_v0 = vsel %vm11354_vm0, %v4988_v29, %v4984_v26 }
 0x3bd   : > { %vm5012_vm8 = vweird.f32 %v7326_v61  ;;  %vm11392_vm9 = vcmp.eq.f32.partialorder %v5015_v33, 8.507059e+37  ;;  %v6860_v3 = vmul.f32 -1.442695, %v3808_v38  ;;  %6406 = vst [vmem:[%s10193_s30 + $0x118] sm:$0xff] %v4989_v0  ;;  %v3393_v46 = vadd.f32 %v11317_v57, %v3184_v22 }
 0x3be   : > { %v4995_v15 = vadd.f32 %v7324_v40, %v4994_v17  ;;  %v5009_v56 = vmul.f32 %v7326_v61, %v5008_v60  ;;  %v3602_v42 = vadd.f32 %v11343_v47, %v10091_v36  ;;  %v5018_v52 = vor.u32 1.1754944e-38, %v5017_v62  ;;  %vm5013_vm11 = vmor %vm5011_vm4, %vm5012_vm8  ;;  %v3813_v17 = vpop.f32.mrf.mxu3  ;;  %v3398_v60 = vpop.f32.mrf.mxu1 }
 0x3bf   : > { %v7328_v7 = vpop.eup %7327  ;;  %v5030_v29 = vand.u32 2147483647, %v11364_v24  ;;  %7333 = vpow2.f32 %v6860_v3  ;;  %v3187_v33 = vadd.f32 %v11345_v44, %v10057_v55  ;;  %v5032_v6 = vand.u32 2147483648, %v11364_v24 }
 0x3c0   : > { %v4999_v8 = vsel %vm4998_vm10, %v7324_v40, %v4995_v15  ;;  %v5010_v53 = vadd.f32 %v7326_v61, %v5009_v56  ;;  %v5022_v57 = vmul.f32 %v7328_v7, %v11364_v24  ;;  %v6861_v28 = vmul.f32 -1.442695, %v3393_v46  ;;  %v3607_v56 = vpop.f32.mrf.mxu2 }
 0x3c1   : > { %v7330_v47 = vpop.eup %7329  ;;  %v5004_v19 = vsel %vm11376_vm5, %v5003_v13, %v4999_v8  ;;  %v3811_v54 = vadd.f32 %v3810_v37, %v3602_v42  ;;  %v3605_v22 = vadd.f32 %v3604_v18, %v10091_v36  ;;  %v3396_v26 = vadd.f32 %v3395_v35, %v3187_v33 }
 0x3c2   : > { %v7332_v44 = vpop.eup %7331  ;;  %6407 = vst [vmem:[%s10193_s30 + $0x120] sm:$0xff] %v5004_v19  ;;  %v5014_v40 = vsel %vm5013_vm11, %v7326_v61, %v5010_v53  ;;  %v5023_v62 = vsub.f32 1.0, %v5022_v57  ;;  %v11415_v38 = vadd.f32 1.0, %v7330_v47  ;;  %7335 = vpow2.f32 %v6861_v28  ;;  %v11437_v46 = vpop.f32.mrf.mxu0 }
 0x3c3   : > { %v5019_v25 = vsel %vm11392_vm9, %v5018_v52, %v5014_v40  ;;  %v11419_v13 = vadd.f32 1.0, %v7332_v44  ;;  %v6862_v20 = vmul.f32 -1.442695, %v3811_v54  ;;  %v13856_v37 = vsub.f32 %v11237_v23, %v11211_v50 }
 0x3c4   : > { %6408 = vst [vmem:[%s10193_s30 + $0x128] sm:$0xff] %v5019_v25  ;;  %v5024_v61 = vmul.f32 %v7328_v7, %v5023_v62  ;;  %vm5027_vm12 = vweird.f32 %v7328_v7  ;;  %7337 = vrcp.f32 %v11415_v38  ;;  %vm5026_vm13 = vweird.f32 %v11364_v24 }
 0x3c5   : > { %v11424_v18 = vmul.f32 0.003921569, %v13856_v37  ;;  %v7334_v35 = vpop.eup %7333  ;;  %vm11429_vm14 = vcmp.eq.f32.partialorder %v5030_v29, 8.507059e+37  ;;  %v5033_v1 = vor.u32 1.1754944e-38, %v5032_v6  ;;  %7339 = vrcp.f32 %v11419_v13  ;;  %vm5028_vm15 = vmor %vm5026_vm13, %vm5027_vm12 }
 0x3c6   : > { %v5025_v3 = vadd.f32 %v7328_v7, %v5024_v61  ;;  %v11434_v15 = vadd.f32 1.0, %v7334_v35  ;;  %v3814_v50 = vadd.f32 %v3813_v17, %v3605_v22  ;;  %v3190_v23 = vadd.f32 %v3189_v16, %v10057_v55 }
 0x3c7   : > { %v5045_v24 = vand.u32 2147483647, %v11415_v38  ;;  %v5047_v42 = vand.u32 2147483648, %v11415_v38  ;;  %7341 = vpow2.f32 %v6862_v20  ;;  %v6863_v52 = vmul.f32 -1.442695, %v3396_v26  ;;  %v11468_v20 = vpop.f32.mrf.mxu1 }
 0x3c8   : > { %v5029_v29 = vsel %vm5028_vm15, %v7328_v7, %v5025_v3  ;;  %v5060_v33 = vand.u32 2147483647, %v11419_v13  ;;  %v5062_v8 = vand.u32 2147483648, %v11419_v13  ;;  %7343 = vrcp.f32 %v11434_v15  ;;  %v7336_v53 = vpop.eup %7335 }
 0x3c9   : > { %v11446_v16 = vmul.f32 %v11140_v12, %v11088_v2  ;;  %v5034_v57 = vsel %vm11429_vm14, %v5033_v1, %v5029_v29  ;;  %vm5041_vm0 = vweird.f32 %v11415_v38  ;;  %7345 = vpow2.f32 %v6863_v52 }
 0x3ca   : > { %v7338_v6 = vpop.eup %7337  ;;  %6409 = vst [vmem:[%s10193_s30 + $0x130] sm:$0xff] %v5034_v57  ;;  %vm5056_vm1 = vweird.f32 %v11419_v13  ;;  %v11453_v7 = vadd.f32 1.0, %v7336_v53  ;;  %v6864_v47 = vmul.f32 -1.442695, %v3814_v50  ;;  %v3399_v19 = vadd.f32 %v3398_v60, %v3190_v23  ;;  %v3816_v60 = vpop.f32.mrf.mxu3 }
 0x3cb   : > { %v7340_v28 = vpop.eup %7339  ;;  %v5037_v54 = vmul.f32 %v7338_v6, %v11415_v38  ;;  %vm11456_vm2 = vcmp.eq.f32.partialorder %v5045_v24, 8.507059e+37  ;;  %v5048_v44 = vor.u32 1.1754944e-38, %v5047_v42  ;;  %v5075_v40 = vand.u32 2147483647, %v11434_v15  ;;  %v11481_v53 = vpop.f32.mrf.mxu0 }
 0x3cc   : > { %v5077_v62 = vand.u32 2147483648, %v11434_v15  ;;  %v5052_v26 = vmul.f32 %v7340_v28, %v11419_v13  ;;  %vm11463_vm3 = vcmp.eq.f32.partialorder %v5060_v33, 8.507059e+37  ;;  %v5063_v25 = vor.u32 1.1754944e-38, %v5062_v8 }
 0x3cd   : > { %7347 = vrcp.f32 %v11453_v7  ;;  %v7342_v37 = vpop.eup %7341  ;;  %v5038_v61 = vsub.f32 1.0, %v5037_v54  ;;  %vm5071_vm4 = vweird.f32 %v11434_v15  ;;  %v3608_v35 = vadd.f32 %v3607_v56, %v10091_v36  ;;  %v3610_v56 = vpop.f32.mrf.mxu2 }
 0x3ce   : > { %7349 = vpow2.f32 %v6864_v47  ;;  %v7344_v0 = vpop.eup %7343  ;;  %vm5042_vm5 = vweird.f32 %v7338_v6  ;;  %v5053_v1 = vsub.f32 1.0, %v5052_v26  ;;  %v11472_v3 = vadd.f32 1.0, %v7342_v37 }
 0x3cf   : > { %v6865_v50 = vmul.f32 -1.442695, %v3399_v19  ;;  %v7346_v23 = vpop.eup %7345  ;;  %v5039_v24 = vmul.f32 %v7338_v6, %v5038_v61  ;;  %v5067_v42 = vmul.f32 %v7344_v0, %v11434_v15  ;;  %vm11475_vm6 = vcmp.eq.f32.partialorder %v5075_v40, 8.507059e+37  ;;  %vm5043_vm9 = vmor %vm5041_vm0, %vm5042_vm5 }
 0x3d0   : > { %v5078_v29 = vor.u32 1.1754944e-38, %v5077_v62  ;;  %v5054_v33 = vmul.f32 %v7340_v28, %v5053_v1  ;;  %vm5057_vm7 = vweird.f32 %v7340_v28  ;;  %v5090_v8 = vand.u32 2147483647, %v11453_v7 }
 0x3d1   : > { %7351 = vrcp.f32 %v11472_v3  ;;  %v5040_v57 = vadd.f32 %v7338_v6, %v5039_v24  ;;  %v5068_v47 = vsub.f32 1.0, %v5067_v42  ;;  %vm5086_vm8 = vweird.f32 %v11453_v7  ;;  %vm5058_vm10 = vmor %vm5056_vm1, %vm5057_vm7 }
 0x3d2   : > { %v5092_v19 = vand.u32 2147483648, %v11453_v7  ;;  %v5055_v40 = vadd.f32 %v7340_v28, %v5054_v33  ;;  %v11488_v62 = vadd.f32 1.0, %v7346_v23  ;;  %7353 = vpow2.f32 %v6865_v50  ;;  %v3819_v33 = vpop.f32.mrf.mxu3 }
 0x3d3   : > { %v7348_v54 = vpop.eup %7347  ;;  %v3817_v26 = vadd.f32 %v3816_v60, %v3608_v35  ;;  %v5044_v61 = vsel %vm5043_vm9, %v7338_v6, %v5040_v57  ;;  %v5069_v1 = vmul.f32 %v7344_v0, %v5068_v47  ;;  %vm5072_vm11 = vweird.f32 %v7344_v0 }
 0x3d4   : > { %v7350_v37 = vpop.eup %7349  ;;  %v5082_v24 = vmul.f32 %v7348_v54, %v11453_v7  ;;  %v5049_v38 = vsel %vm11456_vm2, %v5048_v44, %v5044_v61  ;;  %v5059_v42 = vsel %vm5058_vm10, %v7340_v28, %v5055_v40  ;;  %vm11496_vm12 = vcmp.eq.f32.partialorder %v5090_v8, 8.507059e+37  ;;  %vm5073_vm13 = vmor %vm5071_vm4, %vm5072_vm11  ;;  %v11511_v8 = vpop.f32.mrf.mxu1 }
 0x3d5   : > { %v5105_v60 = vand.u32 2147483647, %v11472_v3  ;;  %6410 = vst [vmem:[%s10193_s30 + $0x138] sm:$0xff] %v5049_v38  ;;  %v5064_v6 = vsel %vm11463_vm3, %v5063_v25, %v5059_v42  ;;  %v5070_v13 = vadd.f32 %v7344_v0, %v5069_v1  ;;  %7355 = vrcp.f32 %v11488_v62  ;;  %v3613_v1 = vpop.f32.mrf.mxu2 }
 0x3d6   : > { %v5083_v35 = vsub.f32 1.0, %v5082_v24  ;;  %6411 = vst [vmem:[%s10193_s30 + $0x140] sm:$0xff] %v5064_v6  ;;  %v5093_v28 = vor.u32 1.1754944e-38, %v5092_v19  ;;  %vm5101_vm14 = vweird.f32 %v11472_v3  ;;  %v11509_v22 = vadd.f32 1.0, %v7350_v37  ;;  %v3198_v24 = vpop.f32.mrf.mxu0 }
 0x3d7   : > { %v7352_v50 = vpop.eup %7351  ;;  %v6866_v44 = vmul.f32 -1.442695, %v3817_v26  ;;  %v5074_v17 = vsel %vm5073_vm13, %v7344_v0, %v5070_v13  ;;  %vm5087_vm15 = vweird.f32 %v7348_v54  ;;  %vm11516_vm0 = vcmp.eq.f32.partialorder %v5105_v60, 8.507059e+37 }
 0x3d8   : > { %v5084_v25 = vmul.f32 %v7348_v54, %v5083_v35  ;;  %v5097_v57 = vmul.f32 %v7352_v50, %v11472_v3  ;;  %v7354_v47 = vpop.eup %7353  ;;  %v5079_v15 = vsel %vm11475_vm6, %v5078_v29, %v5074_v17  ;;  %v5107_v19 = vand.u32 2147483648, %v11472_v3  ;;  %vm5088_vm1 = vmor %vm5086_vm8, %vm5087_vm15 }
 0x3d9   : > { %7357 = vrcp.f32 %v11509_v22  ;;  %6412 = vst [vmem:[%s10193_s30 + $0x148] sm:$0xff] %v5079_v15  ;;  %v5120_v0 = vand.u32 2147483647, %v11488_v62  ;;  %v5122_v61 = vand.u32 2147483648, %v11488_v62  ;;  %vm5102_vm2 = vweird.f32 %v7352_v50 }
 0x3da   : > { %v5085_v26 = vadd.f32 %v7348_v54, %v5084_v25  ;;  %v5098_v37 = vsub.f32 1.0, %v5097_v57  ;;  %v11527_v52 = vadd.f32 1.0, %v7354_v47  ;;  %7359 = vpow2.f32 %v6866_v44  ;;  %vm5103_vm5 = vmor %vm5101_vm14, %vm5102_vm2 }
 0x3db   : > { %v3193_v29 = vadd.f32 %v11437_v46, %v10057_v55  ;;  %v7356_v38 = vpop.eup %7355  ;;  %v5135_v6 = vand.u32 2147483647, %v11509_v22  ;;  %v3611_v13 = vadd.f32 %v3610_v56, %v10091_v36  ;;  %v5108_v35 = vor.u32 1.1754944e-38, %v5107_v19 }
 0x3dc   : > { %v5089_v42 = vsel %vm5088_vm1, %v7348_v54, %v5085_v26  ;;  %v5099_v60 = vmul.f32 %v7352_v50, %v5098_v37  ;;  %v5112_v17 = vmul.f32 %v7356_v38, %v11488_v62  ;;  %vm5116_vm3 = vweird.f32 %v11488_v62 }
 0x3dd   : > { %v5094_v7 = vsel %vm11496_vm12, %v5093_v28, %v5089_v42  ;;  %vm11538_vm4 = vcmp.eq.f32.partialorder %v5120_v0, 8.507059e+37  ;;  %v5137_v54 = vand.u32 2147483648, %v11509_v22  ;;  %7361 = vrcp.f32 %v11527_v52  ;;  %v3407_v42 = vpop.f32.mrf.mxu1 }
 0x3de   : > { %6413 = vst [vmem:[%s10193_s30 + $0x150] sm:$0xff] %v5094_v7  ;;  %v5100_v44 = vadd.f32 %v7352_v50, %v5099_v60  ;;  %v5113_v56 = vsub.f32 1.0, %v5112_v17  ;;  %v5123_v23 = vor.u32 1.1754944e-38, %v5122_v61  ;;  %v3402_v28 = vadd.f32 %v11468_v20, %v3193_v29  ;;  %v3822_v61 = vpop.f32.mrf.mxu3 }
 0x3df   : > { %v7358_v25 = vpop.eup %7357  ;;  %v3820_v57 = vadd.f32 %v3819_v33, %v3611_v13  ;;  %vm5131_vm6 = vweird.f32 %v11509_v22  ;;  %vm11550_vm7 = vcmp.eq.f32.partialorder %v5135_v6, 8.507059e+37  ;;  %vm5117_vm8 = vweird.f32 %v7356_v38 }
 0x3e0   : > { %v5104_v47 = vsel %vm5103_vm5, %v7352_v50, %v5100_v44  ;;  %v5127_v15 = vmul.f32 %v7358_v25, %v11509_v22  ;;  %v7360_v26 = vpop.eup %7359  ;;  %v5114_v37 = vmul.f32 %v7356_v38, %v5113_v56  ;;  %v6867_v0 = vmul.f32 -1.442695, %v3402_v28  ;;  %vm5118_vm9 = vmor %vm5116_vm3, %vm5117_vm8 }
 0x3e1   : > { %v5109_v3 = vsel %vm11516_vm0, %v5108_v35, %v5104_v47  ;;  %v5138_v50 = vor.u32 1.1754944e-38, %v5137_v54  ;;  %v11557_v33 = vadd.f32 1.0, %v7360_v26  ;;  %v6868_v29 = vmul.f32 -1.442695, %v3820_v57  ;;  %v3616_v54 = vpop.f32.mrf.mxu2 }
 0x3e2   : > { %6414 = vst [vmem:[%s10193_s30 + $0x158] sm:$0xff] %v5109_v3  ;;  %v5128_v20 = vsub.f32 1.0, %v5127_v15  ;;  %v5115_v60 = vadd.f32 %v7356_v38, %v5114_v37  ;;  %7363 = vpow2.f32 %v6867_v0  ;;  %v3196_v6 = vadd.f32 %v11481_v53, %v10057_v55 }
 0x3e3   : > { %v3614_v13 = vadd.f32 %v3613_v1, %v10091_v36  ;;  %v7362_v40 = vpop.eup %7361  ;;  %vm5132_vm10 = vweird.f32 %v7358_v25  ;;  %7365 = vrcp.f32 %v11557_v33  ;;  %v3199_v35 = vadd.f32 %v3198_v24, %v10057_v55  ;;  %v3201_v1 = vpop.f32.mrf.mxu0 }
 0x3e4   : > { %v5129_v7 = vmul.f32 %v7358_v25, %v5128_v20  ;;  %v5119_v17 = vsel %vm5118_vm9, %v7356_v38, %v5115_v60  ;;  %v5142_v44 = vmul.f32 %v7362_v40, %v11527_v52  ;;  %vm5146_vm11 = vweird.f32 %v11527_v52  ;;  %vm5133_vm12 = vmor %vm5131_vm6, %vm5132_vm10 }
 0x3e5   : > { %v5150_v53 = vand.u32 2147483647, %v11527_v52  ;;  %v5124_v62 = vsel %vm11538_vm4, %v5123_v23, %v5119_v17  ;;  %v5152_v28 = vand.u32 2147483648, %v11527_v52  ;;  %7367 = vpow2.f32 %v6868_v29 }
 0x3e6   : > { %v5130_v56 = vadd.f32 %v7358_v25, %v5129_v7  ;;  %6415 = vst [vmem:[%s10193_s30 + $0x160] sm:$0xff] %v5124_v62  ;;  %v5143_v24 = vsub.f32 1.0, %v5142_v44  ;;  %vm5147_vm13 = vweird.f32 %v7362_v40  ;;  %v3405_v38 = vadd.f32 %v11511_v8, %v3196_v6  ;;  %v3825_v19 = vpop.f32.mrf.mxu3 }
 0x3e7   : > { %v3823_v57 = vadd.f32 %v3822_v61, %v3614_v13  ;;  %v3408_v15 = vadd.f32 %v3407_v42, %v3199_v35  ;;  %v3617_v26 = vadd.f32 %v3616_v54, %v10091_v36  ;;  %v3202_v46 = vadd.f32 %v3201_v1, %v10057_v55  ;;  %vm5148_vm15 = vmor %vm5146_vm11, %vm5147_vm13 }
 0x3e8   : > { %v5134_v47 = vsel %vm5133_vm12, %v7358_v25, %v5130_v56  ;;  %v7364_v23 = vpop.eup %7363  ;;  %v5144_v37 = vmul.f32 %v7362_v40, %v5143_v24  ;;  %v6869_v0 = vmul.f32 -1.442695, %v3405_v38  ;;  %vm11581_vm14 = vcmp.eq.f32.partialorder %v5150_v53, 8.507059e+37 }
 0x3e9   : > { %v5139_v3 = vsel %vm11550_vm7, %v5138_v50, %v5134_v47  ;;  %v6870_v22 = vmul.f32 -1.442695, %v3823_v57  ;;  %v7366_v20 = vpop.eup %7365  ;;  %v5153_v8 = vor.u32 1.1754944e-38, %v5152_v28  ;;  %v11585_v25 = vadd.f32 1.0, %v7364_v23  ;;  %v3410_v50 = vpop.f32.mrf.mxu1 }
 0x3ea   : > { %6416 = vst [vmem:[%s10193_s30 + $0x168] sm:$0xff] %v5139_v3  ;;  %v6871_v61 = vmul.f32 -1.442695, %v3408_v15  ;;  %v5145_v42 = vadd.f32 %v7362_v40, %v5144_v37  ;;  %v5157_v60 = vmul.f32 %v7366_v20, %v11557_v33  ;;  %v5165_v6 = vand.u32 2147483647, %v11557_v33 }
 0x3eb   : > { %7369 = vpow2.f32 %v6869_v0  ;;  %v7368_v13 = vpop.eup %7367  ;;  %v5167_v7 = vand.u32 2147483648, %v11557_v33  ;;  %v3826_v35 = vadd.f32 %v3825_v19, %v3617_v26  ;;  %v3411_v17 = vadd.f32 %v3410_v50, %v3202_v46 }
 0x3ec   : > { %7371 = vrcp.f32 %v11585_v25  ;;  %v5149_v44 = vsel %vm5148_vm15, %v7362_v40, %v5145_v42  ;;  %v5158_v53 = vsub.f32 1.0, %v5157_v60  ;;  %v11594_v54 = vadd.f32 1.0, %v7368_v13 }
 0x3ed   : > { %7373 = vpow2.f32 %v6870_v22  ;;  %v11598_v1 = vmul.f32 %v11140_v12, %v11446_v16  ;;  %v5154_v62 = vsel %vm11581_vm14, %v5153_v8, %v5149_v44  ;;  %vm5162_vm0 = vweird.f32 %v7366_v20 }
 0x3ee   : > { %7375 = vpow2.f32 %v6871_v61  ;;  %6417 = vst [vmem:[%s10193_s30 + $0x170] sm:$0xff] %v5154_v62  ;;  %v5159_v52 = vmul.f32 %v7366_v20, %v5158_v53  ;;  %v5180_v56 = vand.u32 2147483647, %v11585_v25  ;;  %v5182_v28 = vand.u32 2147483648, %v11585_v25 }
 0x3ef   : > { %7377 = vrcp.f32 %v11594_v54  ;;  %vm5161_vm1 = vweird.f32 %v11557_v33  ;;  %v6872_v16 = vmul.f32 -1.442695, %v3826_v35  ;;  %v13875_v40 = vsub.f32 %v9421_v51, %v10051_v45 }
 0x3f0   : > { %7379 = vrsqrt.f32 %v11424_v18  ;;  %v5160_v57 = vadd.f32 %v7366_v20, %v5159_v52  ;;  %vm11612_vm2 = vcmp.eq.f32.partialorder %v5165_v6, 8.507059e+37  ;;  %v5168_v15 = vor.u32 1.1754944e-38, %v5167_v7  ;;  %vm5163_vm3 = vmor %vm5161_vm1, %vm5162_vm0 }
 0x3f1   : > { %v2991_v24 = vmul.f32 %v13875_v40, %v10634_v43  ;;  %v7370_v38 = vpop.eup %7369  ;;  %v6873_v26 = vmul.f32 -1.442695, %v3411_v17  ;;  %vm5176_vm4 = vweird.f32 %v11585_v25  ;;  %v5195_v33 = vand.u32 2147483647, %v11594_v54 }
 0x3f2   : > { %v11616_v46 = vpop.eup %7371  ;;  %v11621_v23 = vadd.f32 1.0, %v7370_v38  ;;  %7381 = vpow2.f32 %v6872_v16  ;;  %v5164_v3 = vsel %vm5163_vm3, %v7366_v20, %v5160_v57  ;;  %vm11626_vm5 = vcmp.eq.f32.partialorder %v5180_v56, 8.507059e+37 }
 0x3f3   : > { %3248 = vmatmul.f32.gmra.mxu0 %v2991_v24  ;;  %6585 = vst [vmem:[%s8546_s27 + $0x2b0] sm:$0xff] %v2991_v24  ;;  %3666 = vmatmul.f32.gmra.mxu2 %v2991_v24  ;;  %v7374_v51 = vpop.eup %7373  ;;  %v5172_v37 = vmul.f32 %v11616_v46, %v11585_v25  ;;  %v5183_v22 = vor.u32 1.1754944e-38, %v5182_v28  ;;  %v5169_v8 = vsel %vm11612_vm2, %v5168_v15, %v5164_v3  ;;  %vm5191_vm6 = vweird.f32 %v11594_v54 }
 0x3f4   : > { %v7376_v29 = vpop.eup %7375  ;;  %v5197_v61 = vand.u32 2147483648, %v11594_v54  ;;  %7383 = vrcp.f32 %v11621_v23  ;;  %v2864_v20 = vsub.f32 %v9434_v10, %v10051_v45  ;;  %6418 = vst [vmem:[%s10193_s30 + $0x178] sm:$0xff] %v5169_v8  ;;  %v11640_v6 = vadd.f32 1.0, %v7374_v51  ;;  %v3619_v45 = vpop.f32.mrf.mxu2 }
 0x3f5   : > { %v11637_v42 = vpop.eup %7377  ;;  %v5173_v60 = vsub.f32 1.0, %v5172_v37  ;;  %v11642_v19 = vadd.f32 1.0, %v7376_v29  ;;  %7385 = vpow2.f32 %v6873_v26  ;;  %vm5177_vm7 = vweird.f32 %v11616_v46 }
 0x3f6   : > { %v11644_v50 = vpop.eup %7379  ;;  %v5187_v13 = vmul.f32 %v11637_v42, %v11594_v54  ;;  %vm11649_vm8 = vcmp.eq.f32.partialorder %v5195_v33, 8.507059e+37  ;;  %v2992_v10 = vmul.f32 %v2864_v20, %v10634_v43  ;;  %v5210_v17 = vand.u32 2147483647, %v11621_v23  ;;  %vm5178_vm12 = vmor %vm5176_vm4, %vm5177_vm7 }
 0x3f7   : > { %v5174_v35 = vmul.f32 %v11616_v46, %v5173_v60  ;;  %v5212_v44 = vand.u32 2147483648, %v11621_v23  ;;  %7387 = vrcp.f32 %v11640_v6  ;;  %vm2584_vm9 = vweird.f32 %v10139_v63 }
 0x3f8   : > { %v7382_v53 = vpop.eup %7381  ;;  %v5188_v62 = vsub.f32 1.0, %v5187_v13  ;;  %v5198_v52 = vor.u32 1.1754944e-38, %v5197_v61  ;;  %7389 = vrcp.f32 %v11642_v19  ;;  %3457 = vmatmul.f32.gmra.mxu1 %v2992_v10  ;;  %6586 = vst [vmem:[%s8546_s27 + $0x2b8] sm:$0xff] %v2992_v10  ;;  %3875 = vmatmul.f32.gmra.mxu3 %v2992_v10  ;;  %v13882_v43 = vsub.f32 1.5, %v10228_v59 }
 0x3f9   : > { %v5175_v28 = vadd.f32 %v11616_v46, %v5174_v35  ;;  %vm5206_vm10 = vweird.f32 %v11621_v23  ;;  %v5227_v16 = vand.u32 2147483648, %v11640_v6  ;;  %v3620_v40 = vadd.f32 %v3619_v45, %v10091_v36 }
 0x3fa   : > { %v11664_v56 = vmul.f32 %v10139_v63, %v13882_v43  ;;  %v11670_v24 = vpop.eup %7383  ;;  %vm2583_vm11 = vweird.f32 %v10110_v21  ;;  %v5189_v59 = vmul.f32 %v11637_v42, %v5188_v62  ;;  %vm5192_vm13 = vweird.f32 %v11637_v42 }
 0x3fb   : > { %v5225_v38 = vand.u32 2147483647, %v11640_v6  ;;  %v11680_v57 = vadd.f32 1.0, %v7382_v53  ;;  %v7386_v47 = vpop.eup %7385  ;;  %v5179_v15 = vsel %vm5178_vm12, %v11616_v46, %v5175_v28  ;;  %v5202_v26 = vmul.f32 %v11670_v24, %v11621_v23  ;;  %v3828_v46 = vpop.f32.mrf.mxu3  ;;  %vm5193_vm0 = vmor %vm5191_vm6, %vm5192_vm13 }
 0x3fc   : > { %vm11685_vm14 = vcmp.eq.f32.partialorder %v5210_v17, 8.507059e+37  ;;  %v5213_v25 = vor.u32 1.1754944e-38, %v5212_v44  ;;  %v5240_v51 = vand.u32 2147483647, %v11642_v19  ;;  %v5184_v3 = vsel %vm11626_vm5, %v5183_v22, %v5179_v15  ;;  %v3413_v15 = vpop.f32.mrf.mxu1 }
 0x3fd   : > { %v5190_v37 = vadd.f32 %v11637_v42, %v5189_v59  ;;  %vm5221_vm15 = vweird.f32 %v11640_v6  ;;  %v5242_v29 = vand.u32 2147483648, %v11642_v19  ;;  %7391 = vrcp.f32 %v11680_v57  ;;  %v11696_v8 = vpop.eup %7387  ;;  %6419 = vst [vmem:[%s10193_s30 + $0x180] sm:$0xff] %v5184_v3 }
 0x3fe   : > { %v5203_v61 = vsub.f32 1.0, %v5202_v26  ;;  %vm5207_vm1 = vweird.f32 %v11670_v24  ;;  %v5228_v0 = vor.u32 1.1754944e-38, %v5227_v16  ;;  %vm5236_vm2 = vweird.f32 %v11642_v19  ;;  %v11705_v22 = vpop.eup %7389 }
 0x3ff   : > { %vm2594_vm3 = vweird.f32 %v10157_v32  ;;  %v5194_v20 = vsel %vm5193_vm0, %v11637_v42, %v5190_v37  ;;  %v5217_v60 = vmul.f32 %v11696_v8, %v11640_v6  ;;  %vm11711_vm4 = vcmp.eq.f32.partialorder %v5225_v38, 8.507059e+37  ;;  %vm5208_vm13 = vmor %vm5206_vm10, %vm5207_vm1 }
 0x400   : > { %v5257_v54 = vand.u32 2147483648, %v11680_v57  ;;  %v11716_v10 = vadd.f32 1.0, %v7386_v47  ;;  %v5199_v45 = vsel %vm11649_vm8, %v5198_v52, %v5194_v20  ;;  %v5204_v35 = vmul.f32 %v11670_v24, %v5203_v61  ;;  %v3204_v47 = vpop.f32.mrf.mxu0  ;;  %vm2585_vm0 = vmor %vm2583_vm11, %vm2584_vm9 }
 0x401   : > { %v5232_v17 = vmul.f32 %v11705_v22, %v11642_v19  ;;  %v5255_v42 = vand.u32 2147483647, %v11680_v57  ;;  %vm2593_vm5 = vweird.f32 %v10123_v41  ;;  %6420 = vst [vmem:[%s10193_s30 + $0x188] sm:$0xff] %v5199_v45  ;;  %v5218_v44 = vsub.f32 1.0, %v5217_v60 }
 0x402   : > { %vm11726_vm6 = vcmp.eq.f32.partialorder %v5240_v51, 8.507059e+37  ;;  %v5243_v62 = vor.u32 1.1754944e-38, %v5242_v29  ;;  %7393 = vrcp.f32 %v11716_v10  ;;  %v5205_v7 = vadd.f32 %v11670_v24, %v5204_v35 }
 0x403   : > { %vm5222_vm7 = vweird.f32 %v11696_v8  ;;  %v5233_v52 = vsub.f32 1.0, %v5232_v17  ;;  %vm5237_vm8 = vweird.f32 %v11705_v22  ;;  %vm5251_vm12 = vweird.f32 %v11680_v57  ;;  %v11735_v43 = vpop.eup %7391  ;;  %v3831_v45 = vpop.f32.mrf.mxu3 }
 0x404   : > { %v5219_v28 = vmul.f32 %v11696_v8, %v5218_v44  ;;  %v11742_v16 = vor.u32 1.1754944e-38, %v5257_v54  ;;  %v5270_v59 = vand.u32 2147483647, %v11716_v10  ;;  %v3829_v38 = vadd.f32 %v3828_v46, %v3620_v40  ;;  %vm11770_vm11 = vmor %vm5221_vm15, %vm5222_vm7  ;;  %v3622_v54 = vpop.f32.mrf.mxu2 }
 0x405   : > { %v5209_v26 = vsel %vm5208_vm13, %v11670_v24, %v5205_v7  ;;  %v5234_v23 = vmul.f32 %v11705_v22, %v5233_v52  ;;  %v5247_v51 = vmul.f32 %v11735_v43, %v11680_v57  ;;  %vm11753_vm10 = vcmp.eq.f32.partialorder %v5255_v42, 8.507059e+37  ;;  %vm5238_vm15 = vmor %vm5236_vm2, %vm5237_vm8 }
 0x406   : > { %v5272_v40 = vand.u32 2147483648, %v11716_v10  ;;  %vm2604_vm1 = vweird.f32 %v10212_v58  ;;  %v5214_v37 = vsel %vm11685_vm14, %v5213_v25, %v5209_v26  ;;  %v5220_v21 = vadd.f32 %v11696_v8, %v5219_v28  ;;  %v13897_v28 = vld [vmem:[#allocation23_spill] sm:$0xff] }
 0x407   : > { %vm5252_vm9 = vweird.f32 %v11735_v43  ;;  %v2586_v24 = vsel %vm2585_vm0, %v10139_v63, %v11664_v56  ;;  %6421 = vst [vmem:[%s10193_s30 + $0x190] sm:$0xff] %v5214_v37  ;;  %v5235_v46 = vadd.f32 %v11705_v22, %v5234_v23  ;;  %v5248_v33 = vsub.f32 1.0, %v5247_v51  ;;  %v13893_v56 = vld [vmem:[#allocation22_spill] sm:$0xff] }
 0x408   : > { %vm5266_vm14 = vweird.f32 %v11716_v10  ;;  %v6874_v25 = vmul.f32 -1.442695, %v3829_v38  ;;  %v3205_v61 = vadd.f32 %v3204_v47, %v10057_v55  ;;  %v11777_v20 = vpop.eup %7393  ;;  %vm2603_vm13 = vweird.f32 %v10168_v5  ;;  %v3207_v41 = vpop.f32.mrf.mxu0 }
 0x409   : > { %v5224_v63 = vsel %vm11770_vm11, %v11696_v8, %v5220_v21  ;;  %v2865_v6 = vsub.f32 %v9455_v34, %v10064_v27  ;;  %v2866_v60 = vsub.f32 %v13893_v56, %v10064_v27  ;;  %v13894_v35 = vsub.f32 1.5, %v10260_v11  ;;  %v13898_v21 = vld [vmem:[#allocation24_spill] sm:$0xff] }
 0x40a   : > { %v5229_v8 = vsel %vm11711_vm4, %v5228_v0, %v5224_v63  ;;  %v5239_v42 = vsel %vm5238_vm15, %v11705_v22, %v5235_v46  ;;  %v5249_v19 = vmul.f32 %v11735_v43, %v5248_v33  ;;  %v5262_v34 = vmul.f32 %v11777_v20, %v11716_v10  ;;  %vm2595_vm4 = vmor %vm2593_vm5, %vm2594_vm3 }
 0x40b   : > { %v2592_v17 = vmul.f32 %v10157_v32, %v13894_v35  ;;  %vm11800_vm2 = vcmp.eq.f32.partialorder %v5270_v59, 8.507059e+37  ;;  %6422 = vst [vmem:[%s10193_s30 + $0x198] sm:$0xff] %v5229_v8  ;;  %v5244_v27 = vsel %vm11726_vm6, %v5243_v62, %v5239_v42  ;;  %vm5267_vm7 = vweird.f32 %v11777_v20  ;;  %vm5253_vm6 = vmor %vm5251_vm12, %vm5252_vm9 }
 0x40c   : > { %7395 = vpow2.f32 %v6874_v25  ;;  %v3414_v11 = vadd.f32 %v3413_v15, %v3205_v61  ;;  %6423 = vst [vmem:[%s10193_s30 + $0x1a0] sm:$0xff] %v5244_v27  ;;  %v5250_v0 = vadd.f32 %v11735_v43, %v5249_v19  ;;  %v5263_v22 = vsub.f32 1.0, %v5262_v34  ;;  %v3416_v15 = vpop.f32.mrf.mxu1  ;;  %vm5268_vm5 = vmor %vm5266_vm14, %vm5267_vm7  ;;  %v3625_v3 = vpop.f32.mrf.mxu2  ;;  %v13901_v25 = vld [vmem:[#allocation57_spill] sm:$0xff] }
 0x40d   : > { %v2993_v13 = vmul.f32 %v2865_v6, %v2586_v24  ;;  %v2994_v7 = vmul.f32 %v2866_v60, %v2586_v24  ;;  %vm2614_vm8 = vweird.f32 %v10258_v30  ;;  %v3623_v62 = vadd.f32 %v3622_v54, %v10091_v36  ;;  %v13902_v61 = vld [vmem:[#allocation25_spill] sm:$0xff]  ;;  %v13903_v6 = vld [vmem:[#allocation26_spill] sm:$0xff]  ;;  %vm2605_vm12 = vmor %vm2603_vm13, %vm2604_vm1 }
 0x40e   : > { %v6875_v53 = vmul.f32 -1.442695, %v3414_v11  ;;  %v2596_v52 = vsel %vm2595_vm4, %v10157_v32, %v2592_v17  ;;  %v2867_v59 = vsub.f32 %v13897_v28, %v10087_v49  ;;  %v5254_v38 = vsel %vm5253_vm6, %v11735_v43, %v5250_v0 }
 0x40f   : > { %v5264_v47 = vmul.f32 %v11777_v20, %v5263_v22  ;;  %3251 = vmatmul.f32.gmra.mxu0 %v2993_v13  ;;  %6587 = vst [vmem:[%s8546_s27 + $0x2c0] sm:$0xff] %v2993_v13  ;;  %3460 = vmatmul.f32.gmra.mxu1 %v2994_v7  ;;  %v3208_v57 = vadd.f32 %v3207_v41, %v10057_v55  ;;  %vm2613_vm3 = vweird.f32 %v10190_v4  ;;  %v5273_v26 = vor.u32 1.1754944e-38, %v5272_v40  ;;  %v13899_v40 = vld [vmem:[#allocation61_spill] sm:$0xff] }
 0x410   : > { %v5259_v32 = vsel %vm11753_vm10, %v11742_v16, %v5254_v38  ;;  %7397 = vpow2.f32 %v6875_v53  ;;  %6588 = vst [vmem:[%s8546_s27 + $0x2c8] sm:$0xff] %v2994_v7  ;;  %3669 = vmatmul.f32.gmra.mxu2 %v2993_v13  ;;  %3878 = vmatmul.f32.gmra.mxu3 %v2994_v7  ;;  %v3832_v43 = vadd.f32 %v3831_v45, %v3623_v62  ;;  %v13900_v46 = vsub.f32 1.5, %v13899_v40  ;;  %v3834_v45 = vpop.f32.mrf.mxu3  ;;  %v3210_v44 = vpop.f32.mrf.mxu0  ;;  %v13904_v13 = vld [vmem:[#allocation109_spill] sm:$0xff]  ;;  %v13905_v53 = vld [vmem:[#allocation111_spill] sm:$0xff]  ;;  %vm2615_vm0 = vmor %vm2613_vm3, %vm2614_vm8 }
 0x411   : > { %6424 = vst [vmem:[%s10193_s30 + $0x1a8] sm:$0xff] %v5259_v32  ;;  %v5265_v23 = vadd.f32 %v11777_v20, %v5264_v47  ;;  %v3417_v51 = vadd.f32 %v3416_v15, %v3208_v57  ;;  %v2995_v37 = vmul.f32 %v2867_v59, %v2596_v52  ;;  %v2868_v24 = vsub.f32 %v13898_v21, %v10087_v49  ;;  %v13908_v38 = vld [vmem:[#allocation55_spill] sm:$0xff] }
 0x412   : > { %v7396_v29 = vpop.eup %7395  ;;  %v6876_v16 = vmul.f32 -1.442695, %v3832_v43  ;;  %v2602_v33 = vmul.f32 %v10212_v58, %v13900_v46  ;;  %v2869_v63 = vsub.f32 %v13902_v61, %v13901_v25  ;;  %v2870_v56 = vsub.f32 %v13903_v6, %v13901_v25 }
 0x413   : > { %v5269_v49 = vsel %vm5268_vm5, %v11777_v20, %v5265_v23  ;;  %v11852_v10 = vadd.f32 1.0, %v7396_v29  ;;  %v6877_v60 = vmul.f32 -1.442695, %v3417_v51  ;;  %6589 = vst [vmem:[%s8546_s27 + $0x2d0] sm:$0xff] %v2995_v37  ;;  %v2996_v54 = vmul.f32 %v2868_v24, %v2596_v52  ;;  %v13906_v52 = vld [vmem:[#allocation72_spill] sm:$0xff]  ;;  %v13909_v51 = vld [vmem:[#allocation58_spill] sm:$0xff] }
 0x414   : > { %v5274_v35 = vsel %vm11800_vm2, %v5273_v26, %v5269_v49  ;;  %7399 = vpow2.f32 %v6876_v16  ;;  %v3626_v17 = vadd.f32 %v3625_v3, %v10091_v36  ;;  %v2606_v8 = vsel %vm2605_vm12, %v10212_v58, %v2602_v33  ;;  %v3419_v15 = vpop.f32.mrf.mxu1  ;;  %v11891_v26 = vpop.xlane.xlu1 %1879 }
 0x415   : > { %v2701_v5 = vsub.f32 1.5, %v11084_v48  ;;  %v2711_v42 = vsub.f32 1.5, %v11092_v39  ;;  %v11862_v20 = vmul.f32 0.5, %v11598_v1  ;;  %6425 = vst [vmem:[%s10193_s30 + $0x1b0] sm:$0xff] %v5274_v35  ;;  %7401 = vrcp.f32 %v11852_v10  ;;  %v3628_v23 = vpop.f32.mrf.mxu2 }
 0x416   : > { %v7398_v19 = vpop.eup %7397  ;;  %7403 = vpow2.f32 %v6877_v60  ;;  %6590 = vst [vmem:[%s8546_s27 + $0x2d8] sm:$0xff] %v2996_v54  ;;  %v3835_v34 = vadd.f32 %v3834_v45, %v3626_v17  ;;  %v2997_v27 = vmul.f32 %v2869_v63, %v2606_v8  ;;  %v2998_v11 = vmul.f32 %v2870_v56, %v2606_v8  ;;  %v13913_v56 = vld [vmem:[#allocation28_spill] sm:$0xff] }
 0x417   : > { %v2721_v58 = vsub.f32 1.5, %v11102_v31  ;;  %v11870_v0 = vmul.f32 %v11257_v9, %v11232_v14  ;;  %v11872_v22 = vadd.f32 1.0, %v7398_v19  ;;  %3254 = vmatmul.f32.gmra.mxu0 %v2995_v37  ;;  %3463 = vmatmul.f32.gmra.mxu1 %v2996_v54  ;;  %v3211_v1 = vadd.f32 %v3210_v44, %v10057_v55 }
 0x418   : > { %v2731_v7 = vsub.f32 1.5, %v13904_v13  ;;  %v2741_v62 = vsub.f32 1.5, %v13905_v53  ;;  %3672 = vmatmul.f32.gmra.mxu2 %v2995_v37  ;;  %3881 = vmatmul.f32.gmra.mxu3 %v2996_v54  ;;  %v6878_v41 = vmul.f32 -1.442695, %v3835_v34  ;;  %6591 = vst [vmem:[%s8546_s27 + $0x2e0] sm:$0xff] %v2997_v27  ;;  %v13907_v28 = vsub.f32 1.5, %v13906_v52  ;;  %v3837_v6 = vpop.f32.mrf.mxu3  ;;  %v3213_v52 = vpop.f32.mrf.mxu0 }
 0x419   : > { %v2751_v59 = vsub.f32 1.5, %v11862_v20  ;;  %v2903_v47 = vsub.f32 %v13908_v38, %v11257_v9  ;;  %v5285_v57 = vand.u32 2147483647, %v11852_v10  ;;  %7405 = vrcp.f32 %v11872_v22  ;;  %6592 = vst [vmem:[%s8546_s27 + $0x2e8] sm:$0xff] %v2998_v11  ;;  %v13910_v37 = vld [vmem:[#allocation27_spill] sm:$0xff] }
 0x41a   : > { %v2612_v14 = vmul.f32 %v10258_v30, %v13907_v28  ;;  %v7400_v32 = vpop.eup %7399  ;;  %7407 = vpow2.f32 %v6878_v41  ;;  %v3420_v43 = vadd.f32 %v3419_v15, %v3211_v1  ;;  %v2871_v21 = vsub.f32 %v13910_v37, %v13909_v51  ;;  %v13914_v15 = vld [vmem:[#allocation65_spill] sm:$0xff] }
 0x41b   : > { %v7402_v24 = vpop.eup %7401  ;;  %v11898_v29 = vmul.f32 %v11644_v50, %v11424_v18  ;;  %v2072_v16 = vsub.f32 %v11891_v26, %v11870_v0  ;;  %v11902_v3 = vadd.f32 1.0, %v7400_v32  ;;  %v3629_v40 = vadd.f32 %v3628_v23, %v10091_v36 }
 0x41c   : > { %v2616_v4 = vsel %vm2615_vm0, %v10258_v30, %v2612_v14  ;;  %v7404_v46 = vpop.eup %7403  ;;  %v5277_v33 = vmul.f32 %v7402_v24, %v11852_v10  ;;  %vm5281_vm10 = vweird.f32 %v11852_v10  ;;  %v6879_v30 = vmul.f32 -1.442695, %v3420_v43 }
 0x41d   : > { %v11907_v25 = vmul.f32 %v2871_v21, %v2616_v4  ;;  %vm11909_vm1 = vcmp.eq.f32.partialorder %v5285_v57, 8.507059e+37  ;;  %v5287_v63 = vand.u32 2147483648, %v11852_v10  ;;  %7409 = vrcp.f32 %v11902_v3  ;;  %v13917_v21 = vld [vmem:[#allocation62_spill] sm:$0xff] }
 0x41e   : > { %v2872_v49 = vsub.f32 %v13913_v56, %v13909_v51  ;;  %v5278_v60 = vsub.f32 1.0, %v5277_v33  ;;  %v11917_v54 = vadd.f32 1.0, %v7404_v46  ;;  %7411 = vpow2.f32 %v6879_v30  ;;  %v3422_v30 = vpop.f32.mrf.mxu1 }
 0x41f   : > { %v3838_v45 = vadd.f32 %v3837_v6, %v3629_v40  ;;  %6593 = vst [vmem:[%s8546_s27 + $0x2f0] sm:$0xff] %v11907_v25  ;;  %v11921_v35 = vpop.eup %7405  ;;  %vm5282_vm9 = vweird.f32 %v7402_v24  ;;  %v5300_v17 = vand.u32 2147483647, %v11872_v22  ;;  %v5302_v8 = vand.u32 2147483648, %v11872_v22  ;;  %3257 = vmatmul.f32.gmra.mxu0 %v2997_v27  ;;  %3466 = vmatmul.f32.gmra.mxu1 %v2998_v11 }
 0x420   : > { %v3000_v19 = vmul.f32 %v2872_v49, %v2616_v4  ;;  %v7408_v34 = vpop.eup %7407  ;;  %v5279_v44 = vmul.f32 %v7402_v24, %v5278_v60  ;;  %v5292_v1 = vmul.f32 %v11921_v35, %v11872_v22  ;;  %v5315_v41 = vand.u32 2147483647, %v11902_v3  ;;  %3675 = vmatmul.f32.gmra.mxu2 %v2997_v27  ;;  %3884 = vmatmul.f32.gmra.mxu3 %v2998_v11  ;;  %vm5283_vm13 = vmor %vm5281_vm10, %vm5282_vm9 }
 0x421   : > { %7413 = vrcp.f32 %v11917_v54  ;;  %v5288_v28 = vor.u32 1.1754944e-38, %v5287_v63  ;;  %vm5296_vm11 = vweird.f32 %v11872_v22  ;;  %v5317_v14 = vand.u32 2147483648, %v11902_v3 }
 0x422   : > { %v11931_v57 = vadd.f32 1.0, %v7408_v34  ;;  %6594 = vst [vmem:[%s8546_s27 + $0x2f8] sm:$0xff] %v3000_v19  ;;  %vm2624_vm14 = vweird.f32 %v13914_v15  ;;  %v5280_v32 = vadd.f32 %v7402_v24, %v5279_v44  ;;  %v5293_v43 = vsub.f32 1.0, %v5292_v1  ;;  %v13922_v44 = vld [vmem:[#allocation73_spill] sm:$0xff] }
 0x423   : > { %v6880_v23 = vmul.f32 -1.442695, %v3838_v45  ;;  %v3214_v4 = vadd.f32 %v3213_v52, %v10057_v55  ;;  %v11936_v51 = vpop.eup %7409  ;;  %vm11941_vm15 = vcmp.eq.f32.partialorder %v5300_v17, 8.507059e+37  ;;  %v5303_v11 = vor.u32 1.1754944e-38, %v5302_v8 }
 0x424   : > { %vm5311_vm2 = vweird.f32 %v11902_v3  ;;  %7415 = vrcp.f32 %v11931_v57  ;;  %v7412_v37 = vpop.eup %7411  ;;  %vm2623_vm7 = vweird.f32 %v13917_v21  ;;  %v5284_v40 = vsel %vm5283_vm13, %v7402_v24, %v5280_v32 }
 0x425   : > { %v5294_v46 = vmul.f32 %v11921_v35, %v5293_v43  ;;  %vm5297_vm4 = vweird.f32 %v11921_v35  ;;  %v5307_v10 = vmul.f32 %v11936_v51, %v11902_v3  ;;  %vm11952_vm8 = vcmp.eq.f32.partialorder %v5315_v41, 8.507059e+37  ;;  %vm12010_vm9 = vmor %vm2623_vm7, %vm2624_vm14 }
 0x426   : > { %v5289_v63 = vsel %vm11909_vm1, %v5288_v28, %v5284_v40  ;;  %v5318_v6 = vor.u32 1.1754944e-38, %v5317_v14  ;;  %v5330_v56 = vand.u32 2147483647, %v11917_v54  ;;  %v11959_v49 = vadd.f32 1.0, %v7412_v37  ;;  %vm11967_vm6 = vmor %vm5296_vm11, %vm5297_vm4  ;;  %v3631_v28 = vpop.f32.mrf.mxu2 }
 0x427   : > { %v11961_v24 = vpop.eup %7413  ;;  %6426 = vst [vmem:[%s10193_s30 + $0x1b8] sm:$0xff] %v5289_v63  ;;  %v5295_v60 = vadd.f32 %v11921_v35, %v5294_v46  ;;  %v5308_v45 = vsub.f32 1.0, %v5307_v10  ;;  %7417 = vpow2.f32 %v6880_v23  ;;  %v3423_v17 = vadd.f32 %v3422_v30, %v3214_v4  ;;  %3260 = vmatmul.f32.gmra.mxu0 %v11907_v25  ;;  %3469 = vmatmul.f32.gmra.mxu1 %v3000_v19  ;;  %v3840_v46 = vpop.f32.mrf.mxu3 }
 0x428   : > { %v5322_v61 = vmul.f32 %v11961_v24, %v11917_v54  ;;  %vm5326_vm3 = vweird.f32 %v11917_v54  ;;  %v5332_v34 = vand.u32 2147483648, %v11917_v54  ;;  %v13923_v1 = vsub.f32 1.5, %v13922_v44  ;;  %3678 = vmatmul.f32.gmra.mxu2 %v11907_v25  ;;  %3887 = vmatmul.f32.gmra.mxu3 %v3000_v19  ;;  %v13931_v44 = vld [vmem:[#allocation63_spill] sm:$0xff] }
 0x429   : > { %v5299_v22 = vsel %vm11967_vm6, %v11921_v35, %v5295_v60  ;;  %v5309_v52 = vmul.f32 %v11936_v51, %v5308_v45  ;;  %vm5312_vm5 = vweird.f32 %v11936_v51  ;;  %7419 = vrcp.f32 %v11959_v49 }
 0x42a   : > { %v2622_v41 = vmul.f32 %v13914_v15, %v13923_v1  ;;  %v7416_v14 = vpop.eup %7415  ;;  %v5304_v32 = vsel %vm11941_vm15, %v5303_v11, %v5299_v22  ;;  %v5323_v43 = vsub.f32 1.0, %v5322_v61  ;;  %vm11988_vm12 = vcmp.eq.f32.partialorder %v5330_v56, 8.507059e+37  ;;  %vm5313_vm0 = vmor %vm5311_vm2, %vm5312_vm5  ;;  %v13928_v56 = vld [vmem:[#allocation71_spill] sm:$0xff]  ;;  %v13938_v61 = vld [vmem:[#allocation81_spill] sm:$0xff] }
 0x42b   : > { %v5345_v35 = vand.u32 2147483647, %v11931_v57  ;;  %6427 = vst [vmem:[%s10193_s30 + $0x1c0] sm:$0xff] %v5304_v32  ;;  %v5310_v4 = vadd.f32 %v11936_v51, %v5309_v52  ;;  %v5337_v37 = vmul.f32 %v7416_v14, %v11931_v57  ;;  %v5347_v25 = vand.u32 2147483648, %v11931_v57  ;;  %v13932_v32 = vld [vmem:[#allocation59_spill] sm:$0xff] }
 0x42c   : > { %v6881_v19 = vmul.f32 -1.442695, %v3423_v17  ;;  %v5324_v27 = vmul.f32 %v11961_v24, %v5323_v43  ;;  %vm5327_vm10 = vweird.f32 %v11961_v24  ;;  %v5333_v11 = vor.u32 1.1754944e-38, %v5332_v34  ;;  %v3425_v34 = vpop.f32.mrf.mxu1  ;;  %v13933_v43 = vld [vmem:[#allocation29_spill] sm:$0xff] }
 0x42d   : > { %v3632_v40 = vadd.f32 %v3631_v28, %v10091_v36  ;;  %v7418_v10 = vpop.eup %7417  ;;  %v5314_v30 = vsel %vm5313_vm0, %v11936_v51, %v5310_v4  ;;  %v5338_v63 = vsub.f32 1.0, %v5337_v37  ;;  %vm5341_vm1 = vweird.f32 %v11931_v57  ;;  %vm5328_vm14 = vmor %vm5326_vm3, %vm5327_vm10  ;;  %v13934_v4 = vld [vmem:[#allocation30_spill] sm:$0xff] }
 0x42e   : > { %7421 = vpow2.f32 %v6881_v19  ;;  %vm2634_vm11 = vweird.f32 %v13928_v56  ;;  %v5319_v60 = vsel %vm11952_vm8, %v5318_v6, %v5314_v30  ;;  %v5325_v45 = vadd.f32 %v11961_v24, %v5324_v27  ;;  %v3216_v6 = vpop.f32.mrf.mxu0 }
 0x42f   : > { %v12018_v51 = vadd.f32 1.0, %v7418_v10  ;;  %v3841_v17 = vadd.f32 %v3840_v46, %v3632_v40  ;;  %v12020_v8 = vpop.eup %7419  ;;  %6428 = vst [vmem:[%s10193_s30 + $0x1c8] sm:$0xff] %v5319_v60  ;;  %v5339_v21 = vmul.f32 %v7416_v14, %v5338_v63  ;;  %vm5342_vm13 = vweird.f32 %v7416_v14  ;;  %v3634_v46 = vpop.f32.mrf.mxu2  ;;  %v13935_v63 = vld [vmem:[#allocation76_spill] sm:$0xff] }
 0x430   : > { %vm12027_vm15 = vcmp.eq.f32.partialorder %v5345_v35, 8.507059e+37  ;;  %v5348_v33 = vor.u32 1.1754944e-38, %v5347_v25  ;;  %vm2633_vm2 = vweird.f32 %v13931_v44  ;;  %v5329_v1 = vsel %vm5328_vm14, %v11961_v24, %v5325_v45  ;;  %vm5343_vm7 = vmor %vm5341_vm1, %vm5342_vm13 }
 0x431   : > { %v5352_v22 = vmul.f32 %v12020_v8, %v11959_v49  ;;  %7423 = vrcp.f32 %v12018_v51  ;;  %v2626_v54 = vsel %vm12010_vm9, %v13914_v15, %v2622_v41  ;;  %v5334_v52 = vsel %vm11988_vm12, %v5333_v11, %v5329_v1  ;;  %vm2635_vm10 = vmor %vm2633_vm2, %vm2634_vm11 }
 0x432   : > { %v5340_v28 = vadd.f32 %v7416_v14, %v5339_v21  ;;  %v2873_v35 = vsub.f32 %v13933_v43, %v13932_v32  ;;  %v2874_v37 = vsub.f32 %v13934_v4, %v13932_v32  ;;  %6429 = vst [vmem:[%s10193_s30 + $0x1d0] sm:$0xff] %v5334_v52  ;;  %v5360_v25 = vand.u32 2147483647, %v11959_v49  ;;  %v3843_v21 = vpop.f32.mrf.mxu3 }
 0x433   : > { %v5353_v24 = vsub.f32 1.0, %v5352_v22  ;;  %v6882_v15 = vmul.f32 -1.442695, %v3841_v17  ;;  %v3217_v41 = vadd.f32 %v3216_v6, %v10057_v55  ;;  %v5362_v27 = vand.u32 2147483648, %v11959_v49 }
 0x434   : > { %v7422_v23 = vpop.eup %7421  ;;  %v5344_v19 = vsel %vm5343_vm7, %v7416_v14, %v5340_v28  ;;  %v3001_v11 = vmul.f32 %v2873_v35, %v2626_v54  ;;  %v3002_v40 = vmul.f32 %v2874_v37, %v2626_v54  ;;  %vm5357_vm4 = vweird.f32 %v12020_v8 }
 0x435   : > { %v5349_v10 = vsel %vm12027_vm15, %v5348_v33, %v5344_v19  ;;  %v5354_v57 = vmul.f32 %v12020_v8, %v5353_v24  ;;  %v12056_v30 = vadd.f32 1.0, %v7422_v23  ;;  %vm2644_vm8 = vweird.f32 %v13935_v63  ;;  %v3428_v24 = vpop.f32.mrf.mxu1  ;;  %v13942_v23 = vld [vmem:[#allocation31_spill] sm:$0xff] }
 0x436   : > { %6430 = vst [vmem:[%s10193_s30 + $0x1d8] sm:$0xff] %v5349_v10  ;;  %vm5356_vm6 = vweird.f32 %v11959_v49  ;;  %7425 = vpow2.f32 %v6882_v15  ;;  %v3426_v14 = vadd.f32 %v3425_v34, %v3217_v41  ;;  %3263 = vmatmul.f32.gmra.mxu0 %v3001_v11  ;;  %3472 = vmatmul.f32.gmra.mxu1 %v3002_v40  ;;  %v3635_v3 = vadd.f32 %v3634_v46, %v10091_v36  ;;  %v13940_v34 = vld [vmem:[#allocation69_spill] sm:$0xff]  ;;  %v3219_v52 = vpop.f32.mrf.mxu0  ;;  %v13941_v41 = vld [vmem:[#allocation60_spill] sm:$0xff] }
 0x437   : > { %v12062_v60 = vpop.eup %7423  ;;  %v5355_v45 = vadd.f32 %v12020_v8, %v5354_v57  ;;  %vm12065_vm3 = vcmp.eq.f32.partialorder %v5360_v25, 8.507059e+37  ;;  %7427 = vrcp.f32 %v12056_v30  ;;  %6595 = vst [vmem:[%s8546_s27 + $0x300] sm:$0xff] %v3001_v11  ;;  %3681 = vmatmul.f32.gmra.mxu2 %v3001_v11  ;;  %3890 = vmatmul.f32.gmra.mxu3 %v3002_v40  ;;  %v13939_v33 = vsub.f32 1.5, %v13938_v61  ;;  %vm5358_vm12 = vmor %vm5356_vm6, %vm5357_vm4  ;;  %v13944_v61 = vld [vmem:[#allocation82_spill] sm:$0xff] }
 0x438   : > { %vm2643_vm5 = vweird.f32 %v13940_v34  ;;  %v5363_v1 = vor.u32 1.1754944e-38, %v5362_v27  ;;  %v5367_v22 = vmul.f32 %v12062_v60, %v12018_v51  ;;  %vm5371_vm0 = vweird.f32 %v12018_v51  ;;  %6596 = vst [vmem:[%s8546_s27 + $0x308] sm:$0xff] %v3002_v40  ;;  %v13943_v40 = vld [vmem:[#allocation32_spill] sm:$0xff] }
 0x439   : > { %v2632_v6 = vmul.f32 %v13928_v56, %v13939_v33  ;;  %v6883_v54 = vmul.f32 -1.442695, %v3426_v14  ;;  %v5359_v28 = vsel %vm5358_vm12, %v12020_v8, %v5355_v45  ;;  %v5375_v32 = vand.u32 2147483647, %v12018_v51  ;;  %vm2645_vm14 = vmor %vm2643_vm5, %vm2644_vm8 }
 0x43a   : > { %v3844_v43 = vadd.f32 %v3843_v21, %v3635_v3  ;;  %v3220_v35 = vadd.f32 %v3219_v52, %v10057_v55  ;;  %v5364_v49 = vsel %vm12065_vm3, %v5363_v1, %v5359_v28  ;;  %v5368_v4 = vsub.f32 1.0, %v5367_v22  ;;  %v3637_v3 = vpop.f32.mrf.mxu2 }
 0x43b   : > { %v5377_v37 = vand.u32 2147483648, %v12018_v51  ;;  %7429 = vpow2.f32 %v6883_v54  ;;  %6431 = vst [vmem:[%s10193_s30 + $0x1e0] sm:$0xff] %v5364_v49  ;;  %v2636_v15 = vsel %vm2635_vm10, %v13928_v56, %v2632_v6  ;;  %v2875_v19 = vsub.f32 %v13942_v23, %v13941_v41  ;;  %v13953_v23 = vld [vmem:[#allocation33_spill] sm:$0xff] }
 0x43c   : > { %v6884_v8 = vmul.f32 -1.442695, %v3844_v43  ;;  %v3429_v25 = vadd.f32 %v3428_v24, %v3220_v35  ;;  %v7426_v27 = vpop.eup %7425  ;;  %v5369_v44 = vmul.f32 %v12062_v60, %v5368_v4  ;;  %vm5372_vm1 = vweird.f32 %v12062_v60  ;;  %v3846_v4 = vpop.f32.mrf.mxu3 }
 0x43d   : > { %v5390_v11 = vand.u32 2147483647, %v12056_v30  ;;  %v2876_v46 = vsub.f32 %v13943_v40, %v13941_v41  ;;  %v12102_v10 = vpop.eup %7427  ;;  %v12104_v57 = vadd.f32 1.0, %v7426_v27  ;;  %v3003_v14 = vmul.f32 %v2875_v19, %v2636_v15  ;;  %vm12114_vm9 = vmor %vm5371_vm0, %vm5372_vm1  ;;  %v13952_v41 = vld [vmem:[#allocation64_spill] sm:$0xff]  ;;  %v13954_v27 = vld [vmem:[#allocation34_spill] sm:$0xff] }
 0x43e   : > { %7431 = vpow2.f32 %v6884_v8  ;;  %v6885_v56 = vmul.f32 -1.442695, %v3429_v25  ;;  %v5370_v45 = vadd.f32 %v12062_v60, %v5369_v44  ;;  %v5382_v17 = vmul.f32 %v12102_v10, %v12056_v30  ;;  %v3222_v34 = vpop.f32.mrf.mxu0 }
 0x43f   : > { %v3004_v21 = vmul.f32 %v2876_v46, %v2636_v15  ;;  %v13945_v33 = vsub.f32 1.5, %v13944_v61  ;;  %vm12118_vm11 = vcmp.eq.f32.partialorder %v5375_v32, 8.507059e+37  ;;  %v5378_v54 = vor.u32 1.1754944e-38, %v5377_v37  ;;  %3266 = vmatmul.f32.gmra.mxu0 %v3003_v14  ;;  %6597 = vst [vmem:[%s8546_s27 + $0x310] sm:$0xff] %v3003_v14  ;;  %3684 = vmatmul.f32.gmra.mxu2 %v3003_v14  ;;  %v3431_v14 = vpop.f32.mrf.mxu1 }
 0x440   : > { %v5392_v52 = vand.u32 2147483648, %v12056_v30  ;;  %7433 = vrcp.f32 %v12104_v57  ;;  %v5374_v51 = vsel %vm12114_vm9, %v12062_v60, %v5370_v45  ;;  %v5383_v43 = vsub.f32 1.0, %v5382_v17 }
 0x441   : > { %v2642_v6 = vmul.f32 %v13935_v63, %v13945_v33  ;;  %v7430_v28 = vpop.eup %7429  ;;  %7435 = vpow2.f32 %v6885_v56  ;;  %3475 = vmatmul.f32.gmra.mxu1 %v3004_v21  ;;  %6598 = vst [vmem:[%s8546_s27 + $0x318] sm:$0xff] %v3004_v21  ;;  %3893 = vmatmul.f32.gmra.mxu3 %v3004_v21  ;;  %v3638_v32 = vadd.f32 %v3637_v3, %v10091_v36  ;;  %vm5386_vm13 = vweird.f32 %v12056_v30  ;;  %v13956_v30 = vld [vmem:[#allocation70_spill] sm:$0xff] }
 0x442   : > { %v5379_v35 = vsel %vm12118_vm11, %v5378_v54, %v5374_v51  ;;  %vm12137_vm15 = vcmp.eq.f32.partialorder %v5390_v11, 8.507059e+37  ;;  %v12141_v60 = vadd.f32 1.0, %v7430_v28  ;;  %v5384_v37 = vmul.f32 %v12102_v10, %v5383_v43  ;;  %v3640_v0 = vpop.f32.mrf.mxu2 }
 0x443   : > { %6432 = vst [vmem:[%s10193_s30 + $0x1e8] sm:$0xff] %v5379_v35  ;;  %vm5387_vm2 = vweird.f32 %v12102_v10  ;;  %v3847_v24 = vadd.f32 %v3846_v4, %v3638_v32  ;;  %v2646_v8 = vsel %vm2645_vm14, %v13935_v63, %v2642_v6  ;;  %v5393_v15 = vor.u32 1.1754944e-38, %v5392_v52  ;;  %v13955_v63 = vld [vmem:[#allocation77_spill] sm:$0xff] }
 0x444   : > { %v7432_v25 = vpop.eup %7431  ;;  %7437 = vrcp.f32 %v12141_v60  ;;  %v2877_v19 = vsub.f32 %v13953_v23, %v13952_v41  ;;  %v2878_v44 = vsub.f32 %v13954_v27, %v13952_v41  ;;  %v5385_v11 = vadd.f32 %v12102_v10, %v5384_v37  ;;  %vm5388_vm4 = vmor %vm5386_vm13, %vm5387_vm2 }
 0x445   : > { %v12153_v40 = vadd.f32 1.0, %v7432_v25  ;;  %v6886_v46 = vmul.f32 -1.442695, %v3847_v24  ;;  %v3223_v56 = vadd.f32 %v3222_v34, %v10057_v55  ;;  %vm2654_vm7 = vweird.f32 %v13955_v63  ;;  %v3849_v25 = vpop.f32.mrf.mxu3 }
 0x446   : > { %v12156_v3 = vpop.eup %7433  ;;  %v5405_v45 = vand.u32 2147483647, %v12104_v57  ;;  %v5407_v17 = vand.u32 2147483648, %v12104_v57  ;;  %v3005_v21 = vmul.f32 %v2877_v19, %v2646_v8  ;;  %v3006_v61 = vmul.f32 %v2878_v44, %v2646_v8 }
 0x447   : > { %v7436_v33 = vpop.eup %7435  ;;  %v5389_v6 = vsel %vm5388_vm4, %v12102_v10, %v5385_v11  ;;  %v5397_v1 = vmul.f32 %v12156_v3, %v12104_v57  ;;  %v5420_v22 = vand.u32 2147483647, %v12141_v60  ;;  %7439 = vrcp.f32 %v12153_v40 }
 0x448   : > { %vm2653_vm8 = vweird.f32 %v13956_v30  ;;  %v12174_v54 = vmul.f32 0.003921569, %v2072_v16  ;;  %v5394_v52 = vsel %vm12137_vm15, %v5393_v15, %v5389_v6  ;;  %vm5401_vm6 = vweird.f32 %v12104_v57  ;;  %3269 = vmatmul.f32.gmra.mxu0 %v3005_v21  ;;  %6599 = vst [vmem:[%s8546_s27 + $0x320] sm:$0xff] %v3005_v21  ;;  %3687 = vmatmul.f32.gmra.mxu2 %v3005_v21  ;;  %v3225_v15 = vpop.f32.mrf.mxu0  ;;  %v3434_v6 = vpop.f32.mrf.mxu1 }
 0x449   : > { %v5422_v10 = vand.u32 2147483648, %v12141_v60  ;;  %6433 = vst [vmem:[%s10193_s30 + $0x1f0] sm:$0xff] %v5394_v52  ;;  %v5398_v28 = vsub.f32 1.0, %v5397_v1  ;;  %v12182_v51 = vadd.f32 1.0, %v7436_v33  ;;  %7441 = vpow2.f32 %v6886_v46  ;;  %3478 = vmatmul.f32.gmra.mxu1 %v3006_v61  ;;  %3896 = vmatmul.f32.gmra.mxu3 %v3006_v61  ;;  %vm2655_vm11 = vmor %vm2653_vm8, %vm2654_vm7 }
 0x44a   : > { %v3432_v43 = vadd.f32 %v3431_v14, %v3223_v56  ;;  %v7438_v26 = vpop.eup %7437  ;;  %vm12184_vm3 = vcmp.eq.f32.partialorder %v5405_v45, 8.507059e+37  ;;  %v5408_v32 = vor.u32 1.1754944e-38, %v5407_v17  ;;  %vm5416_vm5 = vweird.f32 %v12141_v60  ;;  %6600 = vst [vmem:[%s8546_s27 + $0x328] sm:$0xff] %v3006_v61  ;;  %v13961_v56 = vld [vmem:[#allocation84_spill] sm:$0xff] }
 0x44b   : > { %v3641_v35 = vadd.f32 %v3640_v0, %v10091_v36  ;;  %v5399_v49 = vmul.f32 %v12156_v3, %v5398_v28  ;;  %vm5402_vm12 = vweird.f32 %v12156_v3  ;;  %v5412_v4 = vmul.f32 %v7438_v26, %v12141_v60 }
 0x44c   : > { %vm12194_vm0 = vcmp.eq.f32.partialorder %v5420_v22, 8.507059e+37  ;;  %7443 = vrcp.f32 %v12182_v51  ;;  %v5423_v24 = vor.u32 1.1754944e-38, %v5422_v10  ;;  %vm5431_vm10 = vweird.f32 %v12153_v40  ;;  %vm5403_vm1 = vmor %vm5401_vm6, %vm5402_vm12 }
 0x44d   : > { %v5435_v34 = vand.u32 2147483647, %v12153_v40  ;;  %v6887_v8 = vmul.f32 -1.442695, %v3432_v43  ;;  %v7440_v41 = vpop.eup %7439  ;;  %v5400_v23 = vadd.f32 %v12156_v3, %v5399_v49  ;;  %v5413_v19 = vsub.f32 1.0, %v5412_v4  ;;  %v13965_v49 = vld [vmem:[#allocation66_spill] sm:$0xff] }
 0x44e   : > { %v3850_v27 = vadd.f32 %v3849_v25, %v3641_v35  ;;  %v3226_v44 = vadd.f32 %v3225_v15, %v10057_v55  ;;  %vm5417_vm9 = vweird.f32 %v7438_v26  ;;  %v5427_v11 = vmul.f32 %v7440_v41, %v12153_v40  ;;  %v13966_v4 = vld [vmem:[#allocation35_spill] sm:$0xff] }
 0x44f   : > { %v5437_v46 = vand.u32 2147483648, %v12153_v40  ;;  %v13962_v14 = vsub.f32 1.5, %v13961_v56  ;;  %v7442_v17 = vpop.eup %7441  ;;  %v5404_v21 = vsel %vm5403_vm1, %v12156_v3, %v5400_v23  ;;  %v5414_v61 = vmul.f32 %v7438_v26, %v5413_v19  ;;  %vm5418_vm15 = vmor %vm5416_vm5, %vm5417_vm9  ;;  %v3643_v19 = vpop.f32.mrf.mxu2 }
 0x450   : > { %7445 = vpow2.f32 %v6887_v8  ;;  %v6888_v33 = vmul.f32 -1.442695, %v3850_v27  ;;  %v5409_v57 = vsel %vm12184_vm3, %v5408_v32, %v5404_v21  ;;  %v5428_v1 = vsub.f32 1.0, %v5427_v11  ;;  %v13967_v8 = vld [vmem:[#allocation78_spill] sm:$0xff]  ;;  %v3852_v21 = vpop.f32.mrf.mxu3 }
 0x451   : > { %v2652_v45 = vmul.f32 %v13955_v63, %v13962_v14  ;;  %v12215_v22 = vadd.f32 1.0, %v7442_v17  ;;  %v3435_v52 = vadd.f32 %v3434_v6, %v3226_v44  ;;  %6434 = vst [vmem:[%s10193_s30 + $0x1f8] sm:$0xff] %v5409_v57  ;;  %v5415_v3 = vadd.f32 %v7438_v26, %v5414_v61  ;;  %v13968_v44 = vld [vmem:[#allocation36_spill] sm:$0xff]  ;;  %v3228_v6 = vpop.f32.mrf.mxu0 }
 0x452   : > { %v12217_v10 = vpop.eup %7443  ;;  %vm5432_vm14 = vweird.f32 %v7440_v41  ;;  %vm12224_vm13 = vcmp.eq.f32.partialorder %v5435_v34, 8.507059e+37  ;;  %7447 = vpow2.f32 %v6888_v33  ;;  %v5429_v43 = vmul.f32 %v7440_v41, %v5428_v1  ;;  %v13981_v33 = vld [vmem:[#allocation37_spill] sm:$0xff] }
 0x453   : > { %v5442_v0 = vmul.f32 %v12217_v10, %v12182_v51  ;;  %7449 = vrcp.f32 %v12215_v22  ;;  %v2656_v30 = vsel %vm2655_vm11, %v13955_v63, %v2652_v45  ;;  %v5419_v16 = vsel %vm5418_vm15, %v7438_v26, %v5415_v3  ;;  %vm5433_vm7 = vmor %vm5431_vm10, %vm5432_vm14 }
 0x454   : > { %v5438_v32 = vor.u32 1.1754944e-38, %v5437_v46  ;;  %v5450_v35 = vand.u32 2147483647, %v12182_v51  ;;  %v2879_v34 = vsub.f32 %v13966_v4, %v13965_v49  ;;  %vm2664_vm2 = vweird.f32 %v13967_v8  ;;  %v3437_v4 = vpop.f32.mrf.mxu1 }
 0x455   : > { %v5424_v60 = vsel %vm12194_vm0, %v5423_v24, %v5419_v16  ;;  %v5430_v25 = vadd.f32 %v7440_v41, %v5429_v43  ;;  %v5443_v15 = vsub.f32 1.0, %v5442_v0  ;;  %v6889_v23 = vmul.f32 -1.442695, %v3435_v52  ;;  %v13969_v24 = vld [vmem:[#allocation74_spill] sm:$0xff] }
 0x456   : > { %v7446_v27 = vpop.eup %7445  ;;  %6435 = vst [vmem:[%s10193_s30 + $0x200] sm:$0xff] %v5424_v60  ;;  %vm5447_vm4 = vweird.f32 %v12217_v10  ;;  %v5452_v63 = vand.u32 2147483648, %v12182_v51  ;;  %v3007_v26 = vmul.f32 %v2879_v34, %v2656_v30  ;;  %v2880_v37 = vsub.f32 %v13968_v44, %v13965_v49  ;;  %v13972_v34 = vld [vmem:[#allocation80_spill] sm:$0xff]  ;;  %v13977_v44 = vld [vmem:[#allocation75_spill] sm:$0xff] }
 0x457   : > { %vm2663_vm8 = vweird.f32 %v13969_v24  ;;  %v5434_v11 = vsel %vm5433_vm7, %v7440_v41, %v5430_v25  ;;  %v5444_v46 = vmul.f32 %v12217_v10, %v5443_v15  ;;  %v12251_v56 = vadd.f32 1.0, %v7446_v27  ;;  %v13973_v15 = vld [vmem:[#allocation91_spill] sm:$0xff] }
 0x458   : > { %7451 = vpow2.f32 %v6889_v23  ;;  %v7448_v14 = vpop.eup %7447  ;;  %v5439_v40 = vsel %vm12224_vm13, %v5438_v32, %v5434_v11  ;;  %3272 = vmatmul.f32.gmra.mxu0 %v3007_v26  ;;  %6601 = vst [vmem:[%s8546_s27 + $0x330] sm:$0xff] %v3007_v26  ;;  %v3008_v45 = vmul.f32 %v2880_v37, %v2656_v30  ;;  %3690 = vmatmul.f32.gmra.mxu2 %v3007_v26  ;;  %vm5446_vm6 = vweird.f32 %v12182_v51  ;;  %vm2665_vm9 = vmor %vm2663_vm8, %vm2664_vm2 }
 0x459   : > { %v3644_v17 = vadd.f32 %v3643_v19, %v10091_v36  ;;  %v7450_v61 = vpop.eup %7449  ;;  %6436 = vst [vmem:[%s10193_s30 + $0x208] sm:$0xff] %v5439_v40  ;;  %v5445_v41 = vadd.f32 %v12217_v10, %v5444_v46  ;;  %vm12260_vm3 = vcmp.eq.f32.partialorder %v5450_v35, 8.507059e+37  ;;  %7453 = vrcp.f32 %v12251_v56  ;;  %vm5448_vm5 = vmor %vm5446_vm6, %vm5447_vm4 }
 0x45a   : > { %v5453_v57 = vor.u32 1.1754944e-38, %v5452_v63  ;;  %v5457_v1 = vmul.f32 %v7450_v61, %v12215_v22  ;;  %v5465_v52 = vand.u32 2147483647, %v12215_v22  ;;  %v12269_v3 = vadd.f32 1.0, %v7448_v14  ;;  %3481 = vmatmul.f32.gmra.mxu1 %v3008_v45  ;;  %6602 = vst [vmem:[%s8546_s27 + $0x338] sm:$0xff] %v3008_v45  ;;  %3899 = vmatmul.f32.gmra.mxu3 %v3008_v45 }
 0x45b   : > { %v5449_v51 = vsel %vm5448_vm5, %v12217_v10, %v5445_v41  ;;  %v5467_v28 = vand.u32 2147483648, %v12215_v22  ;;  %v3853_v43 = vadd.f32 %v3852_v21, %v3644_v17  ;;  %v3229_v0 = vadd.f32 %v3228_v6, %v10057_v55  ;;  %v13980_v41 = vld [vmem:[#allocation67_spill] sm:$0xff] }
 0x45c   : > { %v12277_v30 = vmul.f32 %v11644_v50, %v11898_v29  ;;  %v5454_v16 = vsel %vm12260_vm3, %v5453_v57, %v5449_v51  ;;  %v5458_v32 = vsub.f32 1.0, %v5457_v1  ;;  %7455 = vrcp.f32 %v12269_v3  ;;  %v3646_v57 = vpop.f32.mrf.mxu2  ;;  %v3855_v1 = vpop.f32.mrf.mxu3 }
 0x45d   : > { %7457 = vrsqrt.f32 %v12174_v54  ;;  %6437 = vst [vmem:[%s10193_s30 + $0x210] sm:$0xff] %v5454_v16  ;;  %vm5462_vm12 = vweird.f32 %v7450_v61  ;;  %v5480_v10 = vand.u32 2147483647, %v12251_v56  ;;  %v6890_v49 = vmul.f32 -1.442695, %v3853_v43 }
 0x45e   : > { %v7452_v35 = vpop.eup %7451  ;;  %vm2674_vm0 = vweird.f32 %v13972_v34  ;;  %v5459_v60 = vmul.f32 %v7450_v61, %v5458_v32  ;;  %v3438_v25 = vadd.f32 %v3437_v4, %v3229_v0  ;;  %v13974_v23 = vsub.f32 1.5, %v13973_v15 }
 0x45f   : > { %v12286_v29 = vadd.f32 1.0, %v7452_v35  ;;  %v12291_v27 = vpop.eup %7453  ;;  %vm5461_vm10 = vweird.f32 %v12215_v22  ;;  %vm12294_vm1 = vcmp.eq.f32.partialorder %v5465_v52, 8.507059e+37  ;;  %v5468_v26 = vor.u32 1.1754944e-38, %v5467_v28 }
 0x460   : > { %v2662_v19 = vmul.f32 %v13967_v8, %v13974_v23  ;;  %7459 = vpow2.f32 %v6890_v49  ;;  %vm2673_vm11 = vweird.f32 %v13977_v44  ;;  %v5460_v37 = vadd.f32 %v7450_v61, %v5459_v60  ;;  %vm5463_vm13 = vmor %vm5461_vm10, %vm5462_vm12  ;;  %v13983_v23 = vld [vmem:[#allocation92_spill] sm:$0xff] }
 0x461   : > { %v5472_v11 = vmul.f32 %v12291_v27, %v12251_v56  ;;  %vm5476_vm14 = vweird.f32 %v12251_v56  ;;  %7461 = vrcp.f32 %v12286_v29  ;;  %vm12308_vm15 = vcmp.eq.f32.partialorder %v5480_v10, 8.507059e+37  ;;  %vm2675_vm5 = vmor %vm2673_vm11, %vm2674_vm0 }
 0x462   : > { %v5482_v24 = vand.u32 2147483648, %v12251_v56  ;;  %v5495_v46 = vand.u32 2147483647, %v12269_v3  ;;  %v6891_v14 = vmul.f32 -1.442695, %v3438_v25  ;;  %v12314_v40 = vpop.eup %7455  ;;  %v5464_v45 = vsel %vm5463_vm13, %v7450_v61, %v5460_v37  ;;  %v13982_v61 = vld [vmem:[#allocation38_spill] sm:$0xff] }
 0x463   : > { %v5473_v17 = vsub.f32 1.0, %v5472_v11  ;;  %v2666_v21 = vsel %vm2665_vm9, %v13967_v8, %v2662_v19  ;;  %v2881_v6 = vsub.f32 %v13981_v33, %v13980_v41  ;;  %v12319_v52 = vpop.eup %7457  ;;  %v5469_v51 = vsel %vm12294_vm1, %v5468_v26, %v5464_v45  ;;  %v13985_v26 = vld [vmem:[#allocation89_spill] sm:$0xff]  ;;  %v13994_v37 = vld [vmem:[#allocation40_spill] sm:$0xff] }
 0x464   : > { %v5487_v28 = vmul.f32 %v12314_v40, %v12269_v3  ;;  %v5497_v43 = vand.u32 2147483648, %v12269_v3  ;;  %v2882_v0 = vsub.f32 %v13982_v61, %v13980_v41  ;;  %6438 = vst [vmem:[%s10193_s30 + $0x218] sm:$0xff] %v5469_v51  ;;  %vm5477_vm2 = vweird.f32 %v12291_v27  ;;  %v13992_v61 = vld [vmem:[#allocation39_spill] sm:$0xff] }
 0x465   : > { %v5474_v8 = vmul.f32 %v12291_v27, %v5473_v17  ;;  %7463 = vpow2.f32 %v6891_v14  ;;  %v3009_v16 = vmul.f32 %v2881_v6, %v2666_v21  ;;  %v5483_v35 = vor.u32 1.1754944e-38, %v5482_v24  ;;  %vm12347_vm8 = vmor %vm5476_vm14, %vm5477_vm2 }
 0x466   : > { %v7460_v32 = vpop.eup %7459  ;;  %v5488_v10 = vsub.f32 1.0, %v5487_v28  ;;  %v3010_v49 = vmul.f32 %v2882_v0, %v2666_v21  ;;  %v3647_v4 = vadd.f32 %v3646_v57, %v10091_v36  ;;  %vm5491_vm7 = vweird.f32 %v12269_v3  ;;  %v13990_v21 = vld [vmem:[#allocation85_spill] sm:$0xff]  ;;  %v3440_v57 = vpop.f32.mrf.mxu1 }
 0x467   : > { %v12332_v60 = vpop.eup %7461  ;;  %v5475_v25 = vadd.f32 %v12291_v27, %v5474_v8  ;;  %v12336_v15 = vadd.f32 1.0, %v7460_v32  ;;  %3275 = vmatmul.f32.gmra.mxu0 %v3009_v16  ;;  %6603 = vst [vmem:[%s8546_s27 + $0x340] sm:$0xff] %v3009_v16  ;;  %3693 = vmatmul.f32.gmra.mxu2 %v3009_v16  ;;  %v13984_v19 = vsub.f32 1.5, %v13983_v23  ;;  %vm2684_vm4 = vweird.f32 %v13985_v26 }
 0x468   : > { %v5489_v11 = vmul.f32 %v12314_v40, %v5488_v10  ;;  %vm5492_vm6 = vweird.f32 %v12314_v40  ;;  %vm12353_vm3 = vcmp.eq.f32.partialorder %v5495_v46, 8.507059e+37  ;;  %v5502_v14 = vmul.f32 %v12332_v60, %v12286_v29  ;;  %3484 = vmatmul.f32.gmra.mxu1 %v3010_v49  ;;  %6604 = vst [vmem:[%s8546_s27 + $0x348] sm:$0xff] %v3010_v49  ;;  %3902 = vmatmul.f32.gmra.mxu3 %v3010_v49  ;;  %v3231_v46 = vpop.f32.mrf.mxu0  ;;  %v3649_v49 = vpop.f32.mrf.mxu2 }
 0x469   : > { %v2672_v63 = vmul.f32 %v13972_v34, %v13984_v19  ;;  %v5479_v56 = vsel %vm12347_vm8, %v12291_v27, %v5475_v25  ;;  %v5498_v45 = vor.u32 1.1754944e-38, %v5497_v43  ;;  %v5510_v17 = vand.u32 2147483647, %v12286_v29  ;;  %vm5493_vm10 = vmor %vm5491_vm7, %vm5492_vm6  ;;  %v13991_v43 = vld [vmem:[#allocation68_spill] sm:$0xff] }
 0x46a   : > { %7465 = vrcp.f32 %v12336_v15  ;;  %vm2683_vm12 = vweird.f32 %v13990_v21  ;;  %v5484_v41 = vsel %vm12308_vm15, %v5483_v35, %v5479_v56  ;;  %v5490_v33 = vadd.f32 %v12314_v40, %v5489_v11 }
 0x46b   : > { %v5503_v6 = vsub.f32 1.0, %v5502_v14  ;;  %v5512_v27 = vand.u32 2147483648, %v12286_v29  ;;  %v7464_v51 = vpop.eup %7463  ;;  %6439 = vst [vmem:[%s10193_s30 + $0x220] sm:$0xff] %v5484_v41  ;;  %v3856_v44 = vadd.f32 %v3855_v1, %v3647_v4  ;;  %v3232_v28 = vadd.f32 %v3231_v46, %v10057_v55  ;;  %v13993_v4 = vld [vmem:[#allocation93_spill] sm:$0xff]  ;;  %vm2685_vm2 = vmor %vm2683_vm12, %vm2684_vm4 }
 0x46c   : > { %v2676_v22 = vsel %vm2675_vm5, %v13972_v34, %v2672_v63  ;;  %v2883_v0 = vsub.f32 %v13992_v61, %v13991_v43  ;;  %v5494_v8 = vsel %vm5493_vm10, %v12314_v40, %v5490_v33  ;;  %vm5507_vm0 = vweird.f32 %v12332_v60  ;;  %v3858_v34 = vpop.f32.mrf.mxu3 }
 0x46d   : > { %v5504_v16 = vmul.f32 %v12332_v60, %v5503_v6  ;;  %v12386_v32 = vadd.f32 1.0, %v7464_v51  ;;  %v5499_v3 = vsel %vm12353_vm3, %v5498_v45, %v5494_v8  ;;  %v6892_v35 = vmul.f32 -1.442695, %v3856_v44  ;;  %v14000_v44 = vld [vmem:[#allocation79_spill] sm:$0xff] }
 0x46e   : > { %v3441_v1 = vadd.f32 %v3440_v57, %v3232_v28  ;;  %v3011_v10 = vmul.f32 %v2883_v0, %v2676_v22  ;;  %vm2694_vm1 = vweird.f32 %v13993_v4  ;;  %6440 = vst [vmem:[%s10193_s30 + $0x228] sm:$0xff] %v5499_v3  ;;  %vm5506_vm9 = vweird.f32 %v12286_v29  ;;  %v13995_v29 = vld [vmem:[#allocation87_spill] sm:$0xff]  ;;  %v14001_v28 = vld [vmem:[#allocation41_spill] sm:$0xff]  ;;  %v3443_v8 = vpop.f32.mrf.mxu1  ;;  %v14002_v3 = vld [vmem:[#allocation42_spill] sm:$0xff] }
 0x46f   : > { %v5505_v40 = vadd.f32 %v12332_v60, %v5504_v16  ;;  %v5513_v25 = vor.u32 1.1754944e-38, %v5512_v27  ;;  %7467 = vrcp.f32 %v12386_v32  ;;  %vm5508_vm11 = vmor %vm5506_vm9, %vm5507_vm0  ;;  %v5525_v19 = vand.u32 2147483647, %v12336_v15  ;;  %v13996_v27 = vld [vmem:[#allocation107_spill] sm:$0xff] }
 0x470   : > { %v12395_v23 = vpop.eup %7465  ;;  %7469 = vpow2.f32 %v6892_v35  ;;  %v6893_v63 = vmul.f32 -1.442695, %v3441_v1  ;;  %3278 = vmatmul.f32.gmra.mxu0 %v3011_v10  ;;  %6605 = vst [vmem:[%s8546_s27 + $0x350] sm:$0xff] %v3011_v10  ;;  %v2884_v11 = vsub.f32 %v13994_v37, %v13991_v43  ;;  %3696 = vmatmul.f32.gmra.mxu2 %v3011_v10  ;;  %vm2693_vm14 = vweird.f32 %v13995_v29  ;;  %v3234_v0 = vpop.f32.mrf.mxu0  ;;  %v14009_v29 = vld [vmem:[#allocation83_spill] sm:$0xff] }
 0x471   : > { %v12406_v24 = vmul.f32 %v12319_v52, %v12174_v54  ;;  %v5509_v14 = vsel %vm5508_vm11, %v12332_v60, %v5505_v40  ;;  %vm5511_vm13 = vcmp.eq.f32.partialorder %v5510_v17, 8.507059e+37  ;;  %v5517_v56 = vmul.f32 %v12395_v23, %v12336_v15  ;;  %vm2695_vm5 = vmor %vm2693_vm14, %vm2694_vm1  ;;  %v14010_v17 = vld [vmem:[#allocation43_spill] sm:$0xff] }
 0x472   : > { %v5514_v45 = vsel %vm5511_vm13, %v5513_v25, %v5509_v14  ;;  %vm5521_vm15 = vweird.f32 %v12336_v15  ;;  %7471 = vpow2.f32 %v6893_v63  ;;  %v3012_v46 = vmul.f32 %v2884_v11, %v2676_v22  ;;  %v14003_v25 = vld [vmem:[#allocation108_spill] sm:$0xff] }
 0x473   : > { %6441 = vst [vmem:[%s10193_s30 + $0x230] sm:$0xff] %v5514_v45  ;;  %v5518_v41 = vsub.f32 1.0, %v5517_v56  ;;  %v5527_v33 = vand.u32 2147483648, %v12336_v15  ;;  %v3650_v6 = vadd.f32 %v3649_v49, %v10091_v36  ;;  %v13997_v57 = vsub.f32 1.5, %v13996_v27 }
 0x474   : > { %vm5522_vm7 = vweird.f32 %v12395_v23  ;;  %vm12423_vm8 = vcmp.eq.f32.partialorder %v5525_v19, 8.507059e+37  ;;  %v5540_v51 = vand.u32 2147483647, %v12386_v32  ;;  %3487 = vmatmul.f32.gmra.mxu1 %v3012_v46  ;;  %6606 = vst [vmem:[%s8546_s27 + $0x358] sm:$0xff] %v3012_v46  ;;  %3905 = vmatmul.f32.gmra.mxu3 %v3012_v46  ;;  %v2885_v22 = vsub.f32 %v14001_v28, %v14000_v44  ;;  %v3861_v27 = vpop.f32.mrf.mxu3 }
 0x475   : > { %v2682_v60 = vmul.f32 %v13985_v26, %v13997_v57  ;;  %v12431_v43 = vpop.eup %7467  ;;  %v5519_v61 = vmul.f32 %v12395_v23, %v5518_v41  ;;  %v3859_v21 = vadd.f32 %v3858_v34, %v3650_v6  ;;  %v2886_v35 = vsub.f32 %v14002_v3, %v14000_v44  ;;  %vm12450_vm4 = vmor %vm5521_vm15, %vm5522_vm7  ;;  %v3652_v6 = vpop.f32.mrf.mxu2 }
 0x476   : > { %v7470_v1 = vpop.eup %7469  ;;  %v5532_v10 = vmul.f32 %v12431_v43, %v12386_v32  ;;  %v3235_v49 = vadd.f32 %v3234_v0, %v10057_v55  ;;  %v14004_v19 = vsub.f32 1.5, %v14003_v25  ;;  %v5528_v45 = vor.u32 1.1754944e-38, %v5527_v33  ;;  %v14011_v0 = vld [vmem:[#allocation44_spill] sm:$0xff] }
 0x477   : > { %v2686_v16 = vsel %vm2685_vm2, %v13985_v26, %v2682_v60  ;;  %v5520_v34 = vadd.f32 %v12395_v23, %v5519_v61  ;;  %v12444_v37 = vadd.f32 1.0, %v7470_v1  ;;  %v6894_v26 = vmul.f32 -1.442695, %v3859_v21  ;;  %v14012_v1 = vld [vmem:[#allocation99_spill] sm:$0xff] }
 0x478   : > { %v3013_v40 = vmul.f32 %v2885_v22, %v2686_v16  ;;  %v2692_v63 = vmul.f32 %v13993_v4, %v14004_v19  ;;  %v3014_v11 = vmul.f32 %v2886_v35, %v2686_v16  ;;  %v7472_v14 = vpop.eup %7471  ;;  %v5533_v46 = vsub.f32 1.0, %v5532_v10  ;;  %v3237_v35 = vpop.f32.mrf.mxu0 }
 0x479   : > { %vm5536_vm6 = vweird.f32 %v12386_v32  ;;  %v3444_v41 = vadd.f32 %v3443_v8, %v3235_v49  ;;  %v5524_v57 = vsel %vm12450_vm4, %v12395_v23, %v5520_v34  ;;  %vm12459_vm3 = vcmp.eq.f32.partialorder %v5540_v51, 8.507059e+37 }
 0x47a   : > { %3281 = vmatmul.f32.gmra.mxu0 %v3013_v40  ;;  %6607 = vst [vmem:[%s8546_s27 + $0x360] sm:$0xff] %v3013_v40  ;;  %3699 = vmatmul.f32.gmra.mxu2 %v3013_v40  ;;  %v5542_v33 = vand.u32 2147483648, %v12386_v32  ;;  %7473 = vrcp.f32 %v12444_v37  ;;  %v5529_v60 = vsel %vm12423_vm8, %v5528_v45, %v5524_v57  ;;  %v5534_v44 = vmul.f32 %v12431_v43, %v5533_v46  ;;  %v3446_v40 = vpop.f32.mrf.mxu1 }
 0x47b   : > { %6608 = vst [vmem:[%s8546_s27 + $0x368] sm:$0xff] %v3014_v11  ;;  %vm5537_vm12 = vweird.f32 %v12431_v43  ;;  %v12474_v23 = vadd.f32 1.0, %v7472_v14  ;;  %7475 = vpow2.f32 %v6894_v26  ;;  %v6895_v51 = vmul.f32 -1.442695, %v3444_v41  ;;  %v14013_v14 = vld [vmem:[#allocation94_spill] sm:$0xff] }
 0x47c   : > { %6442 = vst [vmem:[%s10193_s30 + $0x238] sm:$0xff] %v5529_v60  ;;  %v3653_v28 = vadd.f32 %v3652_v6, %v10091_v36  ;;  %v2696_v22 = vsel %vm2695_vm5, %v13993_v4, %v2692_v63  ;;  %v5535_v61 = vadd.f32 %v12431_v43, %v5534_v44  ;;  %3490 = vmatmul.f32.gmra.mxu1 %v3014_v11  ;;  %vm5538_vm10 = vmor %vm5536_vm6, %vm5537_vm12  ;;  %v5543_v16 = vor.u32 1.1754944e-38, %v5542_v33  ;;  %v3864_v44 = vpop.f32.mrf.mxu3 }
 0x47d   : > { %7477 = vrcp.f32 %v12474_v23  ;;  %3908 = vmatmul.f32.gmra.mxu3 %v3014_v11  ;;  %v2887_v21 = vsub.f32 %v14010_v17, %v14009_v29  ;;  %v2888_v8 = vsub.f32 %v14011_v0, %v14009_v29  ;;  %v5555_v3 = vand.u32 2147483647, %v12444_v37  ;;  %v3655_v46 = vpop.f32.mrf.mxu2 }
 0x47e   : > { %7479 = vpow2.f32 %v6895_v51  ;;  %v3862_v4 = vadd.f32 %v3861_v27, %v3653_v28  ;;  %vm2704_vm0 = vweird.f32 %v14012_v1  ;;  %v5539_v10 = vsel %vm5538_vm10, %v12431_v43, %v5535_v61 }
 0x47f   : > { %v3238_v49 = vadd.f32 %v3237_v35, %v10057_v55  ;;  %v3015_v25 = vmul.f32 %v2887_v21, %v2696_v22  ;;  %v3016_v19 = vmul.f32 %v2888_v8, %v2696_v22  ;;  %v12493_v32 = vmul.f32 %v12319_v52, %v12406_v24 }
 0x480   : > { %v7474_v63 = vpop.eup %7473  ;;  %v5544_v34 = vsel %vm12459_vm3, %v5543_v16, %v5539_v10  ;;  %v5557_v26 = vand.u32 2147483648, %v12444_v37  ;;  %v6896_v11 = vmul.f32 -1.442695, %v3862_v4  ;;  %vm2703_vm1 = vweird.f32 %v14013_v14  ;;  %v3240_v16 = vpop.f32.mrf.mxu0 }
 0x481   : > { %v12500_v43 = vmul.f32 0.5, %v12277_v30  ;;  %6443 = vst [vmem:[%s10193_s30 + $0x240] sm:$0xff] %v5544_v34  ;;  %v5547_v56 = vmul.f32 %v7474_v63, %v12444_v37  ;;  %v5570_v45 = vand.u32 2147483647, %v12474_v23  ;;  %v3447_v24 = vadd.f32 %v3446_v40, %v3238_v49  ;;  %v7476_v41 = vpop.eup %7475  ;;  %vm2705_vm8 = vmor %vm2703_vm1, %vm2704_vm0 }
 0x482   : > { %3284 = vmatmul.f32.gmra.mxu0 %v3015_v25  ;;  %3702 = vmatmul.f32.gmra.mxu2 %v3015_v25  ;;  %vm5551_vm9 = vweird.f32 %v12444_v37  ;;  %v5572_v6 = vand.u32 2147483648, %v12474_v23  ;;  %7481 = vpow2.f32 %v6896_v11  ;;  %6609 = vst [vmem:[%s8546_s27 + $0x370] sm:$0xff] %v3015_v25  ;;  %v3656_v30 = vadd.f32 %v3655_v46, %v10091_v36  ;;  %v3449_v48 = vpop.f32.mrf.mxu1  ;;  %v14018_v11 = vld [vmem:[#allocation86_spill] sm:$0xff] }
 0x483   : > { %v7478_v27 = vpop.eup %7477  ;;  %v5548_v57 = vsub.f32 1.0, %v5547_v56  ;;  %vm12509_vm11 = vcmp.eq.f32.partialorder %v5555_v3, 8.507059e+37  ;;  %v12513_v33 = vadd.f32 1.0, %v7476_v41  ;;  %v6897_v60 = vmul.f32 -1.442695, %v3447_v24  ;;  %6610 = vst [vmem:[%s8546_s27 + $0x378] sm:$0xff] %v3016_v19 }
 0x484   : > { %v7480_v51 = vpop.eup %7479  ;;  %v5558_v28 = vor.u32 1.1754944e-38, %v5557_v26  ;;  %v5562_v22 = vmul.f32 %v7478_v27, %v12474_v23  ;;  %vm5566_vm14 = vweird.f32 %v12474_v23  ;;  %v3865_v61 = vadd.f32 %v3864_v44, %v3656_v30  ;;  %3493 = vmatmul.f32.gmra.mxu1 %v3016_v19  ;;  %v14020_v46 = vld [vmem:[#allocation46_spill] sm:$0xff] }
 0x485   : > { %v5549_v29 = vmul.f32 %v7474_v63, %v5548_v57  ;;  %vm5552_vm13 = vweird.f32 %v7474_v63  ;;  %vm12518_vm15 = vcmp.eq.f32.partialorder %v5570_v45, 8.507059e+37  ;;  %7483 = vrcp.f32 %v12513_v33  ;;  %3911 = vmatmul.f32.gmra.mxu3 %v3016_v19 }
 0x486   : > { %v5563_v21 = vsub.f32 1.0, %v5562_v22  ;;  %v5573_v0 = vor.u32 1.1754944e-38, %v5572_v6  ;;  %v12523_v8 = vadd.f32 1.0, %v7480_v51  ;;  %7485 = vpow2.f32 %v6897_v60  ;;  %vm5553_vm2 = vmor %vm5551_vm9, %vm5552_vm13 }
 0x487   : > { %v5550_v3 = vadd.f32 %v7474_v63, %v5549_v29  ;;  %v6898_v4 = vmul.f32 -1.442695, %v3865_v61  ;;  %v3241_v35 = vadd.f32 %v3240_v16, %v10057_v55  ;;  %v2702_v10 = vmul.f32 %v14012_v1, %v2701_v5  ;;  %v14019_v5 = vld [vmem:[#allocation45_spill] sm:$0xff] }
 0x488   : > { %v7482_v49 = vpop.eup %7481  ;;  %v5564_v40 = vmul.f32 %v7478_v27, %v5563_v21  ;;  %vm5567_vm7 = vweird.f32 %v7478_v27  ;;  %v5585_v25 = vand.u32 2147483647, %v12513_v33  ;;  %7487 = vrcp.f32 %v12523_v8  ;;  %v3658_v21 = vpop.f32.mrf.mxu2 }
 0x489   : > { %v5554_v19 = vsel %vm5553_vm2, %v7474_v63, %v5550_v3  ;;  %v5587_v34 = vand.u32 2147483648, %v12513_v33  ;;  %v12535_v26 = vadd.f32 1.0, %v7482_v49  ;;  %v2889_v56 = vsub.f32 %v14019_v5, %v14018_v11  ;;  %vm5568_vm4 = vmor %vm5566_vm14, %vm5567_vm7  ;;  %v14025_v49 = vld [vmem:[#allocation100_spill] sm:$0xff]  ;;  %v14026_v5 = vld [vmem:[#allocation95_spill] sm:$0xff] }
 0x48a   : > { %v5559_v37 = vsel %vm12509_vm11, %v5558_v28, %v5554_v19  ;;  %v5565_v45 = vadd.f32 %v7478_v27, %v5564_v40  ;;  %7489 = vpow2.f32 %v6898_v4  ;;  %v3450_v24 = vadd.f32 %v3449_v48, %v3241_v35  ;;  %v3452_v15 = vpop.f32.mrf.mxu1 }
 0x48b   : > { %v12545_v63 = vpop.eup %7483  ;;  %6444 = vst [vmem:[%s10193_s30 + $0x248] sm:$0xff] %v5559_v37  ;;  %vm5581_vm6 = vweird.f32 %v12513_v33  ;;  %7491 = vrcp.f32 %v12535_v26  ;;  %v2706_v14 = vsel %vm2705_vm8, %v14012_v1, %v2702_v10  ;;  %v2890_v41 = vsub.f32 %v14020_v46, %v14018_v11 }
 0x48c   : > { %v7486_v6 = vpop.eup %7485  ;;  %v5569_v30 = vsel %vm5568_vm4, %v7478_v27, %v5565_v45  ;;  %v5577_v57 = vmul.f32 %v12545_v63, %v12513_v33  ;;  %vm12558_vm3 = vcmp.eq.f32.partialorder %v5585_v25, 8.507059e+37  ;;  %v5600_v23 = vand.u32 2147483647, %v12523_v8  ;;  %v3867_v45 = vpop.f32.mrf.mxu3 }
 0x48d   : > { %v5574_v60 = vsel %vm12518_vm15, %v5573_v0, %v5569_v30  ;;  %v5588_v44 = vor.u32 1.1754944e-38, %v5587_v34  ;;  %v12565_v51 = vadd.f32 1.0, %v7486_v6  ;;  %v6899_v1 = vmul.f32 -1.442695, %v3450_v24  ;;  %v3243_v24 = vpop.f32.mrf.mxu0 }
 0x48e   : > { %v12567_v28 = vpop.eup %7487  ;;  %6445 = vst [vmem:[%s10193_s30 + $0x250] sm:$0xff] %v5574_v60  ;;  %v5578_v27 = vsub.f32 1.0, %v5577_v57  ;;  %v5602_v22 = vand.u32 2147483648, %v12523_v8  ;;  %v3017_v61 = vmul.f32 %v2889_v56, %v2706_v14  ;;  %v3018_v29 = vmul.f32 %v2890_v41, %v2706_v14 }
 0x48f   : > { %v5592_v16 = vmul.f32 %v12567_v28, %v12523_v8  ;;  %vm5596_vm5 = vweird.f32 %v12523_v8  ;;  %v5615_v17 = vand.u32 2147483647, %v12535_v26  ;;  %7493 = vrcp.f32 %v12565_v51 }
 0x490   : > { %v7490_v0 = vpop.eup %7489  ;;  %v5579_v3 = vmul.f32 %v12545_v63, %v5578_v27  ;;  %vm5582_vm12 = vweird.f32 %v12545_v63  ;;  %vm12578_vm10 = vcmp.eq.f32.partialorder %v5600_v23, 8.507059e+37  ;;  %v5617_v35 = vand.u32 2147483648, %v12535_v26  ;;  %3287 = vmatmul.f32.gmra.mxu0 %v3017_v61  ;;  %6611 = vst [vmem:[%s8546_s27 + $0x380] sm:$0xff] %v3017_v61  ;;  %3496 = vmatmul.f32.gmra.mxu1 %v3018_v29 }
 0x491   : > { %v7492_v10 = vpop.eup %7491  ;;  %vm2714_vm0 = vweird.f32 %v14025_v49  ;;  %v5593_v40 = vsub.f32 1.0, %v5592_v16  ;;  %v12585_v25 = vadd.f32 1.0, %v7490_v0  ;;  %7495 = vpow2.f32 %v6899_v1  ;;  %6612 = vst [vmem:[%s8546_s27 + $0x388] sm:$0xff] %v3018_v29  ;;  %3705 = vmatmul.f32.gmra.mxu2 %v3017_v61  ;;  %3914 = vmatmul.f32.gmra.mxu3 %v3018_v29  ;;  %vm5583_vm11 = vmor %vm5581_vm6, %vm5582_vm12 }
 0x492   : > { %v3659_v19 = vadd.f32 %v3658_v21, %v10091_v36  ;;  %v5580_v34 = vadd.f32 %v12545_v63, %v5579_v3  ;;  %v5603_v48 = vor.u32 1.1754944e-38, %v5602_v22  ;;  %v5607_v11 = vmul.f32 %v7492_v10, %v12535_v26  ;;  %v14029_v3 = vld [vmem:[#allocation101_spill] sm:$0xff] }
 0x493   : > { %vm5611_vm1 = vweird.f32 %v12535_v26  ;;  %vm2713_vm9 = vweird.f32 %v14026_v5  ;;  %v5594_v56 = vmul.f32 %v12567_v28, %v5593_v40  ;;  %vm5597_vm14 = vweird.f32 %v12567_v28  ;;  %v14032_v26 = vld [vmem:[#allocation97_spill] sm:$0xff] }
 0x494   : > { %vm12599_vm13 = vcmp.eq.f32.partialorder %v5615_v17, 8.507059e+37  ;;  %7497 = vrcp.f32 %v12585_v25  ;;  %v5584_v14 = vsel %vm5583_vm11, %v12545_v63, %v5580_v34  ;;  %v5608_v46 = vsub.f32 1.0, %v5607_v11  ;;  %vm5598_vm15 = vmor %vm5596_vm5, %vm5597_vm14 }
 0x495   : > { %v5618_v41 = vor.u32 1.1754944e-38, %v5617_v35  ;;  %v5630_v33 = vand.u32 2147483647, %v12565_v51  ;;  %v7494_v6 = vpop.eup %7493  ;;  %v5589_v30 = vsel %vm12558_vm3, %v5588_v44, %v5584_v14  ;;  %v5595_v57 = vadd.f32 %v12567_v28, %v5594_v56  ;;  %vm2715_vm12 = vmor %vm2713_vm9, %vm2714_vm0 }
 0x496   : > { %v3868_v23 = vadd.f32 %v3867_v45, %v3659_v19  ;;  %v3244_v60 = vadd.f32 %v3243_v24, %v10057_v55  ;;  %6446 = vst [vmem:[%s10193_s30 + $0x258] sm:$0xff] %v5589_v30  ;;  %v5609_v63 = vmul.f32 %v7492_v10, %v5608_v46  ;;  %vm5612_vm2 = vweird.f32 %v7492_v10  ;;  %v14034_v24 = vld [vmem:[#allocation47_spill] sm:$0xff]  ;;  %v3870_v30 = vpop.f32.mrf.mxu3 }
 0x497   : > { %v5622_v1 = vmul.f32 %v7494_v6, %v12565_v51  ;;  %vm5626_vm7 = vweird.f32 %v12565_v51  ;;  %v7496_v44 = vpop.eup %7495  ;;  %v5599_v27 = vsel %vm5598_vm15, %v12567_v28, %v5595_v57  ;;  %v5632_v22 = vand.u32 2147483648, %v12565_v51  ;;  %vm5613_vm4 = vmor %vm5611_vm1, %vm5612_vm2 }
 0x498   : > { %v6900_v61 = vmul.f32 -1.442695, %v3868_v23  ;;  %v3453_v29 = vadd.f32 %v3452_v15, %v3244_v60  ;;  %v5604_v21 = vsel %vm12578_vm10, %v5603_v48, %v5599_v27  ;;  %v5610_v8 = vadd.f32 %v7492_v10, %v5609_v63  ;;  %v3661_v48 = vpop.f32.mrf.mxu2  ;;  %v3246_v63 = vpop.f32.mrf.mxu0 }
 0x499   : > { %v5623_v16 = vsub.f32 1.0, %v5622_v1  ;;  %v12621_v17 = vadd.f32 1.0, %v7496_v44  ;;  %vm2724_vm8 = vweird.f32 %v14029_v3  ;;  %6447 = vst [vmem:[%s10193_s30 + $0x260] sm:$0xff] %v5604_v21  ;;  %vm12630_vm6 = vcmp.eq.f32.partialorder %v5630_v33, 8.507059e+37  ;;  %v14036_v1 = vld [vmem:[#allocation105_spill] sm:$0xff] }
 0x49a   : > { %v12623_v0 = vpop.eup %7497  ;;  %7499 = vpow2.f32 %v6900_v61  ;;  %v6901_v4 = vmul.f32 -1.442695, %v3453_v29  ;;  %v2712_v35 = vmul.f32 %v14025_v49, %v2711_v42  ;;  %v5614_v40 = vsel %vm5613_vm4, %v7492_v10, %v5610_v8  ;;  %v14033_v10 = vld [vmem:[#allocation88_spill] sm:$0xff]  ;;  %v3455_v29 = vpop.f32.mrf.mxu1  ;;  %v14037_v8 = vld [vmem:[#allocation102_spill] sm:$0xff] }
 0x49b   : > { %v5624_v19 = vmul.f32 %v7494_v6, %v5623_v16  ;;  %vm5627_vm3 = vweird.f32 %v7494_v6  ;;  %v5637_v34 = vmul.f32 %v12623_v0, %v12585_v25  ;;  %vm2723_vm5 = vweird.f32 %v14032_v26 }
 0x49c   : > { %v5619_v11 = vsel %vm12599_vm13, %v5618_v41, %v5614_v40  ;;  %v5633_v56 = vor.u32 1.1754944e-38, %v5632_v22  ;;  %v5645_v45 = vand.u32 2147483647, %v12585_v25  ;;  %7501 = vrcp.f32 %v12621_v17  ;;  %vm5628_vm10 = vmor %vm5626_vm7, %vm5627_vm3  ;;  %v14035_v41 = vld [vmem:[#allocation48_spill] sm:$0xff] }
 0x49d   : > { %6448 = vst [vmem:[%s10193_s30 + $0x268] sm:$0xff] %v5619_v11  ;;  %v5625_v39 = vadd.f32 %v7494_v6, %v5624_v19  ;;  %v5638_v42 = vsub.f32 1.0, %v5637_v34  ;;  %7503 = vpow2.f32 %v6901_v4  ;;  %v2891_v14 = vsub.f32 %v14034_v24, %v14033_v10  ;;  %vm2725_vm15 = vmor %vm2723_vm5, %vm2724_vm8 }
 0x49e   : > { %v5647_v37 = vand.u32 2147483648, %v12585_v25  ;;  %v2716_v46 = vsel %vm2715_vm12, %v14025_v49, %v2712_v35  ;;  %v2892_v33 = vsub.f32 %v14035_v41, %v14033_v10  ;;  %v3662_v5 = vadd.f32 %v3661_v48, %v10091_v36  ;;  %v14041_v10 = vld [vmem:[#allocation49_spill] sm:$0xff] }
 0x49f   : > { %v5629_v57 = vsel %vm5628_vm10, %v7494_v6, %v5625_v39  ;;  %v5639_v23 = vmul.f32 %v12623_v0, %v5638_v42  ;;  %vm5642_vm0 = vweird.f32 %v12623_v0  ;;  %v3019_v60 = vmul.f32 %v2891_v14, %v2716_v46  ;;  %v14040_v42 = vld [vmem:[#allocation90_spill] sm:$0xff] }
 0x4a0   : > { %v7500_v51 = vpop.eup %7499  ;;  %vm2734_vm1 = vweird.f32 %v14036_v1  ;;  %v5634_v49 = vsel %vm12630_vm6, %v5633_v56, %v5629_v57  ;;  %v3020_v15 = vmul.f32 %v2892_v33, %v2716_v46  ;;  %v3871_v44 = vadd.f32 %v3870_v30, %v3662_v5  ;;  %v14042_v14 = vld [vmem:[#allocation50_spill] sm:$0xff]  ;;  %v3664_v46 = vpop.f32.mrf.mxu2 }
 0x4a1   : > { %v3247_v27 = vadd.f32 %v3246_v63, %v10057_v55  ;;  %v12665_v22 = vmul.f32 0.5, %v12493_v32  ;;  %6449 = vst [vmem:[%s10193_s30 + $0x270] sm:$0xff] %v5634_v49  ;;  %v5640_v6 = vadd.f32 %v12623_v0, %v5639_v23  ;;  %vm5641_vm9 = vweird.f32 %v12585_v25  ;;  %3290 = vmatmul.f32.gmra.mxu0 %v3019_v60  ;;  %3708 = vmatmul.f32.gmra.mxu2 %v3019_v60  ;;  %v3873_v5 = vpop.f32.mrf.mxu3  ;;  %v14045_v57 = vld [vmem:[#allocation106_spill] sm:$0xff]  ;;  %v14050_v32 = vld [vmem:[#allocation104_spill] sm:$0xff] }
 0x4a2   : > { %v12670_v61 = vadd.f32 1.0, %v7500_v51  ;;  %v12672_v21 = vpop.eup %7501  ;;  %vm2733_vm11 = vweird.f32 %v14037_v8  ;;  %vm12677_vm14 = vmor %vm5641_vm9, %vm5642_vm0  ;;  %v5648_v16 = vor.u32 1.1754944e-38, %v5647_v37  ;;  %6613 = vst [vmem:[%s8546_s27 + $0x390] sm:$0xff] %v3019_v60  ;;  %3499 = vmatmul.f32.gmra.mxu1 %v3020_v15  ;;  %3917 = vmatmul.f32.gmra.mxu3 %v3020_v15  ;;  %v6902_v25 = vmul.f32 -1.442695, %v3871_v44  ;;  %v3458_v8 = vpop.f32.mrf.mxu1 }
 0x4a3   : > { %v3456_v28 = vadd.f32 %v3455_v29, %v3247_v27  ;;  %v2722_v4 = vmul.f32 %v14029_v3, %v2721_v58  ;;  %v7504_v35 = vpop.eup %7503  ;;  %v5644_v40 = vsel %vm12677_vm14, %v12623_v0, %v5640_v6  ;;  %vm5646_vm13 = vcmp.eq.f32.partialorder %v5645_v45, 8.507059e+37  ;;  %6614 = vst [vmem:[%s8546_s27 + $0x398] sm:$0xff] %v3020_v15  ;;  %v3249_v27 = vpop.f32.mrf.mxu0  ;;  %v14048_v6 = vld [vmem:[#allocation96_spill] sm:$0xff]  ;;  %v14049_v29 = vld [vmem:[#allocation18_spill] sm:$0xff]  ;;  %vm2735_vm3 = vmor %vm2733_vm11, %vm2734_vm1 }
 0x4a4   : > { %v5652_v19 = vmul.f32 %v12672_v21, %v12621_v17  ;;  %7505 = vrcp.f32 %v12670_v61  ;;  %v2761_v34 = vsub.f32 1.5, %v12500_v43  ;;  %v5649_v48 = vsel %vm5646_vm13, %v5648_v16, %v5644_v40 }
 0x4a5   : > { %v5660_v11 = vand.u32 2147483647, %v12621_v17  ;;  %v5662_v31 = vand.u32 2147483648, %v12621_v17  ;;  %6450 = vst [vmem:[%s10193_s30 + $0x278] sm:$0xff] %v5649_v48  ;;  %v12700_v0 = vadd.f32 1.0, %v7504_v35  ;;  %7507 = vpow2.f32 %v6902_v25 }
 0x4a6   : > { %v5653_v58 = vsub.f32 1.0, %v5652_v19  ;;  %v6903_v56 = vmul.f32 -1.442695, %v3456_v28  ;;  %v2771_v45 = vsub.f32 1.5, %v12665_v22  ;;  %v2726_v39 = vsel %vm2725_vm15, %v14029_v3, %v2722_v4 }
 0x4a7   : > { %v2893_v24 = vsub.f32 %v14041_v10, %v14040_v42  ;;  %v2894_v37 = vsub.f32 %v14042_v14, %v14040_v42  ;;  %vm5656_vm2 = vweird.f32 %v12621_v17  ;;  %vm5657_vm7 = vweird.f32 %v12672_v21 }
 0x4a8   : > { %v5654_v26 = vmul.f32 %v12672_v21, %v5653_v58  ;;  %7509 = vrcp.f32 %v12700_v0  ;;  %vm12712_vm8 = vcmp.eq.f32.partialorder %v5660_v11, 8.507059e+37  ;;  %vm2744_vm4 = vweird.f32 %v14045_v57  ;;  %vm12724_vm6 = vmor %vm5656_vm2, %vm5657_vm7 }
 0x4a9   : > { %7511 = vpow2.f32 %v6903_v56  ;;  %v3021_v3 = vmul.f32 %v2893_v24, %v2726_v39  ;;  %v3022_v33 = vmul.f32 %v2894_v37, %v2726_v39  ;;  %v5663_v17 = vor.u32 1.1754944e-38, %v5662_v31 }
 0x4aa   : > { %v12716_v30 = vpop.eup %7505  ;;  %v5655_v23 = vadd.f32 %v12672_v21, %v5654_v26  ;;  %v3665_v60 = vadd.f32 %v3664_v46, %v10091_v36  ;;  %v2732_v63 = vmul.f32 %v14036_v1, %v2731_v7  ;;  %v5675_v15 = vand.u32 2147483647, %v12670_v61  ;;  %v3667_v26 = vpop.f32.mrf.mxu2 }
 0x4ab   : > { %v5667_v49 = vmul.f32 %v12716_v30, %v12670_v61  ;;  %v5677_v44 = vand.u32 2147483648, %v12670_v61  ;;  %3293 = vmatmul.f32.gmra.mxu0 %v3021_v3  ;;  %6615 = vst [vmem:[%s8546_s27 + $0x3a0] sm:$0xff] %v3021_v3  ;;  %3502 = vmatmul.f32.gmra.mxu1 %v3022_v33  ;;  %v2895_v13 = vsub.f32 %v14049_v29, %v14048_v6  ;;  %v7508_v7 = vpop.eup %7507  ;;  %vm2743_vm5 = vweird.f32 %v14050_v32 }
 0x4ac   : > { %v5659_v16 = vsel %vm12724_vm6, %v12672_v21, %v5655_v23  ;;  %6616 = vst [vmem:[%s8546_s27 + $0x3a8] sm:$0xff] %v3022_v33  ;;  %3711 = vmatmul.f32.gmra.mxu2 %v3021_v3  ;;  %3920 = vmatmul.f32.gmra.mxu3 %v3022_v33  ;;  %v3874_v25 = vadd.f32 %v3873_v5, %v3665_v60  ;;  %v12747_v40 = vadd.f32 1.0, %v7508_v7  ;;  %v5690_v21 = vand.u32 2147483647, %v12700_v0  ;;  %vm12789_vm13 = vmor %vm2743_vm5, %vm2744_vm4  ;;  %v14064_v23 = vld [vmem:[#allocation21_spill] sm:$0xff] }
 0x4ad   : > { %v3250_v28 = vadd.f32 %v3249_v27, %v10057_v55  ;;  %v5664_v4 = vsel %vm12712_vm8, %v5663_v17, %v5659_v16  ;;  %v5668_v35 = vsub.f32 1.0, %v5667_v49  ;;  %v2736_v19 = vsel %vm2735_vm3, %v14036_v1, %v2732_v63  ;;  %v3876_v17 = vpop.f32.mrf.mxu3 }
 0x4ae   : > { %v12750_v48 = vpop.eup %7509  ;;  %6451 = vst [vmem:[%s10193_s30 + $0x280] sm:$0xff] %v5664_v4  ;;  %v6904_v11 = vmul.f32 -1.442695, %v3874_v25  ;;  %v3023_v58 = vmul.f32 %v2895_v13, %v2736_v19  ;;  %vm5672_vm12 = vweird.f32 %v12716_v30  ;;  %7513 = vrcp.f32 %v12747_v40  ;;  %v14061_v4 = vld [vmem:[#allocation20_spill] sm:$0xff] }
 0x4af   : > { %v3459_v31 = vadd.f32 %v3458_v8, %v3250_v28  ;;  %v7512_v56 = vpop.eup %7511  ;;  %v5669_v39 = vmul.f32 %v12716_v30, %v5668_v35  ;;  %v5682_v42 = vmul.f32 %v12750_v48, %v12700_v0  ;;  %vm5671_vm10 = vweird.f32 %v12670_v61  ;;  %v14053_v61 = vld [vmem:[#allocation19_spill] sm:$0xff]  ;;  %v14060_v28 = vld [vmem:[#allocation98_spill] sm:$0xff] }
 0x4b0   : > { %vm12760_vm0 = vcmp.eq.f32.partialorder %v5675_v15, 8.507059e+37  ;;  %v5692_v10 = vand.u32 2147483648, %v12700_v0  ;;  %v12765_v24 = vadd.f32 1.0, %v7512_v56  ;;  %6617 = vst [vmem:[%s8546_s27 + $0x3b0] sm:$0xff] %v3023_v58  ;;  %7515 = vpow2.f32 %v6904_v11  ;;  %vm5673_vm1 = vmor %vm5671_vm10, %vm5672_vm12 }
 0x4b1   : > { %v5670_v14 = vadd.f32 %v12716_v30, %v5669_v39  ;;  %v5683_v37 = vsub.f32 1.0, %v5682_v42  ;;  %v6905_v46 = vmul.f32 -1.442695, %v3459_v31  ;;  %v5678_v41 = vor.u32 1.1754944e-38, %v5677_v44  ;;  %v3461_v31 = vpop.f32.mrf.mxu1 }
 0x4b2   : > { %vm5686_vm9 = vweird.f32 %v12700_v0  ;;  %7517 = vrcp.f32 %v12765_v24  ;;  %v2896_v3 = vsub.f32 %v14053_v61, %v14048_v6  ;;  %vm5687_vm11 = vweird.f32 %v12750_v48  ;;  %v3252_v6 = vpop.f32.mrf.mxu0 }
 0x4b3   : > { %v5674_v33 = vsel %vm5673_vm1, %v12716_v30, %v5670_v14  ;;  %v5684_v5 = vmul.f32 %v12750_v48, %v5683_v37  ;;  %vm12776_vm14 = vcmp.eq.f32.partialorder %v5690_v21, 8.507059e+37  ;;  %3296 = vmatmul.f32.gmra.mxu0 %v3023_v58  ;;  %7519 = vpow2.f32 %v6905_v46  ;;  %vm12804_vm2 = vmor %vm5686_vm9, %vm5687_vm11 }
 0x4b4   : > { %v5679_v60 = vsel %vm12760_vm0, %v5678_v41, %v5674_v33  ;;  %v3024_v63 = vmul.f32 %v2896_v3, %v2736_v19  ;;  %3714 = vmatmul.f32.gmra.mxu2 %v3023_v58  ;;  %v3668_v51 = vadd.f32 %v3667_v26, %v10091_v36  ;;  %v12783_v30 = vpop.eup %7513  ;;  %v5693_v44 = vor.u32 1.1754944e-38, %v5692_v10  ;;  %v3670_v3 = vpop.f32.mrf.mxu2 }
 0x4b5   : > { %6452 = vst [vmem:[%s10193_s30 + $0x288] sm:$0xff] %v5679_v60  ;;  %v5685_v15 = vadd.f32 %v12750_v48, %v5684_v5  ;;  %v5705_v27 = vand.u32 2147483647, %v12747_v40  ;;  %v2742_v29 = vmul.f32 %v14045_v57, %v2741_v62  ;;  %vm2754_vm15 = vweird.f32 %v11140_v12  ;;  %v3879_v60 = vpop.f32.mrf.mxu3 }
 0x4b6   : > { %v5697_v7 = vmul.f32 %v12783_v30, %v12747_v40  ;;  %vm5701_vm7 = vweird.f32 %v12747_v40  ;;  %v5707_v32 = vand.u32 2147483648, %v12747_v40  ;;  %3505 = vmatmul.f32.gmra.mxu1 %v3024_v63  ;;  %6618 = vst [vmem:[%s8546_s27 + $0x3b8] sm:$0xff] %v3024_v63  ;;  %3923 = vmatmul.f32.gmra.mxu3 %v3024_v63  ;;  %v3877_v53 = vadd.f32 %v3876_v17, %v3668_v51  ;;  %v7516_v62 = vpop.eup %7515 }
 0x4b7   : > { %v5689_v0 = vsel %vm12804_vm2, %v12750_v48, %v5685_v15  ;;  %v3253_v16 = vadd.f32 %v3252_v6, %v10057_v55  ;;  %v2746_v25 = vsel %vm12789_vm13, %v14045_v57, %v2742_v29  ;;  %v2897_v35 = vsub.f32 %v14061_v4, %v14060_v28 }
 0x4b8   : > { %v12822_v8 = vpop.eup %7517  ;;  %vm2753_vm8 = vweird.f32 %v11088_v2  ;;  %v5694_v19 = vsel %vm12776_vm14, %v5693_v44, %v5689_v0  ;;  %v5698_v21 = vsub.f32 1.0, %v5697_v7  ;;  %v12827_v11 = vadd.f32 1.0, %v7516_v62 }
 0x4b9   : > { %v6906_v48 = vmul.f32 -1.442695, %v3877_v53  ;;  %6453 = vst [vmem:[%s10193_s30 + $0x290] sm:$0xff] %v5694_v19  ;;  %vm12830_vm4 = vcmp.eq.f32.partialorder %v5705_v27, 8.507059e+37  ;;  %v5712_v57 = vmul.f32 %v12822_v8, %v12765_v24  ;;  %v3462_v56 = vadd.f32 %v3461_v31, %v3253_v16  ;;  %v7520_v42 = vpop.eup %7519  ;;  %vm2755_vm11 = vmor %vm2753_vm8, %vm2754_vm15  ;;  %v3464_v19 = vpop.f32.mrf.mxu1 }
 0x4ba   : > { %v3025_v39 = vmul.f32 %v2897_v35, %v2746_v25  ;;  %v5699_v1 = vmul.f32 %v12783_v30, %v5698_v21  ;;  %vm5702_vm6 = vweird.f32 %v12783_v30  ;;  %v5708_v10 = vor.u32 1.1754944e-38, %v5707_v32  ;;  %v14070_v32 = vld [vmem:[#allocation51_spill] sm:$0xff] }
 0x4bb   : > { %7521 = vrcp.f32 %v12827_v11  ;;  %v5713_v14 = vsub.f32 1.0, %v5712_v57  ;;  %v5720_v37 = vand.u32 2147483647, %v12765_v24  ;;  %v12840_v46 = vadd.f32 1.0, %v7520_v42  ;;  %vm5703_vm5 = vmor %vm5701_vm7, %vm5702_vm6 }
 0x4bc   : > { %7523 = vpow2.f32 %v6906_v48  ;;  %3299 = vmatmul.f32.gmra.mxu0 %v3025_v39  ;;  %6619 = vst [vmem:[%s8546_s27 + $0x3c0] sm:$0xff] %v3025_v39  ;;  %v5700_v26 = vadd.f32 %v12783_v30, %v5699_v1  ;;  %vm5717_vm3 = vweird.f32 %v12822_v8  ;;  %v5722_v41 = vand.u32 2147483648, %v12765_v24  ;;  %3717 = vmatmul.f32.gmra.mxu2 %v3025_v39 }
 0x4bd   : > { %v6907_v61 = vmul.f32 -1.442695, %v3462_v56  ;;  %v5714_v33 = vmul.f32 %v12822_v8, %v5713_v14  ;;  %v5735_v5 = vand.u32 2147483647, %v12827_v11  ;;  %7525 = vrcp.f32 %v12840_v46 }
 0x4be   : > { %v2898_v17 = vsub.f32 %v14064_v23, %v14060_v28  ;;  %v5704_v63 = vsel %vm5703_vm5, %v12783_v30, %v5700_v26  ;;  %vm5716_vm12 = vweird.f32 %v12765_v24  ;;  %v5737_v51 = vand.u32 2147483648, %v12827_v11 }
 0x4bf   : > { %7527 = vpow2.f32 %v6907_v61  ;;  %vm2764_vm10 = vweird.f32 %v11644_v50  ;;  %v5709_v40 = vsel %vm12830_vm4, %v5708_v10, %v5704_v63  ;;  %v5715_v49 = vadd.f32 %v12822_v8, %v5714_v33  ;;  %vm12868_vm0 = vmor %vm5716_vm12, %vm5717_vm3  ;;  %v3673_v61 = vpop.f32.mrf.mxu2 }
 0x4c0   : > { %v3026_v15 = vmul.f32 %v2898_v17, %v2746_v25  ;;  %v3671_v44 = vadd.f32 %v3670_v3, %v10091_v36  ;;  %6454 = vst [vmem:[%s10193_s30 + $0x298] sm:$0xff] %v5709_v40  ;;  %vm5721_vm1 = vcmp.eq.f32.partialorder %v5720_v37, 8.507059e+37  ;;  %v5723_v30 = vor.u32 1.1754944e-38, %v5722_v41  ;;  %v3882_v3 = vpop.f32.mrf.mxu3 }
 0x4c1   : > { %v12863_v27 = vpop.eup %7521  ;;  %vm5731_vm9 = vweird.f32 %v12827_v11  ;;  %v2752_v6 = vmul.f32 %v11140_v12, %v2751_v59  ;;  %vm2763_vm14 = vweird.f32 %v11424_v18  ;;  %v5719_v13 = vsel %vm12868_vm0, %v12822_v8, %v5715_v49  ;;  %v14069_v59 = vld [vmem:[#allocation103_spill] sm:$0xff]  ;;  %v3255_v8 = vpop.f32.mrf.mxu0 }
 0x4c2   : > { %v7524_v29 = vpop.eup %7523  ;;  %v5727_v7 = vmul.f32 %v12863_v27, %v12827_v11  ;;  %vm12886_vm13 = vcmp.eq.f32.partialorder %v5735_v5, 8.507059e+37  ;;  %3508 = vmatmul.f32.gmra.mxu1 %v3026_v15  ;;  %6620 = vst [vmem:[%s8546_s27 + $0x3c8] sm:$0xff] %v3026_v15  ;;  %3926 = vmatmul.f32.gmra.mxu3 %v3026_v15  ;;  %v2899_v2 = vsub.f32 %v14070_v32, %v14069_v59  ;;  %v5738_v4 = vor.u32 1.1754944e-38, %v5737_v51  ;;  %vm2765_vm5 = vmor %vm2763_vm14, %vm2764_vm10 }
 0x4c3   : > { %v5724_v53 = vsel %vm5721_vm1, %v5723_v30, %v5719_v13  ;;  %v12893_v62 = vadd.f32 1.0, %v7524_v29  ;;  %v3880_v0 = vadd.f32 %v3879_v60, %v3671_v44  ;;  %v2756_v16 = vsel %vm2755_vm11, %v11140_v12, %v2752_v6  ;;  %v12896_v25 = vpop.eup %7525  ;;  %v14071_v12 = vld [vmem:[#allocation52_spill] sm:$0xff]  ;;  %v14074_v29 = vld [vmem:[#allocation110_spill] sm:$0xff]  ;;  %v14075_v13 = vld [vmem:[#allocation53_spill] sm:$0xff] }
 0x4c4   : > { %6455 = vst [vmem:[%s10193_s30 + $0x2a0] sm:$0xff] %v5724_v53  ;;  %v5728_v28 = vsub.f32 1.0, %v5727_v7  ;;  %v5750_v35 = vand.u32 2147483647, %v12840_v46  ;;  %v3027_v21 = vmul.f32 %v2899_v2, %v2756_v16  ;;  %v5742_v31 = vmul.f32 %v12896_v25, %v12840_v46 }
 0x4c5   : > { %v7528_v48 = vpop.eup %7527  ;;  %v5752_v58 = vand.u32 2147483648, %v12840_v46  ;;  %7529 = vrcp.f32 %v12893_v62  ;;  %v2900_v57 = vsub.f32 %v14071_v12, %v14069_v59  ;;  %vm5732_vm15 = vweird.f32 %v12863_v27 }
 0x4c6   : > { %v5729_v56 = vmul.f32 %v12863_v27, %v5728_v28  ;;  %vm5746_vm2 = vweird.f32 %v12840_v46  ;;  %v12909_v39 = vadd.f32 1.0, %v7528_v48  ;;  %3302 = vmatmul.f32.gmra.mxu0 %v3027_v21  ;;  %6621 = vst [vmem:[%s8546_s27 + $0x3d0] sm:$0xff] %v3027_v21  ;;  %3720 = vmatmul.f32.gmra.mxu2 %v3027_v21  ;;  %vm2774_vm7 = vweird.f32 %v12319_v52  ;;  %vm5733_vm6 = vmor %vm5731_vm9, %vm5732_vm15 }
 0x4c7   : > { %v5743_v42 = vsub.f32 1.0, %v5742_v31  ;;  %v6908_v1 = vmul.f32 -1.442695, %v3880_v0  ;;  %v3256_v10 = vadd.f32 %v3255_v8, %v10057_v55  ;;  %v3028_v14 = vmul.f32 %v2900_v57, %v2756_v16 }
 0x4c8   : > { %v5730_v37 = vadd.f32 %v12863_v27, %v5729_v56  ;;  %vm12915_vm8 = vcmp.eq.f32.partialorder %v5750_v35, 8.507059e+37  ;;  %v5767_v41 = vand.u32 2147483648, %v12893_v62  ;;  %7531 = vrcp.f32 %v12909_v39  ;;  %v3885_v35 = vpop.f32.mrf.mxu3 }
 0x4c9   : > { %vm2773_vm4 = vweird.f32 %v12174_v54  ;;  %v5744_v33 = vmul.f32 %v12896_v25, %v5743_v42  ;;  %vm5747_vm3 = vweird.f32 %v12896_v25  ;;  %v5753_v5 = vor.u32 1.1754944e-38, %v5752_v58  ;;  %6622 = vst [vmem:[%s8546_s27 + $0x3d8] sm:$0xff] %v3028_v14  ;;  %v3258_v44 = vpop.f32.mrf.mxu0 }
 0x4ca   : > { %v2762_v23 = vmul.f32 %v11644_v50, %v2761_v34  ;;  %v5734_v17 = vsel %vm5733_vm6, %v12863_v27, %v5730_v37  ;;  %7533 = vpow2.f32 %v6908_v1  ;;  %v3465_v60 = vadd.f32 %v3464_v19, %v3256_v10  ;;  %3511 = vmatmul.f32.gmra.mxu1 %v3028_v14  ;;  %3929 = vmatmul.f32.gmra.mxu3 %v3028_v14  ;;  %vm5748_vm0 = vmor %vm5746_vm2, %vm5747_vm3  ;;  %v3467_v27 = vpop.f32.mrf.mxu1 }
 0x4cb   : > { %v3674_v11 = vadd.f32 %v3673_v61, %v10091_v36  ;;  %v12934_v63 = vpop.eup %7529  ;;  %v5739_v43 = vsel %vm12886_vm13, %v5738_v4, %v5734_v17  ;;  %v5745_v34 = vadd.f32 %v12896_v25, %v5744_v33  ;;  %vm5761_vm12 = vweird.f32 %v12893_v62  ;;  %v3676_v4 = vpop.f32.mrf.mxu2  ;;  %vm2775_vm1 = vmor %vm2773_vm4, %vm2774_vm7 }
 0x4cc   : > { %v5765_v51 = vand.u32 2147483647, %v12893_v62  ;;  %6456 = vst [vmem:[%s10193_s30 + $0x2a8] sm:$0xff] %v5739_v43  ;;  %v5757_v18 = vmul.f32 %v12934_v63, %v12893_v62  ;;  %v5768_v40 = vor.u32 1.1754944e-38, %v5767_v41  ;;  %v6909_v49 = vmul.f32 -1.442695, %v3465_v60 }
 0x4cd   : > { %v3883_v15 = vadd.f32 %v3882_v3, %v3674_v11  ;;  %v5749_v24 = vsel %vm5748_vm0, %v12896_v25, %v5745_v34  ;;  %v3259_v30 = vadd.f32 %v3258_v44, %v10057_v55  ;;  %v2766_v6 = vsel %vm2765_vm5, %v11644_v50, %v2762_v23  ;;  %v14076_v25 = vld [vmem:[#allocation54_spill] sm:$0xff] }
 0x4ce   : > { %v2901_v7 = vsub.f32 %v14075_v13, %v14074_v29  ;;  %v7532_v46 = vpop.eup %7531  ;;  %v5754_v20 = vsel %vm12915_vm8, %v5753_v5, %v5749_v24  ;;  %v5758_v59 = vsub.f32 1.0, %v5757_v18  ;;  %7535 = vpow2.f32 %v6909_v49  ;;  %v14077_v5 = vld [vmem:[#allocation56_spill] sm:$0xff] }
 0x4cf   : > { %v6910_v32 = vmul.f32 -1.442695, %v3883_v15  ;;  %6457 = vst [vmem:[%s10193_s30 + $0x2b0] sm:$0xff] %v5754_v20  ;;  %vm5762_vm10 = vweird.f32 %v12934_v63  ;;  %v5772_v2 = vmul.f32 %v7532_v46, %v12909_v39  ;;  %v3468_v53 = vadd.f32 %v3467_v27, %v3259_v30 }
 0x4d0   : > { %v3029_v0 = vmul.f32 %v2901_v7, %v2766_v6  ;;  %v7534_v16 = vpop.eup %7533  ;;  %v5759_v50 = vmul.f32 %v12934_v63, %v5758_v59  ;;  %v2902_v28 = vsub.f32 %v14076_v25, %v14074_v29  ;;  %v2772_v8 = vmul.f32 %v12319_v52, %v2771_v45  ;;  %vm5763_vm9 = vmor %vm5761_vm12, %vm5762_vm10  ;;  %v3888_v18 = vpop.f32.mrf.mxu3 }
 0x4d1   : > { %7537 = vpow2.f32 %v6910_v32  ;;  %v5773_v19 = vsub.f32 1.0, %v5772_v2  ;;  %v12968_v21 = vadd.f32 1.0, %v7534_v16  ;;  %v6911_v48 = vmul.f32 -1.442695, %v3468_v53  ;;  %v3261_v10 = vpop.f32.mrf.mxu0 }
 0x4d2   : > { %3305 = vmatmul.f32.gmra.mxu0 %v3029_v0  ;;  %6623 = vst [vmem:[%s8546_s27 + $0x3e0] sm:$0xff] %v3029_v0  ;;  %3723 = vmatmul.f32.gmra.mxu2 %v3029_v0  ;;  %v3677_v31 = vadd.f32 %v3676_v4, %v10091_v36  ;;  %v5760_v58 = vadd.f32 %v12934_v63, %v5759_v50  ;;  %v5780_v22 = vand.u32 2147483647, %v12909_v39  ;;  %v5782_v45 = vand.u32 2147483648, %v12909_v39  ;;  %v3470_v26 = vpop.f32.mrf.mxu1 }
 0x4d3   : > { %v3030_v12 = vmul.f32 %v2902_v28, %v2766_v6  ;;  %v5774_v57 = vmul.f32 %v7532_v46, %v5773_v19  ;;  %vm5777_vm11 = vweird.f32 %v7532_v46  ;;  %7539 = vrcp.f32 %v12968_v21 }
 0x4d4   : > { %v2776_v54 = vsel %vm2775_vm1, %v12319_v52, %v2772_v8  ;;  %v7536_v56 = vpop.eup %7535  ;;  %v5764_v42 = vsel %vm5763_vm9, %v12934_v63, %v5760_v58  ;;  %vm5766_vm14 = vcmp.eq.f32.partialorder %v5765_v51, 8.507059e+37  ;;  %7541 = vpow2.f32 %v6911_v48 }
 0x4d5   : > { %3514 = vmatmul.f32.gmra.mxu1 %v3030_v12  ;;  %6624 = vst [vmem:[%s8546_s27 + $0x3e8] sm:$0xff] %v3030_v12  ;;  %3932 = vmatmul.f32.gmra.mxu3 %v3030_v12  ;;  %v3886_v1 = vadd.f32 %v3885_v35, %v3677_v31  ;;  %v5769_v14 = vsel %vm5766_vm14, %v5768_v40, %v5764_v42  ;;  %vm5776_vm13 = vweird.f32 %v12909_v39  ;;  %v12988_v37 = vadd.f32 1.0, %v7536_v56 }
 0x4d6   : > { %v5775_v62 = vadd.f32 %v7532_v46, %v5774_v57  ;;  %6458 = vst [vmem:[%s10193_s30 + $0x2b8] sm:$0xff] %v5769_v14  ;;  %vm5778_vm15 = vmor %vm5776_vm13, %vm5777_vm11  ;;  %v5783_v41 = vor.u32 1.1754944e-38, %v5782_v45  ;;  %v3262_v3 = vadd.f32 %v3261_v10, %v10057_v55  ;;  %v3031_v33 = vmul.f32 %v2903_v47, %v2776_v54 }
 0x4d7   : > { %v7538_v52 = vpop.eup %7537  ;;  %v6912_v61 = vmul.f32 -1.442695, %v3886_v1  ;;  %v2904_v39 = vsub.f32 %v14077_v5, %v11257_v9  ;;  %vm5781_vm2 = vcmp.eq.f32.partialorder %v5780_v22, 8.507059e+37  ;;  %7543 = vrcp.f32 %v12988_v37  ;;  %v3679_v9 = vpop.f32.mrf.mxu2 }
 0x4d8   : > { %v5779_v23 = vsel %vm5778_vm15, %v7532_v46, %v5775_v62  ;;  %v12999_v60 = vadd.f32 1.0, %v7538_v52  ;;  %6625 = vst [vmem:[%s8546_s27 + $0x3f0] sm:$0xff] %v3031_v33  ;;  %v5795_v63 = vand.u32 2147483647, %v12968_v21  ;;  %v5797_v38 = vand.u32 2147483648, %v12968_v21  ;;  %v3891_v1 = vpop.f32.mrf.mxu3 }
 0x4d9   : > { %v5784_v17 = vsel %vm5781_vm2, %v5783_v41, %v5779_v23  ;;  %7545 = vpow2.f32 %v6912_v61  ;;  %v7540_v11 = vpop.eup %7539  ;;  %v3471_v47 = vadd.f32 %v3470_v26, %v3262_v3  ;;  %v3032_v43 = vmul.f32 %v2904_v39, %v2776_v54  ;;  %v3264_v2 = vpop.f32.mrf.mxu0 }
 0x4da   : > { %6459 = vst [vmem:[%s10193_s30 + $0x2c0] sm:$0xff] %v5784_v17  ;;  %3308 = vmatmul.f32.gmra.mxu0 %v3031_v33  ;;  %3726 = vmatmul.f32.gmra.mxu2 %v3031_v33  ;;  %v7542_v34 = vpop.eup %7541  ;;  %v5787_v51 = vmul.f32 %v7540_v11, %v12968_v21  ;;  %7547 = vrcp.f32 %v12999_v60  ;;  %v5810_v40 = vand.u32 2147483647, %v12988_v37  ;;  %v5812_v44 = vand.u32 2147483648, %v12988_v37  ;;  %v3473_v53 = vpop.f32.mrf.mxu1 }
 0x4db   : > { %v13008_v49 = vadd.f32 1.0, %v7542_v34  ;;  %6626 = vst [vmem:[%s8546_s27 + $0x3f8] sm:$0xff] %v3032_v43  ;;  %v6913_v27 = vmul.f32 -1.442695, %v3471_v47  ;;  %v3680_v24 = vadd.f32 %v3679_v9, %v10091_v36  ;;  %vm5791_vm7 = vweird.f32 %v12968_v21 }
 0x4dc   : > { %v5788_v15 = vsub.f32 1.0, %v5787_v51  ;;  %vm13014_vm8 = vcmp.eq.f32.partialorder %v5795_v63, 8.507059e+37  ;;  %v5798_v29 = vor.u32 1.1754944e-38, %v5797_v38  ;;  %vm5792_vm4 = vweird.f32 %v7540_v11 }
 0x4dd   : > { %3517 = vmatmul.f32.gmra.mxu1 %v3032_v43  ;;  %3935 = vmatmul.f32.gmra.mxu3 %v3032_v43  ;;  %v7544_v30 = vpop.eup %7543  ;;  %7549 = vrcp.f32 %v13008_v49  ;;  %vm5806_vm6 = vweird.f32 %v12988_v37  ;;  %v5825_v20 = vand.u32 2147483647, %v12999_v60  ;;  %v3889_v32 = vadd.f32 %v3888_v18, %v3680_v24  ;;  %vm5793_vm5 = vmor %vm5791_vm7, %vm5792_vm4 }
 0x4de   : > { %v5789_v7 = vmul.f32 %v7540_v11, %v5788_v15  ;;  %v5802_v46 = vmul.f32 %v7544_v30, %v12988_v37  ;;  %7551 = vpow2.f32 %v6913_v27  ;;  %vm13024_vm3 = vcmp.eq.f32.partialorder %v5810_v40, 8.507059e+37 }
 0x4df   : > { %v7546_v13 = vpop.eup %7545  ;;  %v5813_v28 = vor.u32 1.1754944e-38, %v5812_v44  ;;  %vm5821_vm12 = vweird.f32 %v12999_v60  ;;  %v3265_v35 = vadd.f32 %v3264_v2, %v10057_v55  ;;  %vm5807_vm0 = vweird.f32 %v7544_v30  ;;  %v3682_v42 = vpop.f32.mrf.mxu2 }
 0x4e0   : > { %v13022_v59 = vadd.f32 1.0, %v7546_v13  ;;  %v7548_v0 = vpop.eup %7547  ;;  %v5790_v16 = vadd.f32 %v7540_v11, %v5789_v7  ;;  %v5803_v50 = vsub.f32 1.0, %v5802_v46  ;;  %v5827_v48 = vand.u32 2147483648, %v12999_v60  ;;  %vm5808_vm1 = vmor %vm5806_vm6, %vm5807_vm0  ;;  %v3894_v46 = vpop.f32.mrf.mxu3 }
 0x4e1   : > { %v5817_v4 = vmul.f32 %v7548_v0, %v12999_v60  ;;  %vm13037_vm10 = vcmp.eq.f32.partialorder %v5825_v20, 8.507059e+37  ;;  %v6914_v45 = vmul.f32 -1.442695, %v3889_v32  ;;  %v5840_v54 = vand.u32 2147483647, %v13008_v49  ;;  %v3267_v47 = vpop.f32.mrf.mxu0 }
 0x4e2   : > { %7553 = vrcp.f32 %v13022_v59  ;;  %v5794_v8 = vsel %vm5793_vm5, %v7540_v11, %v5790_v16  ;;  %v5804_v19 = vmul.f32 %v7544_v30, %v5803_v50  ;;  %v5842_v56 = vand.u32 2147483648, %v13008_v49  ;;  %v3476_v43 = vpop.f32.mrf.mxu1 }
 0x4e3   : > { %v7550_v31 = vpop.eup %7549  ;;  %v5799_v58 = vsel %vm13014_vm8, %v5798_v29, %v5794_v8  ;;  %v5818_v22 = vsub.f32 1.0, %v5817_v4  ;;  %vm5822_vm9 = vweird.f32 %v7548_v0  ;;  %7555 = vpow2.f32 %v6914_v45 }
 0x4e4   : > { %6460 = vst [vmem:[%s10193_s30 + $0x2c8] sm:$0xff] %v5799_v58  ;;  %v5805_v12 = vadd.f32 %v7544_v30, %v5804_v19  ;;  %v5832_v57 = vmul.f32 %v7550_v31, %v13008_v49  ;;  %v7552_v10 = vpop.eup %7551  ;;  %v3474_v62 = vadd.f32 %v3473_v53, %v3265_v35  ;;  %v5828_v52 = vor.u32 1.1754944e-38, %v5827_v48  ;;  %vm5823_vm11 = vmor %vm5821_vm12, %vm5822_vm9 }
 0x4e5   : > { %v5819_v14 = vmul.f32 %v7548_v0, %v5818_v22  ;;  %v13048_v61 = vadd.f32 1.0, %v7552_v10  ;;  %v3683_v23 = vadd.f32 %v3682_v42, %v10091_v36  ;;  %vm5837_vm14 = vweird.f32 %v7550_v31 }
 0x4e6   : > { %v5809_v26 = vsel %vm5808_vm1, %v7544_v30, %v5805_v12  ;;  %v5833_v41 = vsub.f32 1.0, %v5832_v57  ;;  %v6915_v39 = vmul.f32 -1.442695, %v3474_v62  ;;  %vm5836_vm13 = vweird.f32 %v13008_v49 }
 0x4e7   : > { %v5814_v33 = vsel %vm13024_vm3, %v5813_v28, %v5809_v26  ;;  %v5820_v5 = vadd.f32 %v7548_v0, %v5819_v14  ;;  %7557 = vrcp.f32 %v13048_v61  ;;  %vm13059_vm15 = vcmp.eq.f32.partialorder %v5840_v54, 8.507059e+37  ;;  %vm5838_vm2 = vmor %vm5836_vm13, %vm5837_vm14  ;;  %v3685_v30 = vpop.f32.mrf.mxu2 }
 0x4e8   : > { %v7554_v3 = vpop.eup %7553  ;;  %6461 = vst [vmem:[%s10193_s30 + $0x2d0] sm:$0xff] %v5814_v33  ;;  %v5834_v37 = vmul.f32 %v7550_v31, %v5833_v41  ;;  %v5843_v38 = vor.u32 1.1754944e-38, %v5842_v56  ;;  %7559 = vpow2.f32 %v6915_v39  ;;  %v5855_v18 = vand.u32 2147483647, %v13022_v59  ;;  %v3897_v41 = vpop.f32.mrf.mxu3 }
 0x4e9   : > { %v5847_v17 = vmul.f32 %v7554_v3, %v13022_v59  ;;  %v5824_v11 = vsel %vm5823_vm11, %v7548_v0, %v5820_v5  ;;  %v7556_v51 = vpop.eup %7555  ;;  %v5857_v40 = vand.u32 2147483648, %v13022_v59  ;;  %v3892_v49 = vadd.f32 %v3891_v1, %v3683_v23  ;;  %v3270_v8 = vpop.f32.mrf.mxu0 }
 0x4ea   : > { %v5829_v60 = vsel %vm13037_vm10, %v5828_v52, %v5824_v11  ;;  %v5835_v9 = vadd.f32 %v7550_v31, %v5834_v37  ;;  %v3268_v15 = vadd.f32 %v3267_v47, %v10057_v55  ;;  %vm5852_vm7 = vweird.f32 %v7554_v3 }
 0x4eb   : > { %v5848_v34 = vsub.f32 1.0, %v5847_v17  ;;  %6462 = vst [vmem:[%s10193_s30 + $0x2d8] sm:$0xff] %v5829_v60  ;;  %v13070_v24 = vadd.f32 1.0, %v7556_v51  ;;  %v6916_v29 = vmul.f32 -1.442695, %v3892_v49  ;;  %v3686_v7 = vadd.f32 %v3685_v30, %v10091_v36 }
 0x4ec   : > { %v5839_v44 = vsel %vm5838_vm2, %v7550_v31, %v5835_v9  ;;  %v3477_v13 = vadd.f32 %v3476_v43, %v3268_v15  ;;  %vm5851_vm8 = vweird.f32 %v13022_v59  ;;  %v5858_v2 = vor.u32 1.1754944e-38, %v5857_v40  ;;  %v3479_v31 = vpop.f32.mrf.mxu1 }
 0x4ed   : > { %v5849_v27 = vmul.f32 %v7554_v3, %v5848_v34  ;;  %v5844_v6 = vsel %vm13059_vm15, %v5843_v38, %v5839_v44  ;;  %v7558_v20 = vpop.eup %7557  ;;  %7561 = vrcp.f32 %v13070_v24  ;;  %vm5853_vm4 = vmor %vm5851_vm8, %vm5852_vm7  ;;  %vm5856_vm6 = vcmp.eq.f32.partialorder %v5855_v18, 8.507059e+37 }
 0x4ee   : > { %6463 = vst [vmem:[%s10193_s30 + $0x2e0] sm:$0xff] %v5844_v6  ;;  %v5862_v53 = vmul.f32 %v7558_v20, %v13048_v61  ;;  %7563 = vpow2.f32 %v6916_v29  ;;  %v7560_v0 = vpop.eup %7559  ;;  %v6917_v50 = vmul.f32 -1.442695, %v3477_v13  ;;  %v3895_v25 = vadd.f32 %v3894_v46, %v3686_v7 }
 0x4ef   : > { %v5850_v32 = vadd.f32 %v7554_v3, %v5849_v27  ;;  %v13079_v35 = vadd.f32 1.0, %v7560_v0  ;;  %v5872_v59 = vand.u32 2147483648, %v13048_v61  ;;  %v3271_v48 = vadd.f32 %v3270_v8, %v10057_v55  ;;  %v3688_v12 = vpop.f32.mrf.mxu2 }
 0x4f0   : > { %v5863_v4 = vsub.f32 1.0, %v5862_v53  ;;  %7565 = vpow2.f32 %v6917_v50  ;;  %v6918_v19 = vmul.f32 -1.442695, %v3895_v25  ;;  %vm5867_vm3 = vweird.f32 %v7558_v20  ;;  %v3900_v0 = vpop.f32.mrf.mxu3 }
 0x4f1   : > { %v5854_v16 = vsel %vm5853_vm4, %v7554_v3, %v5850_v32  ;;  %v5870_v22 = vand.u32 2147483647, %v13048_v61  ;;  %7567 = vrcp.f32 %v13079_v35  ;;  %v3480_v45 = vadd.f32 %v3479_v31, %v3271_v48  ;;  %v3273_v9 = vpop.f32.mrf.mxu0 }
 0x4f2   : > { %v5859_v28 = vsel %vm5856_vm6, %v5858_v2, %v5854_v16  ;;  %v5864_v58 = vmul.f32 %v7558_v20, %v5863_v4  ;;  %7569 = vpow2.f32 %v6918_v19  ;;  %vm5866_vm5 = vweird.f32 %v13048_v61 }
 0x4f3   : > { %6464 = vst [vmem:[%s10193_s30 + $0x2e8] sm:$0xff] %v5859_v28  ;;  %v7562_v21 = vpop.eup %7561  ;;  %vm5868_vm12 = vmor %vm5866_vm5, %vm5867_vm3  ;;  %v5873_v42 = vor.u32 1.1754944e-38, %v5872_v59  ;;  %v6919_v10 = vmul.f32 -1.442695, %v3480_v45  ;;  %v3689_v14 = vadd.f32 %v3688_v12, %v10091_v36  ;;  %vm5871_vm0 = vcmp.eq.f32.partialorder %v5870_v22, 8.507059e+37 }
 0x4f4   : > { %v7564_v57 = vpop.eup %7563  ;;  %v5865_v54 = vadd.f32 %v7558_v20, %v5864_v58  ;;  %v5877_v56 = vmul.f32 %v7562_v21, %v13070_v24  ;;  %v5885_v52 = vand.u32 2147483647, %v13070_v24  ;;  %v5887_v61 = vand.u32 2147483648, %v13070_v24  ;;  %v3482_v34 = vpop.f32.mrf.mxu1 }
 0x4f5   : > { %v13088_v1 = vadd.f32 1.0, %v7564_v57  ;;  %vm5882_vm10 = vweird.f32 %v7562_v21  ;;  %v3898_v11 = vadd.f32 %v3897_v41, %v3689_v14  ;;  %vm5881_vm1 = vweird.f32 %v13070_v24 }
 0x4f6   : > { %v5869_v62 = vsel %vm5868_vm12, %v7558_v20, %v5865_v54  ;;  %v5878_v26 = vsub.f32 1.0, %v5877_v56  ;;  %v7566_v3 = vpop.eup %7565  ;;  %vm5886_vm9 = vcmp.eq.f32.partialorder %v5885_v52, 8.507059e+37  ;;  %vm5883_vm11 = vmor %vm5881_vm1, %vm5882_vm10  ;;  %v5888_v38 = vor.u32 1.1754944e-38, %v5887_v61 }
 0x4f7   : > { %v5874_v33 = vsel %vm5871_vm0, %v5873_v42, %v5869_v62  ;;  %7571 = vrcp.f32 %v13088_v1  ;;  %v7568_v5 = vpop.eup %7567  ;;  %v13095_v23 = vadd.f32 1.0, %v7566_v3  ;;  %v5900_v43 = vand.u32 2147483647, %v13079_v35  ;;  %v3691_v53 = vpop.f32.mrf.mxu2 }
 0x4f8   : > { %6465 = vst [vmem:[%s10193_s30 + $0x2f0] sm:$0xff] %v5874_v33  ;;  %v5879_v39 = vmul.f32 %v7562_v21, %v5878_v26  ;;  %7573 = vpow2.f32 %v6919_v10  ;;  %v7570_v37 = vpop.eup %7569  ;;  %v5892_v17 = vmul.f32 %v7568_v5, %v13079_v35  ;;  %v5902_v18 = vand.u32 2147483648, %v13079_v35 }
 0x4f9   : > { %7575 = vrcp.f32 %v13095_v23  ;;  %v13101_v60 = vadd.f32 1.0, %v7570_v37  ;;  %v6920_v40 = vmul.f32 -1.442695, %v3898_v11  ;;  %v3274_v49 = vadd.f32 %v3273_v9, %v10057_v55  ;;  %v3276_v57 = vpop.f32.mrf.mxu0 }
 0x4fa   : > { %v5880_v63 = vadd.f32 %v7562_v21, %v5879_v39  ;;  %v5893_v47 = vsub.f32 1.0, %v5892_v17  ;;  %vm5897_vm14 = vweird.f32 %v7568_v5  ;;  %v5915_v24 = vand.u32 2147483647, %v13088_v1 }
 0x4fb   : > { %vm5896_vm13 = vweird.f32 %v13079_v35  ;;  %7577 = vrcp.f32 %v13101_v60  ;;  %vm5901_vm15 = vcmp.eq.f32.partialorder %v5900_v43, 8.507059e+37  ;;  %v5917_v13 = vand.u32 2147483648, %v13088_v1 }
 0x4fc   : > { %v5884_v51 = vsel %vm5883_vm11, %v7562_v21, %v5880_v63  ;;  %v5894_v27 = vmul.f32 %v7568_v5, %v5893_v47  ;;  %vm5898_vm2 = vmor %vm5896_vm13, %vm5897_vm14  ;;  %v5903_v20 = vor.u32 1.1754944e-38, %v5902_v18  ;;  %7579 = vpow2.f32 %v6920_v40  ;;  %v3485_v54 = vpop.f32.mrf.mxu1  ;;  %v3903_v63 = vpop.f32.mrf.mxu3 }
 0x4fd   : > { %v7572_v15 = vpop.eup %7571  ;;  %v5889_v44 = vsel %vm5886_vm9, %v5888_v38, %v5884_v51  ;;  %v3483_v2 = vadd.f32 %v3482_v34, %v3274_v49  ;;  %vm5911_vm7 = vweird.f32 %v13088_v1  ;;  %vm13114_vm8 = vcmp.eq.f32.partialorder %v5915_v24, 8.507059e+37 }
 0x4fe   : > { %v7574_v30 = vpop.eup %7573  ;;  %6466 = vst [vmem:[%s10193_s30 + $0x2f8] sm:$0xff] %v5889_v44  ;;  %v5907_v6 = vmul.f32 %v7572_v15, %v13088_v1  ;;  %v5895_v29 = vadd.f32 %v7568_v5, %v5894_v27  ;;  %vm5912_vm4 = vweird.f32 %v7572_v15  ;;  %v5918_v35 = vor.u32 1.1754944e-38, %v5917_v13 }
 0x4ff   : > { %v13111_v7 = vadd.f32 1.0, %v7574_v30  ;;  %v7576_v46 = vpop.eup %7575  ;;  %vm5926_vm6 = vweird.f32 %v13095_v23  ;;  %v5930_v59 = vand.u32 2147483647, %v13095_v23  ;;  %v5932_v31 = vand.u32 2147483648, %v13095_v23  ;;  %vm5913_vm3 = vmor %vm5911_vm7, %vm5912_vm4 }
 0x500   : > { %v5908_v32 = vsub.f32 1.0, %v5907_v6  ;;  %v5899_v16 = vsel %vm5898_vm2, %v7568_v5, %v5895_v29  ;;  %v5922_v25 = vmul.f32 %v7576_v46, %v13095_v23  ;;  %v6921_v58 = vmul.f32 -1.442695, %v3483_v2  ;;  %v3694_v23 = vpop.f32.mrf.mxu2 }
 0x501   : > { %v5904_v28 = vsel %vm5901_vm15, %v5903_v20, %v5899_v16  ;;  %7581 = vrcp.f32 %v13111_v7  ;;  %v7578_v19 = vpop.eup %7577  ;;  %v3692_v22 = vadd.f32 %v3691_v53, %v10091_v36  ;;  %vm5927_vm5 = vweird.f32 %v7576_v46  ;;  %v3279_v44 = vpop.f32.mrf.mxu0 }
 0x502   : > { %v5909_v4 = vmul.f32 %v7572_v15, %v5908_v32  ;;  %6467 = vst [vmem:[%s10193_s30 + $0x300] sm:$0xff] %v5904_v28  ;;  %v5923_v8 = vsub.f32 1.0, %v5922_v25  ;;  %v5937_v45 = vmul.f32 %v7578_v19, %v13101_v60  ;;  %v5945_v12 = vand.u32 2147483647, %v13101_v60  ;;  %v7580_v56 = vpop.eup %7579  ;;  %vm5928_vm12 = vmor %vm5926_vm6, %vm5927_vm5 }
 0x503   : > { %v5947_v10 = vand.u32 2147483648, %v13101_v60  ;;  %7583 = vpow2.f32 %v6921_v58  ;;  %v3901_v14 = vadd.f32 %v3900_v0, %v3692_v22  ;;  %v13132_v52 = vadd.f32 1.0, %v7580_v56 }
 0x504   : > { %v5910_v48 = vadd.f32 %v7572_v15, %v5909_v4  ;;  %v5924_v21 = vmul.f32 %v7576_v46, %v5923_v8  ;;  %v5938_v26 = vsub.f32 1.0, %v5937_v45  ;;  %vm5931_vm0 = vcmp.eq.f32.partialorder %v5930_v59, 8.507059e+37  ;;  %v3488_v13 = vpop.f32.mrf.mxu1 }
 0x505   : > { %v5933_v3 = vor.u32 1.1754944e-38, %v5932_v31  ;;  %v6922_v33 = vmul.f32 -1.442695, %v3901_v14  ;;  %v3277_v61 = vadd.f32 %v3276_v57, %v10057_v55  ;;  %vm5942_vm10 = vweird.f32 %v7578_v19 }
 0x506   : > { %v5914_v42 = vsel %vm5913_vm3, %v7572_v15, %v5910_v48  ;;  %v5925_v1 = vadd.f32 %v7576_v46, %v5924_v21  ;;  %v5939_v39 = vmul.f32 %v7578_v19, %v5938_v26  ;;  %vm5941_vm1 = vweird.f32 %v13101_v60 }
 0x507   : > { %v5919_v62 = vsel %vm13114_vm8, %v5918_v35, %v5914_v42  ;;  %v7582_v41 = vpop.eup %7581  ;;  %vm13141_vm9 = vcmp.eq.f32.partialorder %v5945_v12, 8.507059e+37  ;;  %7585 = vrcp.f32 %v13132_v52  ;;  %v5948_v47 = vor.u32 1.1754944e-38, %v5947_v10  ;;  %vm5943_vm11 = vmor %vm5941_vm1, %vm5942_vm10 }
 0x508   : > { %6468 = vst [vmem:[%s10193_s30 + $0x308] sm:$0xff] %v5919_v62  ;;  %v5929_v5 = vsel %vm5928_vm12, %v7576_v46, %v5925_v1  ;;  %v5952_v37 = vmul.f32 %v7582_v41, %v13111_v7  ;;  %v5940_v38 = vadd.f32 %v7578_v19, %v5939_v39  ;;  %7587 = vpow2.f32 %v6922_v33 }
 0x509   : > { %v5934_v17 = vsel %vm5931_vm0, %v5933_v3, %v5929_v5  ;;  %v7584_v9 = vpop.eup %7583  ;;  %v5960_v34 = vand.u32 2147483647, %v13111_v7  ;;  %v5962_v60 = vand.u32 2147483648, %v13111_v7  ;;  %v3486_v51 = vadd.f32 %v3485_v54, %v3277_v61  ;;  %v3282_v54 = vpop.f32.mrf.mxu0 }
 0x50a   : > { %6469 = vst [vmem:[%s10193_s30 + $0x310] sm:$0xff] %v5934_v17  ;;  %v5953_v43 = vsub.f32 1.0, %v5952_v37  ;;  %v3695_v18 = vadd.f32 %v3694_v23, %v10091_v36  ;;  %v5944_v40 = vsel %vm5943_vm11, %v7578_v19, %v5940_v38  ;;  %vm5957_vm14 = vweird.f32 %v7582_v41  ;;  %v3906_v19 = vpop.f32.mrf.mxu3 }
 0x50b   : > { %v13150_v15 = vadd.f32 1.0, %v7584_v9  ;;  %v5949_v27 = vsel %vm13141_vm9, %v5948_v47, %v5944_v40  ;;  %v6923_v24 = vmul.f32 -1.442695, %v3486_v51  ;;  %v3280_v6 = vadd.f32 %v3279_v44, %v10057_v55 }
 0x50c   : > { %v5954_v49 = vmul.f32 %v7582_v41, %v5953_v43  ;;  %v3904_v30 = vadd.f32 %v3903_v63, %v3695_v18  ;;  %6470 = vst [vmem:[%s10193_s30 + $0x318] sm:$0xff] %v5949_v27  ;;  %vm5956_vm13 = vweird.f32 %v13111_v7  ;;  %v5963_v20 = vor.u32 1.1754944e-38, %v5962_v60  ;;  %v3697_v7 = vpop.f32.mrf.mxu2  ;;  %v3491_v61 = vpop.f32.mrf.mxu1 }
 0x50d   : > { %7589 = vrcp.f32 %v13150_v15  ;;  %v7586_v46 = vpop.eup %7585  ;;  %vm5958_vm15 = vmor %vm5956_vm13, %vm5957_vm14  ;;  %v3489_v2 = vadd.f32 %v3488_v13, %v3280_v6  ;;  %vm5961_vm2 = vcmp.eq.f32.partialorder %v5960_v34, 8.507059e+37  ;;  %v3698_v35 = vadd.f32 %v3697_v7, %v10091_v36 }
 0x50e   : > { %v5955_v29 = vadd.f32 %v7582_v41, %v5954_v49  ;;  %7591 = vpow2.f32 %v6923_v24  ;;  %v6924_v32 = vmul.f32 -1.442695, %v3904_v30  ;;  %v7588_v53 = vpop.eup %7587  ;;  %v5967_v16 = vmul.f32 %v7586_v46, %v13132_v52 }
 0x50f   : > { %v13159_v25 = vadd.f32 1.0, %v7588_v53  ;;  %v6925_v4 = vmul.f32 -1.442695, %v3489_v2  ;;  %v5975_v8 = vand.u32 2147483647, %v13132_v52  ;;  %v5977_v59 = vand.u32 2147483648, %v13132_v52 }
 0x510   : > { %v5959_v0 = vsel %vm5958_vm15, %v7582_v41, %v5955_v29  ;;  %7593 = vpow2.f32 %v6924_v32  ;;  %v5968_v28 = vsub.f32 1.0, %v5967_v16  ;;  %vm5972_vm7 = vweird.f32 %v7586_v46 }
 0x511   : > { %v5964_v50 = vsel %vm5961_vm2, %v5963_v20, %v5959_v0  ;;  %7595 = vrcp.f32 %v13159_v25  ;;  %v3907_v58 = vadd.f32 %v3906_v19, %v3698_v35  ;;  %vm5971_vm8 = vweird.f32 %v13132_v52 }
 0x512   : > { %6471 = vst [vmem:[%s10193_s30 + $0x320] sm:$0xff] %v5964_v50  ;;  %v5969_v31 = vmul.f32 %v7586_v46, %v5968_v28  ;;  %7597 = vpow2.f32 %v6925_v4  ;;  %vm5973_vm4 = vmor %vm5971_vm8, %vm5972_vm7  ;;  %vm5976_vm6 = vcmp.eq.f32.partialorder %v5975_v8, 8.507059e+37  ;;  %v5978_v42 = vor.u32 1.1754944e-38, %v5977_v59  ;;  %v3909_v44 = vpop.f32.mrf.mxu3 }
 0x513   : > { %v7590_v48 = vpop.eup %7589  ;;  %v6926_v57 = vmul.f32 -1.442695, %v3907_v58  ;;  %v5990_v14 = vand.u32 2147483647, %v13150_v15  ;;  %v5992_v1 = vand.u32 2147483648, %v13150_v15  ;;  %v3283_v33 = vadd.f32 %v3282_v54, %v10057_v55 }
 0x514   : > { %v7592_v22 = vpop.eup %7591  ;;  %v5982_v21 = vmul.f32 %v7590_v48, %v13150_v15  ;;  %v5970_v45 = vadd.f32 %v7586_v46, %v5969_v31  ;;  %vm5987_vm3 = vweird.f32 %v7590_v48  ;;  %vm5986_vm5 = vweird.f32 %v13150_v15  ;;  %v3700_v15 = vpop.f32.mrf.mxu2 }
 0x515   : > { %v13168_v12 = vadd.f32 1.0, %v7592_v22  ;;  %v6005_v17 = vand.u32 2147483647, %v13159_v25  ;;  %v6007_v11 = vand.u32 2147483648, %v13159_v25  ;;  %vm5988_vm12 = vmor %vm5986_vm5, %vm5987_vm3  ;;  %v5993_v23 = vor.u32 1.1754944e-38, %v5992_v1 }
 0x516   : > { %v7594_v56 = vpop.eup %7593  ;;  %v5983_v10 = vsub.f32 1.0, %v5982_v21  ;;  %v5974_v62 = vsel %vm5973_vm4, %v7586_v46, %v5970_v45  ;;  %vm5991_vm0 = vcmp.eq.f32.partialorder %v5990_v14, 8.507059e+37  ;;  %vm6001_vm10 = vweird.f32 %v13159_v25 }
 0x517   : > { %7599 = vrcp.f32 %v13168_v12  ;;  %v13173_v26 = vpop.eup %7595  ;;  %v5979_v52 = vsel %vm5976_vm6, %v5978_v42, %v5974_v62  ;;  %v13175_v3 = vadd.f32 1.0, %v7594_v56  ;;  %v3492_v43 = vadd.f32 %v3491_v61, %v3283_v33 }
 0x518   : > { %v5984_v41 = vmul.f32 %v7590_v48, %v5983_v10  ;;  %v7598_v5 = vpop.eup %7597  ;;  %6472 = vst [vmem:[%s10193_s30 + $0x328] sm:$0xff] %v5979_v52  ;;  %v5997_v39 = vmul.f32 %v13173_v26, %v13159_v25  ;;  %7601 = vpow2.f32 %v6926_v57  ;;  %vm6002_vm1 = vweird.f32 %v13173_v26 }
 0x519   : > { %7603 = vrcp.f32 %v13175_v3  ;;  %v13187_v38 = vadd.f32 1.0, %v7598_v5  ;;  %v6020_v51 = vand.u32 2147483647, %v13168_v12  ;;  %vm13202_vm9 = vcmp.eq.f32.partialorder %v6005_v17, 8.507059e+37  ;;  %vm13221_vm14 = vmor %vm6001_vm10, %vm6002_vm1 }
 0x51a   : > { %v5985_v37 = vadd.f32 %v7590_v48, %v5984_v41  ;;  %v5998_v63 = vsub.f32 1.0, %v5997_v39  ;;  %v6008_v40 = vor.u32 1.1754944e-38, %v6007_v11  ;;  %vm6016_vm11 = vweird.f32 %v13168_v12 }
 0x51b   : > { %7605 = vrcp.f32 %v13187_v38  ;;  %v6022_v30 = vand.u32 2147483648, %v13168_v12  ;;  %v6035_v6 = vand.u32 2147483647, %v13175_v3  ;;  %v6927_v32 = vmul.f32 -1.442695, %v3492_v43 }
 0x51c   : > { %v5989_v47 = vsel %vm5988_vm12, %v7590_v48, %v5985_v37  ;;  %v5999_v60 = vmul.f32 %v13173_v26, %v5998_v63  ;;  %v3701_v2 = vadd.f32 %v3700_v15, %v10091_v36 }
 0x51d   : > { %v13190_v9 = vpop.eup %7599  ;;  %v5994_v34 = vsel %vm5991_vm0, %v5993_v23, %v5989_v47 }
 0x51e   : > { %6473 = vst [vmem:[%s10193_s30 + $0x330] sm:$0xff] %v5994_v34  ;;  %v6012_v49 = vmul.f32 %v13190_v9, %v13168_v12  ;;  %v7602_v27 = vpop.eup %7601  ;;  %v6000_v24 = vadd.f32 %v13173_v26, %v5999_v60 }
 0x51f   : > { %v13215_v29 = vpop.eup %7603  ;;  %v13225_v20 = vadd.f32 1.0, %v7602_v27 }
 0x520   : > { %v6013_v46 = vsub.f32 1.0, %v6012_v49 }
 0x521   : > { %7922 = shalt.err (!%p7919_p10)
}
 0x522   : > { %s8008_s17 = smov 256   ;;  %s8009_s19 = smov 16   ;;  %v6004_v53 = vsel %vm13221_vm14, %v13173_v26, %v6000_v24  ;;  %vm13246_vm13 = vcmp.eq.f32.partialorder %v6020_v51, 8.507059e+37  ;;  %v6027_v16 = vmul.f32 %v13215_v29, %v13175_v3  ;;  %v6037_v50 = vand.u32 2147483648, %v13175_v3  ;;  %v3285_v28 = vpop.f32.mrf.mxu0  ;;  %v3494_v4 = vpop.f32.mrf.mxu1 }
 0x523   : > { %6978 = dma.vmem_to_hbm [thread:$0]  (%p8133_p3), %s13209_s20, 16384, %s6667_s14, %s6633_s29, %s8008_s17, %s8008_s17, %s8009_s19   ;;  %v6009_v25 = vsel %vm13202_vm9, %v6008_v40, %v6004_v53  ;;  %v6014_v7 = vmul.f32 %v13190_v9, %v6013_v46  ;;  %vm6017_vm15 = vweird.f32 %v13190_v9  ;;  %7607 = vrcp.f32 %v13225_v20  ;;  %v7606_v19 = vpop.eup %7605  ;;  %v3703_v10 = vpop.f32.mrf.mxu2 }
 0x524   : > { %6474 = vst [vmem:[%s10193_s30 + $0x338] sm:$0xff] %v6009_v25  ;;  %v6023_v35 = vor.u32 1.1754944e-38, %v6022_v30  ;;  %v6028_v8 = vsub.f32 1.0, %v6027_v16  ;;  %vm6031_vm2 = vweird.f32 %v13175_v3  ;;  %vm13260_vm7 = vcmp.eq.f32.partialorder %v6035_v6, 8.507059e+37  ;;  %vm6018_vm8 = vmor %vm6016_vm11, %vm6017_vm15  ;;  %v3912_v26 = vpop.f32.mrf.mxu3  ;;  %s6645_s29 = scalar_lea.hbm %s13536_s5, %s6960_s9  ;;  %s6646_s15 = sshll.u32 %s10193_s30, 4  ;;  %s6647_s15 = int_to_ptr.vmem [resolvable:$true] %s6646_s15 }
 0x525   : > { %v6015_v48 = vadd.f32 %v13190_v9, %v6014_v7  ;;  %7609 = vpow2.f32 %v6927_v32  ;;  %v3910_v31 = vadd.f32 %v3909_v44, %v3701_v2  ;;  %v3286_v58 = vadd.f32 %v3285_v28, %v10057_v55  ;;  %s6648_s16 = sshll.u32 %s6645_s29, 4  ;;  %s6628_s25 = scalar_lea.sflag [#allocation4], %s8163_s11  ;;  %s6649_s16 = int_to_ptr.hbm [resolvable:$true] %s6648_s16 }
 0x526   : > { %v6029_v22 = vmul.f32 %v13215_v29, %v6028_v8  ;;  %vm6032_vm4 = vweird.f32 %v13215_v29  ;;  %v6038_v21 = vor.u32 1.1754944e-38, %v6037_v50  ;;  %v6042_v45 = vmul.f32 %v7606_v19, %v13187_v38  ;;  %s7937_s9 = sshra.s32 %s6649_s16, 4  ;;  %s7943_s26 = scalar_lea.hbm %s13536_s5, 2048  ;;  %s7938_s9 = int_to_ptr.hbm [resolvable:$true] %s7937_s9 }
 0x527   : > { %v6019_v57 = vsel %vm6018_vm8, %v13190_v9, %v6015_v48  ;;  %v6050_v54 = vand.u32 2147483647, %v13187_v38  ;;  %v6928_v56 = vmul.f32 -1.442695, %v3910_v31  ;;  %v3495_v42 = vadd.f32 %v3494_v4, %v3286_v58  ;;  %vm6033_vm6 = vmor %vm6031_vm2, %vm6032_vm4  ;;  %s7939_s18 = scalar_lea.hbm %s7938_s9, 1024  ;;  %p7944_p5 = scmp.lt.s32.totalorder %s7938_s9, %s13536_s5 }
 0x528   : > { %v6024_v14 = vsel %vm13246_vm13, %v6023_v35, %v6019_v57  ;;  %v6030_v12 = vadd.f32 %v13215_v29, %v6029_v22  ;;  %v6043_v62 = vsub.f32 1.0, %v6042_v45  ;;  %v3704_v1 = vadd.f32 %v3703_v10, %v10091_v36  ;;  %p7940_p12 = scmp.ne.s32.totalorder %s7938_s9, %s7939_s18  ;;  %p7945_p7 = scmp.lt.s32.totalorder %s7943_s26, %s7939_s18 }
 0x529   : > { %v7608_v52 = vpop.eup %7607  ;;  %6475 = vst [vmem:[%s10193_s30 + $0x340] sm:$0xff] %v6024_v14  ;;  %vm6046_vm3 = vweird.f32 %v13187_v38  ;;  %v6052_v41 = vand.u32 2147483648, %v13187_v38  ;;  %7611 = vpow2.f32 %v6928_v56  ;;  %v6929_v33 = vmul.f32 -1.442695, %v3495_v42 }
 0x52a   : > { %v6034_v61 = vsel %vm6033_vm6, %v13215_v29, %v6030_v12  ;;  %v6044_v5 = vmul.f32 %v7606_v19, %v6043_v62  ;;  %vm6047_vm5 = vweird.f32 %v7606_v19  ;;  %v6057_v39 = vmul.f32 %v7608_v52, %v13225_v20  ;;  %v3288_v23 = vpop.f32.mrf.mxu0  ;;  %v3497_v34 = vpop.f32.mrf.mxu1  ;;  %p7941_p13 = pnand %p7940_p12, %p8133_p3  ;;  %p7946_p1 = por %p7945_p7, %p7944_p5 }
 0x52b   : > { %v7610_v37 = vpop.eup %7609  ;;  %v6039_v17 = vsel %vm13260_vm7, %v6038_v21, %v6034_v61  ;;  %vm13288_vm12 = vcmp.eq.f32.partialorder %v6050_v54, 8.507059e+37  ;;  %7613 = vpow2.f32 %v6929_v33  ;;  %v3913_v11 = vadd.f32 %v3912_v26, %v3704_v1  ;;  %vm6048_vm0 = vmor %vm6046_vm3, %vm6047_vm5  ;;  %v3706_v13 = vpop.f32.mrf.mxu2 }
 0x52c   : > { %6476 = vst [vmem:[%s10193_s30 + $0x348] sm:$0xff] %v6039_v17  ;;  %v6045_v63 = vadd.f32 %v7606_v19, %v6044_v5  ;;  %v6058_v47 = vsub.f32 1.0, %v6057_v39  ;;  %v13293_v43 = vadd.f32 1.0, %v7610_v37  ;;  %v3289_v9 = vadd.f32 %v3288_v23, %v10057_v55  ;;  %v3915_v32 = vpop.f32.mrf.mxu3  ;;  %p7942_p0 = pneg %p7941_p13 }
 0x52d   : > { %v6053_v60 = vor.u32 1.1754944e-38, %v6052_v41  ;;  %v6065_v51 = vand.u32 2147483647, %v13225_v20  ;;  %v6067_v18 = vand.u32 2147483648, %v13225_v20  ;;  %v6930_v40 = vmul.f32 -1.442695, %v3913_v11 }
 0x52e   : > { %v6049_v49 = vsel %vm6048_vm0, %v7606_v19, %v6045_v63  ;;  %v6059_v15 = vmul.f32 %v7608_v52, %v6058_v47  ;;  %vm6062_vm10 = vweird.f32 %v7608_v52  ;;  %7615 = vrcp.f32 %v13293_v43  ;;  %p7947_p4 = pnand %p7946_p1, %p7942_p0 }
 0x52f   : > { %v7612_v44 = vpop.eup %7611  ;;  %v6054_v27 = vsel %vm13288_vm12, %v6053_v60, %v6049_v49  ;;  %7617 = vpow2.f32 %v6930_v40  ;;  %vm6061_vm1 = vweird.f32 %v13225_v20  ;;  %v3498_v30 = vadd.f32 %v3497_v34, %v3289_v9 }
 0x530   : > { %6477 = vst [vmem:[%s10193_s30 + $0x350] sm:$0xff] %v6054_v27  ;;  %v6060_v24 = vadd.f32 %v7608_v52, %v6059_v15  ;;  %v13305_v38 = vadd.f32 1.0, %v7612_v44  ;;  %vm6063_vm9 = vmor %vm6061_vm1, %vm6062_vm10  ;;  %v6068_v29 = vor.u32 1.1754944e-38, %v6067_v18  ;;  %vm6066_vm11 = vcmp.eq.f32.partialorder %v6065_v51, 8.507059e+37 }
 0x531   : > { %v7614_v6 = vpop.eup %7613  ;;  %v6931_v0 = vmul.f32 -1.442695, %v3498_v30  ;;  %v6080_v20 = vand.u32 2147483647, %v13293_v43  ;;  %v3707_v50 = vadd.f32 %v3706_v13, %v10091_v36  ;;  %v6082_v28 = vand.u32 2147483648, %v13293_v43 }
 0x532   : > { %v6064_v46 = vsel %vm6063_vm9, %v7608_v52, %v6060_v24  ;;  %7619 = vrcp.f32 %v13305_v38  ;;  %v13308_v53 = vadd.f32 1.0, %v7614_v6  ;;  %v6095_v4 = vand.u32 2147483647, %v13305_v38  ;;  %v3291_v59 = vpop.f32.mrf.mxu0  ;;  %v3500_v19 = vpop.f32.mrf.mxu1 }
 0x533   : > { %v6069_v2 = vsel %vm6066_vm11, %v6068_v29, %v6064_v46  ;;  %v6097_v35 = vand.u32 2147483648, %v13305_v38  ;;  %v3916_v31 = vadd.f32 %v3915_v32, %v3707_v50  ;;  %v3292_v58 = vadd.f32 %v3291_v59, %v10057_v55  ;;  %v3709_v56 = vpop.f32.mrf.mxu2 }
 0x534   : > { %v7616_v16 = vpop.eup %7615  ;;  %6478 = vst [vmem:[%s10193_s30 + $0x358] sm:$0xff] %v6069_v2  ;;  %7621 = vrcp.f32 %v13308_v53  ;;  %vm6076_vm14 = vweird.f32 %v13293_v43  ;;  %vm13322_vm13 = vcmp.eq.f32.partialorder %v6080_v20, 8.507059e+37  ;;  %v6083_v57 = vor.u32 1.1754944e-38, %v6082_v28  ;;  %v3918_v61 = vpop.f32.mrf.mxu3 }
 0x535   : > { %v7618_v25 = vpop.eup %7617  ;;  %v6072_v7 = vmul.f32 %v7616_v16, %v13293_v43  ;;  %7623 = vpow2.f32 %v6931_v0  ;;  %vm6077_vm15 = vweird.f32 %v7616_v16  ;;  %vm6091_vm2 = vweird.f32 %v13305_v38 }
 0x536   : > { %v13318_v8 = vadd.f32 1.0, %v7618_v25  ;;  %v6932_v42 = vmul.f32 -1.442695, %v3916_v31  ;;  %v3501_v10 = vadd.f32 %v3500_v19, %v3292_v58  ;;  %v3710_v14 = vadd.f32 %v3709_v56, %v10091_v36  ;;  %vm6078_vm8 = vmor %vm6076_vm14, %vm6077_vm15 }
 0x537   : > { %v6073_v48 = vsub.f32 1.0, %v6072_v7  ;;  %vm13330_vm7 = vcmp.eq.f32.partialorder %v6095_v4, 8.507059e+37  ;;  %v6098_v52 = vor.u32 1.1754944e-38, %v6097_v35  ;;  %v6112_v33 = vand.u32 2147483648, %v13308_v53 }
 0x538   : > { %v7620_v22 = vpop.eup %7619  ;;  %7625 = vrcp.f32 %v13318_v8  ;;  %v6933_v17 = vmul.f32 -1.442695, %v3501_v10  ;;  %v3919_v3 = vadd.f32 %v3918_v61, %v3710_v14  ;;  %vm6106_vm6 = vweird.f32 %v13308_v53 }
 0x539   : > { %v6074_v45 = vmul.f32 %v7616_v16, %v6073_v48  ;;  %v6087_v54 = vmul.f32 %v7620_v22, %v13305_v38  ;;  %vm6092_vm4 = vweird.f32 %v7620_v22  ;;  %7627 = vpow2.f32 %v6932_v42 }
 0x53a   : > { %v7622_v12 = vpop.eup %7621  ;;  %v6110_v9 = vand.u32 2147483647, %v13308_v53  ;;  %7629 = vpow2.f32 %v6933_v17  ;;  %v3294_v60 = vpop.f32.mrf.mxu0  ;;  %vm6093_vm3 = vmor %vm6091_vm2, %vm6092_vm4  ;;  %v6113_v18 = vor.u32 1.1754944e-38, %v6112_v33  ;;  %v6125_v44 = vand.u32 2147483647, %v13318_v8 }
 0x53b   : > { %v6075_v62 = vadd.f32 %v7616_v16, %v6074_v45  ;;  %v6088_v1 = vsub.f32 1.0, %v6087_v54  ;;  %v6102_v41 = vmul.f32 %v7622_v12, %v13308_v53  ;;  %v7624_v5 = vpop.eup %7623  ;;  %vm6107_vm5 = vweird.f32 %v7622_v12  ;;  %v3503_v40 = vpop.f32.mrf.mxu1 }
 0x53c   : > { %v13341_v47 = vadd.f32 1.0, %v7624_v5  ;;  %v6934_v27 = vmul.f32 -1.442695, %v3919_v3  ;;  %v6127_v38 = vand.u32 2147483648, %v13318_v8  ;;  %v3295_v29 = vadd.f32 %v3294_v60, %v10057_v55  ;;  %vm6108_vm12 = vmor %vm6106_vm6, %vm6107_vm5  ;;  %v3712_v0 = vpop.f32.mrf.mxu2  ;;  %v3921_v4 = vpop.f32.mrf.mxu3 }
 0x53d   : > { %v6079_v39 = vsel %vm6078_vm8, %v7616_v16, %v6075_v62  ;;  %v6089_v37 = vmul.f32 %v7620_v22, %v6088_v1  ;;  %v6103_v63 = vsub.f32 1.0, %v6102_v41  ;;  %vm6111_vm10 = vcmp.eq.f32.partialorder %v6110_v9, 8.507059e+37 }
 0x53e   : > { %v7626_v11 = vpop.eup %7625  ;;  %v6084_v23 = vsel %vm13322_vm13, %v6083_v57, %v6079_v39  ;;  %7631 = vrcp.f32 %v13341_v47  ;;  %v3504_v2 = vadd.f32 %v3503_v40, %v3295_v29  ;;  %vm6121_vm1 = vweird.f32 %v13318_v8 }
 0x53f   : > { %6479 = vst [vmem:[%s10193_s30 + $0x360] sm:$0xff] %v6084_v23  ;;  %v6090_v43 = vadd.f32 %v7620_v22, %v6089_v37  ;;  %v6117_v34 = vmul.f32 %v7626_v11, %v13318_v8  ;;  %v6104_v51 = vmul.f32 %v7622_v12, %v6103_v63  ;;  %v7628_v24 = vpop.eup %7627  ;;  %vm6122_vm0 = vweird.f32 %v7626_v11 }
 0x540   : > { %v13358_v46 = vadd.f32 1.0, %v7628_v24  ;;  %7633 = vpow2.f32 %v6934_v27  ;;  %v7630_v16 = vpop.eup %7629  ;;  %vm6123_vm9 = vmor %vm6121_vm1, %vm6122_vm0  ;;  %v6128_v25 = vor.u32 1.1754944e-38, %v6127_v38  ;;  %v3713_v28 = vadd.f32 %v3712_v0, %v10091_v36 }
 0x541   : > { %v6094_v49 = vsel %vm6093_vm3, %v7620_v22, %v6090_v43  ;;  %v6118_v15 = vsub.f32 1.0, %v6117_v34  ;;  %v6105_v6 = vadd.f32 %v7622_v12, %v6104_v51  ;;  %v13363_v7 = vadd.f32 1.0, %v7630_v16 }
 0x542   : > { %v6099_v30 = vsel %vm13330_vm7, %v6098_v52, %v6094_v49  ;;  %7635 = vrcp.f32 %v13358_v46  ;;  %vm6126_vm11 = vcmp.eq.f32.partialorder %v6125_v44, 8.507059e+37  ;;  %v6935_v19 = vmul.f32 -1.442695, %v3504_v2  ;;  %v3297_v57 = vpop.f32.mrf.mxu0 }
 0x543   : > { %6480 = vst [vmem:[%s10193_s30 + $0x368] sm:$0xff] %v6099_v30  ;;  %v6119_v13 = vmul.f32 %v7626_v11, %v6118_v15  ;;  %v6109_v32 = vsel %vm6108_vm12, %v7622_v12, %v6105_v6  ;;  %7637 = vrcp.f32 %v13363_v7  ;;  %v6140_v58 = vand.u32 2147483647, %v13341_v47  ;;  %v3506_v54 = vpop.f32.mrf.mxu1 }
 0x544   : > { %v6114_v20 = vsel %vm6111_vm10, %v6113_v18, %v6109_v32  ;;  %v7632_v53 = vpop.eup %7631  ;;  %v6142_v22 = vand.u32 2147483648, %v13341_v47  ;;  %7639 = vpow2.f32 %v6935_v19  ;;  %v3922_v45 = vadd.f32 %v3921_v4, %v3713_v28  ;;  %v3715_v3 = vpop.f32.mrf.mxu2 }
 0x545   : > { %v6120_v50 = vadd.f32 %v7626_v11, %v6119_v13  ;;  %6481 = vst [vmem:[%s10193_s30 + $0x370] sm:$0xff] %v6114_v20  ;;  %v6132_v59 = vmul.f32 %v7632_v53, %v13341_v47  ;;  %vm6137_vm14 = vweird.f32 %v7632_v53  ;;  %v3298_v10 = vadd.f32 %v3297_v57, %v10057_v55 }
 0x546   : > { %v7634_v8 = vpop.eup %7633  ;;  %vm6136_vm13 = vweird.f32 %v13341_v47  ;;  %vm6141_vm15 = vcmp.eq.f32.partialorder %v6140_v58, 8.507059e+37  ;;  %v6143_v62 = vor.u32 1.1754944e-38, %v6142_v22  ;;  %v6936_v1 = vmul.f32 -1.442695, %v3922_v45  ;;  %v3924_v47 = vpop.f32.mrf.mxu3 }
 0x547   : > { %v6124_v35 = vsel %vm6123_vm9, %v7626_v11, %v6120_v50  ;;  %v6133_v31 = vsub.f32 1.0, %v6132_v59  ;;  %v13371_v21 = vadd.f32 1.0, %v7634_v8  ;;  %vm6138_vm2 = vmor %vm6136_vm13, %vm6137_vm14  ;;  %v6155_v41 = vand.u32 2147483647, %v13358_v46 }
 0x548   : > { %v6129_v48 = vsel %vm6126_vm11, %v6128_v25, %v6124_v35  ;;  %v7636_v56 = vpop.eup %7635  ;;  %v6157_v33 = vand.u32 2147483648, %v13358_v46  ;;  %v3507_v61 = vadd.f32 %v3506_v54, %v3298_v10  ;;  %v6170_v37 = vand.u32 2147483647, %v13363_v7 }
 0x549   : > { %6482 = vst [vmem:[%s10193_s30 + $0x378] sm:$0xff] %v6129_v48  ;;  %v6134_v42 = vmul.f32 %v7632_v53, %v6133_v31  ;;  %v6147_v14 = vmul.f32 %v7636_v56, %v13358_v46  ;;  %7641 = vrcp.f32 %v13371_v21  ;;  %v7638_v26 = vpop.eup %7637  ;;  %v6172_v17 = vand.u32 2147483648, %v13363_v7 }
 0x54a   : > { %v6162_v39 = vmul.f32 %v7638_v26, %v13363_v7  ;;  %v7640_v11 = vpop.eup %7639  ;;  %vm6152_vm7 = vweird.f32 %v7636_v56  ;;  %7643 = vpow2.f32 %v6936_v1  ;;  %vm6151_vm8 = vweird.f32 %v13358_v46  ;;  %v3300_v30 = vpop.f32.mrf.mxu0 }
 0x54b   : > { %v6135_v12 = vadd.f32 %v7632_v53, %v6134_v42  ;;  %v6148_v52 = vsub.f32 1.0, %v6147_v14  ;;  %v13384_v9 = vadd.f32 1.0, %v7640_v11  ;;  %v6937_v34 = vmul.f32 -1.442695, %v3507_v61  ;;  %vm6153_vm6 = vmor %vm6151_vm8, %vm6152_vm7  ;;  %v3509_v6 = vpop.f32.mrf.mxu1 }
 0x54c   : > { %v6163_v43 = vsub.f32 1.0, %v6162_v39  ;;  %vm6156_vm4 = vcmp.eq.f32.partialorder %v6155_v41, 8.507059e+37  ;;  %v6158_v18 = vor.u32 1.1754944e-38, %v6157_v33  ;;  %v3716_v40 = vadd.f32 %v3715_v3, %v10091_v36  ;;  %v3718_v25 = vpop.f32.mrf.mxu2 }
 0x54d   : > { %v6139_v5 = vsel %vm6138_vm2, %v7632_v53, %v6135_v12  ;;  %v6149_v63 = vmul.f32 %v7636_v56, %v6148_v52  ;;  %vm6167_vm3 = vweird.f32 %v7638_v26  ;;  %7645 = vrcp.f32 %v13384_v9 }
 0x54e   : > { %v6144_v23 = vsel %vm6141_vm15, %v6143_v62, %v6139_v5  ;;  %v6164_v49 = vmul.f32 %v7638_v26, %v6163_v43  ;;  %vm6166_vm5 = vweird.f32 %v13363_v7  ;;  %vm13390_vm12 = vcmp.eq.f32.partialorder %v6170_v37, 8.507059e+37  ;;  %v3927_v31 = vpop.f32.mrf.mxu3 }
 0x54f   : > { %6483 = vst [vmem:[%s10193_s30 + $0x380] sm:$0xff] %v6144_v23  ;;  %v7642_v60 = vpop.eup %7641  ;;  %v6150_v51 = vadd.f32 %v7636_v56, %v6149_v63  ;;  %v6173_v24 = vor.u32 1.1754944e-38, %v6172_v17  ;;  %7647 = vpow2.f32 %v6937_v34  ;;  %vm6168_vm0 = vmor %vm6166_vm5, %vm6167_vm3  ;;  %v6185_v32 = vand.u32 2147483647, %v13371_v21 }
 0x550   : > { %v6177_v15 = vmul.f32 %v7642_v60, %v13371_v21  ;;  %v6165_v29 = vadd.f32 %v7638_v26, %v6164_v49  ;;  %v7644_v46 = vpop.eup %7643  ;;  %v6187_v2 = vand.u32 2147483648, %v13371_v21  ;;  %v3925_v0 = vadd.f32 %v3924_v47, %v3716_v40 }
 0x551   : > { %v6154_v44 = vsel %vm6153_vm6, %v7636_v56, %v6150_v51  ;;  %v3301_v16 = vadd.f32 %v3300_v30, %v10057_v55  ;;  %vm6182_vm10 = vweird.f32 %v7642_v60  ;;  %v13399_v53 = vadd.f32 1.0, %v7644_v46 }
 0x552   : > { %v6159_v38 = vsel %vm6156_vm4, %v6158_v18, %v6154_v44  ;;  %v6178_v13 = vsub.f32 1.0, %v6177_v15  ;;  %v6169_v20 = vsel %vm6168_vm0, %v7638_v26, %v6165_v29  ;;  %v6938_v28 = vmul.f32 -1.442695, %v3925_v0  ;;  %v3303_v10 = vpop.f32.mrf.mxu0 }
 0x553   : > { %6484 = vst [vmem:[%s10193_s30 + $0x388] sm:$0xff] %v6159_v38  ;;  %v6174_v7 = vsel %vm13390_vm12, %v6173_v24, %v6169_v20  ;;  %v3510_v4 = vadd.f32 %v3509_v6, %v3301_v16  ;;  %v3719_v35 = vadd.f32 %v3718_v25, %v10091_v36  ;;  %v7646_v59 = vpop.eup %7645  ;;  %vm6181_vm1 = vweird.f32 %v13371_v21  ;;  %v3512_v26 = vpop.f32.mrf.mxu1 }
 0x554   : > { %v6179_v50 = vmul.f32 %v7642_v60, %v6178_v13  ;;  %6485 = vst [vmem:[%s10193_s30 + $0x390] sm:$0xff] %v6174_v7  ;;  %7649 = vrcp.f32 %v13399_v53  ;;  %vm6183_vm9 = vmor %vm6181_vm1, %vm6182_vm10  ;;  %v6188_v48 = vor.u32 1.1754944e-38, %v6187_v2  ;;  %v6192_v8 = vmul.f32 %v7646_v59, %v13384_v9  ;;  %v3721_v33 = vpop.f32.mrf.mxu2 }
 0x555   : > { %7651 = vpow2.f32 %v6938_v28  ;;  %v7648_v58 = vpop.eup %7647  ;;  %vm6186_vm11 = vcmp.eq.f32.partialorder %v6185_v32, 8.507059e+37  ;;  %v6939_v45 = vmul.f32 -1.442695, %v3510_v4  ;;  %v3928_v57 = vadd.f32 %v3927_v31, %v3719_v35 }
 0x556   : > { %v6180_v19 = vadd.f32 %v7642_v60, %v6179_v50  ;;  %v6193_v56 = vsub.f32 1.0, %v6192_v8  ;;  %v13408_v42 = vadd.f32 1.0, %v7648_v58  ;;  %v6202_v21 = vand.u32 2147483648, %v13384_v9  ;;  %v3930_v40 = vpop.f32.mrf.mxu3 }
 0x557   : > { %7653 = vpow2.f32 %v6939_v45  ;;  %v6940_v14 = vmul.f32 -1.442695, %v3928_v57  ;;  %v3304_v12 = vadd.f32 %v3303_v10, %v10057_v55  ;;  %vm6197_vm14 = vweird.f32 %v7646_v59 }
 0x558   : > { %v6184_v22 = vsel %vm6183_vm9, %v7642_v60, %v6180_v19  ;;  %v6194_v62 = vmul.f32 %v7646_v59, %v6193_v56  ;;  %v6200_v1 = vand.u32 2147483647, %v13384_v9  ;;  %7655 = vrcp.f32 %v13408_v42 }
 0x559   : > { %v6189_v54 = vsel %vm6186_vm11, %v6188_v48, %v6184_v22  ;;  %7657 = vpow2.f32 %v6940_v14  ;;  %v3513_v41 = vadd.f32 %v3512_v26, %v3304_v12  ;;  %vm6196_vm13 = vweird.f32 %v13384_v9 }
 0x55a   : > { %6486 = vst [vmem:[%s10193_s30 + $0x398] sm:$0xff] %v6189_v54  ;;  %v7650_v52 = vpop.eup %7649  ;;  %v6195_v5 = vadd.f32 %v7646_v59, %v6194_v62  ;;  %vm6198_vm15 = vmor %vm6196_vm13, %vm6197_vm14  ;;  %v6203_v37 = vor.u32 1.1754944e-38, %v6202_v21  ;;  %v3722_v11 = vadd.f32 %v3721_v33, %v10091_v36  ;;  %vm6201_vm2 = vcmp.eq.f32.partialorder %v6200_v1, 8.507059e+37  ;;  %v3306_v29 = vpop.f32.mrf.mxu0 }
 0x55b   : > { %v7652_v61 = vpop.eup %7651  ;;  %v6207_v39 = vmul.f32 %v7650_v52, %v13399_v53  ;;  %v6941_v3 = vmul.f32 -1.442695, %v3513_v41  ;;  %v6215_v47 = vand.u32 2147483647, %v13399_v53  ;;  %v6217_v60 = vand.u32 2147483648, %v13399_v53  ;;  %v3515_v35 = vpop.f32.mrf.mxu1 }
 0x55c   : > { %v13417_v17 = vadd.f32 1.0, %v7652_v61  ;;  %v6199_v23 = vsel %vm6198_vm15, %v7646_v59, %v6195_v5  ;;  %vm6212_vm7 = vweird.f32 %v7650_v52  ;;  %v3931_v44 = vadd.f32 %v3930_v40, %v3722_v11  ;;  %v3724_v31 = vpop.f32.mrf.mxu2 }
 0x55d   : > { %v6208_v63 = vsub.f32 1.0, %v6207_v39  ;;  %v7654_v43 = vpop.eup %7653  ;;  %v6204_v34 = vsel %vm6201_vm2, %v6203_v37, %v6199_v23  ;;  %vm6211_vm8 = vweird.f32 %v13399_v53  ;;  %vm6216_vm4 = vcmp.eq.f32.partialorder %v6215_v47, 8.507059e+37 }
 0x55e   : > { %7659 = vrcp.f32 %v13417_v17  ;;  %v7656_v9 = vpop.eup %7655  ;;  %6487 = vst [vmem:[%s10193_s30 + $0x3a0] sm:$0xff] %v6204_v34  ;;  %v13424_v18 = vadd.f32 1.0, %v7654_v43  ;;  %vm6213_vm6 = vmor %vm6211_vm8, %vm6212_vm7  ;;  %v6218_v24 = vor.u32 1.1754944e-38, %v6217_v60  ;;  %v6230_v6 = vand.u32 2147483647, %v13408_v42  ;;  %v3933_v21 = vpop.f32.mrf.mxu3 }
 0x55f   : > { %v6209_v51 = vmul.f32 %v7650_v52, %v6208_v63  ;;  %7661 = vpow2.f32 %v6941_v3  ;;  %v7658_v49 = vpop.eup %7657  ;;  %v6222_v15 = vmul.f32 %v7656_v9, %v13408_v42  ;;  %v6232_v46 = vand.u32 2147483648, %v13408_v42 }
 0x560   : > { %7663 = vrcp.f32 %v13424_v18  ;;  %v13430_v38 = vadd.f32 1.0, %v7658_v49  ;;  %v6942_v32 = vmul.f32 -1.442695, %v3931_v44  ;;  %v3307_v2 = vadd.f32 %v3306_v29, %v10057_v55 }
 0x561   : > { %v6210_v27 = vadd.f32 %v7650_v52, %v6209_v51  ;;  %v6223_v30 = vsub.f32 1.0, %v6222_v15  ;;  %vm6227_vm3 = vweird.f32 %v7656_v9  ;;  %v6245_v50 = vand.u32 2147483647, %v13417_v17 }
 0x562   : > { %vm6226_vm5 = vweird.f32 %v13408_v42  ;;  %7665 = vrcp.f32 %v13430_v38  ;;  %vm6231_vm12 = vcmp.eq.f32.partialorder %v6230_v6, 8.507059e+37  ;;  %v6247_v28 = vand.u32 2147483648, %v13417_v17  ;;  %v3309_v61 = vpop.f32.mrf.mxu0 }
 0x563   : > { %v6214_v13 = vsel %vm6213_vm6, %v7650_v52, %v6210_v27  ;;  %v6224_v20 = vmul.f32 %v7656_v9, %v6223_v30  ;;  %vm6228_vm0 = vmor %vm6226_vm5, %vm6227_vm3  ;;  %v6233_v19 = vor.u32 1.1754944e-38, %v6232_v46  ;;  %7667 = vpow2.f32 %v6942_v32 }
 0x564   : > { %v7660_v0 = vpop.eup %7659  ;;  %v6219_v16 = vsel %vm6216_vm4, %v6218_v24, %v6214_v13  ;;  %v3516_v8 = vadd.f32 %v3515_v35, %v3307_v2  ;;  %vm6241_vm10 = vweird.f32 %v13417_v17  ;;  %vm13443_vm1 = vcmp.eq.f32.partialorder %v6245_v50, 8.507059e+37 }
 0x565   : > { %v7662_v53 = vpop.eup %7661  ;;  %6488 = vst [vmem:[%s10193_s30 + $0x3a8] sm:$0xff] %v6219_v16  ;;  %v6237_v25 = vmul.f32 %v7660_v0, %v13417_v17  ;;  %v6225_v7 = vadd.f32 %v7656_v9, %v6224_v20  ;;  %vm6242_vm9 = vweird.f32 %v7660_v0  ;;  %v6248_v56 = vor.u32 1.1754944e-38, %v6247_v28 }
 0x566   : > { %v13440_v4 = vadd.f32 1.0, %v7662_v53  ;;  %v7664_v59 = vpop.eup %7663  ;;  %vm6256_vm11 = vweird.f32 %v13424_v18  ;;  %v6260_v10 = vand.u32 2147483647, %v13424_v18  ;;  %v6262_v62 = vand.u32 2147483648, %v13424_v18  ;;  %vm6243_vm14 = vmor %vm6241_vm10, %vm6242_vm9 }
 0x567   : > { %v6238_v48 = vsub.f32 1.0, %v6237_v25  ;;  %v6229_v58 = vsel %vm6228_vm0, %v7656_v9, %v6225_v7  ;;  %v6252_v45 = vmul.f32 %v7664_v59, %v13424_v18  ;;  %v6943_v1 = vmul.f32 -1.442695, %v3516_v8  ;;  %v3727_v18 = vpop.f32.mrf.mxu2 }
 0x568   : > { %v6234_v57 = vsel %vm6231_vm12, %v6233_v19, %v6229_v58  ;;  %7669 = vrcp.f32 %v13440_v4  ;;  %v7666_v14 = vpop.eup %7665  ;;  %v3725_v26 = vadd.f32 %v3724_v31, %v10091_v36  ;;  %vm6257_vm13 = vweird.f32 %v7664_v59 }
 0x569   : > { %v6239_v54 = vmul.f32 %v7660_v0, %v6238_v48  ;;  %6489 = vst [vmem:[%s10193_s30 + $0x3b0] sm:$0xff] %v6234_v57  ;;  %v6253_v42 = vsub.f32 1.0, %v6252_v45  ;;  %v6267_v41 = vmul.f32 %v7666_v14, %v13430_v38  ;;  %v6275_v33 = vand.u32 2147483647, %v13430_v38  ;;  %v7668_v5 = vpop.eup %7667  ;;  %vm6258_vm15 = vmor %vm6256_vm11, %vm6257_vm13 }
 0x56a   : > { %v6277_v37 = vand.u32 2147483648, %v13430_v38  ;;  %7671 = vpow2.f32 %v6943_v1  ;;  %v3934_v3 = vadd.f32 %v3933_v21, %v3725_v26  ;;  %v13461_v63 = vadd.f32 1.0, %v7668_v5 }
 0x56b   : > { %v6240_v12 = vadd.f32 %v7660_v0, %v6239_v54  ;;  %v6254_v52 = vmul.f32 %v7664_v59, %v6253_v42  ;;  %v6268_v17 = vsub.f32 1.0, %v6267_v41  ;;  %vm6261_vm2 = vcmp.eq.f32.partialorder %v6260_v10, 8.507059e+37 }
 0x56c   : > { %v6263_v43 = vor.u32 1.1754944e-38, %v6262_v62  ;;  %v6944_v34 = vmul.f32 -1.442695, %v3934_v3  ;;  %v3310_v60 = vadd.f32 %v3309_v61, %v10057_v55  ;;  %vm6272_vm7 = vweird.f32 %v7666_v14  ;;  %v3518_v55 = vpop.f32.mrf.mxu1 }
 0x56d   : > { %v6244_v39 = vsel %vm6243_vm14, %v7660_v0, %v6240_v12  ;;  %v6255_v23 = vadd.f32 %v7664_v59, %v6254_v52  ;;  %v6269_v51 = vmul.f32 %v7666_v14, %v6268_v17  ;;  %vm6271_vm8 = vweird.f32 %v13430_v38  ;;  %v3936_v0 = vpop.f32.mrf.mxu3 }
 0x56e   : > { %v6249_v11 = vsel %vm13443_vm1, %v6248_v56, %v6244_v39  ;;  %v7670_v47 = vpop.eup %7669  ;;  %vm13470_vm4 = vcmp.eq.f32.partialorder %v6275_v33, 8.507059e+37  ;;  %7673 = vrcp.f32 %v13461_v63  ;;  %v6278_v27 = vor.u32 1.1754944e-38, %v6277_v37  ;;  %vm6273_vm6 = vmor %vm6271_vm8, %vm6272_vm7 }
 0x56f   : > { %6490 = vst [vmem:[%s10193_s30 + $0x3b8] sm:$0xff] %v6249_v11  ;;  %v6259_v9 = vsel %vm6258_vm15, %v7664_v59, %v6255_v23  ;;  %v6282_v40 = vmul.f32 %v7670_v47, %v13440_v4  ;;  %v6270_v44 = vadd.f32 %v7666_v14, %v6269_v51  ;;  %7675 = vpow2.f32 %v6944_v34 }
 0x570   : > { %v6264_v49 = vsel %vm6261_vm2, %v6263_v43, %v6259_v9  ;;  %v7672_v30 = vpop.eup %7671  ;;  %v6290_v6 = vand.u32 2147483647, %v13440_v4  ;;  %v6292_v38 = vand.u32 2147483648, %v13440_v4  ;;  %v3519_v29 = vadd.f32 %v3518_v55, %v3310_v60 }
 0x571   : > { %6491 = vst [vmem:[%s10193_s30 + $0x3c0] sm:$0xff] %v6264_v49  ;;  %v6283_v24 = vsub.f32 1.0, %v6282_v40  ;;  %v3728_v13 = vadd.f32 %v3727_v18, %v10091_v36  ;;  %v6274_v46 = vsel %vm6273_vm6, %v7666_v14, %v6270_v44  ;;  %vm6287_vm3 = vweird.f32 %v7670_v47 }
 0x572   : > { %v4447_v2 = vadd.f32 1.0, %v7672_v30  ;;  %v6279_v16 = vsel %vm13470_vm4, %v6278_v27, %v6274_v46  ;;  %v6945_v20 = vmul.f32 -1.442695, %v3519_v29  ;;  %vm6286_vm5 = vweird.f32 %v13440_v4 }
 0x573   : > { %v6284_v32 = vmul.f32 %v7670_v47, %v6283_v24  ;;  %v3937_v50 = vadd.f32 %v3936_v0, %v3728_v13  ;;  %6492 = vst [vmem:[%s10193_s30 + $0x3c8] sm:$0xff] %v6279_v16  ;;  %vm6288_vm12 = vmor %vm6286_vm5, %vm6287_vm3  ;;  %v6293_v7 = vor.u32 1.1754944e-38, %v6292_v38  ;;  %vm6291_vm0 = vcmp.eq.f32.partialorder %v6290_v6, 8.507059e+37 }
 0x574   : > { %7677 = vrcp.f32 %v4447_v2  ;;  %v7674_v25 = vpop.eup %7673  ;;  %v6305_v31 = vand.u32 2147483647, %v13461_v63  ;;  %v6307_v4 = vand.u32 2147483648, %v13461_v63  ;;  %vm6301_vm1 = vweird.f32 %v13461_v63 }
 0x575   : > { %v6285_v53 = vadd.f32 %v7670_v47, %v6284_v32  ;;  %7679 = vpow2.f32 %v6945_v20  ;;  %v6946_v36 = vmul.f32 -1.442695, %v3937_v50  ;;  %v7676_v28 = vpop.eup %7675  ;;  %v6297_v59 = vmul.f32 %v7674_v25, %v13461_v63 }
 0x576   : > { %v4448_v48 = vadd.f32 1.0, %v7676_v28  ;;  %vm6302_vm10 = vweird.f32 %v7674_v25  ;;  %vm6306_vm11 = vcmp.eq.f32.partialorder %v6305_v31, 8.507059e+37  ;;  %v6308_v10 = vor.u32 1.1754944e-38, %v6307_v4 }
 0x577   : > { %v6289_v35 = vsel %vm6288_vm12, %v7670_v47, %v6285_v53  ;;  %7681 = vpow2.f32 %v6946_v36  ;;  %v6298_v8 = vsub.f32 1.0, %v6297_v59  ;;  %vm6303_vm9 = vmor %vm6301_vm1, %vm6302_vm10  ;;  %v6320_v12 = vand.u32 2147483647, %v4447_v2 }
 0x578   : > { %v6294_v19 = vsel %vm6291_vm0, %v6293_v7, %v6289_v35  ;;  %7683 = vrcp.f32 %v4448_v48  ;;  %v6322_v62 = vand.u32 2147483648, %v4447_v2  ;;  %vm6316_vm13 = vweird.f32 %v4447_v2 }
 0x579   : > { %6493 = vst [vmem:[%s10193_s30 + $0x3d0] sm:$0xff] %v6294_v19  ;;  %v6299_v22 = vmul.f32 %v7674_v25, %v6298_v8  ;;  %vm6321_vm2 = vcmp.eq.f32.partialorder %v6320_v12, 8.507059e+37  ;;  %v6337_v3 = vand.u32 2147483648, %v4448_v48  ;;  %v6335_v63 = vand.u32 2147483647, %v4448_v48 }
 0x57a   : > { %v7678_v58 = vpop.eup %7677  ;;  %v6323_v5 = vor.u32 1.1754944e-38, %v6322_v62  ;;  %vm6331_vm8 = vweird.f32 %v4448_v48 }
 0x57b   : > { %v7680_v45 = vpop.eup %7679  ;;  %v6312_v57 = vmul.f32 %v7678_v58, %v4447_v2  ;;  %v6300_v54 = vadd.f32 %v7674_v25, %v6299_v22  ;;  %vm6317_vm14 = vweird.f32 %v7678_v58  ;;  %v6338_v60 = vor.u32 1.1754944e-38, %v6337_v3 }
 0x57c   : > { %v4449_v56 = vadd.f32 1.0, %v7680_v45  ;;  %vm6318_vm15 = vmor %vm6316_vm13, %vm6317_vm14  ;;  %vm6336_vm6 = vcmp.eq.f32.partialorder %v6335_v63, 8.507059e+37 }
 0x57d   : > { %v7682_v42 = vpop.eup %7681  ;;  %v6313_v21 = vsub.f32 1.0, %v6312_v57  ;;  %v6304_v14 = vsel %vm6303_vm9, %v7674_v25, %v6300_v54 }
 0x57e   : > { %7685 = vrcp.f32 %v4449_v56  ;;  %v7684_v1 = vpop.eup %7683  ;;  %v6309_v26 = vsel %vm6306_vm11, %v6308_v10, %v6304_v14  ;;  %v4450_v41 = vadd.f32 1.0, %v7682_v42  ;;  %v6352_v40 = vand.u32 2147483648, %v4449_v56 }
 0x57f   : > { %v6314_v52 = vmul.f32 %v7678_v58, %v6313_v21  ;;  %6494 = vst [vmem:[%s10193_s30 + $0x3d8] sm:$0xff] %v6309_v26  ;;  %v6327_v33 = vmul.f32 %v7684_v1, %v4448_v48  ;;  %vm6332_vm7 = vweird.f32 %v7684_v1  ;;  %v6350_v44 = vand.u32 2147483647, %v4449_v56 }
 0x580   : > { %7687 = vrcp.f32 %v4450_v41  ;;  %vm6333_vm4 = vmor %vm6331_vm8, %vm6332_vm7  ;;  %vm6346_vm5 = vweird.f32 %v4449_v56  ;;  %v6367_v55 = vand.u32 2147483648, %v4450_v41  ;;  %v6353_v30 = vor.u32 1.1754944e-38, %v6352_v40 }
 0x581   : > { %v6315_v61 = vadd.f32 %v7678_v58, %v6314_v52  ;;  %v6328_v39 = vsub.f32 1.0, %v6327_v33  ;;  %v6365_v38 = vand.u32 2147483647, %v4450_v41  ;;  %vm6351_vm10 = vcmp.eq.f32.partialorder %v6350_v44, 8.507059e+37 }
 0x582   : > { %vm6361_vm1 = vweird.f32 %v4450_v41  ;;  %v6368_v32 = vor.u32 1.1754944e-38, %v6367_v55 }
 0x583   : > { %v6319_v37 = vsel %vm6318_vm15, %v7678_v58, %v6315_v61  ;;  %v6329_v17 = vmul.f32 %v7684_v1, %v6328_v39  ;;  %vm6366_vm11 = vcmp.eq.f32.partialorder %v6365_v38, 8.507059e+37 }
 0x584   : > { %v7686_v11 = vpop.eup %7685  ;;  %v6324_v23 = vsel %vm6321_vm2, %v6323_v5, %v6319_v37 }
 0x585   : > { %6495 = vst [vmem:[%s10193_s30 + $0x3e0] sm:$0xff] %v6324_v23  ;;  %v6342_v47 = vmul.f32 %v7686_v11, %v4449_v56  ;;  %v6330_v43 = vadd.f32 %v7684_v1, %v6329_v17  ;;  %vm6347_vm3 = vweird.f32 %v7686_v11 }
 0x586   : > { %v7688_v34 = vpop.eup %7687  ;;  %vm6348_vm12 = vmor %vm6346_vm5, %vm6347_vm3 }
 0x587   : > { %v6343_v9 = vsub.f32 1.0, %v6342_v47  ;;  %v6334_v51 = vsel %vm6333_vm4, %v7684_v1, %v6330_v43  ;;  %v6357_v49 = vmul.f32 %v7688_v34, %v4450_v41  ;;  %vm6362_vm0 = vweird.f32 %v7688_v34 }
 0x588   : > { %v6339_v15 = vsel %vm6336_vm6, %v6338_v60, %v6334_v51  ;;  %vm6363_vm9 = vmor %vm6361_vm1, %vm6362_vm0 }
 0x589   : > { %v6344_v18 = vmul.f32 %v7686_v11, %v6343_v9  ;;  %6496 = vst [vmem:[%s10193_s30 + $0x3e8] sm:$0xff] %v6339_v15  ;;  %v6358_v27 = vsub.f32 1.0, %v6357_v49 }
 0x58b   : > { %v6345_v24 = vadd.f32 %v7686_v11, %v6344_v18  ;;  %v6359_v6 = vmul.f32 %v7688_v34, %v6358_v27 }
 0x58d   : > { %v6349_v29 = vsel %vm6348_vm12, %v7686_v11, %v6345_v24  ;;  %v6360_v46 = vadd.f32 %v7688_v34, %v6359_v6 }
 0x58e   : > { %v6354_v13 = vsel %vm6351_vm10, %v6353_v30, %v6349_v29 }
 0x58f   : > { %6497 = vst [vmem:[%s10193_s30 + $0x3f0] sm:$0xff] %v6354_v13  ;;  %v6364_v2 = vsel %vm6363_vm9, %v7688_v34, %v6360_v46 }
 0x590   : > { %v6369_v0 = vsel %vm6366_vm11, %v6368_v32, %v6364_v2 }
 0x591   : > { %6498 = vst [vmem:[%s10193_s30 + $0x3f8] sm:$0xff] %v6369_v0 }
 0x592   : > { %7950 = shalt.err (!%p7947_p4)
}
 0x593   : > { %6977 = dma.vmem_to_hbm [thread:$0]  (%p8133_p3), %s6647_s15, 16384, %s6649_s16, %s6628_s25, %s8008_s17, %s8008_s17, %s8009_s19  }
 0x594 PF: > { %s6681_s11 = sand.u32 1, %s7989_s21   ;;  %p14110_p8 = scmp.ge.s32.totalorder %s8001_s24, 2 }
 0x595   : > { %s6682_s30 = scalar_lea.sflag [#allocation4], %s6681_s11 }
 0x596   : > { %p6996_p11 = pnand %p14110_p8, %p8080_p6 }
 0x598   : > { %p6997_p9 = pneg %p6996_p11 }
 0x59a   : > { %7980 = dma.done.wait (%p6997_p9), %s6682_s30, 16384  }
 0x59b   : > { %7982 = vsyncadd (%p6997_p9), %s6682_s30, 4294950912  ;;  %s6692_s14 = scalar_lea.sflag [#allocation12], %s6681_s11 }
 0x59c   : > { %7984 = dma.done.wait (%p6997_p9), %s6692_s14, 16384  }
 0x59d   : > { %7986 = vsyncadd (%p6997_p9), %s6692_s14, 4294950912  ;;  %p25_p3 = scmp.ge.s32.totalorder %s8115_s7, 4   ;;  %s14111_s21 = smov %s7993_s22 }
 0x59e   : > { %s14112_s22 = smov %s7997_s23  ;;  %s14113_s23 = smov %s8129_s12 }
 0x59f   : > { %s14114_s24 = smov %s8115_s7  ;;  %27 = sbr.rel (!%p25_p3) target bundleno = 9 (0x9), region = 114 }
 0x5a4   :  { %6698 = vsyncpa [#allocation3], 1 }
 0x5a5   :  { %6700 = vsyncpa [#allocation3 + $0x1], 1 }
 0x5a6   :  { %6701 = vsyncpa [#allocation6], 1 }
 0x5a7   :  { %6702 = vsyncpa [#allocation9], 1 }
 0x5a8   :  { %6703 = vsyncpa [#allocation4], 1 }
 0x5a9   :  { %6705 = vsyncpa [#allocation4 + $0x1], 1 }
 0x5aa   :  { %6706 = vsyncpa [#allocation12], 1 }
 0x5ab   :  { %6708 = vsyncpa [#allocation12 + $0x1], 1 }

</bundles_post_ra>
